<compile_context>
chip_gen: v7x
topology: tpu7x:2x2x1
jax: 0.10.0
libtpu: 0.0.40
codegen_flags: <defaults>
</compile_context>

<pallas_src>
import functools

import jax
import jax.numpy as jnp
from jax.experimental import pallas as pl
from jax.experimental.pallas import tpu as pltpu


# Layer-0 split weights with at most this many rows are evaluated with VPU
# broadcast FMAs (kept in f32) instead of an MXU matmul.
_VPU_MATMUL_MAX_K = 8


# ----------------------------------------------------------------------------
# TPU-generation awareness (tile sizes / epilogue dtype / VMEM budget)
# ----------------------------------------------------------------------------
def _hw_info():
    kind = ""
    try:
        kind = jax.devices()[0].device_kind.lower()
    except Exception:
        pass
    num_tc = 2 if "v7" in kind else 1
    if "v7" in kind:
        vmem_limit = 48 * 1024 * 1024      # 64 MiB physical -> leave headroom
    elif "v5" in kind or "v6" in kind:
        vmem_limit = 96 * 1024 * 1024      # 128 MiB physical
    else:
        vmem_limit = 64 * 1024 * 1024      # conservative default
    # bf16 VALU only on v6e / v7x; keep the f32 epilogue elsewhere (v5e, v4, ...)
    bf16_valu = ("v6" in kind) or ("v7" in kind)
    return {"num_tc": num_tc, "vmem_limit": vmem_limit, "bf16_valu": bf16_valu}


def _divisor_tile(total, target):
    """Largest multiple-of-8 divisor of `total` that is <= target (else total)."""
    if total <= target:
        return total
    for cand in range(target - target % 8, 7, -8):
        if total % cand == 0:
            return cand
    return total


def _row_tile(total, num_tc, target=1024, min_split_rows=512):
    """Row tile: big tiles on single-TC chips; on v7x prefer >= num_tc grid
    steps but only while each step keeps >= min_split_rows output rows."""
    tile = _divisor_tile(total, target)
    if num_tc > 1 and total // tile < num_tc:
        cand = _divisor_tile(total, max(min_split_rows, total // num_tc))
        if cand < total and cand >= min_split_rows:
            tile = cand
    return tile


def _stream_spec(shape, index_map, depth=None):
    """BlockSpec with deeper input pipelining when requested; silently fall
    back to default double-buffering if this JAX lacks pipeline_mode."""
    if depth is not None and hasattr(pl, "Buffered"):
        try:
            return pl.BlockSpec(shape, index_map, pipeline_mode=pl.Buffered(depth))
        except TypeError:
            pass
    return pl.BlockSpec(shape, index_map)


# ----------------------------------------------------------------------------
# Shared kernel helpers
# ----------------------------------------------------------------------------
def _as_bf16(x):
    return x if x.dtype == jnp.bfloat16 else x.astype(jnp.bfloat16)


def _bias_act(y, b, bf16_epi):
    # bias + ReLU epilogue; on bf16-VALU chips (v6e/v7x) do it in bf16, which
    # halves VALU op count and vreg pressure on the 128-wide padded layers.
    if bf16_epi:
        y = y.astype(jnp.bfloat16)
    return jnp.maximum(y + b, 0.0)


def _mxu_or_vpu_matmul(x, wmat):
    """[S, k] @ [k, C]: for tiny k use k VPU broadcast FMAs (a k<=8 MXU
    contraction wastes >95% of the systolic array), otherwise bf16 MXU dot."""
    k = wmat.shape[0]
    if k <= _VPU_MATMUL_MAX_K:
        xf = x.astype(jnp.float32)
        acc = xf[:, 0:1] * wmat[0:1, :]
        for j in range(1, k):
            acc = acc + xf[:, j:j + 1] * wmat[j:j + 1, :]
        return acc
    return jnp.dot(_as_bf16(x), wmat, preferred_element_type=jnp.float32)


# ----------------------------------------------------------------------------
# Fused SA kernel:  MLP stack  +  neighbor max-pool
# ----------------------------------------------------------------------------
def _sa_fused_kernel(xc_ref, xf_ref, *refs, num_layers, K, bf16_epi):
    # xc: (S, 3)  relative neighbor coords (bf16),  S = rows_per_tile * K
    # xf: (S, Cf) neighbor features (bf16)
    # refs: [Wc0, Wf0, b0, W1, b1, ...], out ref last
    # out: (S // K, Cpad)  -- max over the K neighbor axis, lane-dense pad
    o_ref = refs[-1]
    w = refs[:-1]
    # Layer 0: coord part (k=3) on the VPU, feature part on MXU (or VPU if tiny)
    y = _mxu_or_vpu_matmul(xc_ref[...], w[0][...]) \
        + _mxu_or_vpu_matmul(xf_ref[...], w[1][...])
    y = _bias_act(y, w[2][...], bf16_epi)
    i = 3
    for _ in range(1, num_layers):
        y = jnp.dot(_as_bf16(y), w[i][...], preferred_element_type=jnp.float32)
        y = _bias_act(y, w[i + 1][...], bf16_epi)
        i += 2
    S, Cp = y.shape
    # Neighbor max-pool fused into the same kernel: single sublane-axis reduce.
    # (Layout no-op when K % 8 == 0, e.g. K == 8; correct for any K.)
    o_ref[...] = jnp.max(y.reshape(S // K, K, Cp), axis=1).astype(o_ref.dtype)


def pallas_sa_mlp_pool(nbr_coords, nbr_feats, ops, num_layers, hw,
                       out_dtype=jnp.bfloat16):
    # nbr_coords [B, M, K, 3], nbr_feats [B, M, K, Cf] -> pooled [B*M, Cpad]
    B, M, K, Cf = nbr_feats.shape
    BM = B * M
    xc = nbr_coords.reshape(BM * K, 3).astype(jnp.bfloat16)
    xf = nbr_feats.reshape(BM * K, Cf).astype(jnp.bfloat16)
    Cpad = ops[-1].shape[-1]
    tile = _row_tile(BM, hw["num_tc"])
    grid = (BM // tile,)
    # Per-step compute is small (narrow channels) => deepen input pipelining
    # to hide HBM latency, but only when there are enough grid steps.
    depth = 3 if grid[0] >= 3 else None
    in_specs = [
        _stream_spec((tile * K, 3), lambda i: (i, 0), depth),
        _stream_spec((tile * K, Cf), lambda i: (i, 0), depth),
    ] + [pl.BlockSpec(op.shape, lambda i: (0, 0)) for op in ops]
    out = pl.pallas_call(
        functools.partial(_sa_fused_kernel, num_layers=num_layers, K=K,
                          bf16_epi=hw["bf16_valu"]),
        out_shape=jax.ShapeDtypeStruct((BM, Cpad), out_dtype),
        grid=grid,
        in_specs=in_specs,
        out_specs=pl.BlockSpec((tile, Cpad), lambda i: (i, 0)),
        compiler_params=pltpu.CompilerParams(
            dimension_semantics=("parallel",),
            vmem_limit_bytes=hw["vmem_limit"]),
    )(xc, xf, *ops)
    return out


# ----------------------------------------------------------------------------
# Fused FP kernel:  3-NN interpolation  +  MLP stack (with skip connection)
# ----------------------------------------------------------------------------
def _fp_fused_kernel(p_ref, ct_ref, cf_ref, sf_ref, *refs, num_layers, bf16_epi):
    # p : (1, TN, 3)  f32 query points (tile of N)
    # ct: (1, 3, M)   f32 centers (transposed: one coordinate per row)
    # cf: (1, M, Cc)  bf16 center features
    # sf: (1, TN, Cs) bf16 skip features
    # refs: [Wi0, Ws0, b0, W1, b1, ...], out ref last; out: (1, TN, Cpad)
    o_ref = refs[-1]
    w = refs[:-1]
    p = p_ref[0]
    ct = ct_ref[0]
    # Pairwise squared distances with 3 VPU multiply-adds (no MXU K=3 matmul).
    dx = p[:, 0:1] - ct[0:1, :]
    dy = p[:, 1:2] - ct[1:2, :]
    dz = p[:, 2:3] - ct[2:3, :]
    d2 = dx * dx + dy * dy + dz * dz                       # (TN, M)
    M = d2.shape[1]
    col = jax.lax.broadcasted_iota(jnp.int32, d2.shape, 1)
    wgt = jnp.zeros_like(d2)
    cur = d2
    for _ in range(3):   # three nearest centers, inverse-sq-distance weights
        mn = jnp.min(cur, axis=-1, keepdims=True)
        first = jnp.min(jnp.where(cur == mn, col, M), axis=-1, keepdims=True)
        sel = col == first
        wgt = wgt + jnp.where(sel, pl.reciprocal(mn + 1e-8, approx=True), 0.0)
        cur = jnp.where(sel, jnp.float32(jnp.inf), cur)
    # Exact reciprocal for the normalization (off the critical path, cheap).
    wgt = wgt / jnp.sum(wgt, axis=-1, keepdims=True)
    interp = jnp.dot(wgt.astype(jnp.bfloat16), cf_ref[0],
                     preferred_element_type=jnp.float32)   # (TN, Cc)
    # Layer 0 with a row-split weight (interp part + skip part).
    y = _mxu_or_vpu_matmul(interp, w[0][...]) \
        + _mxu_or_vpu_matmul(sf_ref[0], w[1][...])
    y = _bias_act(y, w[2][...], bf16_epi)
    i = 3
    for _ in range(1, num_layers):
        y = jnp.dot(_as_bf16(y), w[i][...], preferred_element_type=jnp.float32)
        y = _bias_act(y, w[i + 1][...], bf16_epi)
        i += 2
    o_ref[0] = y.astype(o_ref.dtype)


def pallas_fp_interp_mlp(points, centers, cfeats, skip, ops, num_layers, hw,
                         out_dtype):
    # points [B, N, 3], centers [B, M, 3], cfeats [B, M, Cc], skip [B, N, Cs]
    B, N, _ = points.shape
    M = centers.shape[1]
    Cc = cfeats.shape[-1]
    Cs = skip.shape[-1]
    Cpad = ops[-1].shape[-1]
    ct = centers.transpose(0, 2, 1)                        # [B, 3, M]
    # Tile over the query-point axis: keeps the (TN, M) distance working set
    # inside VMEM at realistic N and gives v7x a second parallel grid axis.
    tn = _divisor_tile(N, 512 if hw["num_tc"] > 1 else 1024)
    grid = (B, N // tn)
    in_specs = [
        pl.BlockSpec((1, tn, 3), lambda b, n: (b, n, 0)),
        pl.BlockSpec((1, 3, M), lambda b, n: (b, 0, 0)),
        pl.BlockSpec((1, M, Cc), lambda b, n: (b, 0, 0)),
        pl.BlockSpec((1, tn, Cs), lambda b, n: (b, n, 0)),
    ] + [pl.BlockSpec(op.shape, lambda b, n: (0, 0)) for op in ops]
    out = pl.pallas_call(
        functools.partial(_fp_fused_kernel, num_layers=num_layers,
                          bf16_epi=hw["bf16_valu"]),
        out_shape=jax.ShapeDtypeStruct((B, N, Cpad), out_dtype),
        grid=grid,
        in_specs=in_specs,
        out_specs=pl.BlockSpec((1, tn, Cpad), lambda b, n: (b, n, 0)),
        compiler_params=pltpu.CompilerParams(
            dimension_semantics=("parallel", "parallel"),
            vmem_limit_bytes=hw["vmem_limit"]),
    )(points.astype(jnp.float32), ct.astype(jnp.float32),
      cfeats.astype(jnp.bfloat16), skip.astype(jnp.bfloat16), *ops)
    return out


# ----------------------------------------------------------------------------
# Plain-JAX glue: FPS / ball query / grouping (data-dependent index generation)
# ----------------------------------------------------------------------------
# TODO(synk): furthest point sampling is an inherently sequential argmax loop;
# kept in plain JAX (lax.fori_loop) rather than a Pallas kernel.
def furthest_point_sample(points, num_centers):
    # points [B, N, 3] -> centers [B, M, 3]  (matches PVCNN: starts at index 0)
    N = points.shape[1]

    def per_batch(p):
        def body(i, state):
            idxs, dists, last = state
            d = jnp.sum((p - p[last]) ** 2, axis=-1)
            dists = jnp.minimum(dists, d)
            nxt = jnp.argmax(dists).astype(jnp.int32)
            idxs = idxs.at[i].set(nxt)
            return idxs, dists, nxt

        idxs0 = jnp.zeros((num_centers,), jnp.int32)
        dists0 = jnp.full((N,), 1e10, jnp.float32)
        idxs, _, _ = jax.lax.fori_loop(1, num_centers, body,
                                       (idxs0, dists0, jnp.int32(0)))
        return idxs

    idxs = jax.vmap(per_batch)(points)                           # [B, M]
    return jnp.take_along_axis(points, idxs[..., None], axis=1)  # [B, M, 3]


# TODO(synk): ball-query neighbor selection is data-dependent gather over
# [B, M, N]; kept in plain JAX but now via lax.top_k (O(M*N*K)) instead of a
# full argsort, which was the end-to-end bottleneck at realistic N.
def ball_query(points, centers, radius, K):
    # points [B, N, 3], centers [B, M, 3] -> neighbor indices [B, M, K]
    N = points.shape[1]
    d2 = jnp.sum((centers[:, :, None, :] - points[:, None, :, :]) ** 2, axis=-1)
    mask = d2 < (radius * radius)
    ar = jnp.arange(N, dtype=jnp.int32)
    key = jnp.where(mask, ar[None, None, :], N + ar[None, None, :])
    # K smallest keys == lowest-index in-radius points first (PVCNN order);
    # top_k indices are positions in the point axis == the point indices.
    _, sel = jax.lax.top_k(-key, K)                       # [B, M, K]
    cnt = jnp.sum(mask, axis=-1)                          # [B, M]
    first = jnp.where(cnt > 0, sel[..., 0], 0)            # empty ball -> index 0
    kar = jnp.arange(K)
    idx = jnp.where(kar[None, None, :] < cnt[..., None], sel, first[..., None])
    return idx.astype(jnp.int32)


def group_points(x, idx):
    # x [B, N, C], idx [B, M, K] -> [B, M, K, C]
    return jax.vmap(lambda f, i: f[i])(x, idx)


# ----------------------------------------------------------------------------
# Parameter init (deterministic, synthetic).  BatchNorm is folded in inference
# mode (running mean=0, var=1, eps=1e-5) directly into the conv weight/bias.
# ----------------------------------------------------------------------------
def init_mlp_params(key, channels):
    params = []
    eps = 1e-5
    for i in range(len(channels) - 1):
        cin, cout = channels[i], channels[i + 1]
        key, k1, k2 = jax.random.split(key, 3)
        W = jax.random.normal(k1, (cin, cout), jnp.float32) / jnp.sqrt(float(cin))
        b_conv = 0.01 * jax.random.normal(k2, (cout,), jnp.float32)
        gamma = jnp.ones((cout,), jnp.float32)
        beta = jnp.zeros((cout,), jnp.float32)
        scale = gamma / jnp.sqrt(1.0 + eps)
        W_fold = W * scale[None, :]        # fold BN scale into the weight
        b_fold = b_conv * scale + beta
        params.append((W_fold, b_fold))
    return params


def _pad_last_to(x, mult=128):
    pad = (-x.shape[-1]) % mult
    if pad == 0:
        return x
    cfg = [(0, 0)] * (x.ndim - 1) + [(0, pad)]
    return jnp.pad(x, cfg)


def prep_fused_operands(params, split_at, bias_dtype):
    """Flatten an MLP stack into the operand list consumed by the fused kernels.
    Layer 0's weight is split row-wise at `split_at` (so the two kernel inputs
    never get concatenated in HBM); split parts with a tiny contraction dim are
    stored in f32 (VPU FMA path), the rest in bf16 (MXU path).  The last layer
    is zero-padded to a lane-dense (multiple-of-128) output channel count."""
    ops = []
    n = len(params)
    for l, (W, b) in enumerate(params):
        if l == n - 1:
            W = _pad_last_to(W)
            b = _pad_last_to(b)
        b2 = b.reshape(1, -1).astype(bias_dtype)
        if l == 0:
            for part in (W[:split_at], W[split_at:]):
                dt = jnp.float32 if part.shape[0] <= _VPU_MATMUL_MAX_K \
                    else jnp.bfloat16
                ops.append(part.astype(dt))
            ops.append(b2)
        else:
            ops += [W.astype(jnp.bfloat16), b2]
    return ops


# ----------------------------------------------------------------------------
# PointNet2 model (SA + FP modules, PointNet-only blocks: conv_configs=None)
# ----------------------------------------------------------------------------
class PointNet2Pallas:
    def __init__(self, sa_blocks, fp_blocks, extra_feature_channels=3, key=None):
        if key is None:
            key = jax.random.PRNGKey(42)
        self.hw = _hw_info()
        bias_dtype = jnp.bfloat16 if self.hw["bf16_valu"] else jnp.float32
        self.in_channels = extra_feature_channels + 3
        sa_in_channels = []
        self.sa_cfgs, self.sa_ops, self.sa_nlayers = [], [], []
        feat_c = extra_feature_channels
        cur_in = self.in_channels
        for conv_configs, sa_configs in sa_blocks:
            # TODO(synk): PVConv / voxel (conv_configs) branch not implemented.
            assert conv_configs is None
            sa_in_channels.append(cur_in)
            num_centers, radius, num_neighbors, out_channels = sa_configs
            mlp_channels = [feat_c + 3] + list(out_channels)
            key, sub = jax.random.split(key)
            params = init_mlp_params(sub, mlp_channels)
            self.sa_ops.append(prep_fused_operands(params, split_at=3,
                                                   bias_dtype=bias_dtype))
            self.sa_nlayers.append(len(params))
            self.sa_cfgs.append((num_centers, radius, num_neighbors,
                                 out_channels[-1]))
            feat_c = out_channels[-1]
            cur_in = feat_c

        self.fp_ops, self.fp_nlayers, self.fp_couts = [], [], []
        in_c = cur_in
        for fp_idx, (fp_configs, conv_configs) in enumerate(fp_blocks):
            assert conv_configs is None
            skip_c = sa_in_channels[-1 - fp_idx]
            mlp_channels = [in_c + skip_c] + list(fp_configs)
            key, sub = jax.random.split(key)
            params = init_mlp_params(sub, mlp_channels)
            self.fp_ops.append(prep_fused_operands(params, split_at=in_c,
                                                   bias_dtype=bias_dtype))
            self.fp_nlayers.append(len(params))
            self.fp_couts.append(fp_configs[-1])
            in_c = fp_configs[-1]
        self.out_channels = in_c

    def _sa_forward(self, features, coords, cfg, ops, num_layers):
        num_centers, radius, K, cout = cfg
        centers = furthest_point_sample(coords, num_centers)             # [B,M,3]
        idx = ball_query(coords, centers, radius, K)                     # [B,M,K]
        nbr_coords = group_points(coords, idx) - centers[:, :, None, :]  # [B,M,K,3]
        nbr_feats = group_points(features, idx)                          # [B,M,K,C]
        pooled = pallas_sa_mlp_pool(nbr_coords, nbr_feats, ops, num_layers,
                                    self.hw, out_dtype=jnp.bfloat16)
        B, M = centers.shape[0], centers.shape[1]
        pooled = pooled[:, :cout].reshape(B, M, cout)                    # bf16
        return pooled, centers

    def _fp_forward(self, points_coords, centers_coords, centers_features,
                    points_features, ops, num_layers, cout, is_last):
        out_dtype = jnp.float32 if is_last else jnp.bfloat16
        out = pallas_fp_interp_mlp(points_coords, centers_coords,
                                   centers_features, points_features,
                                   ops, num_layers, self.hw, out_dtype)
        return out[..., :cout], points_coords

    def __call__(self, inputs):
        # inputs: [B, in_channels, N] (PyTorch NCW) -> internal channels-last
        x = inputs[:, : self.in_channels, :].transpose(0, 2, 1)        # [B,N,6]
        coords = x[..., :3]
        features = x[..., 3:]
        coords_list, in_features_list = [], []
        for cfg, ops, nl in zip(self.sa_cfgs, self.sa_ops, self.sa_nlayers):
            in_features_list.append(features)
            coords_list.append(coords)
            features, coords = self._sa_forward(features, coords, cfg, ops, nl)
        in_features_list[0] = x   # with_one_hot_shape_id=False
        n_fp = len(self.fp_ops)
        for fp_idx, (ops, nl, cout) in enumerate(
                zip(self.fp_ops, self.fp_nlayers, self.fp_couts)):
            features, coords = self._fp_forward(
                coords_list[-1 - fp_idx], coords, features,
                in_features_list[-1 - fp_idx], ops, nl, cout,
                is_last=(fp_idx == n_fp - 1))
        return features.transpose(0, 2, 1)   # back to PyTorch [B, C, N]


# ----------------------------------------------------------------------------
if __name__ == "__main__":
    key = jax.random.PRNGKey(0)
    k_in, k_par = jax.random.split(key)

    B, N = 2, 64
    extra_feature_channels = 3                 # -> in_channels = 6
    sa_blocks = [
        (None, (16, 0.4, 8, (16, 32))),        # num_centers, radius, K, mlp
        (None, (8, 0.8, 8, (32, 64))),
    ]
    fp_blocks = [
        ((64, 64), None),
        ((64, 32), None),
    ]

    inputs = jax.random.uniform(k_in, (B, 3 + extra_feature_channels, N),
                                jnp.float32)

    model = PointNet2Pallas(sa_blocks, fp_blocks,
                            extra_feature_channels=extra_feature_channels,
                            key=k_par)
    fwd = jax.jit(model.__call__)
    out = fwd(inputs)
    out = jax.block_until_ready(out)
    assert out.shape == (B, model.out_channels, N), out.shape
    assert bool(jnp.all(jnp.isfinite(out)))
    print("KERNEL_OK")
</pallas_src>

<mosaic_0001>
module attributes {stable_mosaic.version = 11 : i64} {
  func.func @_sa_fused_kernel(%arg0: i32, %arg1: memref<256x3xbf16, #tpu.memory_space<vmem>>, %arg2: memref<256x3xbf16, #tpu.memory_space<vmem>>, %arg3: memref<3x16xf32, #tpu.memory_space<vmem>>, %arg4: memref<3x16xf32, #tpu.memory_space<vmem>>, %arg5: memref<1x16xf32, #tpu.memory_space<vmem>>, %arg6: memref<16x128xbf16, #tpu.memory_space<vmem>>, %arg7: memref<1x128xf32, #tpu.memory_space<vmem>>, %arg8: memref<32x128xbf16, #tpu.memory_space<vmem>>) attributes {dimension_semantics = [#tpu.dimension_semantics<parallel>], iteration_bounds = array<i64: 1>, scalar_prefetch = 0 : i64, scratch_operands = 0 : i64, tpu.core_type = #tpu.core_type<tc>, window_params = [{transform_indices = @transform_0, window_bounds = array<i64: 256, 3>}, {transform_indices = @transform_1, window_bounds = array<i64: 256, 3>}, {pipeline_mode = #tpu.pipeline_mode<synchronous>, transform_indices = @transform_2, window_bounds = array<i64: 3, 16>}, {pipeline_mode = #tpu.pipeline_mode<synchronous>, transform_indices = @transform_3, window_bounds = array<i64: 3, 16>}, {pipeline_mode = #tpu.pipeline_mode<synchronous>, transform_indices = @transform_4, window_bounds = array<i64: 1, 16>}, {pipeline_mode = #tpu.pipeline_mode<synchronous>, transform_indices = @transform_5, window_bounds = array<i64: 16, 128>}, {pipeline_mode = #tpu.pipeline_mode<synchronous>, transform_indices = @transform_6, window_bounds = array<i64: 1, 128>}, {transform_indices = @transform_7, window_bounds = array<i64: 32, 128>}]} {
    %c0 = arith.constant 0 : index
    %c0_0 = arith.constant 0 : index
    %0 = vector.load %arg1[%c0, %c0_0] : memref<256x3xbf16, #tpu.memory_space<vmem>>, vector<256x3xbf16>
    %c0_1 = arith.constant 0 : index
    %c0_2 = arith.constant 0 : index
    %1 = vector.load %arg3[%c0_1, %c0_2] : memref<3x16xf32, #tpu.memory_space<vmem>>, vector<3x16xf32>
    %2 = arith.extf %0 : vector<256x3xbf16> to vector<256x3xf32>
    %3 = vector.extract_strided_slice %2 {offsets = [0, 0], sizes = [256, 1], strides = [1, 1]} : vector<256x3xf32> to vector<256x1xf32>
    %4 = vector.extract_strided_slice %1 {offsets = [0, 0], sizes = [1, 16], strides = [1, 1]} : vector<3x16xf32> to vector<1x16xf32>
    %5 = vector.broadcast %3 : vector<256x1xf32> to vector<256x16xf32>
    %6 = vector.broadcast %4 : vector<1x16xf32> to vector<256x16xf32>
    %7 = arith.mulf %5, %6 : vector<256x16xf32>
    %8 = vector.extract_strided_slice %2 {offsets = [0, 1], sizes = [256, 1], strides = [1, 1]} : vector<256x3xf32> to vector<256x1xf32>
    %9 = vector.extract_strided_slice %1 {offsets = [1, 0], sizes = [1, 16], strides = [1, 1]} : vector<3x16xf32> to vector<1x16xf32>
    %10 = vector.broadcast %8 : vector<256x1xf32> to vector<256x16xf32>
    %11 = vector.broadcast %9 : vector<1x16xf32> to vector<256x16xf32>
    %12 = arith.mulf %10, %11 : vector<256x16xf32>
    %13 = arith.addf %7, %12 : vector<256x16xf32>
    %14 = vector.extract_strided_slice %2 {offsets = [0, 2], sizes = [256, 1], strides = [1, 1]} : vector<256x3xf32> to vector<256x1xf32>
    %15 = vector.extract_strided_slice %1 {offsets = [2, 0], sizes = [1, 16], strides = [1, 1]} : vector<3x16xf32> to vector<1x16xf32>
    %16 = vector.broadcast %14 : vector<256x1xf32> to vector<256x16xf32>
    %17 = vector.broadcast %15 : vector<1x16xf32> to vector<256x16xf32>
    %18 = arith.mulf %16, %17 : vector<256x16xf32>
    %19 = arith.addf %13, %18 : vector<256x16xf32>
    %c0_3 = arith.constant 0 : index
    %c0_4 = arith.constant 0 : index
    %20 = vector.load %arg2[%c0_3, %c0_4] : memref<256x3xbf16, #tpu.memory_space<vmem>>, vector<256x3xbf16>
    %c0_5 = arith.constant 0 : index
    %c0_6 = arith.constant 0 : index
    %21 = vector.load %arg4[%c0_5, %c0_6] : memref<3x16xf32, #tpu.memory_space<vmem>>, vector<3x16xf32>
    %22 = arith.extf %20 : vector<256x3xbf16> to vector<256x3xf32>
    %23 = vector.extract_strided_slice %22 {offsets = [0, 0], sizes = [256, 1], strides = [1, 1]} : vector<256x3xf32> to vector<256x1xf32>
    %24 = vector.extract_strided_slice %21 {offsets = [0, 0], sizes = [1, 16], strides = [1, 1]} : vector<3x16xf32> to vector<1x16xf32>
    %25 = vector.broadcast %23 : vector<256x1xf32> to vector<256x16xf32>
    %26 = vector.broadcast %24 : vector<1x16xf32> to vector<256x16xf32>
    %27 = arith.mulf %25, %26 : vector<256x16xf32>
    %28 = vector.extract_strided_slice %22 {offsets = [0, 1], sizes = [256, 1], strides = [1, 1]} : vector<256x3xf32> to vector<256x1xf32>
    %29 = vector.extract_strided_slice %21 {offsets = [1, 0], sizes = [1, 16], strides = [1, 1]} : vector<3x16xf32> to vector<1x16xf32>
    %30 = vector.broadcast %28 : vector<256x1xf32> to vector<256x16xf32>
    %31 = vector.broadcast %29 : vector<1x16xf32> to vector<256x16xf32>
    %32 = arith.mulf %30, %31 : vector<256x16xf32>
    %33 = arith.addf %27, %32 : vector<256x16xf32>
    %34 = vector.extract_strided_slice %22 {offsets = [0, 2], sizes = [256, 1], strides = [1, 1]} : vector<256x3xf32> to vector<256x1xf32>
    %35 = vector.extract_strided_slice %21 {offsets = [2, 0], sizes = [1, 16], strides = [1, 1]} : vector<3x16xf32> to vector<1x16xf32>
    %36 = vector.broadcast %34 : vector<256x1xf32> to vector<256x16xf32>
    %37 = vector.broadcast %35 : vector<1x16xf32> to vector<256x16xf32>
    %38 = arith.mulf %36, %37 : vector<256x16xf32>
    %39 = arith.addf %33, %38 : vector<256x16xf32>
    %40 = arith.addf %19, %39 : vector<256x16xf32>
    %c0_7 = arith.constant 0 : index
    %c0_8 = arith.constant 0 : index
    %41 = vector.load %arg5[%c0_7, %c0_8] : memref<1x16xf32, #tpu.memory_space<vmem>>, vector<1x16xf32>
    %42 = vector.broadcast %41 : vector<1x16xf32> to vector<256x16xf32>
    %43 = arith.addf %40, %42 : vector<256x16xf32>
    %cst = arith.constant 0.000000e+00 : f32
    %44 = vector.broadcast %cst : f32 to vector<256x16xf32>
    %45 = arith.maximumf %43, %44 : vector<256x16xf32>
    %46 = arith.truncf %45 : vector<256x16xf32> to vector<256x16xbf16>
    %c0_9 = arith.constant 0 : index
    %c0_10 = arith.constant 0 : index
    %47 = vector.load %arg6[%c0_9, %c0_10] : memref<16x128xbf16, #tpu.memory_space<vmem>>, vector<16x128xbf16>
    %cst_11 = arith.constant dense<0.000000e+00> : vector<256x128xf32>
    %48 = tpu.matmul %46, %47, %cst_11 {dimension_numbers = #tpu.dot_dimension_numbers<[1], [0], [0], [1], [0, 0, 1, 1], [], []>} : vector<256x16xbf16>, vector<16x128xbf16>, vector<256x128xf32> -> vector<256x128xf32>
    %c0_12 = arith.constant 0 : index
    %c0_13 = arith.constant 0 : index
    %49 = vector.load %arg7[%c0_12, %c0_13] : memref<1x128xf32, #tpu.memory_space<vmem>>, vector<1x128xf32>
    %50 = vector.broadcast %49 : vector<1x128xf32> to vector<256x128xf32>
    %51 = arith.addf %48, %50 : vector<256x128xf32>
    %cst_14 = arith.constant 0.000000e+00 : f32
    %52 = vector.broadcast %cst_14 : f32 to vector<256x128xf32>
    %53 = arith.maximumf %51, %52 : vector<256x128xf32>
    %54 = vector.shape_cast %53 : vector<256x128xf32> to vector<32x8x128xf32>
    %cst_15 = arith.constant dense<0xFF800000> : vector<32x128xf32>
    %55 = vector.multi_reduction <maximumf>, %54, %cst_15 [1] : vector<32x8x128xf32> to vector<32x128xf32>
    %56 = arith.truncf %55 : vector<32x128xf32> to vector<32x128xbf16>
    %c0_16 = arith.constant 0 : index
    %c0_17 = arith.constant 0 : index
    %57 = vector.load %arg8[%c0_16, %c0_17] : memref<32x128xbf16, #tpu.memory_space<vmem>>, vector<32x128xbf16>
    tpu.vector_store %arg8[%c0_16, %c0_17], %56 {strides = array<i32>} : memref<32x128xbf16, #tpu.memory_space<vmem>>, vector<32x128xbf16>,
    return
  }
  func.func @transform_0(%arg0: i32) -> (i32, i32) {
    %c0_i32 = arith.constant 0 : i32
    %c0_i32_0 = arith.constant 0 : i32
    return %arg0, %c0_i32 : i32, i32
  }
  func.func @transform_1(%arg0: i32) -> (i32, i32) {
    %c0_i32 = arith.constant 0 : i32
    %c0_i32_0 = arith.constant 0 : i32
    return %arg0, %c0_i32 : i32, i32
  }
  func.func @transform_2(%arg0: i32) -> (i32, i32) {
    %c0_i32 = arith.constant 0 : i32
    %c0_i32_0 = arith.constant 0 : i32
    %c0_i32_1 = arith.constant 0 : i32
    return %c0_i32, %c0_i32_0 : i32, i32
  }
  func.func @transform_3(%arg0: i32) -> (i32, i32) {
    %c0_i32 = arith.constant 0 : i32
    %c0_i32_0 = arith.constant 0 : i32
    %c0_i32_1 = arith.constant 0 : i32
    return %c0_i32, %c0_i32_0 : i32, i32
  }
  func.func @transform_4(%arg0: i32) -> (i32, i32) {
    %c0_i32 = arith.constant 0 : i32
    %c0_i32_0 = arith.constant 0 : i32
    %c0_i32_1 = arith.constant 0 : i32
    return %c0_i32, %c0_i32_0 : i32, i32
  }
  func.func @transform_5(%arg0: i32) -> (i32, i32) {
    %c0_i32 = arith.constant 0 : i32
    %c0_i32_0 = arith.constant 0 : i32
    %c0_i32_1 = arith.constant 0 : i32
    return %c0_i32, %c0_i32_0 : i32, i32
  }
  func.func @transform_6(%arg0: i32) -> (i32, i32) {
    %c0_i32 = arith.constant 0 : i32
    %c0_i32_0 = arith.constant 0 : i32
    %c0_i32_1 = arith.constant 0 : i32
    return %c0_i32, %c0_i32_0 : i32, i32
  }
  func.func @transform_7(%arg0: i32) -> (i32, i32) {
    %c0_i32 = arith.constant 0 : i32
    %c0_i32_0 = arith.constant 0 : i32
    return %arg0, %c0_i32 : i32, i32
  }
}

module attributes {stable_mosaic.version = 11 : i64} {
  func.func @_sa_fused_kernel(%arg0: i32, %arg1: memref<128x3xbf16, #tpu.memory_space<vmem>>, %arg2: memref<128x32xbf16, #tpu.memory_space<vmem>>, %arg3: memref<3x32xf32, #tpu.memory_space<vmem>>, %arg4: memref<32x32xbf16, #tpu.memory_space<vmem>>, %arg5: memref<1x32xf32, #tpu.memory_space<vmem>>, %arg6: memref<32x128xbf16, #tpu.memory_space<vmem>>, %arg7: memref<1x128xf32, #tpu.memory_space<vmem>>, %arg8: memref<16x128xbf16, #tpu.memory_space<vmem>>) attributes {dimension_semantics = [#tpu.dimension_semantics<parallel>], iteration_bounds = array<i64: 1>, scalar_prefetch = 0 : i64, scratch_operands = 0 : i64, tpu.core_type = #tpu.core_type<tc>, window_params = [{transform_indices = @transform_0, window_bounds = array<i64: 128, 3>}, {transform_indices = @transform_1, window_bounds = array<i64: 128, 32>}, {pipeline_mode = #tpu.pipeline_mode<synchronous>, transform_indices = @transform_2, window_bounds = array<i64: 3, 32>}, {pipeline_mode = #tpu.pipeline_mode<synchronous>, transform_indices = @transform_3, window_bounds = array<i64: 32, 32>}, {pipeline_mode = #tpu.pipeline_mode<synchronous>, transform_indices = @transform_4, window_bounds = array<i64: 1, 32>}, {pipeline_mode = #tpu.pipeline_mode<synchronous>, transform_indices = @transform_5, window_bounds = array<i64: 32, 128>}, {pipeline_mode = #tpu.pipeline_mode<synchronous>, transform_indices = @transform_6, window_bounds = array<i64: 1, 128>}, {transform_indices = @transform_7, window_bounds = array<i64: 16, 128>}]} {
    %c0 = arith.constant 0 : index
    %c0_0 = arith.constant 0 : index
    %0 = vector.load %arg1[%c0, %c0_0] : memref<128x3xbf16, #tpu.memory_space<vmem>>, vector<128x3xbf16>
    %c0_1 = arith.constant 0 : index
    %c0_2 = arith.constant 0 : index
    %1 = vector.load %arg3[%c0_1, %c0_2] : memref<3x32xf32, #tpu.memory_space<vmem>>, vector<3x32xf32>
    %2 = arith.extf %0 : vector<128x3xbf16> to vector<128x3xf32>
    %3 = vector.extract_strided_slice %2 {offsets = [0, 0], sizes = [128, 1], strides = [1, 1]} : vector<128x3xf32> to vector<128x1xf32>
    %4 = vector.extract_strided_slice %1 {offsets = [0, 0], sizes = [1, 32], strides = [1, 1]} : vector<3x32xf32> to vector<1x32xf32>
    %5 = vector.broadcast %3 : vector<128x1xf32> to vector<128x32xf32>
    %6 = vector.broadcast %4 : vector<1x32xf32> to vector<128x32xf32>
    %7 = arith.mulf %5, %6 : vector<128x32xf32>
    %8 = vector.extract_strided_slice %2 {offsets = [0, 1], sizes = [128, 1], strides = [1, 1]} : vector<128x3xf32> to vector<128x1xf32>
    %9 = vector.extract_strided_slice %1 {offsets = [1, 0], sizes = [1, 32], strides = [1, 1]} : vector<3x32xf32> to vector<1x32xf32>
    %10 = vector.broadcast %8 : vector<128x1xf32> to vector<128x32xf32>
    %11 = vector.broadcast %9 : vector<1x32xf32> to vector<128x32xf32>
    %12 = arith.mulf %10, %11 : vector<128x32xf32>
    %13 = arith.addf %7, %12 : vector<128x32xf32>
    %14 = vector.extract_strided_slice %2 {offsets = [0, 2], sizes = [128, 1], strides = [1, 1]} : vector<128x3xf32> to vector<128x1xf32>
    %15 = vector.extract_strided_slice %1 {offsets = [2, 0], sizes = [1, 32], strides = [1, 1]} : vector<3x32xf32> to vector<1x32xf32>
    %16 = vector.broadcast %14 : vector<128x1xf32> to vector<128x32xf32>
    %17 = vector.broadcast %15 : vector<1x32xf32> to vector<128x32xf32>
    %18 = arith.mulf %16, %17 : vector<128x32xf32>
    %19 = arith.addf %13, %18 : vector<128x32xf32>
    %c0_3 = arith.constant 0 : index
    %c0_4 = arith.constant 0 : index
    %20 = vector.load %arg2[%c0_3, %c0_4] : memref<128x32xbf16, #tpu.memory_space<vmem>>, vector<128x32xbf16>
    %c0_5 = arith.constant 0 : index
    %c0_6 = arith.constant 0 : index
    %21 = vector.load %arg4[%c0_5, %c0_6] : memref<32x32xbf16, #tpu.memory_space<vmem>>, vector<32x32xbf16>
    %cst = arith.constant dense<0.000000e+00> : vector<128x32xf32>
    %22 = tpu.matmul %20, %21, %cst {dimension_numbers = #tpu.dot_dimension_numbers<[1], [0], [0], [1], [0, 0, 1, 1], [], []>} : vector<128x32xbf16>, vector<32x32xbf16>, vector<128x32xf32> -> vector<128x32xf32>
    %23 = arith.addf %19, %22 : vector<128x32xf32>
    %c0_7 = arith.constant 0 : index
    %c0_8 = arith.constant 0 : index
    %24 = vector.load %arg5[%c0_7, %c0_8] : memref<1x32xf32, #tpu.memory_space<vmem>>, vector<1x32xf32>
    %25 = vector.broadcast %24 : vector<1x32xf32> to vector<128x32xf32>
    %26 = arith.addf %23, %25 : vector<128x32xf32>
    %cst_9 = arith.constant 0.000000e+00 : f32
    %27 = vector.broadcast %cst_9 : f32 to vector<128x32xf32>
    %28 = arith.maximumf %26, %27 : vector<128x32xf32>
    %29 = arith.truncf %28 : vector<128x32xf32> to vector<128x32xbf16>
    %c0_10 = arith.constant 0 : index
    %c0_11 = arith.constant 0 : index
    %30 = vector.load %arg6[%c0_10, %c0_11] : memref<32x128xbf16, #tpu.memory_space<vmem>>, vector<32x128xbf16>
    %cst_12 = arith.constant dense<0.000000e+00> : vector<128x128xf32>
    %31 = tpu.matmul %29, %30, %cst_12 {dimension_numbers = #tpu.dot_dimension_numbers<[1], [0], [0], [1], [0, 0, 1, 1], [], []>} : vector<128x32xbf16>, vector<32x128xbf16>, vector<128x128xf32> -> vector<128x128xf32>
    %c0_13 = arith.constant 0 : index
    %c0_14 = arith.constant 0 : index
    %32 = vector.load %arg7[%c0_13, %c0_14] : memref<1x128xf32, #tpu.memory_space<vmem>>, vector<1x128xf32>
    %33 = vector.broadcast %32 : vector<1x128xf32> to vector<128x128xf32>
    %34 = arith.addf %31, %33 : vector<128x128xf32>
    %cst_15 = arith.constant 0.000000e+00 : f32
    %35 = vector.broadcast %cst_15 : f32 to vector<128x128xf32>
    %36 = arith.maximumf %34, %35 : vector<128x128xf32>
    %37 = vector.shape_cast %36 : vector<128x128xf32> to vector<16x8x128xf32>
    %cst_16 = arith.constant dense<0xFF800000> : vector<16x128xf32>
    %38 = vector.multi_reduction <maximumf>, %37, %cst_16 [1] : vector<16x8x128xf32> to vector<16x128xf32>
    %39 = arith.truncf %38 : vector<16x128xf32> to vector<16x128xbf16>
    %c0_17 = arith.constant 0 : index
    %c0_18 = arith.constant 0 : index
    %40 = vector.load %arg8[%c0_17, %c0_18] : memref<16x128xbf16, #tpu.memory_space<vmem>>, vector<16x128xbf16>
    tpu.vector_store %arg8[%c0_17, %c0_18], %39 {strides = array<i32>} : memref<16x128xbf16, #tpu.memory_space<vmem>>, vector<16x128xbf16>,
    return
  }
  func.func @transform_0(%arg0: i32) -> (i32, i32) {
    %c0_i32 = arith.constant 0 : i32
    %c0_i32_0 = arith.constant 0 : i32
    return %arg0, %c0_i32 : i32, i32
  }
  func.func @transform_1(%arg0: i32) -> (i32, i32) {
    %c0_i32 = arith.constant 0 : i32
    %c0_i32_0 = arith.constant 0 : i32
    return %arg0, %c0_i32 : i32, i32
  }
  func.func @transform_2(%arg0: i32) -> (i32, i32) {
    %c0_i32 = arith.constant 0 : i32
    %c0_i32_0 = arith.constant 0 : i32
    %c0_i32_1 = arith.constant 0 : i32
    return %c0_i32, %c0_i32_0 : i32, i32
  }
  func.func @transform_3(%arg0: i32) -> (i32, i32) {
    %c0_i32 = arith.constant 0 : i32
    %c0_i32_0 = arith.constant 0 : i32
    %c0_i32_1 = arith.constant 0 : i32
    return %c0_i32, %c0_i32_0 : i32, i32
  }
  func.func @transform_4(%arg0: i32) -> (i32, i32) {
    %c0_i32 = arith.constant 0 : i32
    %c0_i32_0 = arith.constant 0 : i32
    %c0_i32_1 = arith.constant 0 : i32
    return %c0_i32, %c0_i32_0 : i32, i32
  }
  func.func @transform_5(%arg0: i32) -> (i32, i32) {
    %c0_i32 = arith.constant 0 : i32
    %c0_i32_0 = arith.constant 0 : i32
    %c0_i32_1 = arith.constant 0 : i32
    return %c0_i32, %c0_i32_0 : i32, i32
  }
  func.func @transform_6(%arg0: i32) -> (i32, i32) {
    %c0_i32 = arith.constant 0 : i32
    %c0_i32_0 = arith.constant 0 : i32
    %c0_i32_1 = arith.constant 0 : i32
    return %c0_i32, %c0_i32_0 : i32, i32
  }
  func.func @transform_7(%arg0: i32) -> (i32, i32) {
    %c0_i32 = arith.constant 0 : i32
    %c0_i32_0 = arith.constant 0 : i32
    return %arg0, %c0_i32 : i32, i32
  }
}

module attributes {stable_mosaic.version = 11 : i64} {
  func.func @_fp_fused_kernel(%arg0: i32, %arg1: i32, %arg2: memref<1x16x3xf32, #tpu.memory_space<vmem>>, %arg3: memref<1x3x8xf32, #tpu.memory_space<vmem>>, %arg4: memref<1x8x64xbf16, #tpu.memory_space<vmem>>, %arg5: memref<1x16x32xbf16, #tpu.memory_space<vmem>>, %arg6: memref<64x64xbf16, #tpu.memory_space<vmem>>, %arg7: memref<32x64xbf16, #tpu.memory_space<vmem>>, %arg8: memref<1x64xf32, #tpu.memory_space<vmem>>, %arg9: memref<64x128xbf16, #tpu.memory_space<vmem>>, %arg10: memref<1x128xf32, #tpu.memory_space<vmem>>, %arg11: memref<1x16x128xbf16, #tpu.memory_space<vmem>>) attributes {dimension_semantics = [#tpu.dimension_semantics<parallel>, #tpu.dimension_semantics<parallel>], iteration_bounds = array<i64: 2, 1>, scalar_prefetch = 0 : i64, scratch_operands = 0 : i64, tpu.core_type = #tpu.core_type<tc>, window_params = [{transform_indices = @transform_0, window_bounds = array<i64: 1, 16, 3>}, {transform_indices = @transform_1, window_bounds = array<i64: 1, 3, 8>}, {transform_indices = @transform_2, window_bounds = array<i64: 1, 8, 64>}, {transform_indices = @transform_3, window_bounds = array<i64: 1, 16, 32>}, {pipeline_mode = #tpu.pipeline_mode<synchronous>, transform_indices = @transform_4, window_bounds = array<i64: 64, 64>}, {pipeline_mode = #tpu.pipeline_mode<synchronous>, transform_indices = @transform_5, window_bounds = array<i64: 32, 64>}, {pipeline_mode = #tpu.pipeline_mode<synchronous>, transform_indices = @transform_6, window_bounds = array<i64: 1, 64>}, {pipeline_mode = #tpu.pipeline_mode<synchronous>, transform_indices = @transform_7, window_bounds = array<i64: 64, 128>}, {pipeline_mode = #tpu.pipeline_mode<synchronous>, transform_indices = @transform_8, window_bounds = array<i64: 1, 128>}, {transform_indices = @transform_9, window_bounds = array<i64: 1, 16, 128>}]} {
    %c0 = arith.constant 0 : index
    %c0_0 = arith.constant 0 : index
    %c0_1 = arith.constant 0 : index
    %0 = vector.load %arg2[%c0, %c0_0, %c0_1] : memref<1x16x3xf32, #tpu.memory_space<vmem>>, vector<1x16x3xf32>
    %1 = vector.shape_cast %0 : vector<1x16x3xf32> to vector<16x3xf32>
    %c0_2 = arith.constant 0 : index
    %c0_3 = arith.constant 0 : index
    %c0_4 = arith.constant 0 : index
    %2 = vector.load %arg3[%c0_2, %c0_3, %c0_4] : memref<1x3x8xf32, #tpu.memory_space<vmem>>, vector<1x3x8xf32>
    %3 = vector.shape_cast %2 : vector<1x3x8xf32> to vector<3x8xf32>
    %4 = vector.extract_strided_slice %1 {offsets = [0, 0], sizes = [16, 1], strides = [1, 1]} : vector<16x3xf32> to vector<16x1xf32>
    %5 = vector.extract_strided_slice %3 {offsets = [0, 0], sizes = [1, 8], strides = [1, 1]} : vector<3x8xf32> to vector<1x8xf32>
    %6 = vector.broadcast %4 : vector<16x1xf32> to vector<16x8xf32>
    %7 = vector.broadcast %5 : vector<1x8xf32> to vector<16x8xf32>
    %8 = arith.subf %6, %7 : vector<16x8xf32>
    %9 = vector.extract_strided_slice %1 {offsets = [0, 1], sizes = [16, 1], strides = [1, 1]} : vector<16x3xf32> to vector<16x1xf32>
    %10 = vector.extract_strided_slice %3 {offsets = [1, 0], sizes = [1, 8], strides = [1, 1]} : vector<3x8xf32> to vector<1x8xf32>
    %11 = vector.broadcast %9 : vector<16x1xf32> to vector<16x8xf32>
    %12 = vector.broadcast %10 : vector<1x8xf32> to vector<16x8xf32>
    %13 = arith.subf %11, %12 : vector<16x8xf32>
    %14 = vector.extract_strided_slice %1 {offsets = [0, 2], sizes = [16, 1], strides = [1, 1]} : vector<16x3xf32> to vector<16x1xf32>
    %15 = vector.extract_strided_slice %3 {offsets = [2, 0], sizes = [1, 8], strides = [1, 1]} : vector<3x8xf32> to vector<1x8xf32>
    %16 = vector.broadcast %14 : vector<16x1xf32> to vector<16x8xf32>
    %17 = vector.broadcast %15 : vector<1x8xf32> to vector<16x8xf32>
    %18 = arith.subf %16, %17 : vector<16x8xf32>
    %19 = arith.mulf %8, %8 : vector<16x8xf32>
    %20 = arith.mulf %13, %13 : vector<16x8xf32>
    %21 = arith.addf %19, %20 : vector<16x8xf32>
    %22 = arith.mulf %18, %18 : vector<16x8xf32>
    %23 = arith.addf %21, %22 : vector<16x8xf32>
    %24 = tpu.iota {dimensions = array<i32: 1>} : vector<16x8xi32>
    %cst = arith.constant 0.000000e+00 : f32
    %25 = vector.broadcast %cst : f32 to vector<16x8xf32>
    %cst_5 = arith.constant dense<0x7F800000> : vector<16xf32>
    %26 = vector.multi_reduction <minimumf>, %23, %cst_5 [1] : vector<16x8xf32> to vector<16xf32>
    %27 = vector.shape_cast %26 : vector<16xf32> to vector<16x1xf32>
    %28 = vector.broadcast %27 : vector<16x1xf32> to vector<16x8xf32>
    %29 = arith.cmpf oeq, %23, %28 : vector<16x8xf32>
    %c8_i32 = arith.constant 8 : i32
    %30 = vector.broadcast %c8_i32 : i32 to vector<16x8xi32>
    %31 = arith.select %29, %24, %30 : vector<16x8xi1>, vector<16x8xi32>
    %cst_6 = arith.constant dense<2147483647> : vector<16xi32>
    %32 = vector.multi_reduction <minsi>, %31, %cst_6 [1] : vector<16x8xi32> to vector<16xi32>
    %33 = vector.shape_cast %32 : vector<16xi32> to vector<16x1xi32>
    %34 = vector.broadcast %33 : vector<16x1xi32> to vector<16x8xi32>
    %35 = arith.cmpi eq, %24, %34 : vector<16x8xi32>
    %cst_7 = arith.constant 9.99999993E-9 : f32
    %36 = vector.broadcast %cst_7 : f32 to vector<16x1xf32>
    %37 = arith.addf %27, %36 : vector<16x1xf32>
    %38 = tpu.reciprocal %37 {approx = true} : vector<16x1xf32> -> vector<16x1xf32>
    %cst_8 = arith.constant 0.000000e+00 : f32
    %39 = vector.shape_cast %38 : vector<16x1xf32> to vector<16x1xf32>
    %40 = vector.broadcast %39 : vector<16x1xf32> to vector<16x8xf32>
    %41 = vector.broadcast %cst_8 : f32 to vector<16x8xf32>
    %42 = arith.select %35, %40, %41 : vector<16x8xi1>, vector<16x8xf32>
    %43 = arith.addf %25, %42 : vector<16x8xf32>
    %cst_9 = arith.constant 0x7F800000 : f32
    %44 = vector.broadcast %cst_9 : f32 to vector<16x8xf32>
    %45 = arith.select %35, %44, %23 : vector<16x8xi1>, vector<16x8xf32>
    %cst_10 = arith.constant dense<0x7F800000> : vector<16xf32>
    %46 = vector.multi_reduction <minimumf>, %45, %cst_10 [1] : vector<16x8xf32> to vector<16xf32>
    %47 = vector.shape_cast %46 : vector<16xf32> to vector<16x1xf32>
    %48 = vector.broadcast %47 : vector<16x1xf32> to vector<16x8xf32>
    %49 = arith.cmpf oeq, %45, %48 : vector<16x8xf32>
    %c8_i32_11 = arith.constant 8 : i32
    %50 = vector.broadcast %c8_i32_11 : i32 to vector<16x8xi32>
    %51 = arith.select %49, %24, %50 : vector<16x8xi1>, vector<16x8xi32>
    %cst_12 = arith.constant dense<2147483647> : vector<16xi32>
    %52 = vector.multi_reduction <minsi>, %51, %cst_12 [1] : vector<16x8xi32> to vector<16xi32>
    %53 = vector.shape_cast %52 : vector<16xi32> to vector<16x1xi32>
    %54 = vector.broadcast %53 : vector<16x1xi32> to vector<16x8xi32>
    %55 = arith.cmpi eq, %24, %54 : vector<16x8xi32>
    %cst_13 = arith.constant 9.99999993E-9 : f32
    %56 = vector.broadcast %cst_13 : f32 to vector<16x1xf32>
    %57 = arith.addf %47, %56 : vector<16x1xf32>
    %58 = tpu.reciprocal %57 {approx = true} : vector<16x1xf32> -> vector<16x1xf32>
    %cst_14 = arith.constant 0.000000e+00 : f32
    %59 = vector.shape_cast %58 : vector<16x1xf32> to vector<16x1xf32>
    %60 = vector.broadcast %59 : vector<16x1xf32> to vector<16x8xf32>
    %61 = vector.broadcast %cst_14 : f32 to vector<16x8xf32>
    %62 = arith.select %55, %60, %61 : vector<16x8xi1>, vector<16x8xf32>
    %63 = arith.addf %43, %62 : vector<16x8xf32>
    %cst_15 = arith.constant 0x7F800000 : f32
    %64 = vector.broadcast %cst_15 : f32 to vector<16x8xf32>
    %65 = arith.select %55, %64, %45 : vector<16x8xi1>, vector<16x8xf32>
    %cst_16 = arith.constant dense<0x7F800000> : vector<16xf32>
    %66 = vector.multi_reduction <minimumf>, %65, %cst_16 [1] : vector<16x8xf32> to vector<16xf32>
    %67 = vector.shape_cast %66 : vector<16xf32> to vector<16x1xf32>
    %68 = vector.broadcast %67 : vector<16x1xf32> to vector<16x8xf32>
    %69 = arith.cmpf oeq, %65, %68 : vector<16x8xf32>
    %c8_i32_17 = arith.constant 8 : i32
    %70 = vector.broadcast %c8_i32_17 : i32 to vector<16x8xi32>
    %71 = arith.select %69, %24, %70 : vector<16x8xi1>, vector<16x8xi32>
    %cst_18 = arith.constant dense<2147483647> : vector<16xi32>
    %72 = vector.multi_reduction <minsi>, %71, %cst_18 [1] : vector<16x8xi32> to vector<16xi32>
    %73 = vector.shape_cast %72 : vector<16xi32> to vector<16x1xi32>
    %74 = vector.broadcast %73 : vector<16x1xi32> to vector<16x8xi32>
    %75 = arith.cmpi eq, %24, %74 : vector<16x8xi32>
    %cst_19 = arith.constant 9.99999993E-9 : f32
    %76 = vector.broadcast %cst_19 : f32 to vector<16x1xf32>
    %77 = arith.addf %67, %76 : vector<16x1xf32>
    %78 = tpu.reciprocal %77 {approx = true} : vector<16x1xf32> -> vector<16x1xf32>
    %cst_20 = arith.constant 0.000000e+00 : f32
    %79 = vector.shape_cast %78 : vector<16x1xf32> to vector<16x1xf32>
    %80 = vector.broadcast %79 : vector<16x1xf32> to vector<16x8xf32>
    %81 = vector.broadcast %cst_20 : f32 to vector<16x8xf32>
    %82 = arith.select %75, %80, %81 : vector<16x8xi1>, vector<16x8xf32>
    %83 = arith.addf %63, %82 : vector<16x8xf32>
    %cst_21 = arith.constant dense<0.000000e+00> : vector<16xf32>
    %84 = vector.multi_reduction <add>, %83, %cst_21 [1] : vector<16x8xf32> to vector<16xf32>
    %85 = vector.shape_cast %84 : vector<16xf32> to vector<16x1xf32>
    %86 = vector.broadcast %85 : vector<16x1xf32> to vector<16x8xf32>
    %87 = arith.divf %83, %86 : vector<16x8xf32>
    %88 = arith.truncf %87 : vector<16x8xf32> to vector<16x8xbf16>
    %c0_22 = arith.constant 0 : index
    %c0_23 = arith.constant 0 : index
    %c0_24 = arith.constant 0 : index
    %89 = vector.load %arg4[%c0_22, %c0_23, %c0_24] : memref<1x8x64xbf16, #tpu.memory_space<vmem>>, vector<1x8x64xbf16>
    %90 = vector.shape_cast %89 : vector<1x8x64xbf16> to vector<8x64xbf16>
    %cst_25 = arith.constant dense<0.000000e+00> : vector<16x64xf32>
    %91 = tpu.matmul %88, %90, %cst_25 {dimension_numbers = #tpu.dot_dimension_numbers<[1], [0], [0], [1], [0, 0, 1, 1], [], []>} : vector<16x8xbf16>, vector<8x64xbf16>, vector<16x64xf32> -> vector<16x64xf32>
    %c0_26 = arith.constant 0 : index
    %c0_27 = arith.constant 0 : index
    %92 = vector.load %arg6[%c0_26, %c0_27] : memref<64x64xbf16, #tpu.memory_space<vmem>>, vector<64x64xbf16>
    %93 = arith.truncf %91 : vector<16x64xf32> to vector<16x64xbf16>
    %cst_28 = arith.constant dense<0.000000e+00> : vector<16x64xf32>
    %94 = tpu.matmul %93, %92, %cst_28 {dimension_numbers = #tpu.dot_dimension_numbers<[1], [0], [0], [1], [0, 0, 1, 1], [], []>} : vector<16x64xbf16>, vector<64x64xbf16>, vector<16x64xf32> -> vector<16x64xf32>
    %c0_29 = arith.constant 0 : index
    %c0_30 = arith.constant 0 : index
    %c0_31 = arith.constant 0 : index
    %95 = vector.load %arg5[%c0_29, %c0_30, %c0_31] : memref<1x16x32xbf16, #tpu.memory_space<vmem>>, vector<1x16x32xbf16>
    %96 = vector.shape_cast %95 : vector<1x16x32xbf16> to vector<16x32xbf16>
    %c0_32 = arith.constant 0 : index
    %c0_33 = arith.constant 0 : index
    %97 = vector.load %arg7[%c0_32, %c0_33] : memref<32x64xbf16, #tpu.memory_space<vmem>>, vector<32x64xbf16>
    %cst_34 = arith.constant dense<0.000000e+00> : vector<16x64xf32>
    %98 = tpu.matmul %96, %97, %cst_34 {dimension_numbers = #tpu.dot_dimension_numbers<[1], [0], [0], [1], [0, 0, 1, 1], [], []>} : vector<16x32xbf16>, vector<32x64xbf16>, vector<16x64xf32> -> vector<16x64xf32>
    %99 = arith.addf %94, %98 : vector<16x64xf32>
    %c0_35 = arith.constant 0 : index
    %c0_36 = arith.constant 0 : index
    %100 = vector.load %arg8[%c0_35, %c0_36] : memref<1x64xf32, #tpu.memory_space<vmem>>, vector<1x64xf32>
    %101 = vector.broadcast %100 : vector<1x64xf32> to vector<16x64xf32>
    %102 = arith.addf %99, %101 : vector<16x64xf32>
    %cst_37 = arith.constant 0.000000e+00 : f32
    %103 = vector.broadcast %cst_37 : f32 to vector<16x64xf32>
    %104 = arith.maximumf %102, %103 : vector<16x64xf32>
    %105 = arith.truncf %104 : vector<16x64xf32> to vector<16x64xbf16>
    %c0_38 = arith.constant 0 : index
    %c0_39 = arith.constant 0 : index
    %106 = vector.load %arg9[%c0_38, %c0_39] : memref<64x128xbf16, #tpu.memory_space<vmem>>, vector<64x128xbf16>
    %cst_40 = arith.constant dense<0.000000e+00> : vector<16x128xf32>
    %107 = tpu.matmul %105, %106, %cst_40 {dimension_numbers = #tpu.dot_dimension_numbers<[1], [0], [0], [1], [0, 0, 1, 1], [], []>} : vector<16x64xbf16>, vector<64x128xbf16>, vector<16x128xf32> -> vector<16x128xf32>
    %c0_41 = arith.constant 0 : index
    %c0_42 = arith.constant 0 : index
    %108 = vector.load %arg10[%c0_41, %c0_42] : memref<1x128xf32, #tpu.memory_space<vmem>>, vector<1x128xf32>
    %109 = vector.broadcast %108 : vector<1x128xf32> to vector<16x128xf32>
    %110 = arith.addf %107, %109 : vector<16x128xf32>
    %cst_43 = arith.constant 0.000000e+00 : f32
    %111 = vector.broadcast %cst_43 : f32 to vector<16x128xf32>
    %112 = arith.maximumf %110, %111 : vector<16x128xf32>
    %113 = arith.truncf %112 : vector<16x128xf32> to vector<16x128xbf16>
    %c0_44 = arith.constant 0 : index
    %c0_45 = arith.constant 0 : index
    %c0_46 = arith.constant 0 : index
    %114 = vector.load %arg11[%c0_44, %c0_45, %c0_46] : memref<1x16x128xbf16, #tpu.memory_space<vmem>>, vector<1x16x128xbf16>
    %115 = vector.shape_cast %114 : vector<1x16x128xbf16> to vector<16x128xbf16>
    %116 = vector.shape_cast %113 : vector<16x128xbf16> to vector<1x16x128xbf16>
    tpu.vector_store %arg11[%c0_44, %c0_45, %c0_46], %116 {strides = array<i32>} : memref<1x16x128xbf16, #tpu.memory_space<vmem>>, vector<1x16x128xbf16>,
    return
  }
  func.func @transform_0(%arg0: i32, %arg1: i32) -> (i32, i32, i32) {
    %c0_i32 = arith.constant 0 : i32
    %c0_i32_0 = arith.constant 0 : i32
    return %arg0, %arg1, %c0_i32 : i32, i32, i32
  }
  func.func @transform_1(%arg0: i32, %arg1: i32) -> (i32, i32, i32) {
    %c0_i32 = arith.constant 0 : i32
    %c0_i32_0 = arith.constant 0 : i32
    %c0_i32_1 = arith.constant 0 : i32
    return %arg0, %c0_i32, %c0_i32_0 : i32, i32, i32
  }
  func.func @transform_2(%arg0: i32, %arg1: i32) -> (i32, i32, i32) {
    %c0_i32 = arith.constant 0 : i32
    %c0_i32_0 = arith.constant 0 : i32
    %c0_i32_1 = arith.constant 0 : i32
    return %arg0, %c0_i32, %c0_i32_0 : i32, i32, i32
  }
  func.func @transform_3(%arg0: i32, %arg1: i32) -> (i32, i32, i32) {
    %c0_i32 = arith.constant 0 : i32
    %c0_i32_0 = arith.constant 0 : i32
    return %arg0, %arg1, %c0_i32 : i32, i32, i32
  }
  func.func @transform_4(%arg0: i32, %arg1: i32) -> (i32, i32) {
    %c0_i32 = arith.constant 0 : i32
    %c0_i32_0 = arith.constant 0 : i32
    %c0_i32_1 = arith.constant 0 : i32
    return %c0_i32, %c0_i32_0 : i32, i32
  }
  func.func @transform_5(%arg0: i32, %arg1: i32) -> (i32, i32) {
    %c0_i32 = arith.constant 0 : i32
    %c0_i32_0 = arith.constant 0 : i32
    %c0_i32_1 = arith.constant 0 : i32
    return %c0_i32, %c0_i32_0 : i32, i32
  }
  func.func @transform_6(%arg0: i32, %arg1: i32) -> (i32, i32) {
    %c0_i32 = arith.constant 0 : i32
    %c0_i32_0 = arith.constant 0 : i32
    %c0_i32_1 = arith.constant 0 : i32
    return %c0_i32, %c0_i32_0 : i32, i32
  }
  func.func @transform_7(%arg0: i32, %arg1: i32) -> (i32, i32) {
    %c0_i32 = arith.constant 0 : i32
    %c0_i32_0 = arith.constant 0 : i32
    %c0_i32_1 = arith.constant 0 : i32
    return %c0_i32, %c0_i32_0 : i32, i32
  }
  func.func @transform_8(%arg0: i32, %arg1: i32) -> (i32, i32) {
    %c0_i32 = arith.constant 0 : i32
    %c0_i32_0 = arith.constant 0 : i32
    %c0_i32_1 = arith.constant 0 : i32
    return %c0_i32, %c0_i32_0 : i32, i32
  }
  func.func @transform_9(%arg0: i32, %arg1: i32) -> (i32, i32, i32) {
    %c0_i32 = arith.constant 0 : i32
    %c0_i32_0 = arith.constant 0 : i32
    return %arg0, %arg1, %c0_i32 : i32, i32, i32
  }
}

module attributes {stable_mosaic.version = 11 : i64} {
  func.func @_fp_fused_kernel(%arg0: i32, %arg1: i32, %arg2: memref<1x64x3xf32, #tpu.memory_space<vmem>>, %arg3: memref<1x3x16xf32, #tpu.memory_space<vmem>>, %arg4: memref<1x16x64xbf16, #tpu.memory_space<vmem>>, %arg5: memref<1x64x6xbf16, #tpu.memory_space<vmem>>, %arg6: memref<64x64xbf16, #tpu.memory_space<vmem>>, %arg7: memref<6x64xf32, #tpu.memory_space<vmem>>, %arg8: memref<1x64xf32, #tpu.memory_space<vmem>>, %arg9: memref<64x128xbf16, #tpu.memory_space<vmem>>, %arg10: memref<1x128xf32, #tpu.memory_space<vmem>>, %arg11: memref<1x64x128xf32, #tpu.memory_space<vmem>>) attributes {dimension_semantics = [#tpu.dimension_semantics<parallel>, #tpu.dimension_semantics<parallel>], iteration_bounds = array<i64: 2, 1>, scalar_prefetch = 0 : i64, scratch_operands = 0 : i64, tpu.core_type = #tpu.core_type<tc>, window_params = [{transform_indices = @transform_0, window_bounds = array<i64: 1, 64, 3>}, {transform_indices = @transform_1, window_bounds = array<i64: 1, 3, 16>}, {transform_indices = @transform_2, window_bounds = array<i64: 1, 16, 64>}, {transform_indices = @transform_3, window_bounds = array<i64: 1, 64, 6>}, {pipeline_mode = #tpu.pipeline_mode<synchronous>, transform_indices = @transform_4, window_bounds = array<i64: 64, 64>}, {pipeline_mode = #tpu.pipeline_mode<synchronous>, transform_indices = @transform_5, window_bounds = array<i64: 6, 64>}, {pipeline_mode = #tpu.pipeline_mode<synchronous>, transform_indices = @transform_6, window_bounds = array<i64: 1, 64>}, {pipeline_mode = #tpu.pipeline_mode<synchronous>, transform_indices = @transform_7, window_bounds = array<i64: 64, 128>}, {pipeline_mode = #tpu.pipeline_mode<synchronous>, transform_indices = @transform_8, window_bounds = array<i64: 1, 128>}, {transform_indices = @transform_9, window_bounds = array<i64: 1, 64, 128>}]} {
    %c0 = arith.constant 0 : index
    %c0_0 = arith.constant 0 : index
    %c0_1 = arith.constant 0 : index
    %0 = vector.load %arg2[%c0, %c0_0, %c0_1] : memref<1x64x3xf32, #tpu.memory_space<vmem>>, vector<1x64x3xf32>
    %1 = vector.shape_cast %0 : vector<1x64x3xf32> to vector<64x3xf32>
    %c0_2 = arith.constant 0 : index
    %c0_3 = arith.constant 0 : index
    %c0_4 = arith.constant 0 : index
    %2 = vector.load %arg3[%c0_2, %c0_3, %c0_4] : memref<1x3x16xf32, #tpu.memory_space<vmem>>, vector<1x3x16xf32>
    %3 = vector.shape_cast %2 : vector<1x3x16xf32> to vector<3x16xf32>
    %4 = vector.extract_strided_slice %1 {offsets = [0, 0], sizes = [64, 1], strides = [1, 1]} : vector<64x3xf32> to vector<64x1xf32>
    %5 = vector.extract_strided_slice %3 {offsets = [0, 0], sizes = [1, 16], strides = [1, 1]} : vector<3x16xf32> to vector<1x16xf32>
    %6 = vector.broadcast %4 : vector<64x1xf32> to vector<64x16xf32>
    %7 = vector.broadcast %5 : vector<1x16xf32> to vector<64x16xf32>
    %8 = arith.subf %6, %7 : vector<64x16xf32>
    %9 = vector.extract_strided_slice %1 {offsets = [0, 1], sizes = [64, 1], strides = [1, 1]} : vector<64x3xf32> to vector<64x1xf32>
    %10 = vector.extract_strided_slice %3 {offsets = [1, 0], sizes = [1, 16], strides = [1, 1]} : vector<3x16xf32> to vector<1x16xf32>
    %11 = vector.broadcast %9 : vector<64x1xf32> to vector<64x16xf32>
    %12 = vector.broadcast %10 : vector<1x16xf32> to vector<64x16xf32>
    %13 = arith.subf %11, %12 : vector<64x16xf32>
    %14 = vector.extract_strided_slice %1 {offsets = [0, 2], sizes = [64, 1], strides = [1, 1]} : vector<64x3xf32> to vector<64x1xf32>
    %15 = vector.extract_strided_slice %3 {offsets = [2, 0], sizes = [1, 16], strides = [1, 1]} : vector<3x16xf32> to vector<1x16xf32>
    %16 = vector.broadcast %14 : vector<64x1xf32> to vector<64x16xf32>
    %17 = vector.broadcast %15 : vector<1x16xf32> to vector<64x16xf32>
    %18 = arith.subf %16, %17 : vector<64x16xf32>
    %19 = arith.mulf %8, %8 : vector<64x16xf32>
    %20 = arith.mulf %13, %13 : vector<64x16xf32>
    %21 = arith.addf %19, %20 : vector<64x16xf32>
    %22 = arith.mulf %18, %18 : vector<64x16xf32>
    %23 = arith.addf %21, %22 : vector<64x16xf32>
    %24 = tpu.iota {dimensions = array<i32: 1>} : vector<64x16xi32>
    %cst = arith.constant 0.000000e+00 : f32
    %25 = vector.broadcast %cst : f32 to vector<64x16xf32>
    %cst_5 = arith.constant dense<0x7F800000> : vector<64xf32>
    %26 = vector.multi_reduction <minimumf>, %23, %cst_5 [1] : vector<64x16xf32> to vector<64xf32>
    %27 = vector.shape_cast %26 : vector<64xf32> to vector<64x1xf32>
    %28 = vector.broadcast %27 : vector<64x1xf32> to vector<64x16xf32>
    %29 = arith.cmpf oeq, %23, %28 : vector<64x16xf32>
    %c16_i32 = arith.constant 16 : i32
    %30 = vector.broadcast %c16_i32 : i32 to vector<64x16xi32>
    %31 = arith.select %29, %24, %30 : vector<64x16xi1>, vector<64x16xi32>
    %cst_6 = arith.constant dense<2147483647> : vector<64xi32>
    %32 = vector.multi_reduction <minsi>, %31, %cst_6 [1] : vector<64x16xi32> to vector<64xi32>
    %33 = vector.shape_cast %32 : vector<64xi32> to vector<64x1xi32>
    %34 = vector.broadcast %33 : vector<64x1xi32> to vector<64x16xi32>
    %35 = arith.cmpi eq, %24, %34 : vector<64x16xi32>
    %cst_7 = arith.constant 9.99999993E-9 : f32
    %36 = vector.broadcast %cst_7 : f32 to vector<64x1xf32>
    %37 = arith.addf %27, %36 : vector<64x1xf32>
    %38 = tpu.reciprocal %37 {approx = true} : vector<64x1xf32> -> vector<64x1xf32>
    %cst_8 = arith.constant 0.000000e+00 : f32
    %39 = vector.shape_cast %38 : vector<64x1xf32> to vector<64x1xf32>
    %40 = vector.broadcast %39 : vector<64x1xf32> to vector<64x16xf32>
    %41 = vector.broadcast %cst_8 : f32 to vector<64x16xf32>
    %42 = arith.select %35, %40, %41 : vector<64x16xi1>, vector<64x16xf32>
    %43 = arith.addf %25, %42 : vector<64x16xf32>
    %cst_9 = arith.constant 0x7F800000 : f32
    %44 = vector.broadcast %cst_9 : f32 to vector<64x16xf32>
    %45 = arith.select %35, %44, %23 : vector<64x16xi1>, vector<64x16xf32>
    %cst_10 = arith.constant dense<0x7F800000> : vector<64xf32>
    %46 = vector.multi_reduction <minimumf>, %45, %cst_10 [1] : vector<64x16xf32> to vector<64xf32>
    %47 = vector.shape_cast %46 : vector<64xf32> to vector<64x1xf32>
    %48 = vector.broadcast %47 : vector<64x1xf32> to vector<64x16xf32>
    %49 = arith.cmpf oeq, %45, %48 : vector<64x16xf32>
    %c16_i32_11 = arith.constant 16 : i32
    %50 = vector.broadcast %c16_i32_11 : i32 to vector<64x16xi32>
    %51 = arith.select %49, %24, %50 : vector<64x16xi1>, vector<64x16xi32>
    %cst_12 = arith.constant dense<2147483647> : vector<64xi32>
    %52 = vector.multi_reduction <minsi>, %51, %cst_12 [1] : vector<64x16xi32> to vector<64xi32>
    %53 = vector.shape_cast %52 : vector<64xi32> to vector<64x1xi32>
    %54 = vector.broadcast %53 : vector<64x1xi32> to vector<64x16xi32>
    %55 = arith.cmpi eq, %24, %54 : vector<64x16xi32>
    %cst_13 = arith.constant 9.99999993E-9 : f32
    %56 = vector.broadcast %cst_13 : f32 to vector<64x1xf32>
    %57 = arith.addf %47, %56 : vector<64x1xf32>
    %58 = tpu.reciprocal %57 {approx = true} : vector<64x1xf32> -> vector<64x1xf32>
    %cst_14 = arith.constant 0.000000e+00 : f32
    %59 = vector.shape_cast %58 : vector<64x1xf32> to vector<64x1xf32>
    %60 = vector.broadcast %59 : vector<64x1xf32> to vector<64x16xf32>
    %61 = vector.broadcast %cst_14 : f32 to vector<64x16xf32>
    %62 = arith.select %55, %60, %61 : vector<64x16xi1>, vector<64x16xf32>
    %63 = arith.addf %43, %62 : vector<64x16xf32>
    %cst_15 = arith.constant 0x7F800000 : f32
    %64 = vector.broadcast %cst_15 : f32 to vector<64x16xf32>
    %65 = arith.select %55, %64, %45 : vector<64x16xi1>, vector<64x16xf32>
    %cst_16 = arith.constant dense<0x7F800000> : vector<64xf32>
    %66 = vector.multi_reduction <minimumf>, %65, %cst_16 [1] : vector<64x16xf32> to vector<64xf32>
    %67 = vector.shape_cast %66 : vector<64xf32> to vector<64x1xf32>
    %68 = vector.broadcast %67 : vector<64x1xf32> to vector<64x16xf32>
    %69 = arith.cmpf oeq, %65, %68 : vector<64x16xf32>
    %c16_i32_17 = arith.constant 16 : i32
    %70 = vector.broadcast %c16_i32_17 : i32 to vector<64x16xi32>
    %71 = arith.select %69, %24, %70 : vector<64x16xi1>, vector<64x16xi32>
    %cst_18 = arith.constant dense<2147483647> : vector<64xi32>
    %72 = vector.multi_reduction <minsi>, %71, %cst_18 [1] : vector<64x16xi32> to vector<64xi32>
    %73 = vector.shape_cast %72 : vector<64xi32> to vector<64x1xi32>
    %74 = vector.broadcast %73 : vector<64x1xi32> to vector<64x16xi32>
    %75 = arith.cmpi eq, %24, %74 : vector<64x16xi32>
    %cst_19 = arith.constant 9.99999993E-9 : f32
    %76 = vector.broadcast %cst_19 : f32 to vector<64x1xf32>
    %77 = arith.addf %67, %76 : vector<64x1xf32>
    %78 = tpu.reciprocal %77 {approx = true} : vector<64x1xf32> -> vector<64x1xf32>
    %cst_20 = arith.constant 0.000000e+00 : f32
    %79 = vector.shape_cast %78 : vector<64x1xf32> to vector<64x1xf32>
    %80 = vector.broadcast %79 : vector<64x1xf32> to vector<64x16xf32>
    %81 = vector.broadcast %cst_20 : f32 to vector<64x16xf32>
    %82 = arith.select %75, %80, %81 : vector<64x16xi1>, vector<64x16xf32>
    %83 = arith.addf %63, %82 : vector<64x16xf32>
    %cst_21 = arith.constant dense<0.000000e+00> : vector<64xf32>
    %84 = vector.multi_reduction <add>, %83, %cst_21 [1] : vector<64x16xf32> to vector<64xf32>
    %85 = vector.shape_cast %84 : vector<64xf32> to vector<64x1xf32>
    %86 = vector.broadcast %85 : vector<64x1xf32> to vector<64x16xf32>
    %87 = arith.divf %83, %86 : vector<64x16xf32>
    %88 = arith.truncf %87 : vector<64x16xf32> to vector<64x16xbf16>
    %c0_22 = arith.constant 0 : index
    %c0_23 = arith.constant 0 : index
    %c0_24 = arith.constant 0 : index
    %89 = vector.load %arg4[%c0_22, %c0_23, %c0_24] : memref<1x16x64xbf16, #tpu.memory_space<vmem>>, vector<1x16x64xbf16>
    %90 = vector.shape_cast %89 : vector<1x16x64xbf16> to vector<16x64xbf16>
    %cst_25 = arith.constant dense<0.000000e+00> : vector<64x64xf32>
    %91 = tpu.matmul %88, %90, %cst_25 {dimension_numbers = #tpu.dot_dimension_numbers<[1], [0], [0], [1], [0, 0, 1, 1], [], []>} : vector<64x16xbf16>, vector<16x64xbf16>, vector<64x64xf32> -> vector<64x64xf32>
    %c0_26 = arith.constant 0 : index
    %c0_27 = arith.constant 0 : index
    %92 = vector.load %arg6[%c0_26, %c0_27] : memref<64x64xbf16, #tpu.memory_space<vmem>>, vector<64x64xbf16>
    %93 = arith.truncf %91 : vector<64x64xf32> to vector<64x64xbf16>
    %cst_28 = arith.constant dense<0.000000e+00> : vector<64x64xf32>
    %94 = tpu.matmul %93, %92, %cst_28 {dimension_numbers = #tpu.dot_dimension_numbers<[1], [0], [0], [1], [0, 0, 1, 1], [], []>} : vector<64x64xbf16>, vector<64x64xbf16>, vector<64x64xf32> -> vector<64x64xf32>
    %c0_29 = arith.constant 0 : index
    %c0_30 = arith.constant 0 : index
    %c0_31 = arith.constant 0 : index
    %95 = vector.load %arg5[%c0_29, %c0_30, %c0_31] : memref<1x64x6xbf16, #tpu.memory_space<vmem>>, vector<1x64x6xbf16>
    %96 = vector.shape_cast %95 : vector<1x64x6xbf16> to vector<64x6xbf16>
    %c0_32 = arith.constant 0 : index
    %c0_33 = arith.constant 0 : index
    %97 = vector.load %arg7[%c0_32, %c0_33] : memref<6x64xf32, #tpu.memory_space<vmem>>, vector<6x64xf32>
    %98 = arith.extf %96 : vector<64x6xbf16> to vector<64x6xf32>
    %99 = vector.extract_strided_slice %98 {offsets = [0, 0], sizes = [64, 1], strides = [1, 1]} : vector<64x6xf32> to vector<64x1xf32>
    %100 = vector.extract_strided_slice %97 {offsets = [0, 0], sizes = [1, 64], strides = [1, 1]} : vector<6x64xf32> to vector<1x64xf32>
    %101 = vector.broadcast %99 : vector<64x1xf32> to vector<64x64xf32>
    %102 = vector.broadcast %100 : vector<1x64xf32> to vector<64x64xf32>
    %103 = arith.mulf %101, %102 : vector<64x64xf32>
    %104 = vector.extract_strided_slice %98 {offsets = [0, 1], sizes = [64, 1], strides = [1, 1]} : vector<64x6xf32> to vector<64x1xf32>
    %105 = vector.extract_strided_slice %97 {offsets = [1, 0], sizes = [1, 64], strides = [1, 1]} : vector<6x64xf32> to vector<1x64xf32>
    %106 = vector.broadcast %104 : vector<64x1xf32> to vector<64x64xf32>
    %107 = vector.broadcast %105 : vector<1x64xf32> to vector<64x64xf32>
    %108 = arith.mulf %106, %107 : vector<64x64xf32>
    %109 = arith.addf %103, %108 : vector<64x64xf32>
    %110 = vector.extract_strided_slice %98 {offsets = [0, 2], sizes = [64, 1], strides = [1, 1]} : vector<64x6xf32> to vector<64x1xf32>
    %111 = vector.extract_strided_slice %97 {offsets = [2, 0], sizes = [1, 64], strides = [1, 1]} : vector<6x64xf32> to vector<1x64xf32>
    %112 = vector.broadcast %110 : vector<64x1xf32> to vector<64x64xf32>
    %113 = vector.broadcast %111 : vector<1x64xf32> to vector<64x64xf32>
    %114 = arith.mulf %112, %113 : vector<64x64xf32>
    %115 = arith.addf %109, %114 : vector<64x64xf32>
    %116 = vector.extract_strided_slice %98 {offsets = [0, 3], sizes = [64, 1], strides = [1, 1]} : vector<64x6xf32> to vector<64x1xf32>
    %117 = vector.extract_strided_slice %97 {offsets = [3, 0], sizes = [1, 64], strides = [1, 1]} : vector<6x64xf32> to vector<1x64xf32>
    %118 = vector.broadcast %116 : vector<64x1xf32> to vector<64x64xf32>
    %119 = vector.broadcast %117 : vector<1x64xf32> to vector<64x64xf32>
    %120 = arith.mulf %118, %119 : vector<64x64xf32>
    %121 = arith.addf %115, %120 : vector<64x64xf32>
    %122 = vector.extract_strided_slice %98 {offsets = [0, 4], sizes = [64, 1], strides = [1, 1]} : vector<64x6xf32> to vector<64x1xf32>
    %123 = vector.extract_strided_slice %97 {offsets = [4, 0], sizes = [1, 64], strides = [1, 1]} : vector<6x64xf32> to vector<1x64xf32>
    %124 = vector.broadcast %122 : vector<64x1xf32> to vector<64x64xf32>
    %125 = vector.broadcast %123 : vector<1x64xf32> to vector<64x64xf32>
    %126 = arith.mulf %124, %125 : vector<64x64xf32>
    %127 = arith.addf %121, %126 : vector<64x64xf32>
    %128 = vector.extract_strided_slice %98 {offsets = [0, 5], sizes = [64, 1], strides = [1, 1]} : vector<64x6xf32> to vector<64x1xf32>
    %129 = vector.extract_strided_slice %97 {offsets = [5, 0], sizes = [1, 64], strides = [1, 1]} : vector<6x64xf32> to vector<1x64xf32>
    %130 = vector.broadcast %128 : vector<64x1xf32> to vector<64x64xf32>
    %131 = vector.broadcast %129 : vector<1x64xf32> to vector<64x64xf32>
    %132 = arith.mulf %130, %131 : vector<64x64xf32>
    %133 = arith.addf %127, %132 : vector<64x64xf32>
    %134 = arith.addf %94, %133 : vector<64x64xf32>
    %c0_34 = arith.constant 0 : index
    %c0_35 = arith.constant 0 : index
    %135 = vector.load %arg8[%c0_34, %c0_35] : memref<1x64xf32, #tpu.memory_space<vmem>>, vector<1x64xf32>
    %136 = vector.broadcast %135 : vector<1x64xf32> to vector<64x64xf32>
    %137 = arith.addf %134, %136 : vector<64x64xf32>
    %cst_36 = arith.constant 0.000000e+00 : f32
    %138 = vector.broadcast %cst_36 : f32 to vector<64x64xf32>
    %139 = arith.maximumf %137, %138 : vector<64x64xf32>
    %140 = arith.truncf %139 : vector<64x64xf32> to vector<64x64xbf16>
    %c0_37 = arith.constant 0 : index
    %c0_38 = arith.constant 0 : index
    %141 = vector.load %arg9[%c0_37, %c0_38] : memref<64x128xbf16, #tpu.memory_space<vmem>>, vector<64x128xbf16>
    %cst_39 = arith.constant dense<0.000000e+00> : vector<64x128xf32>
    %142 = tpu.matmul %140, %141, %cst_39 {dimension_numbers = #tpu.dot_dimension_numbers<[1], [0], [0], [1], [0, 0, 1, 1], [], []>} : vector<64x64xbf16>, vector<64x128xbf16>, vector<64x128xf32> -> vector<64x128xf32>
    %c0_40 = arith.constant 0 : index
    %c0_41 = arith.constant 0 : index
    %143 = vector.load %arg10[%c0_40, %c0_41] : memref<1x128xf32, #tpu.memory_space<vmem>>, vector<1x128xf32>
    %144 = vector.broadcast %143 : vector<1x128xf32> to vector<64x128xf32>
    %145 = arith.addf %142, %144 : vector<64x128xf32>
    %cst_42 = arith.constant 0.000000e+00 : f32
    %146 = vector.broadcast %cst_42 : f32 to vector<64x128xf32>
    %147 = arith.maximumf %145, %146 : vector<64x128xf32>
    %c0_43 = arith.constant 0 : index
    %c0_44 = arith.constant 0 : index
    %c0_45 = arith.constant 0 : index
    %148 = vector.load %arg11[%c0_43, %c0_44, %c0_45] : memref<1x64x128xf32, #tpu.memory_space<vmem>>, vector<1x64x128xf32>
    %149 = vector.shape_cast %148 : vector<1x64x128xf32> to vector<64x128xf32>
    %150 = vector.shape_cast %147 : vector<64x128xf32> to vector<1x64x128xf32>
    tpu.vector_store %arg11[%c0_43, %c0_44, %c0_45], %150 {strides = array<i32>} : memref<1x64x128xf32, #tpu.memory_space<vmem>>, vector<1x64x128xf32>,
    return
  }
  func.func @transform_0(%arg0: i32, %arg1: i32) -> (i32, i32, i32) {
    %c0_i32 = arith.constant 0 : i32
    %c0_i32_0 = arith.constant 0 : i32
    return %arg0, %arg1, %c0_i32 : i32, i32, i32
  }
  func.func @transform_1(%arg0: i32, %arg1: i32) -> (i32, i32, i32) {
    %c0_i32 = arith.constant 0 : i32
    %c0_i32_0 = arith.constant 0 : i32
    %c0_i32_1 = arith.constant 0 : i32
    return %arg0, %c0_i32, %c0_i32_0 : i32, i32, i32
  }
  func.func @transform_2(%arg0: i32, %arg1: i32) -> (i32, i32, i32) {
    %c0_i32 = arith.constant 0 : i32
    %c0_i32_0 = arith.constant 0 : i32
    %c0_i32_1 = arith.constant 0 : i32
    return %arg0, %c0_i32, %c0_i32_0 : i32, i32, i32
  }
  func.func @transform_3(%arg0: i32, %arg1: i32) -> (i32, i32, i32) {
    %c0_i32 = arith.constant 0 : i32
    %c0_i32_0 = arith.constant 0 : i32
    return %arg0, %arg1, %c0_i32 : i32, i32, i32
  }
  func.func @transform_4(%arg0: i32, %arg1: i32) -> (i32, i32) {
    %c0_i32 = arith.constant 0 : i32
    %c0_i32_0 = arith.constant 0 : i32
    %c0_i32_1 = arith.constant 0 : i32
    return %c0_i32, %c0_i32_0 : i32, i32
  }
  func.func @transform_5(%arg0: i32, %arg1: i32) -> (i32, i32) {
    %c0_i32 = arith.constant 0 : i32
    %c0_i32_0 = arith.constant 0 : i32
    %c0_i32_1 = arith.constant 0 : i32
    return %c0_i32, %c0_i32_0 : i32, i32
  }
  func.func @transform_6(%arg0: i32, %arg1: i32) -> (i32, i32) {
    %c0_i32 = arith.constant 0 : i32
    %c0_i32_0 = arith.constant 0 : i32
    %c0_i32_1 = arith.constant 0 : i32
    return %c0_i32, %c0_i32_0 : i32, i32
  }
  func.func @transform_7(%arg0: i32, %arg1: i32) -> (i32, i32) {
    %c0_i32 = arith.constant 0 : i32
    %c0_i32_0 = arith.constant 0 : i32
    %c0_i32_1 = arith.constant 0 : i32
    return %c0_i32, %c0_i32_0 : i32, i32
  }
  func.func @transform_8(%arg0: i32, %arg1: i32) -> (i32, i32) {
    %c0_i32 = arith.constant 0 : i32
    %c0_i32_0 = arith.constant 0 : i32
    %c0_i32_1 = arith.constant 0 : i32
    return %c0_i32, %c0_i32_0 : i32, i32
  }
  func.func @transform_9(%arg0: i32, %arg1: i32) -> (i32, i32, i32) {
    %c0_i32 = arith.constant 0 : i32
    %c0_i32_0 = arith.constant 0 : i32
    return %arg0, %arg1, %c0_i32 : i32, i32, i32
  }
}

</mosaic_0001>

<bundles_post_ra>
// kernel: custom-call.16
= control target key start
LH: loop header
LB: loop body
LE: loop exit
PB: predicated region body
PF: predicated region fallthrough
CT: control target
= control target key end

     0   :  { %s6_s0 = inlined_call_operand.vmem [shape: f32[2,64], index: 0, kind: output, shape index: {}]  }

// kernel: a_call__.4
= control target key start
LH: loop header
LB: loop body
LE: loop exit
PB: predicated region body
PF: predicated region fallthrough
CT: control target
= control target key end

     0   :  { %12 = vsyncpa [#allocation3], 0  ;;  %s4254_s0 = inlined_call_operand.hbm [shape: bf16[256,3], index: 0, kind: input, shape index: {}]   ;;  %s4255_s1 = inlined_call_operand.hbm [shape: bf16[256,3], index: 1, kind: input, shape index: {}]   ;;  %s4256_s2 = inlined_call_operand.hbm [shape: f32[3,16], index: 2, kind: input, shape index: {}]   ;;  %s4257_s3 = inlined_call_operand.hbm [shape: f32[3,16], index: 3, kind: input, shape index: {}]   ;;  %s4258_s4 = inlined_call_operand.hbm [shape: f32[1,16], index: 4, kind: input, shape index: {}]   ;;  %s4259_s5 = inlined_call_operand.hbm [shape: bf16[16,128], index: 5, kind: input, shape index: {}]   ;;  %s4260_s6 = inlined_call_operand.hbm [shape: f32[1,128], index: 6, kind: input, shape index: {}]   ;;  %s4261_s7 = inlined_call_operand.hbm [shape: bf16[32,128], index: 7, kind: output, shape index: {}]  }
   0x1   :  { %13 = vsyncpa [#allocation6], 0 }
   0x2   :  { %14 = vsyncpa [#allocation9], 0 }
   0x3   :  { %15 = vsyncpa [#allocation12], 0 }
   0x4   :  { %16 = vsyncpa [#allocation4], 0  ;;  %s3215_s24 = smov [#allocation5]   ;;  %s3216_s26 = smov [#allocation8]  }
   0x5   :  { %s34_s25 = sshll.u32 %s3215_s24, 4  ;;  %s57_s27 = sshll.u32 %s3216_s26, 4  ;;  %s35_s25 = int_to_ptr.vmem [resolvable:$true] %s34_s25  ;;  %s58_s27 = int_to_ptr.vmem [resolvable:$true] %s57_s27 }
   0x6   :  { %s3029_s30 = scalar_lea.hbm %s4255_s1, 2048 }
   0x7   :  { %p3030_p0 = scmp.ne.s32.totalorder %s4255_s1, %s3029_s30  ;;  %p3033_p1 = scmp.lt.u32.totalorder %s3029_s30, %s4255_s1 }
   0x9   :  { %p3035_p2 = pnand %p3033_p1, %p3030_p0 }
   0xb   :  { %3038 = shalt.err (!%p3035_p2)
}
   0xc   :  { %s3039_s12 = scalar_lea.vmem %s35_s25, 2048  ;;  %p3044_p4 = scmp.lt.s32.totalorder %s35_s25, %s35_s25 }
   0xd   :  { %p3040_p3 = scmp.ne.s32.totalorder %s35_s25, %s3039_s12  ;;  %p3045_p5 = scmp.lt.s32.totalorder %s3039_s12, %s3039_s12 }
   0xf   :  { %p3046_p6 = por %p3045_p5, %p3044_p4 }
  0x11   :  { %p3047_p7 = pnand %p3046_p6, %p3040_p3 }
  0x13   :  { %3050 = shalt.err (!%p3047_p7)
}
  0x14   :  { %s3217_s13 = smov 64   ;;  %s3218_s14 = smov 4  }
  0x15   :  { %40 = dma.hbm_to_vmem [thread:$0]  %s4255_s1, 2048, %s35_s25, [#allocation6], %s3217_s13, %s3217_s13, %s3218_s14  }
  0x16   :  { %s3051_s19 = scalar_lea.hbm %s4257_s3, 64 }
  0x17   :  { %p3052_p8 = scmp.ne.s32.totalorder %s4257_s3, %s3051_s19  ;;  %p3055_p9 = scmp.lt.u32.totalorder %s3051_s19, %s4257_s3 }
  0x19   :  { %p3057_p10 = pnand %p3055_p9, %p3052_p8 }
  0x1b   :  { %3060 = shalt.err (!%p3057_p10)
}
  0x1c   :  { %s3061_s24 = scalar_lea.vmem %s58_s27, 64  ;;  %p3066_p12 = scmp.lt.s32.totalorder %s58_s27, %s58_s27 }
  0x1d   :  { %p3062_p11 = scmp.ne.s32.totalorder %s58_s27, %s3061_s24  ;;  %p3067_p13 = scmp.lt.s32.totalorder %s3061_s24, %s3061_s24 }
  0x1f   :  { %p3068_p0 = por %p3067_p13, %p3066_p12 }
  0x21   :  { %p3069_p1 = pnand %p3068_p0, %p3062_p11 }
  0x23   :  { %3072 = shalt.err (!%p3069_p1)
}
  0x24   :  { %60 = dma.hbm_to_vmem [thread:$0]  %s4257_s3, 64, %s58_s27, [#allocation9]  }
  0x25   :  { %s3219_s26 = smov [#allocation11]   ;;  %s3220_s29 = smov [#allocation2]  }
  0x26   :  { %s76_s28 = sshll.u32 %s3219_s26, 4  ;;  %s22_s30 = sshll.u32 %s3220_s29, 4  ;;  %s77_s28 = int_to_ptr.vmem [resolvable:$true] %s76_s28  ;;  %s3295_s30 = int_to_ptr.vmem [resolvable:$true] %s22_s30 }
  0x27   :  { %s3073_s10 = scalar_lea.hbm %s4259_s5, 128 }
  0x28   :  { %p3074_p2 = scmp.ne.s32.totalorder %s4259_s5, %s3073_s10  ;;  %p3077_p3 = scmp.lt.u32.totalorder %s3073_s10, %s4259_s5 }
  0x2a   :  { %p3079_p4 = pnand %p3077_p3, %p3074_p2 }
  0x2c   :  { %3082 = shalt.err (!%p3079_p4)
}
  0x2d   :  { %s3083_s3 = scalar_lea.vmem %s77_s28, 128  ;;  %p3088_p6 = scmp.lt.s32.totalorder %s77_s28, %s77_s28 }
  0x2e   :  { %p3084_p5 = scmp.ne.s32.totalorder %s77_s28, %s3083_s3  ;;  %p3089_p7 = scmp.lt.s32.totalorder %s3083_s3, %s3083_s3 }
  0x30   :  { %p3090_p8 = por %p3089_p7, %p3088_p6 }
  0x32   :  { %p3091_p9 = pnand %p3090_p8, %p3084_p5 }
  0x34   :  { %3094 = shalt.err (!%p3091_p9)
}
  0x35   :  { %82 = dma.hbm_to_vmem [thread:$0]  %s4259_s5, 128, %s77_s28, [#allocation12], %s3217_s13, %s3217_s13, %s3218_s14  }
  0x36   :  { %s3095_s20 = scalar_lea.hbm %s4254_s0, 2048 }
  0x37   :  { %p3096_p10 = scmp.ne.s32.totalorder %s4254_s0, %s3095_s20  ;;  %p3099_p11 = scmp.lt.u32.totalorder %s3095_s20, %s4254_s0 }
  0x39   :  { %p3101_p12 = pnand %p3099_p11, %p3096_p10 }
  0x3b   :  { %3104 = shalt.err (!%p3101_p12)
}
  0x3c   :  { %s3105_s1 = scalar_lea.vmem %s3295_s30, 2048  ;;  %p3110_p0 = scmp.lt.s32.totalorder %s3295_s30, %s3295_s30 }
  0x3d   :  { %p3106_p13 = scmp.ne.s32.totalorder %s3295_s30, %s3105_s1  ;;  %p3111_p1 = scmp.lt.s32.totalorder %s3105_s1, %s3105_s1 }
  0x3f   :  { %p3112_p2 = por %p3111_p1, %p3110_p0 }
  0x41   :  { %p3113_p3 = pnand %p3112_p2, %p3106_p13 }
  0x43   :  { %3116 = shalt.err (!%p3113_p3)
}
  0x44   :  { %28 = dma.hbm_to_vmem [thread:$0]  %s4254_s0, 2048, %s3295_s30, [#allocation3], %s3217_s13, %s3217_s13, %s3218_s14  }
  0x45   :  { %s3221_s26 = smov [#allocation7]   ;;  %s3222_s29 = smov [#allocation10]  }
  0x46   :  { %s47_s28 = sshll.u32 %s3221_s26, 4  ;;  %s67_s8 = sshll.u32 %s3222_s29, 4  ;;  %s48_s28 = int_to_ptr.vmem [resolvable:$true] %s47_s28  ;;  %s68_s8 = int_to_ptr.vmem [resolvable:$true] %s67_s8 }
  0x47   :  { %s3117_s11 = scalar_lea.hbm %s4256_s2, 64 }
  0x48   :  { %p3118_p4 = scmp.ne.s32.totalorder %s4256_s2, %s3117_s11  ;;  %p3121_p5 = scmp.lt.u32.totalorder %s3117_s11, %s4256_s2 }
  0x4a   :  { %p3123_p6 = pnand %p3121_p5, %p3118_p4 }
  0x4c   :  { %3126 = shalt.err (!%p3123_p6)
}
  0x4d   :  { %s3127_s0 = scalar_lea.vmem %s48_s28, 64  ;;  %p3132_p8 = scmp.lt.s32.totalorder %s48_s28, %s48_s28 }
  0x4e   :  { %p3128_p7 = scmp.ne.s32.totalorder %s48_s28, %s3127_s0  ;;  %p3133_p9 = scmp.lt.s32.totalorder %s3127_s0, %s3127_s0 }
  0x50   :  { %p3134_p10 = por %p3133_p9, %p3132_p8 }
  0x52   :  { %p3135_p11 = pnand %p3134_p10, %p3128_p7 }
  0x54   :  { %3138 = shalt.err (!%p3135_p11)
}
  0x55   :  { %50 = dma.hbm_to_vmem [thread:$0]  %s4256_s2, 64, %s48_s28, [#allocation6]  }
  0x56   :  { %s3139_s19 = scalar_lea.hbm %s4258_s4, 16 }
  0x57   :  { %p3140_p12 = scmp.ne.s32.totalorder %s4258_s4, %s3139_s19  ;;  %p3143_p13 = scmp.lt.u32.totalorder %s3139_s19, %s4258_s4 }
  0x59   :  { %p3145_p0 = pnand %p3143_p13, %p3140_p12 }
  0x5b   :  { %3148 = shalt.err (!%p3145_p0)
}
  0x5c   :  { %s3149_s24 = scalar_lea.vmem %s68_s8, 16  ;;  %s3153_s1 = scalar_lea.vmem %s68_s8, 32 }
  0x5d   :  { %p3150_p1 = scmp.ne.s32.totalorder %s68_s8, %s3149_s24  ;;  %p3154_p2 = scmp.lt.s32.totalorder %s68_s8, %s68_s8 }
  0x5e   :  { %p3155_p3 = scmp.lt.s32.totalorder %s3153_s1, %s3149_s24 }
  0x60   :  { %p3156_p4 = por %p3155_p3, %p3154_p2 }
  0x62   :  { %p3157_p5 = pnand %p3156_p4, %p3150_p1 }
  0x64   :  { %3160 = shalt.err (!%p3157_p5)
}
  0x65   :  { %70 = dma.hbm_to_vmem [thread:$0]  %s4258_s4, 16, %s68_s8, [#allocation9]  }
  0x66   :  { %s3223_s25 = smov [#allocation13]   ;;  %s3161_s9 = scalar_lea.hbm %s4260_s6, 16 }
  0x67   :  { %s89_s26 = sshll.u32 %s3223_s25, 4  ;;  %p3162_p6 = scmp.ne.s32.totalorder %s4260_s6, %s3161_s9  ;;  %s90_s26 = int_to_ptr.vmem [resolvable:$true] %s89_s26 }
  0x68   :  { %p3165_p7 = scmp.lt.u32.totalorder %s3161_s9, %s4260_s6 }
  0x6a   :  { %p3167_p8 = pnand %p3165_p7, %p3162_p6 }
  0x6c   :  { %3170 = shalt.err (!%p3167_p8)
}
  0x6d   :  { %s3171_s16 = scalar_lea.vmem %s90_s26, 16  ;;  %s3175_s4 = scalar_lea.vmem %s90_s26, 32 }
  0x6e   :  { %p3172_p9 = scmp.ne.s32.totalorder %s90_s26, %s3171_s16  ;;  %p3176_p10 = scmp.lt.s32.totalorder %s90_s26, %s90_s26 }
  0x6f   :  { %p3177_p11 = scmp.lt.s32.totalorder %s3175_s4, %s3171_s16 }
  0x71   :  { %p3178_p12 = por %p3177_p11, %p3176_p10 }
  0x73   :  { %p3179_p13 = pnand %p3178_p12, %p3172_p9 }
  0x75   :  { %3182 = shalt.err (!%p3179_p13)
}
  0x76   :  { %92 = dma.hbm_to_vmem [thread:$0]  %s4260_s6, 16, %s90_s26, [#allocation12]  }
  0x77   :  { %3205 = dma.done.wait [#allocation3], 2048  }
  0x78   :  { %3206 = vsyncadd [#allocation3], 4294965248 }
  0x79   :  { %3207 = dma.done.wait [#allocation6], 2112  }
  0x7a   :  { %3208 = vsyncadd [#allocation6], 4294965184 }
  0x7b   :  { %3209 = dma.done.wait [#allocation9], 80  }
  0x7c   :  { %3210 = vsyncadd [#allocation9], 4294967216 }
  0x7d   :  { %3211 = dma.done.wait [#allocation12], 144  }
  0x7e   :  { %3212 = vsyncadd [#allocation12], 4294967152  ;;  %v4263_v0 = vmov 1   ;;  %v4268_v1 = vmov 0   ;;  %v2428_v2 = vld [vmem:[#allocation2 + $0x10] sm:$0xff]   ;;  %v2300_v3 = vld [vmem:[#allocation2] sm:$0xff]  }
  0x7f   :  { %2564 = vset.pattern.permute.xlu0 %v4263_v0  ;;  %2523 = vset.pattern.permute.xlu1 %v4268_v1  ;;  %v2429_v4 = vld [vmem:[#allocation2 + $0x18] sm:$0xff]   ;;  %v2309_v5 = vunpack.c.l.bf16 %v2428_v2  ;;  %v2310_v6 = vunpack.c.h.bf16 %v2428_v2  ;;  %v2301_v7 = vunpack.c.l.bf16 %v2300_v3  ;;  %v2302_v8 = vunpack.c.h.bf16 %v2300_v3  ;;  %v2431_v11 = vld [vmem:[#allocation2 + $0x28] sm:$0xff]   ;;  %v2449_v38 = vld [vmem:[#allocation5 + $0x40] sm:$0xff]   ;;  %s3227_s6 = smov [#allocation14]  }
  0x80   :  { %v2313_v9 = vunpack.c.l.bf16 %v2429_v4  ;;  %v2314_v10 = vunpack.c.h.bf16 %v2429_v4  ;;  %v2321_v15 = vunpack.c.l.bf16 %v2431_v11  ;;  %v2322_v16 = vunpack.c.h.bf16 %v2431_v11  ;;  %v2433_v17 = vld [vmem:[#allocation2 + $0x38] sm:$0xff]   ;;  %v2435_v21 = vld [vmem:[#allocation2 + $0x48] sm:$0xff]   ;;  %v2445_v50 = vld [vmem:[#allocation5 + $0x20] sm:$0xff]   ;;  %s2201_s0 = sshll.u32 %s3227_s6, 4  ;;  %s2202_s0 = int_to_ptr.vmem [resolvable:$true] %s2201_s0 }
  0x81   :  { %v3370_v12 = vpack.i.bf16 %v2310_v6, %v2309_v5  ;;  %v3372_v13 = vpack.i.bf16 %v2302_v8, %v2301_v7  ;;  %v2329_v19 = vunpack.c.l.bf16 %v2433_v17  ;;  %v2330_v20 = vunpack.c.h.bf16 %v2433_v17  ;;  %v2437_v25 = vld [vmem:[#allocation2 + $0x58] sm:$0xff]   ;;  %v2439_v29 = vld [vmem:[#allocation2 + $0x68] sm:$0xff]   ;;  %v2430_v62 = vld [vmem:[#allocation2 + $0x20] sm:$0xff]   ;;  %s3183_s30 = scalar_lea.vmem %s2202_s0, 256  ;;  %p3188_p1 = scmp.lt.s32.totalorder %s2202_s0, %s2202_s0 }
  0x82   :  { %v3376_v14 = vpack.i.bf16 %v2314_v10, %v2313_v9  ;;  %v3380_v18 = vpack.i.bf16 %v2322_v16, %v2321_v15  ;;  %v2337_v23 = vunpack.c.l.bf16 %v2435_v21  ;;  %v2338_v24 = vunpack.c.h.bf16 %v2435_v21  ;;  %v2441_v30 = vld [vmem:[#allocation2 + $0x78] sm:$0xff]   ;;  %v2450_v36 = vld [vmem:[#allocation5 + $0x48] sm:$0xff]   ;;  %v2432_v3 = vld [vmem:[#allocation2 + $0x30] sm:$0xff]   ;;  %p3184_p0 = scmp.ne.s32.totalorder %s2202_s0, %s3183_s30  ;;  %p3189_p2 = scmp.lt.s32.totalorder %s3183_s30, %s3183_s30 }
  0x83   :  { %2525 = vperm.xlu1 %2523, %v3370_v12   ;;  %2566 = vperm.xlu0 %2564, %v3372_v13   ;;  %v3384_v22 = vpack.i.bf16 %v2330_v20, %v2329_v19  ;;  %v2345_v27 = vunpack.c.l.bf16 %v2437_v25  ;;  %v2346_v28 = vunpack.c.h.bf16 %v2437_v25  ;;  %v2353_v31 = vunpack.c.l.bf16 %v2439_v29  ;;  %v2452_v42 = vld [vmem:[#allocation5 + $0x58] sm:$0xff]   ;;  %v2427_v45 = vld [vmem:[#allocation2 + $0x8] sm:$0xff]   ;;  %v2434_v7 = vld [vmem:[#allocation2 + $0x40] sm:$0xff]  }
  0x84   :  { %v3388_v26 = vpack.i.bf16 %v2338_v24, %v2337_v23  ;;  %v2354_v32 = vunpack.c.h.bf16 %v2439_v29  ;;  %v2361_v34 = vunpack.c.l.bf16 %v2441_v30  ;;  %v2362_v35 = vunpack.c.h.bf16 %v2441_v30  ;;  %v2444_v49 = vld [vmem:[#allocation5 + $0x18] sm:$0xff]   ;;  %v2436_v11 = vld [vmem:[#allocation2 + $0x50] sm:$0xff]   ;;  %v2438_v20 = vld [vmem:[#allocation2 + $0x60] sm:$0xff]   ;;  %p3190_p3 = por %p3189_p2, %p3188_p1 }
  0x85   :  { %v3392_v33 = vpack.i.bf16 %v2346_v28, %v2345_v27  ;;  %v2401_v40 = vunpack.c.l.bf16 %v2450_v36  ;;  %v2402_v41 = vunpack.c.h.bf16 %v2450_v36  ;;  %v2397_v43 = vunpack.c.l.bf16 %v2449_v38  ;;  %v2440_v25 = vld [vmem:[#allocation2 + $0x70] sm:$0xff]   ;;  %v2454_v30 = vld [vmem:[#allocation5 + $0x68] sm:$0xff]  }
  0x86   :  { %v3394_v37 = vpack.i.bf16 %v2354_v32, %v2353_v31  ;;  %v3396_v39 = vpack.i.bf16 %v2362_v35, %v2361_v34  ;;  %v2398_v44 = vunpack.c.h.bf16 %v2449_v38  ;;  %v2409_v47 = vunpack.c.l.bf16 %v2452_v42  ;;  %v2455_v36 = vld [vmem:[#allocation5 + $0x70] sm:$0xff]   ;;  %p3191_p4 = pnand %p3190_p3, %p3184_p0 }
  0x87   :  { %2530 = vperm.xlu1 %2523, %v3376_v14   ;;  %2582 = vperm.xlu0 %2564, %v3376_v14   ;;  %v3400_v46 = vpack.i.bf16 %v2402_v41, %v2401_v40  ;;  %v2410_v48 = vunpack.c.h.bf16 %v2452_v42  ;;  %v2305_v52 = vunpack.c.l.bf16 %v2427_v45  ;;  %v2306_v53 = vunpack.c.h.bf16 %v2427_v45  ;;  %v2451_v45 = vld [vmem:[#allocation5 + $0x50] sm:$0xff]  }
  0x88   :  { %v3404_v51 = vpack.i.bf16 %v2398_v44, %v2397_v43  ;;  %v2377_v55 = vunpack.c.l.bf16 %v2444_v49  ;;  %v2378_v56 = vunpack.c.h.bf16 %v2444_v49  ;;  %v2381_v57 = vunpack.c.l.bf16 %v2445_v50 }
  0x89   :  { %v3406_v54 = vpack.i.bf16 %v2410_v48, %v2409_v47  ;;  %v2382_v58 = vunpack.c.h.bf16 %v2445_v50  ;;  %v3410_v59 = vpack.i.bf16 %v2306_v53, %v2305_v52  ;;  %v2317_v63 = vunpack.c.l.bf16 %v2430_v62 }
  0x8a   :  { %v3412_v60 = vpack.i.bf16 %v2378_v56, %v2377_v55  ;;  %v2318_v2 = vunpack.c.h.bf16 %v2430_v62  ;;  %v2325_v5 = vunpack.c.l.bf16 %v2432_v3  ;;  %v2326_v6 = vunpack.c.h.bf16 %v2432_v3 }
  0x8b   :  { %2535 = vperm.xlu1 %2523, %v3380_v18   ;;  %2592 = vperm.xlu0 %2564, %v3380_v18   ;;  %v3414_v61 = vpack.i.bf16 %v2382_v58, %v2381_v57  ;;  %v2333_v9 = vunpack.c.l.bf16 %v2434_v7  ;;  %v2334_v10 = vunpack.c.h.bf16 %v2434_v7  ;;  %v4265_v15 = vmov 2  }
  0x8c   :  { %v3421_v4 = vpack.i.bf16 %v2318_v2, %v2317_v63  ;;  %v3425_v8 = vpack.i.bf16 %v2326_v6, %v2325_v5  ;;  %v2341_v17 = vunpack.c.l.bf16 %v2436_v11  ;;  %v2342_v19 = vunpack.c.h.bf16 %v2436_v11  ;;  %v3483_v63 = vld [vmem:[#allocation7] sm:$0x7] }
  0x8d   :  { %v2606_v16 = vpack.i.bf16 %v2334_v10, %v2333_v9  ;;  %v2349_v23 = vunpack.c.l.bf16 %v2438_v20  ;;  %v2350_v24 = vunpack.c.h.bf16 %v2438_v20  ;;  %v2357_v28 = vunpack.c.l.bf16 %v2440_v25  ;;  %v2448_v10 = vld [vmem:[#allocation5 + $0x38] sm:$0xff]  }
  0x8e   :  { %v2616_v21 = vpack.i.bf16 %v2342_v19, %v2341_v17  ;;  %v2358_v29 = vunpack.c.h.bf16 %v2440_v25  ;;  %v2417_v32 = vunpack.c.l.bf16 %v2454_v30  ;;  %v2418_v34 = vunpack.c.h.bf16 %v2454_v30 }
  0x8f   :  { %2540 = vperm.xlu1 %2523, %v3384_v22   ;;  %2602 = vperm.xlu0 %2564, %v3384_v22   ;;  %v2626_v27 = vpack.i.bf16 %v2350_v24, %v2349_v23  ;;  %v2421_v38 = vunpack.c.l.bf16 %v2455_v36  ;;  %v2422_v40 = vunpack.c.h.bf16 %v2455_v36  ;;  %v340_v47 = vlaneseq }
  0x90   :  { %v2636_v31 = vpack.i.bf16 %v2358_v29, %v2357_v28  ;;  %v3432_v35 = vpack.i.bf16 %v2418_v34, %v2417_v32  ;;  %v2405_v50 = vunpack.c.l.bf16 %v2451_v45  ;;  %v2406_v52 = vunpack.c.h.bf16 %v2451_v45 }
  0x91   :  { %v3443_v41 = vpack.i.bf16 %v2422_v40, %v2421_v38  ;;  %v3470_v53 = vshrl.u32 %v340_v47, 7  ;;  %v2393_v20 = vunpack.c.l.bf16 %v2448_v10  ;;  %vm1555_vm0 = vcmask 130048  }
  0x92   :  { %v3477_v57 = vpack.i.bf16 %v2406_v52, %v2405_v50  ;;  %vm2149_vm1 = vcmask 1041409   ;;  %vm2151_vm2 = vcmask 1042434   ;;  %vm2153_vm3 = vcmask 1043459  }
  0x93   :  { %2545 = vperm.xlu1 %2523, %v3388_v26   ;;  %2612 = vperm.xlu0 %2564, %v3388_v26   ;;  %v4267_v58 = vsub.s32 1, %v3470_v53  ;;  %vm2155_vm4 = vcmask 1044484   ;;  %vm2157_vm5 = vcmask 1045509   ;;  %vm2159_vm6 = vcmask 1046534  }
  0x94   :  { %vm2161_vm7 = vcmask 1047559  }
  0x97   :  { %2550 = vperm.xlu1 %2523, %v3392_v33   ;;  %2622 = vperm.xlu0 %2564, %v3392_v33  }
  0x9b   :  { %2555 = vperm.xlu1 %2523, %v3394_v37   ;;  %2632 = vperm.xlu0 %2564, %v3394_v37  }
  0x9f   :  { %2560 = vperm.xlu1 %2523, %v3396_v39   ;;  %2642 = vperm.xlu0 %2564, %v3396_v39  }
  0xa3   :  { %2570 = vset.pattern.permute.xlu1 %v4263_v0  ;;  %2715 = vperm.xlu0 %2564, %v3404_v51  }
  0xa4   :  { %2572 = vperm.xlu1 %2570, %v3410_v59  }
  0xa7   :  { %2732 = vperm.xlu0 %2564, %v3400_v46  }
  0xa8   :  { %2577 = vperm.xlu1 %2570, %v3370_v12  }
  0xab   :  { %2769 = vperm.xlu0 %2564, %v3406_v54  }
  0xac   :  { %2587 = vperm.xlu1 %2570, %v3421_v4  }
  0xaf   :  { %2773 = vset.pattern.permute.xlu0 %v4265_v15 }
  0xb0   :  { %2597 = vperm.xlu1 %2570, %v3425_v8   ;;  %2775 = vperm.xlu0 %2773, %v3410_v59  }
  0xb4   :  { %2607 = vperm.xlu1 %2570, %v2606_v16   ;;  %2780 = vperm.xlu0 %2773, %v3421_v4  }
  0xb8   :  { %2617 = vperm.xlu1 %2570, %v2616_v21   ;;  %2785 = vperm.xlu0 %2773, %v3425_v8  }
  0xbc   :  { %2627 = vperm.xlu1 %2570, %v2626_v27   ;;  %2790 = vperm.xlu0 %2773, %v2606_v16  }
  0xc0   :  { %2637 = vperm.xlu1 %2570, %v2636_v31   ;;  %2795 = vperm.xlu0 %2773, %v2616_v21  }
  0xc4   :  { %2646 = vset.pattern.permute.xlu1 %v4265_v15  ;;  %2800 = vperm.xlu0 %2773, %v2626_v27  }
  0xc5   :  { %2648 = vperm.xlu1 %2646, %v3372_v13  }
  0xc8   :  { %2805 = vperm.xlu0 %2773, %v2636_v31  }
  0xc9   :  { %2653 = vperm.xlu1 %2646, %v3370_v12   ;;  %v2442_v12 = vld [vmem:[#allocation5 + $0x8] sm:$0xff]  }
  0xcc   :  { %2810 = vperm.xlu0 %2773, %v3404_v51  }
  0xcd   :  { %2658 = vperm.xlu1 %2646, %v3376_v14   ;;  %v2369_v14 = vunpack.c.l.bf16 %v2442_v12 }
  0xd0   :  { %2826 = vperm.xlu0 %2773, %v3412_v60  }
  0xd1   :  { %2663 = vperm.xlu1 %2646, %v3380_v18   ;;  %v2370_v18 = vunpack.c.h.bf16 %v2442_v12 }
  0xd3   :  { %v2693_v42 = vpack.i.bf16 %v2370_v18, %v2369_v14 }
  0xd4   :  { %2865 = vperm.xlu0 %2773, %v3414_v61  }
  0xd5   :  { %2668 = vperm.xlu1 %2646, %v3384_v22   ;;  %v2443_v22 = vld [vmem:[#allocation5 + $0x10] sm:$0xff]  }
  0xd6   :  { %v2374_v43 = vunpack.c.h.bf16 %v2443_v22 }
  0xd8   :  { %2881 = vperm.xlu0 %2773, %v3432_v35  }
  0xd9   :  { %2673 = vperm.xlu1 %2646, %v3388_v26   ;;  %v2373_v26 = vunpack.c.l.bf16 %v2443_v22 }
  0xdc   :  { %2885 = vset.pattern.permute.xlu0 %v4268_v1 }
  0xdd   :  { %2678 = vperm.xlu1 %2646, %v3392_v33   ;;  %2887 = vperm.xlu0 %2885, %v3372_v13   ;;  %v3456_v13 = vpack.i.bf16 %v2374_v43, %v2373_v26  ;;  %v2364_v33 = vld [vmem:[#allocation5] sm:$0xff]  }
  0xde   :  { %v2366_v44 = vunpack.c.h.bf16 %v2364_v33 }
  0xe1   :  { %2683 = vperm.xlu1 %2646, %v3394_v37   ;;  %2892 = vperm.xlu0 %2885, %v3410_v59   ;;  %v2365_v37 = vunpack.c.l.bf16 %v2364_v33 }
  0xe5   :  { %2688 = vperm.xlu1 %2646, %v3396_v39   ;;  %2897 = vperm.xlu0 %2885, %v3421_v4   ;;  %v2709_v39 = vpack.i.bf16 %v2366_v44, %v2365_v37 }
  0xe9   :  { %2692 = vset.pattern.permute.xlu1 %v4268_v1  ;;  %2902 = vperm.xlu0 %2885, %v3425_v8  }
  0xea   :  { %2694 = vperm.xlu1 %2692, %v2693_v42  }
  0xed   :  { %2907 = vperm.xlu0 %2885, %v2606_v16  }
  0xee   :  { %2699 = vperm.xlu1 %2692, %v3456_v13  }
  0xf1   :  { %2912 = vperm.xlu0 %2885, %v2616_v21   ;;  %v3028_v21 = vld [vmem:[#allocation11] sm:$0xff]  }
  0xf2   :  { %2704 = vperm.xlu1 %2692, %v3414_v61   ;;  %2474 = vmatprep.subr.bf16.mxu0 %v3028_v21 }
  0xf3   :  { %2508 = vmatprep.subr.bf16.mxu1 %v3028_v21  ;;  %2475 = vmatpush3.bf16.msra.mxu0 %v3028_v21 }
  0xf4   :  { %2509 = vmatpush3.bf16.msra.mxu1 %v3028_v21 }
  0xf5   :  { %2917 = vperm.xlu0 %2885, %v2626_v27   ;;  %v4262_v27 = vsub.s32 0, %v3470_v53 }
  0xf6   :  { %2708 = vset.pattern.permute.xlu1 %v4263_v0 }
  0xf7   :  { %2710 = vperm.xlu1 %2708, %v2709_v39   ;;  %v3526_v30 = vrot.slane %v3483_v63, %v4262_v27 }
  0xf9   :  { %2922 = vperm.xlu0 %2885, %v2636_v31  }
  0xfb   :  { %2719 = vset.pattern.permute.xlu1 %v4268_v1 }
  0xfc   :  { %2721 = vperm.xlu1 %2719, %v3400_v46  }
  0xfd   :  { %2927 = vperm.xlu0 %2885, %v2709_v39  }
 0x100   :  { %2725 = vset.pattern.permute.xlu1 %v4263_v0 }
 0x101   :  { %2727 = vperm.xlu1 %2725, %v2693_v42   ;;  %2932 = vperm.xlu0 %2885, %v3412_v60  }
 0x102   :  { %v3465_v48 = vpop.permute.xlu1 %2525  ;;  %v3467_v49 = vpop.permute.xlu0 %2566 }
 0x105   :  { %2736 = vset.pattern.permute.xlu1 %v4265_v15  ;;  %2937 = vperm.xlu0 %2885, %v3404_v51   ;;  %v3488_v51 = vrot.slane %v3483_v63, %v4267_v58 }
 0x106   :  { %v3473_v55 = vpop.permute.xlu1 %2530  ;;  %2738 = vperm.xlu1 %2736, %v2709_v39   ;;  %v3475_v56 = vpop.permute.xlu0 %2582 }
 0x109   :  { %2942 = vperm.xlu0 %2885, %v3477_v57  }
 0x10a   :  { %v3481_v59 = vpop.permute.xlu1 %2535  ;;  %2743 = vperm.xlu1 %2736, %v2693_v42   ;;  %v2593_v62 = vpop.permute.xlu0 %2592 }
 0x10b   :  { %v2595_v2 = vunpack.i.h.bf16 %v2593_v62  ;;  %v2594_v3 = vunpack.i.l.bf16 %v2593_v62 }
 0x10d   :  { %v3491_v4 = vmul.f32 %v2595_v2, %v3488_v51  ;;  %v3494_v5 = vmul.f32 %v2594_v3, %v3488_v51  ;;  %2947 = vperm.xlu0 %2885, %v3406_v54  }
 0x10e   :  { %v3497_v6 = vpop.permute.xlu1 %2540  ;;  %2748 = vperm.xlu1 %2736, %v3400_v46   ;;  %v2603_v7 = vpop.permute.xlu0 %2602  ;;  %v2394_v46 = vunpack.c.h.bf16 %v2448_v10 }
 0x10f   :  { %v2605_v8 = vunpack.i.h.bf16 %v2603_v7  ;;  %v2604_v9 = vunpack.i.l.bf16 %v2603_v7 }
 0x110   :  { %v3518_v25 = vpack.i.bf16 %v2394_v46, %v2393_v20 }
 0x111   :  { %v3501_v11 = vmul.f32 %v2605_v8, %v3488_v51  ;;  %v3504_v16 = vmul.f32 %v2604_v9, %v3488_v51  ;;  %2952 = vperm.xlu0 %2885, %v3432_v35  }
 0x112   :  { %v3507_v17 = vpop.permute.xlu1 %2545  ;;  %2752 = vset.pattern.permute.xlu1 %v4263_v0  ;;  %v3510_v19 = vpop.permute.xlu0 %2612 }
 0x113   :  { %2754 = vperm.xlu1 %2752, %v3456_v13  }
 0x115   :  { %2963 = vperm.xlu0 %2885, %v3443_v41  }
 0x116   :  { %v3514_v23 = vpop.permute.xlu1 %2550  ;;  %v3516_v24 = vpop.permute.xlu0 %2622 }
 0x117   :  { %2759 = vperm.xlu1 %2752, %v3477_v57  }
 0x119   :  { %2979 = vperm.xlu0 %2885, %v3518_v25  }
 0x11a   :  { %v2556_v28 = vpop.permute.xlu1 %2555  ;;  %v2633_v29 = vpop.permute.xlu0 %2632 }
 0x11b   :  { %v2558_v31 = vunpack.i.h.bf16 %v2556_v28  ;;  %v2557_v32 = vunpack.i.l.bf16 %v2556_v28  ;;  %2764 = vperm.xlu1 %2752, %v3412_v60   ;;  %v2635_v34 = vunpack.i.h.bf16 %v2633_v29  ;;  %v2634_v36 = vunpack.i.l.bf16 %v2633_v29 }
 0x11d   :  { %v371_v38 = vmul.f32 %v2558_v31, %v3526_v30  ;;  %v370_v40 = vmul.f32 %v2557_v32, %v3526_v30  ;;  %v535_v12 = vmul.f32 %v2635_v34, %v3488_v51  ;;  %v534_v14 = vmul.f32 %v2634_v36, %v3488_v51  ;;  %2983 = vset.pattern.permute.xlu0 %v4263_v0 }
 0x11e   :  { %v2561_v18 = vpop.permute.xlu1 %2560  ;;  %v2643_v22 = vpop.permute.xlu0 %2642  ;;  %2985 = vperm.xlu0 %2983, %v3414_v61   ;;  %v2453_v61 = vld [vmem:[#allocation5 + $0x60] sm:$0xff]  }
 0x11f   :  { %v2563_v42 = vunpack.i.h.bf16 %v2561_v18  ;;  %v2562_v26 = vunpack.i.l.bf16 %v2561_v18  ;;  %v2645_v43 = vunpack.i.h.bf16 %v2643_v22  ;;  %v2644_v60 = vunpack.i.l.bf16 %v2643_v22  ;;  %2814 = vset.pattern.permute.xlu1 %v4265_v15 }
 0x120   :  { %v3536_v33 = vadd.f32 %v535_v12, %v371_v38  ;;  %v3538_v37 = vadd.f32 %v534_v14, %v370_v40  ;;  %2816 = vperm.xlu1 %2814, %v3456_v13   ;;  %v2413_v13 = vunpack.c.l.bf16 %v2453_v61  ;;  %v2414_v3 = vunpack.c.h.bf16 %v2453_v61 }
 0x121   :  { %v375_v44 = vmul.f32 %v2563_v42, %v3526_v30  ;;  %v374_v39 = vmul.f32 %v2562_v26, %v3526_v30  ;;  %v539_v45 = vmul.f32 %v2645_v43, %v3488_v51  ;;  %v538_v47 = vmul.f32 %v2644_v60, %v3488_v51 }
 0x122   :  { %v3545_v50 = vpop.permute.xlu0 %2715  ;;  %2996 = vperm.xlu0 %2983, %v3518_v25   ;;  %v2836_v9 = vpack.i.bf16 %v2414_v3, %v2413_v13  ;;  %v4266_v12 = vsub.s32 2, %v3470_v53 }
 0x123   :  { %v3547_v52 = vadd.f32 %v539_v45, %v375_v44  ;;  %v3549_v62 = vadd.f32 %v538_v47, %v374_v39  ;;  %v3552_v2 = vpop.permute.xlu1 %2572 }
 0x124   :  { %2821 = vperm.xlu1 %2814, %v3477_v57   ;;  %v2446_v57 = vld [vmem:[#allocation5 + $0x28] sm:$0xff]   ;;  %v3587_v22 = vrot.slane %v3483_v63, %v4266_v12  ;;  %v2447_v63 = vld [vmem:[#allocation5 + $0x30] sm:$0xff]  }
 0x125   :  { %v2385_v28 = vunpack.c.l.bf16 %v2446_v57  ;;  %v2386_v29 = vunpack.c.h.bf16 %v2446_v57 }
 0x126   :  { %v3555_v7 = vpop.permute.xlu0 %2732  ;;  %3012 = vset.pattern.permute.xlu0 %v4265_v15 }
 0x127   :  { %v3557_v8 = vpop.permute.xlu1 %2577  ;;  %3014 = vperm.xlu0 %3012, %v3443_v41   ;;  %v2848_v40 = vpack.i.bf16 %v2386_v29, %v2385_v28  ;;  %v2390_v28 = vunpack.c.h.bf16 %v2447_v63  ;;  %v2528_v29 = vunpack.i.h.bf16 %v3465_v48 }
 0x128   :  { %2831 = vperm.xlu1 %2814, %v3406_v54  }
 0x12a   :  { %v3562_v10 = vpop.permute.xlu0 %2769 }
 0x12b   :  { %4272 = vst [vmem:[#allocation20_spill] sm:$0xff] %v3562_v10  ;;  %v3564_v20 = vpop.permute.xlu1 %2587  ;;  %v3644_v10 = vld [vmem:[#allocation8] sm:$0x7] }
 0x12c   :  { %2835 = vset.pattern.permute.xlu1 %v4268_v1 }
 0x12d   :  { %2837 = vperm.xlu1 %2835, %v2836_v9  }
 0x12f   :  { %v2598_v46 = vpop.permute.xlu1 %2597  ;;  %v3567_v21 = vpop.permute.xlu0 %2775 }
 0x130   :  { %v2600_v31 = vunpack.i.h.bf16 %v2598_v46  ;;  %v2599_v32 = vunpack.i.l.bf16 %v2598_v46  ;;  %v2389_v46 = vunpack.c.l.bf16 %v2447_v63  ;;  %v2585_v63 = vunpack.i.h.bf16 %v3475_v56 }
 0x131   :  { %2841 = vset.pattern.permute.xlu1 %v4263_v0 }
 0x132   :  { %v3571_v54 = vmul.f32 %v2600_v31, %v3488_v51  ;;  %v3574_v34 = vmul.f32 %v2599_v32, %v3488_v51  ;;  %2843 = vperm.xlu1 %2841, %v2836_v9   ;;  %v2527_v31 = vunpack.i.l.bf16 %v3465_v48  ;;  %v2580_v32 = vunpack.i.h.bf16 %v3557_v8 }
 0x133   :  { %v3576_v36 = vpop.permute.xlu1 %2607  ;;  %v3578_v38 = vpop.permute.xlu0 %2780  ;;  %v3622_v48 = vpack.i.bf16 %v2390_v28, %v2389_v46 }
 0x134   :  { %v513_v27 = vmul.f32 %v2580_v32, %v3488_v51  ;;  %v2537_v32 = vunpack.i.l.bf16 %v3481_v59 }
 0x136   :  { %2847 = vset.pattern.permute.xlu1 %v4268_v1 }
 0x137   :  { %v3582_v14 = vpop.permute.xlu1 %2617  ;;  %2849 = vperm.xlu1 %2847, %v2848_v40   ;;  %v2786_v18 = vpop.permute.xlu0 %2785 }
 0x138   :  { %v2788_v42 = vunpack.i.h.bf16 %v2786_v18  ;;  %v2787_v26 = vunpack.i.l.bf16 %v2786_v18  ;;  %v2579_v18 = vunpack.i.l.bf16 %v3557_v8  ;;  %v348_v8 = vmul.f32 %v2527_v31, %v3526_v30 }
 0x139   :  { %v2538_v31 = vunpack.i.h.bf16 %v3481_v59 }
 0x13a   :  { %v3590_v43 = vmul.f32 %v2788_v42, %v3587_v22  ;;  %v3593_v60 = vmul.f32 %v2787_v26, %v3587_v22  ;;  %v2532_v26 = vunpack.i.l.bf16 %v3473_v55 }
 0x13b   :  { %v3595_v44 = vpop.permute.xlu1 %2627  ;;  %2853 = vset.pattern.permute.xlu1 %v4263_v0  ;;  %v3598_v39 = vpop.permute.xlu0 %2790  ;;  %v512_v0 = vmul.f32 %v2579_v18, %v3488_v51 }
 0x13c   :  { %2855 = vperm.xlu1 %2853, %v2848_v40   ;;  %v350_v12 = vmul.f32 %v2532_v26, %v3526_v30 }
 0x13f   :  { %v2638_v45 = vpop.permute.xlu1 %2637  ;;  %v3600_v47 = vpop.permute.xlu0 %2795 }
 0x140   :  { %v2640_v61 = vunpack.i.h.bf16 %v2638_v45  ;;  %v2639_v13 = vunpack.i.l.bf16 %v2638_v45  ;;  %2860 = vperm.xlu1 %2853, %v3432_v35   ;;  %v2533_v35 = vunpack.i.h.bf16 %v3473_v55 }
 0x142   :  { %v3604_v3 = vmul.f32 %v2640_v61, %v3488_v51  ;;  %v3607_v57 = vmul.f32 %v2639_v13, %v3488_v51  ;;  %v2584_v61 = vunpack.i.l.bf16 %v3475_v56  ;;  %v349_v13 = vmul.f32 %v2528_v29, %v3526_v30  ;;  %v2456_v29 = vld [vmem:[#allocation5 + $0x78] sm:$0xff]  }
 0x143   :  { %v3613_v42 = vpop.permute.xlu0 %2800  ;;  %v515_v56 = vmul.f32 %v2585_v63, %v3488_v51 }
 0x144   :  { %4273 = vst [vmem:[#allocation21_spill] sm:$0xff] %v3604_v3  ;;  %4274 = vst [vmem:[#allocation22_spill] sm:$0xff] %v3607_v57  ;;  %2869 = vset.pattern.permute.xlu1 %v4265_v15  ;;  %v3618_v45 = vpop.permute.xlu1 %2648  ;;  %v351_v15 = vmul.f32 %v2533_v35, %v3526_v30  ;;  %v545_v26 = vadd.f32 %v513_v27, %v349_v13  ;;  %v355_v13 = vmul.f32 %v2538_v31, %v3526_v30 }
 0x145   :  { %4275 = vst [vmem:[#allocation23_spill] sm:$0xff] %v3618_v45  ;;  %2871 = vperm.xlu1 %2869, %v2836_v9   ;;  %v514_v9 = vmul.f32 %v2584_v61, %v3488_v51  ;;  %v2426_v45 = vunpack.c.h.bf16 %v2456_v29 }
 0x147   :  { %v2806_v55 = vpop.permute.xlu0 %2805  ;;  %v546_v27 = vadd.f32 %v514_v9, %v350_v12  ;;  %v4282_v12 = vsub.s32 2, %v3470_v53 }
 0x148   :  { %v2654_v58 = vpop.permute.xlu1 %2653  ;;  %v2808_v1 = vunpack.i.h.bf16 %v2806_v55  ;;  %v2807_v57 = vunpack.i.l.bf16 %v2806_v55  ;;  %v544_v55 = vadd.f32 %v512_v0, %v348_v8  ;;  %v547_v0 = vadd.f32 %v515_v56, %v351_v15 }
 0x149   :  { %v2656_v46 = vunpack.i.h.bf16 %v2654_v58  ;;  %v2655_v28 = vunpack.i.l.bf16 %v2654_v58  ;;  %2876 = vperm.xlu1 %2869, %v2848_v40   ;;  %v2425_v40 = vunpack.c.l.bf16 %v2456_v29  ;;  %v354_v8 = vmul.f32 %v2537_v32, %v3526_v30 }
 0x14a   :  { %v3635_v18 = vmul.f32 %v2808_v1, %v3587_v22  ;;  %v3638_v35 = vmul.f32 %v2807_v57, %v3587_v22  ;;  %v3668_v56 = vrot.slane %v3644_v10, %v4282_v12 }
 0x14b   :  { %v709_v63 = vmul.f32 %v2656_v46, %v3587_v22  ;;  %v708_v61 = vmul.f32 %v2655_v28, %v3587_v22  ;;  %v3642_v3 = vpop.permute.xlu0 %2810  ;;  %v2543_v46 = vunpack.i.h.bf16 %v3497_v6  ;;  %v2542_v28 = vunpack.i.l.bf16 %v3497_v6 }
 0x14c   :  { %4276 = vst [vmem:[#allocation24_spill] sm:$0xff] %v3635_v18  ;;  %4277 = vst [vmem:[#allocation25_spill] sm:$0xff] %v3638_v35  ;;  %v2659_v58 = vpop.permute.xlu1 %2658  ;;  %v4280_v35 = vmov 0   ;;  %v3670_v31 = vpack.i.bf16 %v2426_v45, %v2425_v40 }
 0x14d   :  { %v3646_v59 = vadd.f32 %v709_v63, %v545_v26  ;;  %v3648_v1 = vadd.f32 %v708_v61, %v544_v55  ;;  %v2661_v18 = vunpack.i.h.bf16 %v2659_v58  ;;  %v2660_v57 = vunpack.i.l.bf16 %v2659_v58  ;;  %2956 = vset.pattern.permute.xlu1 %v4280_v35 }
 0x14e   :  { %2958 = vperm.xlu1 %2956, %v3622_v48   ;;  %v4281_v63 = vsub.s32 1, %v3470_v53  ;;  %v2569_v58 = vunpack.i.h.bf16 %v3467_v49  ;;  %v359_v12 = vmul.f32 %v2543_v46, %v3526_v30  ;;  %v358_v45 = vmul.f32 %v2542_v28, %v3526_v30 }
 0x14f   :  { %4278 = vst [vmem:[#allocation26_spill] sm:$0xff] %v3646_v59  ;;  %4279 = vst [vmem:[#allocation27_spill] sm:$0xff] %v3648_v1  ;;  %v711_v29 = vmul.f32 %v2661_v18, %v3587_v22  ;;  %v710_v26 = vmul.f32 %v2660_v57, %v3587_v22  ;;  %v3658_v55 = vpop.permute.xlu0 %2826  ;;  %v2568_v57 = vunpack.i.l.bf16 %v3467_v49  ;;  %v550_v59 = vadd.f32 %v3494_v5, %v354_v8 }
 0x150   :  { %v3663_v15 = vrot.slane %v3644_v10, %v4281_v63  ;;  %v2664_v9 = vpop.permute.xlu1 %2663  ;;  %v551_v63 = vadd.f32 %v3491_v4, %v355_v13  ;;  %v4285_v1 = vmov 1   ;;  %v2548_v49 = vunpack.i.h.bf16 %v3507_v17 }
 0x151   :  { %v3672_v6 = vadd.f32 %v710_v26, %v546_v27  ;;  %v3674_v32 = vadd.f32 %v711_v29, %v547_v0  ;;  %v2666_v18 = vunpack.i.h.bf16 %v2664_v9  ;;  %v2665_v61 = vunpack.i.l.bf16 %v2664_v9 }
 0x152   :  { %2967 = vset.pattern.permute.xlu1 %v4285_v1  ;;  %v2547_v4 = vunpack.i.l.bf16 %v3507_v17  ;;  %v2615_v5 = vunpack.i.h.bf16 %v3510_v19  ;;  %v2614_v13 = vunpack.i.l.bf16 %v3510_v19  ;;  %v2553_v9 = vunpack.i.h.bf16 %v3514_v23 }
 0x153   :  { %4283 = vst [vmem:[#allocation28_spill] sm:$0xff] %v3672_v6  ;;  %4284 = vst [vmem:[#allocation29_spill] sm:$0xff] %v3674_v32  ;;  %v715_v40 = vmul.f32 %v2666_v18, %v3587_v22  ;;  %v714_v0 = vmul.f32 %v2665_v61, %v3587_v22  ;;  %2969 = vperm.xlu1 %2967, %v3622_v48   ;;  %v3686_v27 = vpop.permute.xlu0 %2865  ;;  %v2552_v18 = vunpack.i.l.bf16 %v3514_v23  ;;  %v2625_v61 = vunpack.i.h.bf16 %v3516_v24 }
 0x154   :  { %v2669_v8 = vpop.permute.xlu1 %2668  ;;  %v2624_v6 = vunpack.i.l.bf16 %v3516_v24  ;;  %v555_v17 = vadd.f32 %v3501_v11, %v359_v12  ;;  %v554_v32 = vadd.f32 %v3504_v16, %v358_v45  ;;  %v362_v23 = vmul.f32 %v2547_v4, %v3526_v30 }
 0x155   :  { %v3692_v46 = vadd.f32 %v714_v0, %v550_v59  ;;  %v3694_v28 = vadd.f32 %v715_v40, %v551_v63  ;;  %v2671_v29 = vunpack.i.h.bf16 %v2669_v8  ;;  %v2670_v26 = vunpack.i.l.bf16 %v2669_v8 }
 0x156   :  { %v363_v40 = vmul.f32 %v2548_v49, %v3526_v30  ;;  %v527_v24 = vmul.f32 %v2615_v5, %v3488_v51  ;;  %v526_v11 = vmul.f32 %v2614_v13, %v3488_v51  ;;  %v367_v45 = vmul.f32 %v2553_v9, %v3526_v30 }
 0x157   :  { %4286 = vst [vmem:[#allocation30_spill] sm:$0xff] %v3692_v46  ;;  %4287 = vst [vmem:[#allocation31_spill] sm:$0xff] %v3694_v28  ;;  %v719_v19 = vmul.f32 %v2671_v29, %v3587_v22  ;;  %v718_v59 = vmul.f32 %v2670_v26, %v3587_v22  ;;  %2974 = vperm.xlu1 %2967, %v3443_v41   ;;  %v3705_v63 = vpop.permute.xlu0 %2881  ;;  %v366_v41 = vmul.f32 %v2552_v18, %v3526_v30 }
 0x158   :  { %v3709_v0 = vpop.permute.xlu1 %2673  ;;  %v531_v8 = vmul.f32 %v2625_v61, %v3488_v51  ;;  %v530_v49 = vmul.f32 %v2624_v6, %v3488_v51  ;;  %v3722_v4 = vmul.f32 %v2569_v58, %v3488_v51  ;;  %v3725_v29 = vmul.f32 %v2568_v57, %v3488_v51 }
 0x159   :  { %v3713_v12 = vadd.f32 %v718_v59, %v554_v32  ;;  %v3715_v16 = vadd.f32 %v719_v19, %v555_v17  ;;  %v4290_v32 = vsub.s32 0, %v3470_v53  ;;  %v2575_v13 = vunpack.i.h.bf16 %v3552_v2 }
 0x15a   :  { %v2574_v26 = vunpack.i.l.bf16 %v3552_v2  ;;  %v2590_v9 = vunpack.i.h.bf16 %v3564_v20  ;;  %v2589_v6 = vunpack.i.l.bf16 %v3564_v20  ;;  %v3740_v18 = vadd.f32 %v527_v24, %v363_v40 }
 0x15b   :  { %4288 = vst [vmem:[#allocation32_spill] sm:$0xff] %v3713_v12  ;;  %4289 = vst [vmem:[#allocation33_spill] sm:$0xff] %v3715_v16  ;;  %2989 = vset.pattern.permute.xlu1 %v4280_v35  ;;  %v3731_v5 = vrot.slane %v3644_v10, %v4290_v32  ;;  %v3742_v35 = vadd.f32 %v526_v11, %v362_v23  ;;  %v563_v61 = vadd.f32 %v531_v8, %v367_v45  ;;  %v4291_v59 = vmov 2  }
 0x15c   :  { %2991 = vperm.xlu1 %2989, %v3670_v31   ;;  %v2679_v58 = vpop.permute.xlu1 %2678  ;;  %v3738_v57 = vpop.permute.xlu0 %2887  ;;  %v562_v17 = vadd.f32 %v530_v49, %v366_v41  ;;  %v2778_v19 = vunpack.i.h.bf16 %v3567_v21  ;;  %v2777_v2 = vunpack.i.l.bf16 %v3567_v21  ;;  %v511_v40 = vmul.f32 %v2575_v13, %v3488_v51 }
 0x15d   :  { %v2681_v53 = vunpack.i.h.bf16 %v2679_v58  ;;  %v2680_v10 = vunpack.i.l.bf16 %v2679_v58  ;;  %v510_v23 = vmul.f32 %v2574_v26, %v3488_v51  ;;  %v517_v24 = vmul.f32 %v2590_v9, %v3488_v51 }
 0x15e   :  { %v516_v11 = vmul.f32 %v2589_v6, %v3488_v51  ;;  %v707_v13 = vmul.f32 %v2778_v19, %v3587_v22  ;;  %v706_v26 = vmul.f32 %v2777_v2, %v3587_v22  ;;  %v2783_v6 = vunpack.i.h.bf16 %v3578_v38 }
 0x15f   :  { %v727_v32 = vmul.f32 %v2681_v53, %v3587_v22  ;;  %v726_v16 = vmul.f32 %v2680_v10, %v3587_v22 }
 0x160   :  { %3000 = vset.pattern.permute.xlu1 %v4285_v1  ;;  %v2684_v45 = vpop.permute.xlu1 %2683  ;;  %v2893_v21 = vpop.permute.xlu0 %2892  ;;  %v2782_v1 = vunpack.i.l.bf16 %v3578_v38 }
 0x161   :  { %v3755_v41 = vadd.f32 %v726_v16, %v562_v17  ;;  %v3757_v8 = vadd.f32 %v727_v32, %v563_v61  ;;  %v2686_v49 = vunpack.i.h.bf16 %v2684_v45  ;;  %v2685_v58 = vunpack.i.l.bf16 %v2684_v45  ;;  %3002 = vperm.xlu1 %3000, %v3670_v31  }
 0x162   :  { %v2895_v53 = vunpack.i.h.bf16 %v2893_v21  ;;  %v2894_v9 = vunpack.i.l.bf16 %v2893_v21  ;;  %v2610_v61 = vunpack.i.h.bf16 %v3576_v36  ;;  %v2609_v17 = vunpack.i.l.bf16 %v3576_v36 }
 0x163   :  { %v731_v10 = vmul.f32 %v2686_v49, %v3587_v22  ;;  %v730_v16 = vmul.f32 %v2685_v58, %v3587_v22 }
 0x164   :  { %v347_v32 = vmul.f32 %v2895_v53, %v3526_v30  ;;  %v346_v19 = vmul.f32 %v2894_v9, %v3526_v30  ;;  %v2689_v45 = vpop.permute.xlu1 %2688  ;;  %v2898_v2 = vpop.permute.xlu0 %2897  ;;  %v713_v53 = vmul.f32 %v2783_v6, %v3587_v22  ;;  %v712_v9 = vmul.f32 %v2782_v1, %v3587_v22 }
 0x165   :  { %v3771_v21 = vadd.f32 %v730_v16, %v3538_v37  ;;  %v3774_v20 = vadd.f32 %v731_v10, %v3536_v33  ;;  %v2691_v38 = vunpack.i.h.bf16 %v2689_v45  ;;  %v2690_v49 = vunpack.i.l.bf16 %v2689_v45  ;;  %3006 = vset.pattern.permute.xlu1 %v4291_v59 }
 0x166   :  { %v543_v58 = vadd.f32 %v511_v40, %v347_v32  ;;  %v542_v12 = vadd.f32 %v510_v23, %v346_v19  ;;  %v2900_v28 = vunpack.i.h.bf16 %v2898_v2  ;;  %v2899_v36 = vunpack.i.l.bf16 %v2898_v2  ;;  %3008 = vperm.xlu1 %3006, %v3622_v48  }
 0x167   :  { %v735_v37 = vmul.f32 %v2691_v38, %v3587_v22  ;;  %v734_v16 = vmul.f32 %v2690_v49, %v3587_v22  ;;  %v2620_v38 = vunpack.i.h.bf16 %v3582_v14  ;;  %v2619_v49 = vunpack.i.l.bf16 %v3582_v14 }
 0x168   :  { %v3782_v33 = vadd.f32 %v706_v26, %v542_v12  ;;  %v3784_v10 = vadd.f32 %v707_v13, %v543_v58  ;;  %v353_v59 = vmul.f32 %v2900_v28, %v3526_v30  ;;  %v352_v40 = vmul.f32 %v2899_v36, %v3526_v30  ;;  %v2903_v23 = vpop.permute.xlu0 %2902 }
 0x169   :  { %v3789_v32 = vadd.f32 %v734_v16, %v3549_v62  ;;  %v3792_v48 = vadd.f32 %v735_v37, %v3547_v52  ;;  %v2905_v6 = vunpack.i.h.bf16 %v2903_v23  ;;  %v2904_v1 = vunpack.i.l.bf16 %v2903_v23  ;;  %v3794_v19 = vpop.permute.xlu1 %2694 }
 0x16a   :  { %v2793_v12 = vunpack.i.h.bf16 %v3598_v39  ;;  %v2792_v13 = vunpack.i.l.bf16 %v3598_v39  ;;  %v549_v26 = vadd.f32 %v517_v24, %v353_v59  ;;  %v548_v45 = vadd.f32 %v516_v11, %v352_v40  ;;  %3019 = vperm.xlu1 %3006, %v3518_v25  }
 0x16b   :  { %4292 = vst [vmem:[#allocation34_spill] sm:$0xff] %v3789_v32  ;;  %4293 = vst [vmem:[#allocation35_spill] sm:$0xff] %v3792_v48  ;;  %v525_v28 = vmul.f32 %v2610_v61, %v3488_v51  ;;  %v524_v62 = vmul.f32 %v2609_v17, %v3488_v51  ;;  %v357_v2 = vmul.f32 %v2905_v6, %v3526_v30  ;;  %v2798_v59 = vunpack.i.h.bf16 %v3600_v47  ;;  %v4305_v32 = vld [vmem:[#allocation24_spill] sm:$0xff] }
 0x16c   :  { %v356_v52 = vmul.f32 %v2904_v1, %v3526_v30  ;;  %v3805_v58 = vadd.f32 %v712_v9, %v548_v45  ;;  %v3807_v36 = vadd.f32 %v713_v53, %v549_v26  ;;  %v2908_v39 = vpop.permute.xlu0 %2907  ;;  %v721_v37 = vmul.f32 %v2793_v12, %v3587_v22 }
 0x16d   :  { %v553_v24 = vadd.f32 %v3571_v54, %v357_v2  ;;  %v2910_v11 = vunpack.i.h.bf16 %v2908_v39  ;;  %v2909_v61 = vunpack.i.l.bf16 %v2908_v39  ;;  %v3811_v17 = vpop.permute.xlu1 %2699  ;;  %v720_v16 = vmul.f32 %v2792_v13, %v3587_v22 }
 0x16e   :  { %v552_v25 = vadd.f32 %v3574_v34, %v356_v52  ;;  %v2797_v14 = vunpack.i.l.bf16 %v3600_v47  ;;  %3024 = vperm.xlu1 %3006, %v3670_v31   ;;  %v2735_v40 = vunpack.i.h.bf16 %v3555_v7  ;;  %v2734_v23 = vunpack.i.l.bf16 %v3555_v7 }
 0x16f   :  { %v3822_v54 = vadd.f32 %v3590_v43, %v553_v24  ;;  %v361_v34 = vmul.f32 %v2910_v11, %v3526_v30  ;;  %v360_v9 = vmul.f32 %v2909_v61, %v3526_v30  ;;  %v529_v6 = vmul.f32 %v2620_v38, %v3488_v51 }
 0x170   :  { %v3819_v53 = vadd.f32 %v3593_v60, %v552_v25  ;;  %v528_v47 = vmul.f32 %v2619_v49, %v3488_v51  ;;  %v2913_v1 = vpop.permute.xlu0 %2912  ;;  %v2630_v43 = vunpack.i.h.bf16 %v3595_v44  ;;  %v2629_v45 = vunpack.i.l.bf16 %v3595_v44 }
 0x171   :  { %4295 = vst [vmem:[#allocation37_spill] sm:$0xff] %v3822_v54  ;;  %v557_v31 = vadd.f32 %v525_v28, %v361_v34  ;;  %v556_v12 = vadd.f32 %v524_v62, %v360_v9  ;;  %v2915_v60 = vunpack.i.h.bf16 %v2913_v1  ;;  %v2914_v13 = vunpack.i.l.bf16 %v2913_v1  ;;  %v3830_v26 = vpop.permute.xlu1 %2704 }
 0x172   :  { %4294 = vst [vmem:[#allocation36_spill] sm:$0xff] %v3819_v53  ;;  %v725_v2 = vmul.f32 %v2798_v59, %v3587_v22  ;;  %v724_v52 = vmul.f32 %v2797_v14, %v3587_v22  ;;  %v4296_v62 = vunpack.i.h.bf16 %v3545_v50  ;;  %v4297_v44 = vunpack.i.l.bf16 %v3545_v50 }
 0x173   :  { %v3836_v7 = vadd.f32 %v720_v16, %v556_v12  ;;  %v3838_v38 = vadd.f32 %v721_v37, %v557_v31  ;;  %v365_v49 = vmul.f32 %v2915_v60, %v3526_v30  ;;  %v364_v28 = vmul.f32 %v2914_v13, %v3526_v30  ;;  %v4298_v60 = vld [vmem:[#allocation20_spill] sm:$0xff] }
 0x174   :  { %v3845_v39 = vmul.f32 %v4296_v62, %v3663_v15  ;;  %v3850_v24 = vmul.f32 %v4297_v44, %v3663_v15  ;;  %v2803_v25 = vunpack.i.h.bf16 %v3613_v42  ;;  %v2802_v11 = vunpack.i.l.bf16 %v3613_v42  ;;  %v2918_v61 = vpop.permute.xlu0 %2917 }
 0x175   :  { %v561_v37 = vadd.f32 %v529_v6, %v365_v49  ;;  %v560_v16 = vadd.f32 %v528_v47, %v364_v28  ;;  %v2920_v59 = vunpack.i.h.bf16 %v2918_v61  ;;  %v2919_v14 = vunpack.i.l.bf16 %v2918_v61 }
 0x176   :  { %v3855_v34 = vmul.f32 %v2735_v40, %v3663_v15  ;;  %v3858_v9 = vmul.f32 %v2734_v23, %v3663_v15  ;;  %v533_v1 = vmul.f32 %v2630_v43, %v3488_v51  ;;  %v532_v50 = vmul.f32 %v2629_v45, %v3488_v51  ;;  %v3862_v31 = vpop.permute.xlu1 %2710 }
 0x177   :  { %v3864_v12 = vadd.f32 %v724_v52, %v560_v16  ;;  %v3866_v42 = vadd.f32 %v725_v2, %v561_v37  ;;  %v369_v6 = vmul.f32 %v2920_v59, %v3526_v30  ;;  %v368_v47 = vmul.f32 %v2919_v14, %v3526_v30 }
 0x178   :  { %v2772_v40 = vunpack.i.h.bf16 %v4298_v60  ;;  %v729_v13 = vmul.f32 %v2803_v25, %v3587_v22  ;;  %v728_v23 = vmul.f32 %v2802_v11, %v3587_v22  ;;  %v2889_v43 = vunpack.i.l.bf16 %v3738_v57  ;;  %v2923_v49 = vpop.permute.xlu0 %2922 }
 0x179   :  { %v565_v51 = vadd.f32 %v533_v1, %v369_v6  ;;  %v564_v45 = vadd.f32 %v532_v50, %v368_v47  ;;  %v2925_v28 = vunpack.i.h.bf16 %v2923_v49  ;;  %v2924_v52 = vunpack.i.l.bf16 %v2923_v49  ;;  %v4300_v1 = vld [vmem:[#allocation23_spill] sm:$0xff]  ;;  %v4302_v49 = vld [vmem:[#allocation22_spill] sm:$0xff] }
 0x17a   :  { %v2771_v2 = vunpack.i.l.bf16 %v4298_v60  ;;  %v2676_v62 = vunpack.i.h.bf16 %v3709_v0  ;;  %v2675_v44 = vunpack.i.l.bf16 %v3709_v0  ;;  %v2890_v61 = vunpack.i.h.bf16 %v3738_v57 }
 0x17b   :  { %v3878_v37 = vadd.f32 %v728_v23, %v564_v45  ;;  %v3880_v25 = vadd.f32 %v729_v13, %v565_v51  ;;  %v373_v11 = vmul.f32 %v2925_v28, %v3526_v30  ;;  %v372_v16 = vmul.f32 %v2924_v52, %v3526_v30  ;;  %v3884_v59 = vpop.permute.xlu1 %2721  ;;  %v4301_v13 = vld [vmem:[#allocation21_spill] sm:$0xff] }
 0x17c   :  { %v3887_v14 = vmul.f32 %v2772_v40, %v3663_v15  ;;  %v2651_v50 = vunpack.i.h.bf16 %v4300_v1  ;;  %v2650_v6 = vunpack.i.l.bf16 %v4300_v1  ;;  %v344_v0 = vmul.f32 %v2889_v43, %v3526_v30  ;;  %v2928_v57 = vpop.permute.xlu0 %2927  ;;  %v4303_v1 = vld [vmem:[#allocation25_spill] sm:$0xff] }
 0x17d   :  { %4299 = vst [vmem:[#allocation20_spill] sm:$0xff] %v3880_v25  ;;  %v2813_v47 = vunpack.i.h.bf16 %v3642_v3  ;;  %v2812_v60 = vunpack.i.l.bf16 %v3642_v3  ;;  %v569_v23 = vadd.f32 %v4301_v13, %v373_v11  ;;  %v568_v51 = vadd.f32 %v4302_v49, %v372_v16 }
 0x17e   :  { %v3897_v45 = vmul.f32 %v2771_v2, %v3663_v15  ;;  %v2829_v40 = vunpack.i.h.bf16 %v3658_v55  ;;  %v723_v28 = vmul.f32 %v2676_v62, %v3587_v22  ;;  %v722_v52 = vmul.f32 %v2675_v44, %v3587_v22 }
 0x17f   :  { %v345_v43 = vmul.f32 %v2890_v61, %v3526_v30  ;;  %v3904_v48 = vadd.f32 %v4303_v1, %v568_v51  ;;  %v3907_v3 = vadd.f32 %v4305_v32, %v569_v23  ;;  %v2930_v11 = vunpack.i.h.bf16 %v2928_v57 }
 0x180   :  { %v705_v16 = vmul.f32 %v2651_v50, %v3587_v22  ;;  %v704_v2 = vmul.f32 %v2650_v6, %v3587_v22  ;;  %v540_v13 = vadd.f32 %v3725_v29, %v344_v0  ;;  %v2929_v49 = vunpack.i.l.bf16 %v2928_v57  ;;  %v2728_v54 = vpop.permute.xlu1 %2727  ;;  %v3912_v62 = vpop.permute.xlu0 %2932 }
 0x181   :  { %4304 = vst [vmem:[#allocation23_spill] sm:$0xff] %v3904_v48  ;;  %4306 = vst [vmem:[#allocation21_spill] sm:$0xff] %v3907_v3  ;;  %v3915_v44 = vmul.f32 %v2813_v47, %v3668_v56  ;;  %v3918_v30 = vmul.f32 %v2812_v60, %v3668_v56  ;;  %v2713_v32 = vunpack.i.h.bf16 %v3862_v31  ;;  %v2712_v61 = vunpack.i.l.bf16 %v3862_v31 }
 0x182   :  { %v3923_v50 = vmul.f32 %v2829_v40, %v3668_v56  ;;  %v3929_v0 = vadd.f32 %v722_v52, %v3742_v35  ;;  %v3932_v57 = vadd.f32 %v723_v28, %v3740_v18  ;;  %v541_v47 = vadd.f32 %v3722_v4, %v345_v43 }
 0x183   :  { %v998_v60 = vmul.f32 %v2930_v11, %v3731_v5  ;;  %v736_v31 = vadd.f32 %v704_v2, %v540_v13  ;;  %v2697_v23 = vunpack.i.h.bf16 %v3794_v19  ;;  %v997_v51 = vmul.f32 %v2929_v49, %v3731_v5 }
 0x184   :  { %v2729_v40 = vunpack.i.l.bf16 %v2728_v54  ;;  %v2696_v1 = vunpack.i.l.bf16 %v3794_v19  ;;  %v1162_v6 = vmul.f32 %v2713_v32, %v3663_v15  ;;  %v1161_v35 = vmul.f32 %v2712_v61, %v3663_v15  ;;  %v2938_v29 = vpop.permute.xlu0 %2937 }
 0x185   :  { %v2730_v52 = vunpack.i.h.bf16 %v2728_v54  ;;  %v2739_v18 = vpop.permute.xlu1 %2738  ;;  %v2940_v28 = vunpack.i.h.bf16 %v2938_v29  ;;  %v2939_v22 = vunpack.i.l.bf16 %v2938_v29  ;;  %v737_v11 = vadd.f32 %v705_v16, %v541_v47 }
 0x186   :  { %v2741_v4 = vunpack.i.h.bf16 %v2739_v18  ;;  %v2740_v43 = vunpack.i.l.bf16 %v2739_v18  ;;  %v2724_v2 = vunpack.i.h.bf16 %v3884_v59  ;;  %v2723_v13 = vunpack.i.l.bf16 %v3884_v59 }
 0x187   :  { %v1194_v49 = vadd.f32 %v1162_v6, %v998_v60  ;;  %v1193_v53 = vadd.f32 %v1161_v35, %v997_v51  ;;  %v1163_v19 = vmul.f32 %v2729_v40, %v3663_v15  ;;  %v1000_v54 = vmul.f32 %v2697_v23, %v3731_v5 }
 0x188   :  { %v1358_v32 = vmul.f32 %v2741_v4, %v3668_v56  ;;  %v1357_v61 = vmul.f32 %v2740_v43, %v3668_v56  ;;  %v999_v3 = vmul.f32 %v2696_v1, %v3731_v5  ;;  %v1164_v29 = vmul.f32 %v2730_v52, %v3663_v15  ;;  %v3950_v47 = vpop.permute.xlu0 %2942  ;;  %v3957_v43 = vld [vmem:[#allocation10] ss:$0 sm:$0xff] }
 0x189   :  { %v1013_v16 = vmul.f32 %v2939_v22, %v3731_v5  ;;  %v2744_v18 = vpop.permute.xlu1 %2743  ;;  %v2702_v59 = vunpack.i.h.bf16 %v3811_v17  ;;  %v1014_v6 = vmul.f32 %v2940_v28, %v3731_v5  ;;  %v2701_v40 = vunpack.i.l.bf16 %v3811_v17 }
 0x18a   :  { %v1389_v60 = vadd.f32 %v1357_v61, %v1193_v53  ;;  %v1390_v51 = vadd.f32 %v1358_v32, %v1194_v49  ;;  %v1016_v35 = vmul.f32 %v2724_v2, %v3731_v5  ;;  %v2746_v23 = vunpack.i.h.bf16 %v2744_v18 }
 0x18b   :  { %v2745_v4 = vunpack.i.l.bf16 %v2744_v18  ;;  %v1015_v1 = vmul.f32 %v2723_v13, %v3731_v5  ;;  %v1195_v52 = vadd.f32 %v1163_v19, %v999_v3  ;;  %v1196_v46 = vadd.f32 %v1164_v29, %v1000_v54 }
 0x18c   :  { %v1421_v22 = vadd.f32 %v1389_v60, %v736_v31  ;;  %v1422_v48 = vadd.f32 %v1390_v51, %v737_v11  ;;  %v1209_v25 = vadd.f32 %v3850_v24, %v1013_v16  ;;  %v1360_v53 = vmul.f32 %v2746_v23, %v3668_v56  ;;  %v3962_v17 = vpop.permute.xlu0 %2947 }
 0x18d   :  { %v1359_v28 = vmul.f32 %v2745_v4, %v3668_v56  ;;  %v2749_v2 = vpop.permute.xlu1 %2748  ;;  %v2707_v49 = vunpack.i.h.bf16 %v3830_v26  ;;  %v1210_v13 = vadd.f32 %v3845_v39, %v1014_v6  ;;  %v1211_v24 = vadd.f32 %v3858_v9, %v1015_v1 }
 0x18e   :  { %v2751_v3 = vunpack.i.h.bf16 %v2749_v2  ;;  %v2750_v19 = vunpack.i.l.bf16 %v2749_v2  ;;  %v1392_v31 = vadd.f32 %v1360_v53, %v1196_v46  ;;  %v1460_v11 = vadd.f32 %v3957_v43, %v1421_v22 }
 0x18f   :  { %v1391_v32 = vadd.f32 %v1359_v28, %v1195_v52  ;;  %v1461_v61 = vadd.f32 %v3957_v43, %v1422_v48  ;;  %v1212_v54 = vadd.f32 %v3855_v34, %v1016_v35  ;;  %v2706_v18 = vunpack.i.l.bf16 %v3830_v26 }
 0x190   :  { %v1376_v29 = vmul.f32 %v2751_v3, %v3668_v56  ;;  %v1375_v16 = vmul.f32 %v2750_v19, %v3668_v56  ;;  %v1405_v39 = vadd.f32 %v3918_v30, %v1209_v25  ;;  %v3974_v6 = vpop.permute.xlu0 %2952  ;;  %v1492_v60 = vmax.f32 %v1460_v11, 0.0 }
 0x191   :  { %v1493_v46 = vmax.f32 %v1461_v61, 0.0  ;;  %v1423_v51 = vadd.f32 %v1391_v32, %v3782_v33  ;;  %v1424_v48 = vadd.f32 %v1392_v31, %v3784_v10  ;;  %v4307_v34 = vunpack.i.l.bf16 %v3658_v55 }
 0x192   :  { %v1407_v23 = vadd.f32 %v1375_v16, %v1211_v24  ;;  %v1408_v9 = vadd.f32 %v1376_v29, %v1212_v54  ;;  %v2755_v4 = vpop.permute.xlu1 %2754  ;;  %v4308_v26 = vunpack.i.h.bf16 %v3686_v27  ;;  %v4309_v30 = vunpack.i.l.bf16 %v3686_v27 }
 0x193   :  { %v3981_v35 = vmul.f32 %v4307_v34, %v3668_v56  ;;  %v1406_v33 = vadd.f32 %v3915_v44, %v1210_v13  ;;  %v2935_v10 = vunpack.i.h.bf16 %v3912_v62  ;;  %v2934_v52 = vunpack.i.l.bf16 %v3912_v62 }
 0x194   :  { %v3986_v25 = vmul.f32 %v4308_v26, %v3668_v56  ;;  %v3991_v1 = vmul.f32 %v4309_v30, %v3668_v56  ;;  %v1439_v55 = vadd.f32 %v1407_v23, %v3929_v0  ;;  %v1440_v22 = vadd.f32 %v1408_v9, %v3932_v57  ;;  %v4000_v3 = vpop.permute.xlu0 %2963 }
 0x195   :  { %v1002_v53 = vmul.f32 %v2702_v59, %v3731_v5  ;;  %v1001_v28 = vmul.f32 %v2701_v40, %v3731_v5  ;;  %v1524_v2 = vpack.c.bf16 %v1493_v46, %v1492_v60  ;;  %v1437_v27 = vadd.f32 %v1405_v39, %v3836_v7 }
 0x196   :  { %v4004_v19 = vmul.f32 %v2707_v49, %v3731_v5  ;;  %v4007_v44 = vmul.f32 %v2706_v18, %v3731_v5  ;;  %v1462_v62 = vadd.f32 %v3957_v43, %v1423_v51  ;;  %v1463_v0 = vadd.f32 %v3957_v43, %v1424_v48  ;;  %v4011_v57 = vpop.permute.xlu1 %2759 }
 0x197   :  { %v2945_v59 = vunpack.i.h.bf16 %v3950_v47  ;;  %v2944_v40 = vunpack.i.l.bf16 %v3950_v47  ;;  %2476 = vmatprep.mubr.msk.bf16.mxu0 %vm1555_vm0, %v1524_v2  ;;  %v1438_v7 = vadd.f32 %v1406_v33, %v3838_v38  ;;  %v1476_v49 = vadd.f32 %v3957_v43, %v1437_v27 }
 0x198   :  { %v1004_v13 = vmul.f32 %v2935_v10, %v3731_v5  ;;  %v1003_v32 = vmul.f32 %v2934_v52, %v3731_v5  ;;  %v2950_v31 = vunpack.i.h.bf16 %v3962_v17  ;;  %v2949_v11 = vunpack.i.l.bf16 %v3962_v17  ;;  %v4023_v47 = vpop.permute.xlu0 %2979 }
 0x199   :  { %v2757_v61 = vunpack.i.h.bf16 %v2755_v4  ;;  %v2756_v24 = vunpack.i.l.bf16 %v2755_v4  ;;  %v1477_v54 = vadd.f32 %v3957_v43, %v1438_v7  ;;  %v1508_v29 = vmax.f32 %v1476_v49, 0.0 }
 0x19a   :  { %v1478_v16 = vadd.f32 %v3957_v43, %v1439_v55  ;;  %v1479_v38 = vadd.f32 %v3957_v43, %v1440_v22  ;;  %v1494_v18 = vmax.f32 %v1462_v62, 0.0  ;;  %v1495_v39 = vmax.f32 %v1463_v0, 0.0  ;;  %v2765_v60 = vpop.permute.xlu1 %2764 }
 0x19b   :  { %v1018_v46 = vmul.f32 %v2945_v59, %v3731_v5  ;;  %v1017_v51 = vmul.f32 %v2944_v40, %v3731_v5  ;;  %v1509_v48 = vmax.f32 %v1477_v54, 0.0  ;;  %v2767_v17 = vunpack.i.h.bf16 %v2765_v60 }
 0x19c   :  { %v1020_v23 = vmul.f32 %v2950_v31, %v3731_v5  ;;  %v1019_v9 = vmul.f32 %v2949_v11, %v3731_v5  ;;  %v1525_v4 = vpack.c.bf16 %v1495_v39, %v1494_v18  ;;  %v2766_v34 = vunpack.i.l.bf16 %v2765_v60  ;;  %v4310_v39 = vld [vmem:[#allocation29_spill] sm:$0xff] }
 0x19d   :  { %v1166_v26 = vmul.f32 %v2757_v61, %v3663_v15  ;;  %v1165_v30 = vmul.f32 %v2756_v24, %v3663_v15  ;;  %v1532_v33 = vpack.c.bf16 %v1509_v48, %v1508_v29  ;;  %v1168_v10 = vmul.f32 %v2767_v17, %v3663_v15  ;;  %v2986_v27 = vpop.permute.xlu0 %2985 }
 0x19e   :  { %v2762_v52 = vunpack.i.h.bf16 %v4011_v57  ;;  %2477 = vmatmul.mubr.msk.bf16.vlgmr.msra.gmra.mrb[0].mxu0 %vm1555_vm0, %v1525_v4  ;;  %v1167_v55 = vmul.f32 %v2766_v34, %v3663_v15  ;;  %v1510_v22 = vmax.f32 %v1478_v16, 0.0  ;;  %v1511_v2 = vmax.f32 %v1479_v38, 0.0 }
 0x19f   :  { %2492 = vmatprep.mubr.msk.bf16.mxu1 %vm1555_vm0, %v1532_v33  ;;  %v2761_v62 = vunpack.i.l.bf16 %v4011_v57  ;;  %v1200_v0 = vadd.f32 %v1168_v10, %v1004_v13  ;;  %v2988_v59 = vunpack.i.h.bf16 %v2986_v27  ;;  %v2987_v40 = vunpack.i.l.bf16 %v2986_v27  ;;  %v2817_v7 = vpop.permute.xlu1 %2816 }
 0x1a0   :  { %v1199_v49 = vadd.f32 %v1167_v55, %v1003_v32  ;;  %v1533_v31 = vpack.c.bf16 %v1511_v2, %v1510_v22  ;;  %v2819_v11 = vunpack.i.h.bf16 %v2817_v7  ;;  %v2818_v61 = vunpack.i.l.bf16 %v2817_v7  ;;  %v4312_v55 = vld [vmem:[#allocation27_spill] sm:$0xff]  ;;  %v4313_v22 = vld [vmem:[#allocation26_spill] sm:$0xff] }
 0x1a1   :  { %v1197_v24 = vadd.f32 %v1165_v30, %v1001_v28  ;;  %v1396_v54 = vadd.f32 %v3923_v50, %v1200_v0  ;;  %v1170_v29 = vmul.f32 %v2988_v59, %v3663_v15  ;;  %v1169_v16 = vmul.f32 %v2987_v40, %v3663_v15 }
 0x1a2   :  { %v1198_v38 = vadd.f32 %v1166_v26, %v1002_v53  ;;  %v1395_v18 = vadd.f32 %v3981_v35, %v1199_v49  ;;  %2493 = vmatmul.mubr.msk.bf16.vlgmr.msra.gmra.mrb[0].mxu1 %vm1555_vm0, %v1533_v31  ;;  %v1362_v57 = vmul.f32 %v2819_v11, %v3668_v56  ;;  %v1361_v13 = vmul.f32 %v2818_v61, %v3668_v56  ;;  %v4311_v53 = vld [vmem:[#allocation28_spill] sm:$0xff] }
 0x1a3   :  { %v1182_v32 = vmul.f32 %v2762_v52, %v3663_v15  ;;  %v1428_v60 = vadd.f32 %v1396_v54, %v4310_v39  ;;  %v1202_v28 = vadd.f32 %v1170_v29, %v4004_v19  ;;  %v1201_v50 = vadd.f32 %v1169_v16, %v4007_v44  ;;  %v2822_v48 = vpop.permute.xlu1 %2821 }
 0x1a4   :  { %v1181_v17 = vmul.f32 %v2761_v62, %v3663_v15  ;;  %v1427_v4 = vadd.f32 %v1395_v18, %v4311_v53  ;;  %v1393_v35 = vadd.f32 %v1361_v13, %v1197_v24  ;;  %v1394_v34 = vadd.f32 %v1362_v57, %v1198_v38 }
 0x1a5   :  { %v1215_v26 = vadd.f32 %v3897_v45, %v1019_v9  ;;  %v1397_v30 = vadd.f32 %v3991_v1, %v1201_v50  ;;  %v1398_v33 = vadd.f32 %v3986_v25, %v1202_v28  ;;  %v2824_v10 = vunpack.i.h.bf16 %v2822_v48 }
 0x1a6   :  { %v1216_v52 = vadd.f32 %v3887_v14, %v1020_v23  ;;  %v1425_v19 = vadd.f32 %v1393_v35, %v4312_v55  ;;  %v1426_v44 = vadd.f32 %v1394_v34, %v4313_v22  ;;  %v2823_v2 = vunpack.i.l.bf16 %v2822_v48 }
 0x1a7   :  { %v1214_v27 = vadd.f32 %v1182_v32, %v1018_v46  ;;  %v1429_v62 = vadd.f32 %v1397_v30, %v3805_v58  ;;  %v1430_v0 = vadd.f32 %v1398_v33, %v3807_v36  ;;  %v1378_v59 = vmul.f32 %v2824_v10, %v3668_v56  ;;  %v2832_v45 = vpop.permute.xlu1 %2831 }
 0x1a8   :  { %v1213_v9 = vadd.f32 %v1181_v17, %v1017_v51  ;;  %v1464_v1 = vadd.f32 %v3957_v43, %v1425_v19  ;;  %v1465_v25 = vadd.f32 %v3957_v43, %v1426_v44  ;;  %v1377_v14 = vmul.f32 %v2823_v2, %v3668_v56 }
 0x1a9   :  { %v1410_v23 = vadd.f32 %v1378_v59, %v1214_v27  ;;  %v2834_v40 = vunpack.i.h.bf16 %v2832_v45  ;;  %v2833_v7 = vunpack.i.l.bf16 %v2832_v45  ;;  %v1466_v49 = vadd.f32 %v3957_v43, %v1427_v4 }
 0x1aa   :  { %v1409_v46 = vadd.f32 %v1377_v14, %v1213_v9  ;;  %v1496_v31 = vmax.f32 %v1464_v1, 0.0  ;;  %v1497_v58 = vmax.f32 %v1465_v25, 0.0  ;;  %v1467_v36 = vadd.f32 %v3957_v43, %v1428_v60 }
 0x1ab   :  { %v1442_v11 = vadd.f32 %v1410_v23, %v3866_v42  ;;  %v1380_v51 = vmul.f32 %v2834_v40, %v3668_v56  ;;  %v1379_v61 = vmul.f32 %v2833_v7, %v3668_v56  ;;  %v1498_v24 = vmax.f32 %v1466_v49, 0.0 }
 0x1ac   :  { %v1441_v54 = vadd.f32 %v1409_v46, %v3864_v12  ;;  %v2838_v29 = vpop.permute.xlu1 %2837  ;;  %v1526_v16 = vpack.c.bf16 %v1497_v58, %v1496_v31  ;;  %v1499_v38 = vmax.f32 %v1467_v36, 0.0  ;;  %v1468_v18 = vadd.f32 %v3957_v43, %v1429_v62 }
 0x1ad   :  { %v1481_v57 = vadd.f32 %v3957_v43, %v1442_v11  ;;  %v1411_v13 = vadd.f32 %v1379_v61, %v1215_v26  ;;  %v1412_v32 = vadd.f32 %v1380_v51, %v1216_v52  ;;  %v1469_v60 = vadd.f32 %v3957_v43, %v1430_v0 }
 0x1ae   :  { %v1480_v39 = vadd.f32 %v3957_v43, %v1441_v54  ;;  %2480 = vmatprep.mubr.msk.bf16.mxu0 %vm1555_vm0, %v1526_v16  ;;  %v1527_v42 = vpack.c.bf16 %v1499_v38, %v1498_v24  ;;  %v1500_v50 = vmax.f32 %v1468_v18, 0.0  ;;  %v2955_v55 = vunpack.i.h.bf16 %v3974_v6 }
 0x1af   :  { %v1443_v28 = vadd.f32 %v1411_v13, %v3755_v41  ;;  %v1444_v12 = vadd.f32 %v1412_v32, %v3757_v8  ;;  %v1501_v48 = vmax.f32 %v1469_v60, 0.0  ;;  %v1513_v53 = vmax.f32 %v1481_v57, 0.0 }
 0x1b0   :  { %2481 = vmatmul.mubr.msk.bf16.gmra.mrb[4].mxu0 %vm1555_vm0, %v1527_v42  ;;  %v1512_v17 = vmax.f32 %v1480_v39, 0.0  ;;  %v2954_v19 = vunpack.i.l.bf16 %v3974_v6  ;;  %v2884_v22 = vunpack.i.h.bf16 %v3705_v63  ;;  %v2883_v44 = vunpack.i.l.bf16 %v3705_v63 }
 0x1b1   :  { %v1482_v4 = vadd.f32 %v3957_v43, %v1443_v28  ;;  %v1483_v35 = vadd.f32 %v3957_v43, %v1444_v12  ;;  %v2844_v34 = vpop.permute.xlu1 %2843  ;;  %v1528_v26 = vpack.c.bf16 %v1501_v48, %v1500_v50  ;;  %v1024_v45 = vmul.f32 %v2955_v55, %v3731_v5 }
 0x1b2   :  { %v1534_v30 = vpack.c.bf16 %v1513_v53, %v1512_v17  ;;  %v2846_v2 = vunpack.i.h.bf16 %v2844_v34  ;;  %v2845_v27 = vunpack.i.l.bf16 %v2844_v34  ;;  %v1023_v9 = vmul.f32 %v2954_v19, %v3731_v5 }
 0x1b3   :  { %v1514_v33 = vmax.f32 %v1482_v4, 0.0  ;;  %v1515_v10 = vmax.f32 %v1483_v35, 0.0  ;;  %2484 = vmatprep.mubr.msk.bf16.mxu0 %vm1555_vm0, %v1528_v26  ;;  %v2840_v1 = vunpack.i.h.bf16 %v2838_v29  ;;  %v2839_v25 = vunpack.i.l.bf16 %v2838_v29 }
 0x1b4   :  { %2496 = vmatprep.mubr.msk.bf16.mxu1 %vm1555_vm0, %v1534_v30  ;;  %v1384_v7 = vmul.f32 %v2884_v22, %v3668_v56  ;;  %v1383_v63 = vmul.f32 %v2883_v44, %v3668_v56  ;;  %v1186_v49 = vmul.f32 %v2846_v2, %v3663_v15  ;;  %v1185_v46 = vmul.f32 %v2845_v27, %v3663_v15 }
 0x1b5   :  { %v1535_v41 = vpack.c.bf16 %v1515_v10, %v1514_v33  ;;  %v1022_v61 = vmul.f32 %v2840_v1, %v3731_v5  ;;  %v1021_v24 = vmul.f32 %v2839_v25, %v3731_v5 }
 0x1b6   :  { %v2850_v8 = vpop.permute.xlu1 %2849 }
 0x1b7   :  { %2497 = vmatmul.mubr.msk.bf16.gmra.mrb[4].mxu1 %vm1555_vm0, %v1535_v41  ;;  %v2852_v31 = vunpack.i.h.bf16 %v2850_v8  ;;  %v2851_v58 = vunpack.i.l.bf16 %v2850_v8  ;;  %v1217_v13 = vadd.f32 %v1185_v46, %v1021_v24  ;;  %v1218_v32 = vadd.f32 %v1186_v49, %v1022_v61  ;;  %v4314_v41 = vld [vmem:[#allocation20_spill] sm:$0xff] }
 0x1b8   :  { %v2966_v46 = vunpack.i.h.bf16 %v4000_v3 }
 0x1b9   :  { %v1008_v60 = vmul.f32 %v2852_v31, %v3731_v5  ;;  %v1007_v28 = vmul.f32 %v2851_v58, %v3731_v5  ;;  %v2965_v31 = vunpack.i.l.bf16 %v4000_v3 }
 0x1bb   :  { %v2856_v52 = vpop.permute.xlu1 %2855 }
 0x1bc   :  { %v2858_v14 = vunpack.i.h.bf16 %v2856_v52  ;;  %v2857_v23 = vunpack.i.l.bf16 %v2856_v52 }
 0x1be   :  { %v1172_v16 = vmul.f32 %v2858_v14, %v3663_v15  ;;  %v1171_v38 = vmul.f32 %v2857_v23, %v3663_v15 }
 0x1bf   :  { %v2861_v62 = vpop.permute.xlu1 %2860 }
 0x1c0   :  { %v2863_v0 = vunpack.i.h.bf16 %v2861_v62  ;;  %v2862_v59 = vunpack.i.l.bf16 %v2861_v62  ;;  %v1203_v34 = vadd.f32 %v1171_v38, %v1007_v28  ;;  %v1204_v26 = vadd.f32 %v1172_v16, %v1008_v60  ;;  %v2997_v62 = vpop.permute.xlu0 %2996  ;;  %v4317_v60 = vld [vmem:[#allocation23_spill] sm:$0xff] }
 0x1c2   :  { %v1188_v40 = vmul.f32 %v2863_v0, %v3663_v15  ;;  %v1187_v6 = vmul.f32 %v2862_v59, %v3663_v15  ;;  %v4315_v59 = vld [vmem:[#allocation30_spill] sm:$0xff] }
 0x1c4   :  { %v1219_v36 = vadd.f32 %v1187_v6, %v1023_v9  ;;  %v1220_v11 = vadd.f32 %v1188_v40, %v1024_v45  ;;  %v2872_v51 = vpop.permute.xlu1 %2871 }
 0x1c5   :  { %v2874_v54 = vunpack.i.h.bf16 %v2872_v51  ;;  %v2873_v29 = vunpack.i.l.bf16 %v2872_v51 }
 0x1c6   :  { %v1415_v18 = vadd.f32 %v1383_v63, %v1219_v36  ;;  %v1416_v57 = vadd.f32 %v1384_v7, %v1220_v11  ;;  %v3015_v7 = vpop.permute.xlu0 %3014 }
 0x1c7   :  { %v1382_v39 = vmul.f32 %v2874_v54, %v3668_v56  ;;  %v1381_v42 = vmul.f32 %v2873_v29, %v3668_v56  ;;  %v3017_v36 = vunpack.i.h.bf16 %v3015_v7  ;;  %v3016_v11 = vunpack.i.l.bf16 %v3015_v7 }
 0x1c8   :  { %v1447_v12 = vadd.f32 %v1415_v18, %v3771_v21  ;;  %v1448_v50 = vadd.f32 %v1416_v57, %v3774_v20  ;;  %v2877_v48 = vpop.permute.xlu1 %2876  ;;  %v1026_v54 = vmul.f32 %v2966_v46, %v3731_v5  ;;  %v1025_v29 = vmul.f32 %v2965_v31, %v3731_v5 }
 0x1c9   :  { %v1413_v17 = vadd.f32 %v1381_v42, %v1217_v13  ;;  %v1414_v53 = vadd.f32 %v1382_v39, %v1218_v32  ;;  %v2879_v4 = vunpack.i.h.bf16 %v2877_v48  ;;  %v2878_v35 = vunpack.i.l.bf16 %v2877_v48 }
 0x1ca   :  { %v1486_v30 = vadd.f32 %v3957_v43, %v1447_v12  ;;  %v1487_v33 = vadd.f32 %v3957_v43, %v1448_v50  ;;  %v1386_v3 = vmul.f32 %v3017_v36, %v3668_v56  ;;  %v1385_v18 = vmul.f32 %v3016_v11, %v3668_v56  ;;  %v4318_v12 = vld [vmem:[#allocation21_spill] sm:$0xff]  ;;  %v4319_v36 = vld [vmem:[#allocation36_spill] sm:$0xff] }
 0x1cb   :  { %v1445_v10 = vadd.f32 %v1413_v17, %v3878_v37  ;;  %v1446_v8 = vadd.f32 %v1414_v53, %v4314_v41  ;;  %v1368_v52 = vmul.f32 %v2879_v4, %v3668_v56  ;;  %v1367_v21 = vmul.f32 %v2878_v35, %v3668_v56  ;;  %v4316_v37 = vld [vmem:[#allocation31_spill] sm:$0xff] }
 0x1cc   :  { %v1518_v20 = vmax.f32 %v1486_v30, 0.0  ;;  %v1519_v55 = vmax.f32 %v1487_v33, 0.0  ;;  %v2998_v41 = vunpack.i.l.bf16 %v2997_v62 }
 0x1cd   :  { %v1484_v19 = vadd.f32 %v3957_v43, %v1445_v10  ;;  %v1485_v22 = vadd.f32 %v3957_v43, %v1446_v8  ;;  %v1399_v44 = vadd.f32 %v1367_v21, %v1203_v34  ;;  %v1400_v2 = vadd.f32 %v1368_v52, %v1204_v26  ;;  %v2959_v27 = vpop.permute.xlu1 %2958 }
 0x1ce   :  { %v1537_v0 = vpack.c.bf16 %v1519_v55, %v1518_v20  ;;  %v2982_v34 = vunpack.i.h.bf16 %v4023_v47  ;;  %v2981_v26 = vunpack.i.l.bf16 %v4023_v47  ;;  %v2961_v30 = vunpack.i.h.bf16 %v2959_v27 }
 0x1cf   :  { %v1431_v45 = vadd.f32 %v1399_v44, %v4315_v59  ;;  %v1432_v9 = vadd.f32 %v1400_v2, %v4316_v37  ;;  %v1516_v1 = vmax.f32 %v1484_v19, 0.0  ;;  %v1517_v25 = vmax.f32 %v1485_v22, 0.0 }
 0x1d0   :  { %v2960_v33 = vunpack.i.l.bf16 %v2959_v27  ;;  %v2999_v10 = vunpack.i.h.bf16 %v2997_v62  ;;  %v1010_v22 = vmul.f32 %v2961_v30, %v3731_v5  ;;  %v1012_v47 = vmul.f32 %v2982_v34, %v3731_v5 }
 0x1d1   :  { %v1470_v14 = vadd.f32 %v3957_v43, %v1431_v45  ;;  %v1471_v23 = vadd.f32 %v3957_v43, %v1432_v9  ;;  %v1536_v40 = vpack.c.bf16 %v1517_v25, %v1516_v1  ;;  %v1011_v27 = vmul.f32 %v2981_v26, %v3731_v5 }
 0x1d2   :  { %v2970_v6 = vpop.permute.xlu1 %2969  ;;  %v1009_v44 = vmul.f32 %v2960_v33, %v3731_v5  ;;  %v1176_v62 = vmul.f32 %v2999_v10, %v3663_v15  ;;  %v1175_v59 = vmul.f32 %v2998_v41, %v3663_v15 }
 0x1d3   :  { %2500 = vmatprep.mubr.msk.bf16.mxu1 %vm1555_vm0, %v1536_v40  ;;  %v1502_v63 = vmax.f32 %v1470_v14, 0.0  ;;  %v1503_v49 = vmax.f32 %v1471_v23, 0.0  ;;  %v2972_v48 = vunpack.i.h.bf16 %v2970_v6  ;;  %v2971_v17 = vunpack.i.l.bf16 %v2970_v6 }
 0x1d4   :  { %2501 = vmatmul.mubr.msk.bf16.gmra.mrb[8].mxu1 %vm1555_vm0, %v1537_v0  ;;  %v1208_v46 = vadd.f32 %v1176_v62, %v1012_v47  ;;  %v4168_v47 = vld [vmem:[#allocation13] ss:$0 sm:$0xff] }
 0x1d5   :  { %v1529_v58 = vpack.c.bf16 %v1503_v49, %v1502_v63  ;;  %v1174_v21 = vmul.f32 %v2972_v48, %v3663_v15  ;;  %v1173_v20 = vmul.f32 %v2971_v17, %v3663_v15  ;;  %v1207_v49 = vadd.f32 %v1175_v59, %v1011_v27 }
 0x1d6   :  { %v2975_v51 = vpop.permute.xlu1 %2974 }
 0x1d7   :  { %v2977_v61 = vunpack.i.h.bf16 %v2975_v51  ;;  %v2976_v24 = vunpack.i.l.bf16 %v2975_v51  ;;  %2485 = vmatmul.mubr.msk.bf16.gmra.mrb[8].mxu0 %vm1555_vm0, %v1529_v58  ;;  %v1205_v45 = vadd.f32 %v1173_v20, %v1009_v44  ;;  %v1206_v37 = vadd.f32 %v1174_v21, %v1010_v22  ;;  %v4320_v51 = vld [vmem:[#allocation37_spill] sm:$0xff]  ;;  %v4324_v20 = vld [vmem:[#allocation35_spill] sm:$0xff] }
 0x1d9   :  { %v1190_v16 = vmul.f32 %v2977_v61, %v3663_v15  ;;  %v1189_v38 = vmul.f32 %v2976_v24, %v3663_v15 }
 0x1db   :  { %v1221_v57 = vadd.f32 %v1189_v38, %v1025_v29  ;;  %v1222_v13 = vadd.f32 %v1190_v16, %v1026_v54  ;;  %v2992_v32 = vpop.permute.xlu1 %2991 }
 0x1dc   :  { %v2994_v31 = vunpack.i.h.bf16 %v2992_v32  ;;  %v2993_v58 = vunpack.i.l.bf16 %v2992_v32 }
 0x1dd   :  { %v1417_v39 = vadd.f32 %v1385_v18, %v1221_v57  ;;  %v1418_v42 = vadd.f32 %v1386_v3, %v1222_v13 }
 0x1de   :  { %v1028_v32 = vmul.f32 %v2994_v31, %v3731_v5 }
 0x1df   :  { %v1449_v28 = vadd.f32 %v1417_v39, %v4317_v60  ;;  %v1450_v50 = vadd.f32 %v1418_v42, %v4318_v12  ;;  %v1027_v39 = vmul.f32 %v2993_v58, %v3731_v5 }
 0x1e0   :  { %v3003_v53 = vpop.permute.xlu1 %3002 }
 0x1e1   :  { %v1488_v4 = vadd.f32 %v3957_v43, %v1449_v28  ;;  %v1489_v35 = vadd.f32 %v3957_v43, %v1450_v50  ;;  %v3005_v25 = vunpack.i.h.bf16 %v3003_v53  ;;  %v3004_v14 = vunpack.i.l.bf16 %v3003_v53  ;;  %v4321_v28 = vld [vmem:[#allocation32_spill] sm:$0xff]  ;;  %v4322_v50 = vld [vmem:[#allocation33_spill] sm:$0xff] }
 0x1e3   :  { %v1520_v8 = vmax.f32 %v1488_v4, 0.0  ;;  %v1521_v52 = vmax.f32 %v1489_v35, 0.0  ;;  %v1192_v29 = vmul.f32 %v3005_v25, %v3663_v15  ;;  %v1191_v16 = vmul.f32 %v3004_v14, %v3663_v15 }
 0x1e5   :  { %v3009_v55 = vpop.permute.xlu1 %3008  ;;  %v1538_v19 = vpack.c.bf16 %v1521_v52, %v1520_v8  ;;  %v1223_v15 = vadd.f32 %v1191_v16, %v1027_v39  ;;  %v1224_v4 = vadd.f32 %v1192_v29, %v1028_v32  ;;  %v4323_v52 = vld [vmem:[#allocation34_spill] sm:$0xff] }
 0x1e6   :  { %v3011_v2 = vunpack.i.h.bf16 %v3009_v55  ;;  %v3010_v0 = vunpack.i.l.bf16 %v3009_v55 }
 0x1e7   :  { %2504 = vmatprep.mubr.msk.bf16.mxu1 %vm1555_vm0, %v1538_v19 }
 0x1e8   :  { %v1370_v9 = vmul.f32 %v3011_v2, %v3668_v56  ;;  %v1369_v1 = vmul.f32 %v3010_v0, %v3668_v56 }
 0x1e9   :  { %v3020_v23 = vpop.permute.xlu1 %3019 }
 0x1ea   :  { %v1401_v40 = vadd.f32 %v1369_v1, %v1205_v45  ;;  %v1402_v6 = vadd.f32 %v1370_v9, %v1206_v37  ;;  %v3022_v7 = vunpack.i.h.bf16 %v3020_v23  ;;  %v3021_v63 = vunpack.i.l.bf16 %v3020_v23 }
 0x1ec   :  { %v1433_v11 = vadd.f32 %v1401_v40, %v4319_v36  ;;  %v1434_v61 = vadd.f32 %v1402_v6, %v4320_v51  ;;  %v1372_v24 = vmul.f32 %v3022_v7, %v3668_v56  ;;  %v1371_v54 = vmul.f32 %v3021_v63, %v3668_v56 }
 0x1ed   :  { %v3025_v38 = vpop.permute.xlu1 %3024 }
 0x1ee   :  { %v1472_v3 = vadd.f32 %v3957_v43, %v1433_v11  ;;  %v1473_v18 = vadd.f32 %v3957_v43, %v1434_v61  ;;  %v1403_v57 = vadd.f32 %v1371_v54, %v1207_v49  ;;  %v1404_v13 = vadd.f32 %v1372_v24, %v1208_v46 }
 0x1ef   :  { %v3027_v42 = vunpack.i.h.bf16 %v3025_v38  ;;  %v3026_v60 = vunpack.i.l.bf16 %v3025_v38 }
 0x1f0   :  { %v1435_v12 = vadd.f32 %v1403_v57, %v4321_v28  ;;  %v1436_v48 = vadd.f32 %v1404_v13, %v4322_v50  ;;  %v1504_v17 = vmax.f32 %v1472_v3, 0.0  ;;  %v1505_v53 = vmax.f32 %v1473_v18, 0.0 }
 0x1f1   :  { %v1388_v35 = vmul.f32 %v3027_v42, %v3668_v56  ;;  %v1387_v34 = vmul.f32 %v3026_v60, %v3668_v56 }
 0x1f2   :  { %v1474_v26 = vadd.f32 %v3957_v43, %v1435_v12  ;;  %v1475_v30 = vadd.f32 %v3957_v43, %v1436_v48  ;;  %v1530_v33 = vpack.c.bf16 %v1505_v53, %v1504_v17 }
 0x1f3   :  { %v1419_v5 = vadd.f32 %v1387_v34, %v1223_v15  ;;  %v1420_v10 = vadd.f32 %v1388_v35, %v1224_v4 }
 0x1f4   :  { %2488 = vmatprep.mubr.msk.bf16.mxu0 %vm1555_vm0, %v1530_v33  ;;  %v1506_v41 = vmax.f32 %v1474_v26, 0.0  ;;  %v1507_v8 = vmax.f32 %v1475_v30, 0.0 }
 0x1f5   :  { %v1451_v21 = vadd.f32 %v1419_v5, %v4323_v52  ;;  %v1452_v55 = vadd.f32 %v1420_v10, %v4324_v20 }
 0x1f6   :  { %v1531_v19 = vpack.c.bf16 %v1507_v8, %v1506_v41 }
 0x1f7   :  { %v1490_v22 = vadd.f32 %v3957_v43, %v1451_v21  ;;  %v1491_v56 = vadd.f32 %v3957_v43, %v1452_v55 }
 0x1f8   :  { %2489 = vmatmul.mubr.msk.bf16.gmra.mrb[12].mxu0 %vm1555_vm0, %v1531_v19 }
 0x1f9   :  { %v1522_v44 = vmax.f32 %v1490_v22, 0.0  ;;  %v1523_v2 = vmax.f32 %v1491_v56, 0.0 }
 0x1fb   :  { %v1539_v0 = vpack.c.bf16 %v1523_v2, %v1522_v44 }
 0x1fd   :  { %2505 = vmatmul.mubr.msk.bf16.gmra.mrb[12].mxu1 %vm1555_vm0, %v1539_v0 }
 0x271   :  { %v2478_v27 = vpop.f32.mrb[0].mxu0 }
 0x272   :  { %v1647_v62 = vadd.f32 %v2478_v27, %v4168_v47  ;;  %v1638_v59 = vpop.f32.mrb[1].mxu0 }
 0x273   :  { %v1639_v45 = vadd.f32 %v4168_v47, %v1638_v59  ;;  %v2479_v37 = vpop.f32.mrb[2].mxu0 }
 0x274   :  { %v1767_v9 = vmax.f32 %v1647_v62, 0.0  ;;  %v1650_v1 = vadd.f32 %v2479_v37, %v4168_v47  ;;  %v1641_v43 = vpop.f32.mrb[3].mxu0 }
 0x275   :  { %v1765_v25 = vmax.f32 %v1639_v45, 0.0  ;;  %v1642_v14 = vadd.f32 %v4168_v47, %v1641_v43  ;;  %v2494_v23 = vpop.f32.mrb[0].mxu1 }
 0x276   :  { %v1809_v40 = vrot.slane %v1767_v9, 4  ;;  %v1768_v6 = vmax.f32 %v1650_v1, 0.0  ;;  %v1711_v7 = vadd.f32 %v2494_v23, %v4168_v47  ;;  %v1702_v63 = vpop.f32.mrb[1].mxu1 }
 0x277   :  { %v1797_v49 = vrot.slane %v1765_v25, 4  ;;  %v1766_v46 = vmax.f32 %v1642_v14, 0.0  ;;  %v1703_v31 = vadd.f32 %v4168_v47, %v1702_v63  ;;  %v2495_v58 = vpop.f32.mrb[2].mxu1 }
 0x278   :  { %v1810_v36 = vmax.f32 %v1767_v9, %v1809_v40  ;;  %v1815_v11 = vrot.slane %v1768_v6, 4  ;;  %v1783_v51 = vmax.f32 %v1711_v7, 0.0  ;;  %v1714_v61 = vadd.f32 %v2495_v58, %v4168_v47  ;;  %v1705_v24 = vpop.f32.mrb[3].mxu1 }
 0x279   :  { %v1798_v54 = vmax.f32 %v1765_v25, %v1797_v49  ;;  %v1803_v29 = vrot.slane %v1766_v46, 4  ;;  %v1781_v16 = vmax.f32 %v1703_v31, 0.0  ;;  %v1706_v38 = vadd.f32 %v4168_v47, %v1705_v24 }
 0x27a   :  { %v1811_v3 = vrot.slane %v1810_v36, 2  ;;  %v1816_v18 = vmax.f32 %v1768_v6, %v1815_v11  ;;  %v1905_v57 = vrot.slane %v1783_v51, 4  ;;  %v1784_v13 = vmax.f32 %v1714_v61, 0.0 }
 0x27b   :  { %v1799_v32 = vrot.slane %v1798_v54, 2  ;;  %v1804_v39 = vmax.f32 %v1766_v46, %v1803_v29  ;;  %v1893_v42 = vrot.slane %v1781_v16, 4  ;;  %v1782_v60 = vmax.f32 %v1706_v38, 0.0 }
 0x27c   :  { %v1812_v28 = vmax.f32 %v1810_v36, %v1811_v3  ;;  %v1817_v12 = vrot.slane %v1816_v18, 2  ;;  %v1906_v50 = vmax.f32 %v1783_v51, %v1905_v57  ;;  %v1911_v48 = vrot.slane %v1784_v13, 4 }
 0x27d   :  { %v1800_v17 = vmax.f32 %v1798_v54, %v1799_v32  ;;  %v1805_v53 = vrot.slane %v1804_v39, 2  ;;  %v1894_v15 = vmax.f32 %v1781_v16, %v1893_v42  ;;  %v1899_v4 = vrot.slane %v1782_v60, 4 }
 0x27e   :  { %v1813_v35 = vrot.slane %v1812_v28, 1  ;;  %v1818_v34 = vmax.f32 %v1816_v18, %v1817_v12  ;;  %v1907_v26 = vrot.slane %v1906_v50, 2  ;;  %v1912_v30 = vmax.f32 %v1784_v13, %v1911_v48 }
 0x27f   :  { %v1801_v33 = vrot.slane %v1800_v17, 1  ;;  %v1806_v5 = vmax.f32 %v1804_v39, %v1805_v53  ;;  %v1895_v10 = vrot.slane %v1894_v15, 2  ;;  %v1900_v41 = vmax.f32 %v1782_v60, %v1899_v4 }
 0x280   :  { %v1814_v8 = vmax.f32 %v1812_v28, %v1813_v35  ;;  %v1819_v52 = vrot.slane %v1818_v34, 1  ;;  %v1908_v21 = vmax.f32 %v1906_v50, %v1907_v26  ;;  %v1913_v20 = vrot.slane %v1912_v30, 2 }
 0x281   :  { %v1802_v55 = vmax.f32 %v1800_v17, %v1801_v33  ;;  %v1807_v19 = vrot.slane %v1806_v5, 1  ;;  %v1896_v22 = vmax.f32 %v1894_v15, %v1895_v10  ;;  %v1901_v56 = vrot.slane %v1900_v41, 2 }
 0x282   :  { %v2269_v44 = vpack.c.bf16 %v1814_v8, %v1814_v8  ;;  %v1820_v2 = vmax.f32 %v1818_v34, %v1819_v52  ;;  %v1909_v0 = vrot.slane %v1908_v21, 1  ;;  %v1914_v27 = vmax.f32 %v1912_v30, %v1913_v20 }
 0x283   :  { %v2267_v62 = vpack.c.bf16 %v1802_v55, %v1802_v55  ;;  %v1808_v59 = vmax.f32 %v1806_v5, %v1807_v19  ;;  %v1897_v45 = vrot.slane %v1896_v22, 1  ;;  %v1902_v37 = vmax.f32 %v1900_v41, %v1901_v56  ;;  %v2482_v9 = vpop.f32.mrb[4].mxu0 }
 0x284   :  { %v2119_v1 = vunpack.c.l.b16 %v2269_v44  ;;  %v2270_v43 = vpack.c.bf16 %v1820_v2, %v1820_v2  ;;  %v1910_v25 = vmax.f32 %v1908_v21, %v1909_v0  ;;  %v1915_v14 = vrot.slane %v1914_v27, 1  ;;  %v1654_v23 = vpop.f32.mrb[5].mxu0 }
 0x285   :  { %v2117_v40 = vunpack.c.l.b16 %v2267_v62  ;;  %v2268_v6 = vpack.c.bf16 %v1808_v59, %v1808_v59  ;;  %v1898_v7 = vmax.f32 %v1896_v22, %v1897_v45  ;;  %v1903_v63 = vrot.slane %v1902_v37, 1  ;;  %v2483_v49 = vpop.f32.mrb[6].mxu0 }
 0x286   :  { %v2120_v46 = vunpack.c.l.b16 %v2270_v43  ;;  %v2285_v31 = vpack.c.bf16 %v1910_v25, %v1910_v25  ;;  %v1916_v58 = vmax.f32 %v1914_v27, %v1915_v14  ;;  %v1663_v36 = vadd.f32 %v2482_v9, %v4168_v47  ;;  %v1657_v11 = vpop.f32.mrb[7].mxu0 }
 0x287   :  { %v2118_v51 = vunpack.c.l.b16 %v2268_v6  ;;  %v2283_v61 = vpack.c.bf16 %v1898_v7, %v1898_v7  ;;  %v1904_v24 = vmax.f32 %v1902_v37, %v1903_v63  ;;  %v1655_v54 = vadd.f32 %v4168_v47, %v1654_v23 }
 0x288   :  { %v2135_v29 = vunpack.c.l.b16 %v2285_v31  ;;  %v2286_v16 = vpack.c.bf16 %v1916_v58, %v1916_v58  ;;  %v1771_v38 = vmax.f32 %v1663_v36, 0.0  ;;  %v1666_v3 = vadd.f32 %v2483_v49, %v4168_v47 }
 0x289   :  { %v2150_v18 = vsel %vm2149_vm1, %v2118_v51, %v2117_v40  ;;  %v2133_v57 = vunpack.c.l.b16 %v2283_v61  ;;  %v2284_v13 = vpack.c.bf16 %v1904_v24, %v1904_v24  ;;  %v1769_v32 = vmax.f32 %v1655_v54, 0.0 }
 0x28a   :  { %v2152_v39 = vsel %vm2151_vm2, %v2119_v1, %v2150_v18  ;;  %v2136_v42 = vunpack.c.l.b16 %v2286_v16  ;;  %v1833_v60 = vrot.slane %v1771_v38, 4  ;;  %v1772_v28 = vmax.f32 %v1666_v3, 0.0  ;;  %v2498_v12 = vpop.f32.mrb[4].mxu1 }
 0x28b   :  { %v2134_v50 = vunpack.c.l.b16 %v2284_v13  ;;  %v1821_v48 = vrot.slane %v1769_v32, 4  ;;  %v4184_v17 = vsel %vm2153_vm3, %v2120_v46, %v2152_v39  ;;  %v1658_v53 = vadd.f32 %v4168_v47, %v1657_v11  ;;  %v1718_v15 = vpop.f32.mrb[5].mxu1 }
 0x28c   :  { %v1834_v4 = vmax.f32 %v1771_v38, %v1833_v60  ;;  %v1839_v35 = vrot.slane %v1772_v28, 4  ;;  %v1727_v34 = vadd.f32 %v2498_v12, %v4168_v47  ;;  %v1719_v26 = vadd.f32 %v4168_v47, %v1718_v15  ;;  %v2499_v30 = vpop.f32.mrb[6].mxu1 }
 0x28d   :  { %v2170_v33 = vsel %vm2149_vm1, %v2134_v50, %v2133_v57  ;;  %v1822_v5 = vmax.f32 %v1769_v32, %v1821_v48  ;;  %v1770_v10 = vmax.f32 %v1658_v53, 0.0  ;;  %v1730_v41 = vadd.f32 %v2499_v30, %v4168_v47  ;;  %v1721_v8 = vpop.f32.mrb[7].mxu1 }
 0x28e   :  { %v2171_v52 = vsel %vm2151_vm2, %v2135_v29, %v2170_v33  ;;  %v1835_v21 = vrot.slane %v1834_v4, 2  ;;  %v1840_v20 = vmax.f32 %v1772_v28, %v1839_v35  ;;  %v1787_v55 = vmax.f32 %v1727_v34, 0.0 }
 0x28f   :  { %v1823_v19 = vrot.slane %v1822_v5, 2  ;;  %v1827_v22 = vrot.slane %v1770_v10, 4  ;;  %v1785_v56 = vmax.f32 %v1719_v26, 0.0  ;;  %v2172_v44 = vsel %vm2153_vm3, %v2136_v42, %v2171_v52 }
 0x290   :  { %v1836_v2 = vmax.f32 %v1834_v4, %v1835_v21  ;;  %v1841_v0 = vrot.slane %v1840_v20, 2  ;;  %v1929_v27 = vrot.slane %v1787_v55, 4  ;;  %v1788_v62 = vmax.f32 %v1730_v41, 0.0 }
 0x291   :  { %v1824_v59 = vmax.f32 %v1822_v5, %v1823_v19  ;;  %v1828_v45 = vmax.f32 %v1770_v10, %v1827_v22  ;;  %v1917_v37 = vrot.slane %v1785_v56, 4  ;;  %v1722_v9 = vadd.f32 %v4168_v47, %v1721_v8 }
 0x292   :  { %v1837_v1 = vrot.slane %v1836_v2, 1  ;;  %v1842_v43 = vmax.f32 %v1840_v20, %v1841_v0  ;;  %v1930_v25 = vmax.f32 %v1787_v55, %v1929_v27  ;;  %v1935_v14 = vrot.slane %v1788_v62, 4 }
 0x293   :  { %v1825_v23 = vrot.slane %v1824_v59, 1  ;;  %v1829_v40 = vrot.slane %v1828_v45, 2  ;;  %v1918_v6 = vmax.f32 %v1785_v56, %v1917_v37  ;;  %v1786_v7 = vmax.f32 %v1722_v9, 0.0 }
 0x294   :  { %v1843_v63 = vrot.slane %v1842_v43, 1  ;;  %v1931_v49 = vrot.slane %v1930_v25, 2  ;;  %v1936_v46 = vmax.f32 %v1788_v62, %v1935_v14  ;;  %v1838_v51 = vmax.f32 %v1836_v2, %v1837_v1 }
 0x295   :  { %v1826_v31 = vmax.f32 %v1824_v59, %v1825_v23  ;;  %v1830_v58 = vmax.f32 %v1828_v45, %v1829_v40  ;;  %v1919_v36 = vrot.slane %v1918_v6, 2  ;;  %v1923_v11 = vrot.slane %v1786_v7, 4 }
 0x296   :  { %v1844_v61 = vmax.f32 %v1842_v43, %v1843_v63  ;;  %v1932_v24 = vmax.f32 %v1930_v25, %v1931_v49  ;;  %v1937_v54 = vrot.slane %v1936_v46, 2  ;;  %v2273_v60 = vpack.c.bf16 %v1838_v51, %v1838_v51 }
 0x297   :  { %v2271_v29 = vpack.c.bf16 %v1826_v31, %v1826_v31  ;;  %v1831_v16 = vrot.slane %v1830_v58, 1  ;;  %v1920_v38 = vmax.f32 %v1918_v6, %v1919_v36  ;;  %v1924_v3 = vmax.f32 %v1786_v7, %v1923_v11 }
 0x298   :  { %v1933_v18 = vrot.slane %v1932_v24, 1  ;;  %v1938_v57 = vmax.f32 %v1936_v46, %v1937_v54  ;;  %v2274_v28 = vpack.c.bf16 %v1844_v61, %v1844_v61  ;;  %v2123_v33 = vunpack.c.l.b16 %v2273_v60 }
 0x299   :  { %v2121_v13 = vunpack.c.l.b16 %v2271_v29  ;;  %v1832_v32 = vmax.f32 %v1830_v58, %v1831_v16  ;;  %v1921_v39 = vrot.slane %v1920_v38, 1  ;;  %v1925_v42 = vrot.slane %v1924_v3, 2 }
 0x29a   :  { %v1939_v12 = vrot.slane %v1938_v57, 1  ;;  %v1934_v4 = vmax.f32 %v1932_v24, %v1933_v18  ;;  %v2124_v5 = vunpack.c.l.b16 %v2274_v28 }
 0x29b   :  { %v2156_v50 = vsel %vm2155_vm4, %v2121_v13, %v4184_v17  ;;  %v2272_v48 = vpack.c.bf16 %v1832_v32, %v1832_v32  ;;  %v1922_v53 = vmax.f32 %v1920_v38, %v1921_v39  ;;  %v1926_v15 = vmax.f32 %v1924_v3, %v1925_v42 }
 0x29c   :  { %v1940_v26 = vmax.f32 %v1938_v57, %v1939_v12  ;;  %v2289_v52 = vpack.c.bf16 %v1934_v4, %v1934_v4 }
 0x29d   :  { %v2122_v35 = vunpack.c.l.b16 %v2272_v48  ;;  %v2287_v34 = vpack.c.bf16 %v1922_v53, %v1922_v53  ;;  %v1927_v30 = vrot.slane %v1926_v15, 1 }
 0x29e   :  { %v2290_v20 = vpack.c.bf16 %v1940_v26, %v1940_v26  ;;  %v2139_v2 = vunpack.c.l.b16 %v2289_v52 }
 0x29f   :  { %v2158_v10 = vsel %vm2157_vm5, %v2122_v35, %v2156_v50  ;;  %v2137_v41 = vunpack.c.l.b16 %v2287_v34  ;;  %v1928_v8 = vmax.f32 %v1926_v15, %v1927_v30 }
 0x2a0   :  { %v2160_v17 = vsel %vm2159_vm6, %v2123_v33, %v2158_v10  ;;  %v2140_v0 = vunpack.c.l.b16 %v2290_v20 }
 0x2a1   :  { %v2173_v21 = vsel %vm2155_vm4, %v2137_v41, %v2172_v44  ;;  %v2288_v55 = vpack.c.bf16 %v1928_v8, %v1928_v8  ;;  %v2162_v19 = vsel %vm2161_vm7, %v2124_v5, %v2160_v17 }
 0x2a2   :  { %v2184_v22 = vpack.c.b16 %v2162_v19, %v2162_v19 }
 0x2a3   :  { %v2138_v56 = vunpack.c.l.b16 %v2288_v55 }
 0x2a4   :  { %2192 = vst [vmem:[#allocation14] sm:$0xf] %v2184_v22 }
 0x2a5   :  { %v2174_v27 = vsel %vm2157_vm5, %v2138_v56, %v2173_v21 }
 0x2a6   :  { %v2175_v62 = vsel %vm2159_vm6, %v2139_v2, %v2174_v27 }
 0x2a7   :  { %v2502_v59 = vpop.f32.mrb[8].mxu1  ;;  %v2176_v45 = vsel %vm2161_vm7, %v2140_v0, %v2175_v62 }
 0x2a8   :  { %v1743_v37 = vadd.f32 %v2502_v59, %v4168_v47  ;;  %v1734_v9 = vpop.f32.mrb[9].mxu1  ;;  %v2186_v44 = vpack.c.b16 %v2176_v45, %v2176_v45 }
 0x2a9   :  { %v1735_v1 = vadd.f32 %v4168_v47, %v1734_v9  ;;  %v2503_v43 = vpop.f32.mrb[10].mxu1 }
 0x2aa   :  { %v1791_v25 = vmax.f32 %v1743_v37, 0.0  ;;  %v1746_v14 = vadd.f32 %v2503_v43, %v4168_v47  ;;  %v2486_v23 = vpop.f32.mrb[8].mxu0  ;;  %v1737_v40 = vpop.f32.mrb[11].mxu1  ;;  %2194 = vst [vmem:[#allocation14 + $0x8] sm:$0xf] %v2186_v44 }
 0x2ab   :  { %v1789_v6 = vmax.f32 %v1735_v1, 0.0  ;;  %v1679_v7 = vadd.f32 %v2486_v23, %v4168_v47  ;;  %v1738_v63 = vadd.f32 %v4168_v47, %v1737_v40  ;;  %v1670_v49 = vpop.f32.mrb[9].mxu0 }
 0x2ac   :  { %v1953_v46 = vrot.slane %v1791_v25, 4  ;;  %v1792_v31 = vmax.f32 %v1746_v14, 0.0  ;;  %v1671_v58 = vadd.f32 %v4168_v47, %v1670_v49  ;;  %v2487_v36 = vpop.f32.mrb[10].mxu0 }
 0x2ad   :  { %v1941_v11 = vrot.slane %v1789_v6, 4  ;;  %v1775_v51 = vmax.f32 %v1679_v7, 0.0  ;;  %v1790_v61 = vmax.f32 %v1738_v63, 0.0  ;;  %v1682_v24 = vadd.f32 %v2487_v36, %v4168_v47  ;;  %v1673_v54 = vpop.f32.mrb[11].mxu0 }
 0x2ae   :  { %v1954_v29 = vmax.f32 %v1791_v25, %v1953_v46  ;;  %v1959_v16 = vrot.slane %v1792_v31, 4  ;;  %v1773_v38 = vmax.f32 %v1671_v58, 0.0  ;;  %v1674_v3 = vadd.f32 %v4168_v47, %v1673_v54 }
 0x2af   :  { %v1942_v18 = vmax.f32 %v1789_v6, %v1941_v11  ;;  %v1857_v57 = vrot.slane %v1775_v51, 4  ;;  %v1947_v13 = vrot.slane %v1790_v61, 4  ;;  %v1776_v32 = vmax.f32 %v1682_v24, 0.0 }
 0x2b0   :  { %v1955_v39 = vrot.slane %v1954_v29, 2  ;;  %v1960_v42 = vmax.f32 %v1792_v31, %v1959_v16  ;;  %v1845_v60 = vrot.slane %v1773_v38, 4  ;;  %v1774_v28 = vmax.f32 %v1674_v3, 0.0 }
 0x2b1   :  { %v1943_v12 = vrot.slane %v1942_v18, 2  ;;  %v1858_v50 = vmax.f32 %v1775_v51, %v1857_v57  ;;  %v1948_v48 = vmax.f32 %v1790_v61, %v1947_v13  ;;  %v1863_v53 = vrot.slane %v1776_v32, 4 }
 0x2b2   :  { %v1956_v15 = vmax.f32 %v1954_v29, %v1955_v39  ;;  %v1961_v4 = vrot.slane %v1960_v42, 2  ;;  %v1846_v35 = vmax.f32 %v1773_v38, %v1845_v60  ;;  %v1851_v34 = vrot.slane %v1774_v28, 4 }
 0x2b3   :  { %v1944_v26 = vmax.f32 %v1942_v18, %v1943_v12  ;;  %v1859_v30 = vrot.slane %v1858_v50, 2  ;;  %v1949_v33 = vrot.slane %v1948_v48, 2  ;;  %v1864_v5 = vmax.f32 %v1776_v32, %v1863_v53 }
 0x2b4   :  { %v1957_v10 = vrot.slane %v1956_v15, 1  ;;  %v1962_v41 = vmax.f32 %v1960_v42, %v1961_v4  ;;  %v1847_v8 = vrot.slane %v1846_v35, 2  ;;  %v1852_v52 = vmax.f32 %v1774_v28, %v1851_v34 }
 0x2b5   :  { %v1945_v17 = vrot.slane %v1944_v26, 1  ;;  %v1860_v21 = vmax.f32 %v1858_v50, %v1859_v30  ;;  %v1950_v20 = vmax.f32 %v1948_v48, %v1949_v33  ;;  %v1865_v55 = vrot.slane %v1864_v5, 2 }
 0x2b6   :  { %v1958_v19 = vmax.f32 %v1956_v15, %v1957_v10  ;;  %v1963_v22 = vrot.slane %v1962_v41, 1  ;;  %v1848_v56 = vmax.f32 %v1846_v35, %v1847_v8  ;;  %v1853_v2 = vrot.slane %v1852_v52, 2 }
 0x2b7   :  { %v1946_v0 = vmax.f32 %v1944_v26, %v1945_v17  ;;  %v1861_v27 = vrot.slane %v1860_v21, 1  ;;  %v1951_v62 = vrot.slane %v1950_v20, 1  ;;  %v1866_v59 = vmax.f32 %v1864_v5, %v1865_v55 }
 0x2b8   :  { %v1964_v45 = vmax.f32 %v1962_v41, %v1963_v22  ;;  %v1849_v37 = vrot.slane %v1848_v56, 1  ;;  %v1854_v9 = vmax.f32 %v1852_v52, %v1853_v2  ;;  %v2293_v14 = vpack.c.bf16 %v1958_v19, %v1958_v19 }
 0x2b9   :  { %v2291_v44 = vpack.c.bf16 %v1946_v0, %v1946_v0  ;;  %v1862_v1 = vmax.f32 %v1860_v21, %v1861_v27  ;;  %v1952_v43 = vmax.f32 %v1950_v20, %v1951_v62  ;;  %v1867_v25 = vrot.slane %v1866_v59, 1 }
 0x2ba   :  { %v1850_v23 = vmax.f32 %v1848_v56, %v1849_v37  ;;  %v1855_v40 = vrot.slane %v1854_v9, 1  ;;  %v2294_v6 = vpack.c.bf16 %v1964_v45, %v1964_v45  ;;  %v2143_v11 = vunpack.c.l.b16 %v2293_v14 }
 0x2bb   :  { %v2292_v7 = vpack.c.bf16 %v1952_v43, %v1952_v43  ;;  %v1868_v63 = vmax.f32 %v1866_v59, %v1867_v25  ;;  %v2141_v31 = vunpack.c.l.b16 %v2291_v44  ;;  %v2277_v58 = vpack.c.bf16 %v1862_v1, %v1862_v1 }
 0x2bc   :  { %v2275_v49 = vpack.c.bf16 %v1850_v23, %v1850_v23  ;;  %v1856_v46 = vmax.f32 %v1854_v9, %v1855_v40  ;;  %v2144_v24 = vunpack.c.l.b16 %v2294_v6 }
 0x2bd   :  { %v2142_v36 = vunpack.c.l.b16 %v2292_v7  ;;  %v2278_v51 = vpack.c.bf16 %v1868_v63, %v1868_v63  ;;  %v2127_v3 = vunpack.c.l.b16 %v2277_v58 }
 0x2be   :  { %v2276_v61 = vpack.c.bf16 %v1856_v46, %v1856_v46  ;;  %v2125_v16 = vunpack.c.l.b16 %v2275_v49 }
 0x2bf   :  { %v2177_v54 = vsel %vm2149_vm1, %v2142_v36, %v2141_v31  ;;  %v2128_v57 = vunpack.c.l.b16 %v2278_v51 }
 0x2c0   :  { %v2178_v29 = vsel %vm2151_vm2, %v2143_v11, %v2177_v54  ;;  %v2126_v38 = vunpack.c.l.b16 %v2276_v61 }
 0x2c1   :  { %v4214_v18 = vsel %vm2153_vm3, %v2144_v24, %v2178_v29 }
 0x2c2   :  { %v2163_v13 = vsel %vm2149_vm1, %v2126_v38, %v2125_v16 }
 0x2c3   :  { %v2164_v32 = vsel %vm2151_vm2, %v2127_v3, %v2163_v13 }
 0x2c4   :  { %v4219_v39 = vsel %vm2153_vm3, %v2128_v57, %v2164_v32 }
 0x2cb   :  { %v2490_v42 = vpop.f32.mrb[12].mxu0 }
 0x2cc   :  { %v1695_v60 = vadd.f32 %v2490_v42, %v4168_v47  ;;  %v1686_v28 = vpop.f32.mrb[13].mxu0 }
 0x2cd   :  { %v1687_v12 = vadd.f32 %v4168_v47, %v1686_v28  ;;  %v2491_v50 = vpop.f32.mrb[14].mxu0 }
 0x2ce   :  { %v1779_v48 = vmax.f32 %v1695_v60, 0.0  ;;  %v1698_v53 = vadd.f32 %v2491_v50, %v4168_v47  ;;  %v1689_v15 = vpop.f32.mrb[15].mxu0 }
 0x2cf   :  { %v1777_v4 = vmax.f32 %v1687_v12, 0.0  ;;  %v1690_v35 = vadd.f32 %v4168_v47, %v1689_v15 }
 0x2d0   :  { %v1881_v34 = vrot.slane %v1779_v48, 4  ;;  %v1780_v26 = vmax.f32 %v1698_v53, 0.0  ;;  %v2506_v30 = vpop.f32.mrb[12].mxu1 }
 0x2d1   :  { %v1869_v33 = vrot.slane %v1777_v4, 4  ;;  %v1778_v5 = vmax.f32 %v1690_v35, 0.0  ;;  %v1759_v10 = vadd.f32 %v2506_v30, %v4168_v47  ;;  %v1750_v41 = vpop.f32.mrb[13].mxu1 }
 0x2d2   :  { %v1882_v8 = vmax.f32 %v1779_v48, %v1881_v34  ;;  %v1887_v52 = vrot.slane %v1780_v26, 4  ;;  %v1751_v17 = vadd.f32 %v4168_v47, %v1750_v41  ;;  %v2507_v21 = vpop.f32.mrb[14].mxu1 }
 0x2d3   :  { %v1870_v20 = vmax.f32 %v1777_v4, %v1869_v33  ;;  %v1875_v55 = vrot.slane %v1778_v5, 4  ;;  %v1795_v19 = vmax.f32 %v1759_v10, 0.0  ;;  %v1762_v22 = vadd.f32 %v2507_v21, %v4168_v47  ;;  %v1753_v56 = vpop.f32.mrb[15].mxu1 }
 0x2d4   :  { %v1883_v2 = vrot.slane %v1882_v8, 2  ;;  %v1888_v0 = vmax.f32 %v1780_v26, %v1887_v52  ;;  %v1793_v27 = vmax.f32 %v1751_v17, 0.0  ;;  %v1754_v62 = vadd.f32 %v4168_v47, %v1753_v56 }
 0x2d5   :  { %v1871_v59 = vrot.slane %v1870_v20, 2  ;;  %v1876_v45 = vmax.f32 %v1778_v5, %v1875_v55  ;;  %v1977_v37 = vrot.slane %v1795_v19, 4  ;;  %v1796_v9 = vmax.f32 %v1762_v22, 0.0 }
 0x2d6   :  { %v1884_v44 = vmax.f32 %v1882_v8, %v1883_v2  ;;  %v1889_v1 = vrot.slane %v1888_v0, 2  ;;  %v1965_v43 = vrot.slane %v1793_v27, 4  ;;  %v1794_v25 = vmax.f32 %v1754_v62, 0.0 }
 0x2d7   :  { %v1872_v14 = vmax.f32 %v1870_v20, %v1871_v59  ;;  %v1877_v23 = vrot.slane %v1876_v45, 2  ;;  %v1978_v40 = vmax.f32 %v1795_v19, %v1977_v37  ;;  %v1983_v6 = vrot.slane %v1796_v9, 4 }
 0x2d8   :  { %v1885_v7 = vrot.slane %v1884_v44, 1  ;;  %v1890_v63 = vmax.f32 %v1888_v0, %v1889_v1  ;;  %v1966_v49 = vmax.f32 %v1793_v27, %v1965_v43  ;;  %v1971_v46 = vrot.slane %v1794_v25, 4 }
 0x2d9   :  { %v1873_v31 = vrot.slane %v1872_v14, 1  ;;  %v1878_v58 = vmax.f32 %v1876_v45, %v1877_v23  ;;  %v1979_v36 = vrot.slane %v1978_v40, 2  ;;  %v1984_v47 = vmax.f32 %v1796_v9, %v1983_v6 }
 0x2da   :  { %v1886_v11 = vmax.f32 %v1884_v44, %v1885_v7  ;;  %v1891_v51 = vrot.slane %v1890_v63, 1  ;;  %v1967_v61 = vrot.slane %v1966_v49, 2  ;;  %v1972_v24 = vmax.f32 %v1794_v25, %v1971_v46 }
 0x2db   :  { %v1874_v54 = vmax.f32 %v1872_v14, %v1873_v31  ;;  %v1879_v29 = vrot.slane %v1878_v58, 1  ;;  %v1980_v16 = vmax.f32 %v1978_v40, %v1979_v36  ;;  %v1985_v38 = vrot.slane %v1984_v47, 2 }
 0x2dc   :  { %v1892_v3 = vmax.f32 %v1890_v63, %v1891_v51  ;;  %v1968_v57 = vmax.f32 %v1966_v49, %v1967_v61  ;;  %v1973_v13 = vrot.slane %v1972_v24, 2  ;;  %v2281_v12 = vpack.c.bf16 %v1886_v11, %v1886_v11 }
 0x2dd   :  { %v2279_v32 = vpack.c.bf16 %v1874_v54, %v1874_v54  ;;  %v1880_v42 = vmax.f32 %v1878_v58, %v1879_v29  ;;  %v1981_v60 = vrot.slane %v1980_v16, 1  ;;  %v1986_v28 = vmax.f32 %v1984_v47, %v1985_v38 }
 0x2de   :  { %v2282_v50 = vpack.c.bf16 %v1892_v3, %v1892_v3  ;;  %v1969_v48 = vrot.slane %v1968_v57, 1  ;;  %v1974_v53 = vmax.f32 %v1972_v24, %v1973_v13  ;;  %v2131_v41 = vunpack.c.l.b16 %v2281_v12 }
 0x2df   :  { %v2129_v15 = vunpack.c.l.b16 %v2279_v32  ;;  %v2280_v4 = vpack.c.bf16 %v1880_v42, %v1880_v42  ;;  %v1982_v35 = vmax.f32 %v1980_v16, %v1981_v60  ;;  %v1987_v34 = vrot.slane %v1986_v28, 1 }
 0x2e0   :  { %v1970_v26 = vmax.f32 %v1968_v57, %v1969_v48  ;;  %v1975_v30 = vrot.slane %v1974_v53, 1  ;;  %v2132_v17 = vunpack.c.l.b16 %v2282_v50 }
 0x2e1   :  { %v2166_v33 = vsel %vm2155_vm4, %v2129_v15, %v4219_v39  ;;  %v2130_v5 = vunpack.c.l.b16 %v2280_v4  ;;  %v1988_v10 = vmax.f32 %v1986_v28, %v1987_v34  ;;  %v2297_v20 = vpack.c.bf16 %v1982_v35, %v1982_v35 }
 0x2e2   :  { %v2295_v8 = vpack.c.bf16 %v1970_v26, %v1970_v26  ;;  %v1976_v52 = vmax.f32 %v1974_v53, %v1975_v30 }
 0x2e3   :  { %v2167_v21 = vsel %vm2157_vm5, %v2130_v5, %v2166_v33  ;;  %v2298_v19 = vpack.c.bf16 %v1988_v10, %v1988_v10  ;;  %v2147_v62 = vunpack.c.l.b16 %v2297_v20 }
 0x2e4   :  { %v2145_v55 = vunpack.c.l.b16 %v2295_v8  ;;  %v2296_v22 = vpack.c.bf16 %v1976_v52, %v1976_v52  ;;  %v2168_v56 = vsel %vm2159_vm6, %v2131_v41, %v2167_v21 }
 0x2e5   :  { %v2169_v2 = vsel %vm2161_vm7, %v2132_v17, %v2168_v56  ;;  %v2148_v59 = vunpack.c.l.b16 %v2298_v19 }
 0x2e6   :  { %v2180_v0 = vsel %vm2155_vm4, %v2145_v55, %v4214_v18  ;;  %v2146_v39 = vunpack.c.l.b16 %v2296_v22  ;;  %v2185_v27 = vpack.c.b16 %v2169_v2, %v2169_v2 }
 0x2e8   :  { %v2181_v45 = vsel %vm2157_vm5, %v2146_v39, %v2180_v0  ;;  %2193 = vst [vmem:[#allocation14 + $0x4] sm:$0xf] %v2185_v27 }
 0x2e9   :  { %v2182_v37 = vsel %vm2159_vm6, %v2147_v62, %v2181_v45 }
 0x2ea   :  { %v2183_v9 = vsel %vm2161_vm7, %v2148_v59, %v2182_v37 }
 0x2eb   :  { %v2187_v44 = vpack.c.b16 %v2183_v9, %v2183_v9 }
 0x2ed   :  { %2195 = vst [vmem:[#allocation14 + $0xc] sm:$0xf] %v2187_v44 }
 0x2ee   :  { %3194 = shalt.err (!%p3191_p4)
}
 0x2ef   :  { %s3195_s18 = scalar_lea.hbm %s4261_s7, 256 }
 0x2f0   :  { %p3196_p5 = scmp.ne.s32.totalorder %s4261_s7, %s3195_s18  ;;  %p3199_p6 = scmp.lt.u32.totalorder %s3195_s18, %s4261_s7 }
 0x2f2   :  { %p3201_p7 = pnand %p3199_p6, %p3196_p5 }
 0x2f4   :  { %3204 = shalt.err (!%p3201_p7)
}
 0x2f5   :  { %2207 = dma.vmem_to_hbm [thread:$0]  %s2202_s0, 256, %s4261_s7, [#allocation4], %s3217_s13, %s3217_s13, %s3218_s14  }
 0x2f6   :  { %3213 = dma.done.wait [#allocation4], 256  }
 0x2f7   :  { %3214 = vsyncadd [#allocation4], 4294967040 }
 0x2f8   :  { %2211 = vsyncpa [#allocation3], 1 }
 0x2f9   :  { %2212 = vsyncpa [#allocation6], 1 }
 0x2fa   :  { %2213 = vsyncpa [#allocation9], 1 }
 0x2fb   :  { %2214 = vsyncpa [#allocation12], 1 }
 0x2fc   :  { %2215 = vsyncpa [#allocation4], 1 }

// kernel: custom-call.17
= control target key start
LH: loop header
LB: loop body
LE: loop exit
PB: predicated region body
PF: predicated region fallthrough
CT: control target
= control target key end

     0   :  { %s6_s0 = inlined_call_operand.vmem [shape: f32[2,16], index: 0, kind: output, shape index: {}]  }

// kernel: a_call__.5
= control target key start
LH: loop header
LB: loop body
LE: loop exit
PB: predicated region body
PF: predicated region fallthrough
CT: control target
= control target key end

     0   :  { %12 = vsyncpa [#allocation3], 0  ;;  %s1968_s0 = inlined_call_operand.hbm [shape: bf16[128,3], index: 0, kind: input, shape index: {}]   ;;  %s1969_s1 = inlined_call_operand.hbm [shape: bf16[128,32], index: 1, kind: input, shape index: {}]   ;;  %s1970_s2 = inlined_call_operand.hbm [shape: f32[3,32], index: 2, kind: input, shape index: {}]   ;;  %s1971_s3 = inlined_call_operand.hbm [shape: bf16[32,32], index: 3, kind: input, shape index: {}]   ;;  %s1972_s4 = inlined_call_operand.hbm [shape: f32[1,32], index: 4, kind: input, shape index: {}]   ;;  %s1973_s5 = inlined_call_operand.hbm [shape: bf16[32,128], index: 5, kind: input, shape index: {}]   ;;  %s1974_s6 = inlined_call_operand.hbm [shape: f32[1,128], index: 6, kind: input, shape index: {}]   ;;  %s1975_s7 = inlined_call_operand.hbm [shape: bf16[16,128], index: 7, kind: output, shape index: {}]  }
   0x1   :  { %13 = vsyncpa [#allocation6], 0 }
   0x2   :  { %14 = vsyncpa [#allocation9], 0 }
   0x3   :  { %15 = vsyncpa [#allocation12], 0 }
   0x4   :  { %16 = vsyncpa [#allocation4], 0  ;;  %s1600_s24 = smov [#allocation5]   ;;  %s1601_s26 = smov [#allocation8]  }
   0x5   :  { %s34_s25 = sshll.u32 %s1600_s24, 4  ;;  %s56_s27 = sshll.u32 %s1601_s26, 4  ;;  %s35_s25 = int_to_ptr.vmem [resolvable:$true] %s34_s25  ;;  %s1653_s27 = int_to_ptr.vmem [resolvable:$true] %s56_s27 }
   0x6   :  { %s1414_s30 = scalar_lea.hbm %s1969_s1, 1024 }
   0x7   :  { %p1415_p0 = scmp.ne.s32.totalorder %s1969_s1, %s1414_s30  ;;  %p1418_p1 = scmp.lt.u32.totalorder %s1414_s30, %s1969_s1 }
   0x9   :  { %p1420_p2 = pnand %p1418_p1, %p1415_p0 }
   0xb   :  { %1423 = shalt.err (!%p1420_p2)
}
   0xc   :  { %s1424_s12 = scalar_lea.vmem %s35_s25, 1024  ;;  %p1429_p4 = scmp.lt.s32.totalorder %s35_s25, %s35_s25 }
   0xd   :  { %p1425_p3 = scmp.ne.s32.totalorder %s35_s25, %s1424_s12  ;;  %p1430_p5 = scmp.lt.s32.totalorder %s1424_s12, %s1424_s12 }
   0xf   :  { %p1431_p6 = por %p1430_p5, %p1429_p4 }
  0x11   :  { %p1432_p7 = pnand %p1431_p6, %p1425_p3 }
  0x13   :  { %1435 = shalt.err (!%p1432_p7)
}
  0x14   :  { %s1602_s13 = smov 64   ;;  %s1603_s14 = smov 4  }
  0x15   :  { %40 = dma.hbm_to_vmem [thread:$0]  %s1969_s1, 1024, %s35_s25, [#allocation6], %s1602_s13, %s1602_s13, %s1603_s14  }
  0x16   :  { %s1436_s19 = scalar_lea.hbm %s1971_s3, 256 }
  0x17   :  { %p1437_p8 = scmp.ne.s32.totalorder %s1971_s3, %s1436_s19  ;;  %p1440_p9 = scmp.lt.u32.totalorder %s1436_s19, %s1971_s3 }
  0x19   :  { %p1442_p10 = pnand %p1440_p9, %p1437_p8 }
  0x1b   :  { %1445 = shalt.err (!%p1442_p10)
}
  0x1c   :  { %s1446_s24 = scalar_lea.vmem %s1653_s27, 256  ;;  %p1451_p12 = scmp.lt.s32.totalorder %s1653_s27, %s1653_s27 }
  0x1d   :  { %p1447_p11 = scmp.ne.s32.totalorder %s1653_s27, %s1446_s24  ;;  %p1452_p13 = scmp.lt.s32.totalorder %s1446_s24, %s1446_s24 }
  0x1f   :  { %p1453_p0 = por %p1452_p13, %p1451_p12 }
  0x21   :  { %p1454_p1 = pnand %p1453_p0, %p1447_p11 }
  0x23   :  { %1457 = shalt.err (!%p1454_p1)
}
  0x24   :  { %62 = dma.hbm_to_vmem [thread:$0]  %s1971_s3, 256, %s1653_s27, [#allocation9], %s1602_s13, %s1602_s13, %s1603_s14  }
  0x25   :  { %s1604_s26 = smov [#allocation11]   ;;  %s1605_s29 = smov [#allocation2]  }
  0x26   :  { %s78_s28 = sshll.u32 %s1604_s26, 4  ;;  %s22_s30 = sshll.u32 %s1605_s29, 4  ;;  %s79_s28 = int_to_ptr.vmem [resolvable:$true] %s78_s28  ;;  %s1690_s30 = int_to_ptr.vmem [resolvable:$true] %s22_s30 }
  0x27   :  { %s1458_s10 = scalar_lea.hbm %s1973_s5, 256 }
  0x28   :  { %p1459_p2 = scmp.ne.s32.totalorder %s1973_s5, %s1458_s10  ;;  %p1462_p3 = scmp.lt.u32.totalorder %s1458_s10, %s1973_s5 }
  0x2a   :  { %p1464_p4 = pnand %p1462_p3, %p1459_p2 }
  0x2c   :  { %1467 = shalt.err (!%p1464_p4)
}
  0x2d   :  { %s1468_s3 = scalar_lea.vmem %s79_s28, 256  ;;  %p1473_p6 = scmp.lt.s32.totalorder %s79_s28, %s79_s28 }
  0x2e   :  { %p1469_p5 = scmp.ne.s32.totalorder %s79_s28, %s1468_s3  ;;  %p1474_p7 = scmp.lt.s32.totalorder %s1468_s3, %s1468_s3 }
  0x30   :  { %p1475_p8 = por %p1474_p7, %p1473_p6 }
  0x32   :  { %p1476_p9 = pnand %p1475_p8, %p1469_p5 }
  0x34   :  { %1479 = shalt.err (!%p1476_p9)
}
  0x35   :  { %84 = dma.hbm_to_vmem [thread:$0]  %s1973_s5, 256, %s79_s28, [#allocation12], %s1602_s13, %s1602_s13, %s1603_s14  }
  0x36   :  { %s1480_s20 = scalar_lea.hbm %s1968_s0, 1024 }
  0x37   :  { %p1481_p10 = scmp.ne.s32.totalorder %s1968_s0, %s1480_s20  ;;  %p1484_p11 = scmp.lt.u32.totalorder %s1480_s20, %s1968_s0 }
  0x39   :  { %p1486_p12 = pnand %p1484_p11, %p1481_p10 }
  0x3b   :  { %1489 = shalt.err (!%p1486_p12)
}
  0x3c   :  { %s1490_s1 = scalar_lea.vmem %s1690_s30, 1024  ;;  %p1495_p0 = scmp.lt.s32.totalorder %s1690_s30, %s1690_s30 }
  0x3d   :  { %p1491_p13 = scmp.ne.s32.totalorder %s1690_s30, %s1490_s1  ;;  %p1496_p1 = scmp.lt.s32.totalorder %s1490_s1, %s1490_s1 }
  0x3f   :  { %p1497_p2 = por %p1496_p1, %p1495_p0 }
  0x41   :  { %p1498_p3 = pnand %p1497_p2, %p1491_p13 }
  0x43   :  { %1501 = shalt.err (!%p1498_p3)
}
  0x44   :  { %28 = dma.hbm_to_vmem [thread:$0]  %s1968_s0, 1024, %s1690_s30, [#allocation3], %s1602_s13, %s1602_s13, %s1603_s14  }
  0x45   :  { %s1606_s26 = smov [#allocation7]   ;;  %s1607_s29 = smov [#allocation10]  }
  0x46   :  { %s47_s28 = sshll.u32 %s1606_s26, 4  ;;  %s69_s8 = sshll.u32 %s1607_s29, 4  ;;  %s48_s28 = int_to_ptr.vmem [resolvable:$true] %s47_s28  ;;  %s70_s8 = int_to_ptr.vmem [resolvable:$true] %s69_s8 }
  0x47   :  { %s1502_s11 = scalar_lea.hbm %s1970_s2, 64 }
  0x48   :  { %p1503_p4 = scmp.ne.s32.totalorder %s1970_s2, %s1502_s11  ;;  %p1506_p5 = scmp.lt.u32.totalorder %s1502_s11, %s1970_s2 }
  0x4a   :  { %p1508_p6 = pnand %p1506_p5, %p1503_p4 }
  0x4c   :  { %1511 = shalt.err (!%p1508_p6)
}
  0x4d   :  { %s1512_s0 = scalar_lea.vmem %s48_s28, 64  ;;  %p1517_p8 = scmp.lt.s32.totalorder %s48_s28, %s48_s28 }
  0x4e   :  { %p1513_p7 = scmp.ne.s32.totalorder %s48_s28, %s1512_s0  ;;  %p1518_p9 = scmp.lt.s32.totalorder %s1512_s0, %s1512_s0 }
  0x50   :  { %p1519_p10 = por %p1518_p9, %p1517_p8 }
  0x52   :  { %p1520_p11 = pnand %p1519_p10, %p1513_p7 }
  0x54   :  { %1523 = shalt.err (!%p1520_p11)
}
  0x55   :  { %50 = dma.hbm_to_vmem [thread:$0]  %s1970_s2, 64, %s48_s28, [#allocation6]  }
  0x56   :  { %s1524_s19 = scalar_lea.hbm %s1972_s4, 16 }
  0x57   :  { %p1525_p12 = scmp.ne.s32.totalorder %s1972_s4, %s1524_s19  ;;  %p1528_p13 = scmp.lt.u32.totalorder %s1524_s19, %s1972_s4 }
  0x59   :  { %p1530_p0 = pnand %p1528_p13, %p1525_p12 }
  0x5b   :  { %1533 = shalt.err (!%p1530_p0)
}
  0x5c   :  { %s1534_s24 = scalar_lea.vmem %s70_s8, 16  ;;  %s1538_s1 = scalar_lea.vmem %s70_s8, 32 }
  0x5d   :  { %p1535_p1 = scmp.ne.s32.totalorder %s70_s8, %s1534_s24  ;;  %p1539_p2 = scmp.lt.s32.totalorder %s70_s8, %s70_s8 }
  0x5e   :  { %p1540_p3 = scmp.lt.s32.totalorder %s1538_s1, %s1534_s24 }
  0x60   :  { %p1541_p4 = por %p1540_p3, %p1539_p2 }
  0x62   :  { %p1542_p5 = pnand %p1541_p4, %p1535_p1 }
  0x64   :  { %1545 = shalt.err (!%p1542_p5)
}
  0x65   :  { %72 = dma.hbm_to_vmem [thread:$0]  %s1972_s4, 16, %s70_s8, [#allocation9]  }
  0x66   :  { %s1608_s25 = smov [#allocation13]   ;;  %s1546_s9 = scalar_lea.hbm %s1974_s6, 16 }
  0x67   :  { %s91_s26 = sshll.u32 %s1608_s25, 4  ;;  %p1547_p6 = scmp.ne.s32.totalorder %s1974_s6, %s1546_s9  ;;  %s92_s26 = int_to_ptr.vmem [resolvable:$true] %s91_s26 }
  0x68   :  { %p1550_p7 = scmp.lt.u32.totalorder %s1546_s9, %s1974_s6 }
  0x6a   :  { %p1552_p8 = pnand %p1550_p7, %p1547_p6 }
  0x6c   :  { %1555 = shalt.err (!%p1552_p8)
}
  0x6d   :  { %s1556_s16 = scalar_lea.vmem %s92_s26, 16  ;;  %s1560_s4 = scalar_lea.vmem %s92_s26, 32 }
  0x6e   :  { %p1557_p9 = scmp.ne.s32.totalorder %s92_s26, %s1556_s16  ;;  %p1561_p10 = scmp.lt.s32.totalorder %s92_s26, %s92_s26 }
  0x6f   :  { %p1562_p11 = scmp.lt.s32.totalorder %s1560_s4, %s1556_s16 }
  0x71   :  { %p1563_p12 = por %p1562_p11, %p1561_p10 }
  0x73   :  { %p1564_p13 = pnand %p1563_p12, %p1557_p9 }
  0x75   :  { %1567 = shalt.err (!%p1564_p13)
}
  0x76   :  { %94 = dma.hbm_to_vmem [thread:$0]  %s1974_s6, 16, %s92_s26, [#allocation12]  }
  0x77   :  { %1590 = dma.done.wait [#allocation3], 1024  }
  0x78   :  { %1591 = vsyncadd [#allocation3], 4294966272 }
  0x79   :  { %1592 = dma.done.wait [#allocation6], 1088  }
  0x7a   :  { %1593 = vsyncadd [#allocation6], 4294966208 }
  0x7b   :  { %1594 = dma.done.wait [#allocation9], 272  }
  0x7c   :  { %1595 = vsyncadd [#allocation9], 4294967024 }
  0x7d   :  { %1596 = dma.done.wait [#allocation12], 272  }
  0x7e   :  { %1597 = vsyncadd [#allocation12], 4294967024  ;;  %v1609_v0 = vmov 0   ;;  %v1402_v1 = vld [vmem:[#allocation8] sm:$0xff]   ;;  %v1403_v2 = vld [vmem:[#allocation8 + $0x8] sm:$0xff]   ;;  %vm522_vm0 = vcmask 261120   ;;  %v230_v55 = vlaneseq }
  0x7f   :  { %1264 = vset.pattern.permute.xlu0 %v1609_v0  ;;  %1276 = vset.pattern.permute.xlu1 %v1609_v0  ;;  %v1404_v3 = vld [vmem:[#allocation5] sm:$0xff]   ;;  %v1405_v4 = vld [vmem:[#allocation5 + $0x8] sm:$0xff]   ;;  %v1406_v5 = vld [vmem:[#allocation5 + $0x10] sm:$0xff]   ;;  %v1610_v19 = vmov 1   ;;  %v1611_v26 = vmov 2   ;;  %vm1043_vm1 = vcmask 1041409  }
  0x80   :  { %1211 = vmatprep.subr.bf16.mxu0 %v1402_v1  ;;  %1215 = vmatprep.mubr.msk.bf16.mxu0 %vm522_vm0, %v1404_v3  ;;  %v1153_v6 = vld [vmem:[#allocation2] sm:$0xff]   ;;  %v1184_v7 = vld [vmem:[#allocation2 + $0x8] sm:$0xff]   ;;  %v1407_v14 = vld [vmem:[#allocation5 + $0x18] sm:$0xff]   ;;  %v231_v57 = vshrl.u32 %v230_v55, 7  ;;  %vm1045_vm2 = vcmask 1042434   ;;  %vm1047_vm3 = vcmask 1043459  }
  0x81   :  { %1212 = vmatpush3.bf16.msra.mxu0 %v1402_v1  ;;  %v1154_v8 = vunpack.c.l.bf16 %v1153_v6  ;;  %v1155_v9 = vunpack.c.h.bf16 %v1153_v6  ;;  %v1158_v10 = vunpack.c.l.bf16 %v1184_v7  ;;  %v1159_v11 = vunpack.c.h.bf16 %v1184_v7  ;;  %v1186_v15 = vld [vmem:[#allocation2 + $0x18] sm:$0xff]   ;;  %v1408_v16 = vld [vmem:[#allocation5 + $0x20] sm:$0xff]   ;;  %v1185_v20 = vld [vmem:[#allocation2 + $0x10] sm:$0xff]   ;;  %s1612_s6 = smov [#allocation14]  }
  0x82   :  { %1213 = vmatprep.subr.bf16.mxu0 %v1403_v2  ;;  %v1166_v17 = vunpack.c.l.bf16 %v1186_v15  ;;  %v1167_v18 = vunpack.c.h.bf16 %v1186_v15  ;;  %v1409_v22 = vld [vmem:[#allocation5 + $0x28] sm:$0xff]   ;;  %v1410_v23 = vld [vmem:[#allocation5 + $0x30] sm:$0xff]   ;;  %v1162_v24 = vunpack.c.l.bf16 %v1185_v20  ;;  %v1163_v25 = vunpack.c.h.bf16 %v1185_v20  ;;  %v1411_v29 = vld [vmem:[#allocation5 + $0x38] sm:$0xff]   ;;  %s1075_s0 = sshll.u32 %s1612_s6, 4  ;;  %s1076_s0 = int_to_ptr.vmem [resolvable:$true] %s1075_s0 }
  0x83   :  { %v1265_v12 = vpack.i.bf16 %v1155_v9, %v1154_v8  ;;  %v1277_v13 = vpack.i.bf16 %v1159_v11, %v1158_v10  ;;  %v1188_v28 = vld [vmem:[#allocation2 + $0x28] sm:$0xff]   ;;  %v1190_v33 = vld [vmem:[#allocation2 + $0x38] sm:$0xff]   ;;  %v1187_v34 = vld [vmem:[#allocation2 + $0x20] sm:$0xff]   ;;  %v232_v60 = vsub.s32 0, %v231_v57  ;;  %v316_v61 = vsub.s32 1, %v231_v57  ;;  %s1568_s30 = scalar_lea.vmem %s1076_s0, 128  ;;  %p1573_p1 = scmp.lt.s32.totalorder %s1076_s0, %s1076_s0 }
  0x84   :  { %v1307_v21 = vpack.i.bf16 %v1167_v18, %v1166_v17  ;;  %v1295_v27 = vpack.i.bf16 %v1163_v25, %v1162_v24  ;;  %v1174_v30 = vunpack.c.l.bf16 %v1188_v28  ;;  %v1175_v31 = vunpack.c.h.bf16 %v1188_v28  ;;  %v1189_v41 = vld [vmem:[#allocation2 + $0x30] sm:$0xff]   ;;  %v1413_v46 = vld [vmem:[#allocation11 + $0x8] sm:$0xff]   ;;  %p1569_p0 = scmp.ne.s32.totalorder %s1076_s0, %s1568_s30  ;;  %p1574_p2 = scmp.lt.s32.totalorder %s1568_s30, %s1568_s30 }
  0x85   :  { %1214 = vmatpush3.bf16.msra.mxu0 %v1403_v2  ;;  %1266 = vperm.xlu0 %1264, %v1265_v12   ;;  %v1182_v35 = vunpack.c.l.bf16 %v1190_v33  ;;  %v1183_v36 = vunpack.c.h.bf16 %v1190_v33  ;;  %v1170_v37 = vunpack.c.l.bf16 %v1187_v34  ;;  %v1171_v38 = vunpack.c.h.bf16 %v1187_v34  ;;  %v1412_v45 = vld [vmem:[#allocation11] sm:$0xff]   ;;  %v133_v62 = vld [vmem:[#allocation7] sm:$0x7] }
  0x86   :  { %1278 = vperm.xlu1 %1276, %v1277_v13   ;;  %v1357_v32 = vpack.i.bf16 %v1175_v31, %v1174_v30  ;;  %v1178_v42 = vunpack.c.l.bf16 %v1189_v41  ;;  %v1179_v43 = vunpack.c.h.bf16 %v1189_v41  ;;  %1231 = vmatprep.subr.bf16.mxu1 %v1412_v45  ;;  %v1788_v1 = vrot.slane %v133_v62, %v316_v61  ;;  %p1575_p3 = por %p1574_p2, %p1573_p1 }
  0x87   :  { %v1380_v39 = vpack.i.bf16 %v1183_v36, %v1182_v35  ;;  %v1335_v40 = vpack.i.bf16 %v1171_v38, %v1170_v37  ;;  %1232 = vmatpush3.bf16.msra.mxu1 %v1412_v45  ;;  %v416_v11 = vsub.s32 2, %v231_v57  ;;  %vm1049_vm4 = vcmask 1044484  }
  0x88   :  { %1216 = vmatmul.mubr.msk.bf16.vlgmr.msra.gmra.mrb[0].mxu0 %vm522_vm0, %v1405_v4  ;;  %v1369_v44 = vpack.i.bf16 %v1179_v43, %v1178_v42  ;;  %1233 = vmatprep.subr.bf16.mxu1 %v1413_v46  ;;  %vm1051_vm5 = vcmask 1045509   ;;  %vm1053_vm6 = vcmask 1046534   ;;  %vm1055_vm7 = vcmask 1047559   ;;  %p1576_p4 = pnand %p1575_p3, %p1569_p0 }
  0x89   :  { %1219 = vmatprep.mubr.msk.bf16.mxu0 %vm522_vm0, %v1406_v5  ;;  %1270 = vset.pattern.permute.xlu0 %v1610_v19 }
  0x8a   :  { %1282 = vset.pattern.permute.xlu1 %v1610_v19  ;;  %1272 = vperm.xlu0 %1270, %v1265_v12  }
  0x8b   :  { %1284 = vperm.xlu1 %1282, %v1277_v13   ;;  %1234 = vmatpush3.bf16.msra.mxu1 %v1413_v46 }
  0x8e   :  { %1306 = vset.pattern.permute.xlu0 %v1609_v0 }
  0x8f   :  { %1288 = vset.pattern.permute.xlu1 %v1611_v26  ;;  %1308 = vperm.xlu0 %1306, %v1307_v21  }
  0x90   :  { %1220 = vmatmul.mubr.msk.bf16.gmra.mrb[4].mxu0 %vm522_vm0, %v1407_v14  ;;  %1290 = vperm.xlu1 %1288, %v1265_v12  }
  0x91   :  { %1223 = vmatprep.mubr.msk.bf16.mxu0 %vm522_vm0, %v1408_v16 }
  0x93   :  { %1312 = vset.pattern.permute.xlu0 %v1611_v26 }
  0x94   :  { %1294 = vset.pattern.permute.xlu1 %v1609_v0  ;;  %1314 = vperm.xlu0 %1312, %v1277_v13  }
  0x95   :  { %1296 = vperm.xlu1 %1294, %v1295_v27  }
  0x98   :  { %1224 = vmatmul.mubr.msk.bf16.gmra.mrb[8].mxu0 %vm522_vm0, %v1409_v22  ;;  %1330 = vperm.xlu0 %1312, %v1307_v21  }
  0x99   :  { %1227 = vmatprep.mubr.msk.bf16.mxu0 %vm522_vm0, %v1410_v23  ;;  %1300 = vset.pattern.permute.xlu1 %v1610_v19  ;;  %v1802_v23 = vrot.slane %v133_v62, %v416_v11 }
  0x9a   :  { %1302 = vperm.xlu1 %1300, %v1295_v27  }
  0x9c   :  { %1358 = vperm.xlu0 %1312, %v1357_v32  }
  0x9e   :  { %1319 = vperm.xlu1 %1300, %v1307_v21  }
  0xa0   :  { %1228 = vmatmul.mubr.msk.bf16.gmra.mrb[12].mxu0 %vm522_vm0, %v1411_v29  ;;  %1362 = vset.pattern.permute.xlu0 %v1609_v0 }
  0xa1   :  { %1364 = vperm.xlu0 %1362, %v1357_v32  }
  0xa2   :  { %1323 = vset.pattern.permute.xlu1 %v1611_v26 }
  0xa3   :  { %1325 = vperm.xlu1 %1323, %v1295_v27  }
  0xa5   :  { %1381 = vperm.xlu0 %1362, %v1380_v39  }
  0xa7   :  { %1334 = vset.pattern.permute.xlu1 %v1609_v0 }
  0xa8   :  { %1336 = vperm.xlu1 %1334, %v1335_v40  }
  0xa9   :  { %1396 = vset.pattern.permute.xlu0 %v1611_v26 }
  0xaa   :  { %1398 = vperm.xlu0 %1396, %v1380_v39  }
  0xac   :  { %1340 = vset.pattern.permute.xlu1 %v1610_v19 }
  0xad   :  { %1342 = vperm.xlu1 %1340, %v1335_v40  }
  0xb1   :  { %1347 = vperm.xlu1 %1340, %v1357_v32  }
  0xb5   :  { %1351 = vset.pattern.permute.xlu1 %v1611_v26 }
  0xb6   :  { %1353 = vperm.xlu1 %1351, %v1335_v40  }
  0xba   :  { %1368 = vset.pattern.permute.xlu1 %v1609_v0  ;;  %v1786_v0 = vrot.slane %v133_v62, %v232_v60 }
  0xbb   :  { %1370 = vperm.xlu1 %1368, %v1369_v44  }
  0xbf   :  { %1374 = vset.pattern.permute.xlu1 %v1610_v19 }
  0xc0   :  { %1376 = vperm.xlu1 %1374, %v1369_v44  }
  0xc4   :  { %1386 = vperm.xlu1 %1374, %v1380_v39  }
  0xc8   :  { %1390 = vset.pattern.permute.xlu1 %v1611_v26 }
  0xc9   :  { %1392 = vperm.xlu1 %1390, %v1369_v44  }
 0x104   :  { %v1267_v52 = vpop.permute.xlu0 %1266 }
 0x105   :  { %v1279_v47 = vpop.permute.xlu1 %1278  ;;  %v1269_v3 = vunpack.i.h.bf16 %v1267_v52  ;;  %v1268_v4 = vunpack.i.l.bf16 %v1267_v52 }
 0x106   :  { %v1281_v7 = vunpack.i.h.bf16 %v1279_v47  ;;  %v1280_v8 = vunpack.i.l.bf16 %v1279_v47 }
 0x107   :  { %v235_v13 = vmul.f32 %v1269_v3, %v1786_v0  ;;  %v234_v14 = vmul.f32 %v1268_v4, %v1786_v0 }
 0x108   :  { %v237_v17 = vmul.f32 %v1281_v7, %v1786_v0  ;;  %v236_v18 = vmul.f32 %v1280_v8, %v1786_v0 }
 0x109   :  { %v1273_v54 = vpop.permute.xlu0 %1272 }
 0x10a   :  { %v1285_v48 = vpop.permute.xlu1 %1284  ;;  %v1275_v5 = vunpack.i.h.bf16 %v1273_v54  ;;  %v1274_v6 = vunpack.i.l.bf16 %v1273_v54 }
 0x10b   :  { %v1287_v9 = vunpack.i.h.bf16 %v1285_v48  ;;  %v1286_v10 = vunpack.i.l.bf16 %v1285_v48 }
 0x10c   :  { %v319_v15 = vmul.f32 %v1275_v5, %v1788_v1  ;;  %v318_v16 = vmul.f32 %v1274_v6, %v1788_v1 }
 0x10d   :  { %v321_v19 = vmul.f32 %v1287_v9, %v1788_v1  ;;  %v320_v20 = vmul.f32 %v1286_v10, %v1788_v1 }
 0x10e   :  { %v1309_v58 = vpop.permute.xlu0 %1308  ;;  %v334_v32 = vadd.f32 %v318_v16, %v234_v14  ;;  %v335_v33 = vadd.f32 %v319_v15, %v235_v13 }
 0x10f   :  { %v1291_v49 = vpop.permute.xlu1 %1290  ;;  %v1311_v22 = vunpack.i.h.bf16 %v1309_v58  ;;  %v1310_v26 = vunpack.i.l.bf16 %v1309_v58  ;;  %v336_v36 = vadd.f32 %v320_v20, %v236_v18  ;;  %v337_v37 = vadd.f32 %v321_v19, %v237_v17 }
 0x110   :  { %v1292_v24 = vunpack.i.l.bf16 %v1291_v49  ;;  %v1293_v27 = vunpack.i.h.bf16 %v1291_v49 }
 0x111   :  { %v241_v38 = vmul.f32 %v1311_v22, %v1786_v0  ;;  %v240_v42 = vmul.f32 %v1310_v26, %v1786_v0 }
 0x112   :  { %v418_v39 = vmul.f32 %v1292_v24, %v1802_v23  ;;  %v419_v43 = vmul.f32 %v1293_v27, %v1802_v23 }
 0x113   :  { %v1315_v63 = vpop.permute.xlu0 %1314 }
 0x114   :  { %v1778_v50 = vpop.permute.xlu1 %1296  ;;  %v1317_v28 = vunpack.i.h.bf16 %v1315_v63  ;;  %v1316_v29 = vunpack.i.l.bf16 %v1315_v63  ;;  %v434_v61 = vadd.f32 %v418_v39, %v334_v32  ;;  %v435_v5 = vadd.f32 %v419_v43, %v335_v33 }
 0x115   :  { %v1298_v34 = vunpack.i.l.bf16 %v1778_v50  ;;  %v1299_v40 = vunpack.i.h.bf16 %v1778_v50 }
 0x116   :  { %v421_v44 = vmul.f32 %v1317_v28, %v1802_v23  ;;  %v420_v45 = vmul.f32 %v1316_v29, %v1802_v23  ;;  %v1840_v28 = vld [vmem:[#allocation10] ss:$0 sm:$0xff] }
 0x117   :  { %v1331_v12 = vpop.permute.xlu0 %1330  ;;  %v238_v50 = vmul.f32 %v1298_v34, %v1786_v0  ;;  %v239_v57 = vmul.f32 %v1299_v40, %v1786_v0 }
 0x118   :  { %v1333_v49 = vunpack.i.h.bf16 %v1331_v12  ;;  %v1332_v52 = vunpack.i.l.bf16 %v1331_v12  ;;  %v436_v4 = vadd.f32 %v420_v45, %v336_v36  ;;  %v437_v12 = vadd.f32 %v421_v44, %v337_v37 }
 0x119   :  { %v1780_v51 = vpop.permute.xlu1 %1302 }
 0x11a   :  { %v1304_v35 = vunpack.i.l.bf16 %v1780_v51  ;;  %v1305_v41 = vunpack.i.h.bf16 %v1780_v51  ;;  %v425_v6 = vmul.f32 %v1333_v49, %v1802_v23  ;;  %v424_v7 = vmul.f32 %v1332_v52, %v1802_v23 }
 0x11b   :  { %v1359_v25 = vpop.permute.xlu0 %1358 }
 0x11c   :  { %v322_v51 = vmul.f32 %v1304_v35, %v1788_v1  ;;  %v1361_v54 = vunpack.i.h.bf16 %v1359_v25  ;;  %v1360_v55 = vunpack.i.l.bf16 %v1359_v25  ;;  %v323_v58 = vmul.f32 %v1305_v41, %v1788_v1 }
 0x11d   :  { %v1320_v53 = vpop.permute.xlu1 %1319 }
 0x11e   :  { %v1322_v30 = vunpack.i.h.bf16 %v1320_v53  ;;  %v1321_v31 = vunpack.i.l.bf16 %v1320_v53  ;;  %v1828_v10 = vmul.f32 %v1361_v54, %v1802_v23  ;;  %v1831_v11 = vmul.f32 %v1360_v55, %v1802_v23 }
 0x11f   :  { %v338_v13 = vadd.f32 %v322_v51, %v238_v50  ;;  %v339_v18 = vadd.f32 %v323_v58, %v239_v57 }
 0x120   :  { %v325_v47 = vmul.f32 %v1322_v30, %v1788_v1  ;;  %v324_v48 = vmul.f32 %v1321_v31, %v1788_v1  ;;  %v1365_v53 = vpop.permute.xlu0 %1364 }
 0x121   :  { %v1367_v62 = vunpack.i.h.bf16 %v1365_v53  ;;  %v1366_v63 = vunpack.i.l.bf16 %v1365_v53 }
 0x122   :  { %v1782_v56 = vpop.permute.xlu1 %1325  ;;  %v340_v8 = vadd.f32 %v324_v48, %v240_v42  ;;  %v341_v9 = vadd.f32 %v325_v47, %v241_v38 }
 0x123   :  { %v1327_v60 = vunpack.i.l.bf16 %v1782_v56  ;;  %v1328_v15 = vunpack.i.h.bf16 %v1782_v56  ;;  %v245_v20 = vmul.f32 %v1367_v62, %v1786_v0  ;;  %v244_v22 = vmul.f32 %v1366_v63, %v1786_v0 }
 0x124   :  { %v1382_v14 = vpop.permute.xlu0 %1381  ;;  %v440_v29 = vadd.f32 %v424_v7, %v340_v8  ;;  %v441_v56 = vadd.f32 %v425_v6, %v341_v9 }
 0x125   :  { %v422_v16 = vmul.f32 %v1327_v60, %v1802_v23  ;;  %v1384_v17 = vunpack.i.h.bf16 %v1382_v14  ;;  %v1383_v24 = vunpack.i.l.bf16 %v1382_v14  ;;  %v423_v36 = vmul.f32 %v1328_v15, %v1802_v23 }
 0x127   :  { %v1784_v59 = vpop.permute.xlu1 %1336  ;;  %v438_v39 = vadd.f32 %v422_v16, %v338_v13  ;;  %v1849_v40 = vmul.f32 %v1384_v17, %v1786_v0  ;;  %v439_v57 = vadd.f32 %v423_v36, %v339_v18 }
 0x128   :  { %v1338_v19 = vunpack.i.l.bf16 %v1784_v59  ;;  %v1339_v30 = vunpack.i.h.bf16 %v1784_v59 }
 0x129   :  { %v1859_v48 = vpop.permute.xlu0 %1398 }
 0x12a   :  { %v242_v41 = vmul.f32 %v1338_v19, %v1786_v0  ;;  %v243_v49 = vmul.f32 %v1339_v30, %v1786_v0  ;;  %v1401_v62 = vunpack.i.h.bf16 %v1859_v48  ;;  %v1400_v63 = vunpack.i.l.bf16 %v1859_v48 }
 0x12c   :  { %v1790_v2 = vpop.permute.xlu1 %1342 }
 0x12d   :  { %v1344_v25 = vunpack.i.l.bf16 %v1790_v2  ;;  %v1345_v31 = vunpack.i.h.bf16 %v1790_v2 }
 0x12f   :  { %v326_v43 = vmul.f32 %v1344_v25, %v1788_v1  ;;  %v327_v52 = vmul.f32 %v1345_v31, %v1788_v1 }
 0x130   :  { %v1800_v21 = vpop.permute.xlu1 %1347 }
 0x131   :  { %v1349_v26 = vunpack.i.l.bf16 %v1800_v21  ;;  %v1350_v32 = vunpack.i.h.bf16 %v1800_v21  ;;  %v1854_v21 = vmul.f32 %v1383_v24, %v1786_v0  ;;  %v342_v8 = vadd.f32 %v326_v43, %v242_v41 }
 0x133   :  { %v328_v44 = vmul.f32 %v1349_v26, %v1788_v1  ;;  %v329_v53 = vmul.f32 %v1350_v32, %v1788_v1 }
 0x135   :  { %v1814_v46 = vpop.permute.xlu1 %1353  ;;  %v344_v7 = vadd.f32 %v328_v44, %v244_v22  ;;  %v345_v14 = vadd.f32 %v329_v53, %v245_v20 }
 0x136   :  { %v1356_v51 = vunpack.i.h.bf16 %v1814_v46  ;;  %v1355_v54 = vunpack.i.l.bf16 %v1814_v46  ;;  %v343_v46 = vadd.f32 %v327_v52, %v243_v49 }
 0x137   :  { %v444_v31 = vadd.f32 %v1831_v11, %v344_v7 }
 0x138   :  { %v427_v15 = vmul.f32 %v1356_v51, %v1802_v23  ;;  %v426_v16 = vmul.f32 %v1355_v54, %v1802_v23 }
 0x13a   :  { %v1823_v3 = vpop.permute.xlu1 %1370  ;;  %v443_v41 = vadd.f32 %v427_v15, %v343_v46 }
 0x13b   :  { %v1372_v24 = vunpack.i.l.bf16 %v1823_v3  ;;  %v1373_v32 = vunpack.i.h.bf16 %v1823_v3 }
 0x13f   :  { %v1845_v35 = vpop.permute.xlu1 %1376 }
 0x140   :  { %v1378_v30 = vunpack.i.l.bf16 %v1845_v35 }
 0x15b   :  { %v1217_v27 = vpop.f32.mrb[0].mxu0 }
 0x15c   :  { %v646_v33 = vadd.f32 %v1217_v27, %v436_v4  ;;  %v581_v34 = vpop.f32.mrb[1].mxu0 }
 0x15d   :  { %v644_v37 = vadd.f32 %v581_v34, %v434_v61  ;;  %v1218_v38 = vpop.f32.mrb[2].mxu0  ;;  %v1387_v61 = vpop.permute.xlu1 %1386 }
 0x15e   :  { %v669_v59 = vadd.f32 %v1840_v28, %v646_v33  ;;  %v647_v42 = vadd.f32 %v1218_v38, %v437_v12  ;;  %v584_v2 = vpop.f32.mrb[3].mxu0  ;;  %v1388_v25 = vunpack.i.l.bf16 %v1387_v61  ;;  %v1389_v33 = vunpack.i.h.bf16 %v1387_v61 }
 0x15f   :  { %v667_v45 = vadd.f32 %v1840_v28, %v644_v37  ;;  %v645_v47 = vadd.f32 %v584_v2, %v435_v5  ;;  %v1379_v37 = vunpack.i.h.bf16 %v1845_v35  ;;  %v330_v2 = vmul.f32 %v1378_v30, %v1788_v1 }
 0x160   :  { %v670_v50 = vadd.f32 %v1840_v28, %v647_v42  ;;  %v685_v58 = vmax.f32 %v669_v59, 0.0  ;;  %v246_v59 = vmul.f32 %v1372_v24, %v1786_v0  ;;  %v332_v11 = vmul.f32 %v1388_v25, %v1788_v1 }
 0x161   :  { %v668_v55 = vadd.f32 %v1840_v28, %v645_v47  ;;  %v683_v4 = vmax.f32 %v667_v45, 0.0  ;;  %v1393_v34 = vpop.permute.xlu1 %1392  ;;  %v333_v35 = vmul.f32 %v1389_v33, %v1788_v1 }
 0x162   :  { %v686_v60 = vmax.f32 %v670_v50, 0.0  ;;  %v1394_v44 = vunpack.i.l.bf16 %v1393_v34  ;;  %v331_v50 = vmul.f32 %v1379_v37, %v1788_v1  ;;  %v1395_v51 = vunpack.i.h.bf16 %v1393_v34 }
 0x163   :  { %v684_v5 = vmax.f32 %v668_v55, 0.0  ;;  %v1221_v6 = vpop.f32.mrb[4].mxu0  ;;  %v346_v1 = vadd.f32 %v330_v2, %v246_v59 }
 0x164   :  { %v700_v9 = vpack.c.bf16 %v686_v60, %v685_v58  ;;  %v650_v12 = vadd.f32 %v1221_v6, %v440_v29  ;;  %v597_v13 = vpop.f32.mrb[5].mxu0  ;;  %v432_v58 = vmul.f32 %v1400_v63, %v1802_v23 }
 0x165   :  { %v648_v17 = vadd.f32 %v597_v13, %v438_v39  ;;  %v1222_v18 = vpop.f32.mrb[6].mxu0  ;;  %v699_v19 = vpack.c.bf16 %v684_v5, %v683_v4  ;;  %v442_v39 = vadd.f32 %v426_v16, %v342_v8  ;;  %v348_v5 = vadd.f32 %v332_v11, %v1854_v21 }
 0x166   :  { %v673_v26 = vadd.f32 %v1840_v28, %v650_v12  ;;  %v651_v27 = vadd.f32 %v1222_v18, %v441_v56  ;;  %v600_v22 = vpop.f32.mrb[7].mxu0  ;;  %v445_v56 = vadd.f32 %v1828_v10, %v345_v14  ;;  %v247_v10 = vmul.f32 %v1373_v32, %v1786_v0 }
 0x167   :  { %v671_v29 = vadd.f32 %v1840_v28, %v648_v17  ;;  %v649_v20 = vadd.f32 %v600_v22, %v439_v57  ;;  %1235 = vmatprep.mubr.msk.bf16.mxu1 %vm522_vm0, %v699_v19  ;;  %v430_v0 = vmul.f32 %v1394_v44, %v1802_v23  ;;  %v433_v8 = vmul.f32 %v1401_v62, %v1802_v23 }
 0x168   :  { %v674_v36 = vadd.f32 %v1840_v28, %v651_v27  ;;  %1236 = vmatmul.mubr.msk.bf16.vlgmr.msra.gmra.mrb[0].mxu1 %vm522_vm0, %v700_v9  ;;  %v689_v42 = vmax.f32 %v673_v26, 0.0  ;;  %v349_v9 = vadd.f32 %v333_v35, %v1849_v40  ;;  %v431_v21 = vmul.f32 %v1395_v51, %v1802_v23 }
 0x169   :  { %v672_v38 = vadd.f32 %v1840_v28, %v649_v20  ;;  %v687_v43 = vmax.f32 %v671_v29, 0.0  ;;  %v347_v13 = vadd.f32 %v331_v50, %v247_v10  ;;  %v448_v15 = vadd.f32 %v432_v58, %v348_v5 }
 0x16a   :  { %v690_v3 = vmax.f32 %v674_v36, 0.0  ;;  %v446_v19 = vadd.f32 %v430_v0, %v346_v1  ;;  %v449_v25 = vadd.f32 %v433_v8, %v349_v9 }
 0x16b   :  { %v688_v45 = vmax.f32 %v672_v38, 0.0  ;;  %v1225_v47 = vpop.f32.mrb[8].mxu0  ;;  %v447_v40 = vadd.f32 %v431_v21, %v347_v13 }
 0x16c   :  { %v702_v49 = vpack.c.bf16 %v690_v3, %v689_v42  ;;  %v654_v52 = vadd.f32 %v1225_v47, %v444_v31  ;;  %v613_v53 = vpop.f32.mrb[9].mxu0 }
 0x16d   :  { %v701_v54 = vpack.c.bf16 %v688_v45, %v687_v43  ;;  %v652_v55 = vadd.f32 %v613_v53, %v442_v39  ;;  %v1226_v57 = vpop.f32.mrb[10].mxu0 }
 0x16e   :  { %v677_v60 = vadd.f32 %v1840_v28, %v654_v52  ;;  %v655_v61 = vadd.f32 %v1226_v57, %v445_v56  ;;  %v616_v4 = vpop.f32.mrb[11].mxu0 }
 0x16f   :  { %v675_v6 = vadd.f32 %v1840_v28, %v652_v55  ;;  %v653_v7 = vadd.f32 %v616_v4, %v443_v41  ;;  %1239 = vmatprep.mubr.msk.bf16.mxu1 %vm522_vm0, %v701_v54  ;;  %v1912_v41 = vld [vmem:[#allocation13] ss:$0 sm:$0xff] }
 0x170   :  { %v678_v63 = vadd.f32 %v1840_v28, %v655_v61  ;;  %1240 = vmatmul.mubr.msk.bf16.gmra.mrb[4].mxu1 %vm522_vm0, %v702_v49  ;;  %v693_v14 = vmax.f32 %v677_v60, 0.0 }
 0x171   :  { %v676_v12 = vadd.f32 %v1840_v28, %v653_v7  ;;  %v691_v16 = vmax.f32 %v675_v6, 0.0 }
 0x172   :  { %v694_v46 = vmax.f32 %v678_v63, 0.0 }
 0x173   :  { %v692_v17 = vmax.f32 %v676_v12, 0.0  ;;  %v1229_v18 = vpop.f32.mrb[12].mxu0 }
 0x174   :  { %v704_v48 = vpack.c.bf16 %v694_v46, %v693_v14  ;;  %v658_v62 = vadd.f32 %v1229_v18, %v448_v15  ;;  %v629_v24 = vpop.f32.mrb[13].mxu0 }
 0x175   :  { %v703_v26 = vpack.c.bf16 %v692_v17, %v691_v16  ;;  %v656_v27 = vadd.f32 %v629_v24, %v446_v19  ;;  %v1230_v22 = vpop.f32.mrb[14].mxu0 }
 0x176   :  { %v681_v23 = vadd.f32 %v1840_v28, %v658_v62  ;;  %v659_v30 = vadd.f32 %v1230_v22, %v449_v25  ;;  %v632_v29 = vpop.f32.mrb[15].mxu0 }
 0x177   :  { %v679_v20 = vadd.f32 %v1840_v28, %v656_v27  ;;  %v657_v31 = vadd.f32 %v632_v29, %v447_v40  ;;  %1243 = vmatprep.mubr.msk.bf16.mxu1 %vm522_vm0, %v703_v26 }
 0x178   :  { %v682_v32 = vadd.f32 %v1840_v28, %v659_v30  ;;  %1244 = vmatmul.mubr.msk.bf16.gmra.mrb[8].mxu1 %vm522_vm0, %v704_v48  ;;  %v697_v34 = vmax.f32 %v681_v23, 0.0 }
 0x179   :  { %v680_v33 = vadd.f32 %v1840_v28, %v657_v31  ;;  %v695_v56 = vmax.f32 %v679_v20, 0.0 }
 0x17a   :  { %v698_v36 = vmax.f32 %v682_v32, 0.0 }
 0x17b   :  { %v696_v37 = vmax.f32 %v680_v33, 0.0 }
 0x17c   :  { %v706_v38 = vpack.c.bf16 %v698_v36, %v697_v34 }
 0x17d   :  { %v705_v39 = vpack.c.bf16 %v696_v37, %v695_v56 }
 0x17f   :  { %1247 = vmatprep.mubr.msk.bf16.mxu1 %vm522_vm0, %v705_v39 }
 0x180   :  { %1248 = vmatmul.mubr.msk.bf16.gmra.mrb[12].mxu1 %vm522_vm0, %v706_v38 }
 0x23b   :  { %v1237_v59 = vpop.f32.mrb[0].mxu1 }
 0x23c   :  { %v797_v11 = vadd.f32 %v1237_v59, %v1912_v41  ;;  %v788_v42 = vpop.f32.mrb[1].mxu1 }
 0x23d   :  { %v789_v3 = vadd.f32 %v1912_v41, %v788_v42  ;;  %v1238_v2 = vpop.f32.mrb[2].mxu1 }
 0x23e   :  { %v853_v28 = vmax.f32 %v797_v11, 0.0  ;;  %v800_v43 = vadd.f32 %v1238_v2, %v1912_v41  ;;  %v791_v44 = vpop.f32.mrb[3].mxu1 }
 0x23f   :  { %v851_v45 = vmax.f32 %v789_v3, 0.0  ;;  %v792_v47 = vadd.f32 %v1912_v41, %v791_v44 }
 0x240   :  { %v879_v10 = vrot.slane %v853_v28, 4  ;;  %v854_v35 = vmax.f32 %v800_v43, 0.0 }
 0x241   :  { %v867_v49 = vrot.slane %v851_v45, 4  ;;  %v852_v52 = vmax.f32 %v792_v47, 0.0 }
 0x242   :  { %v880_v53 = vmax.f32 %v853_v28, %v879_v10  ;;  %v885_v50 = vrot.slane %v854_v35, 4 }
 0x243   :  { %v868_v51 = vmax.f32 %v851_v45, %v867_v49  ;;  %v873_v54 = vrot.slane %v852_v52, 4  ;;  %v1241_v55 = vpop.f32.mrb[4].mxu1 }
 0x244   :  { %v881_v57 = vrot.slane %v880_v53, 2  ;;  %v886_v58 = vmax.f32 %v854_v35, %v885_v50  ;;  %v813_v60 = vadd.f32 %v1241_v55, %v1912_v41  ;;  %v804_v61 = vpop.f32.mrb[5].mxu1 }
 0x245   :  { %v869_v4 = vrot.slane %v868_v51, 2  ;;  %v874_v5 = vmax.f32 %v852_v52, %v873_v54  ;;  %v805_v0 = vadd.f32 %v1912_v41, %v804_v61  ;;  %v1242_v6 = vpop.f32.mrb[6].mxu1 }
 0x246   :  { %v882_v7 = vmax.f32 %v880_v53, %v881_v57  ;;  %v887_v1 = vrot.slane %v886_v58, 2  ;;  %v857_v8 = vmax.f32 %v813_v60, 0.0  ;;  %v816_v63 = vadd.f32 %v1242_v6, %v1912_v41  ;;  %v807_v9 = vpop.f32.mrb[7].mxu1 }
 0x247   :  { %v870_v21 = vmax.f32 %v868_v51, %v869_v4  ;;  %v875_v12 = vrot.slane %v874_v5, 2  ;;  %v855_v13 = vmax.f32 %v805_v0, 0.0  ;;  %v808_v14 = vadd.f32 %v1912_v41, %v807_v9 }
 0x248   :  { %v883_v46 = vrot.slane %v882_v7, 1  ;;  %v888_v15 = vmax.f32 %v886_v58, %v887_v1  ;;  %v903_v16 = vrot.slane %v857_v8, 4  ;;  %v858_v17 = vmax.f32 %v816_v63, 0.0 }
 0x249   :  { %v871_v18 = vrot.slane %v870_v21, 1  ;;  %v876_v19 = vmax.f32 %v874_v5, %v875_v12  ;;  %v891_v48 = vrot.slane %v855_v13, 4  ;;  %v856_v62 = vmax.f32 %v808_v14, 0.0 }
 0x24a   :  { %v884_v24 = vmax.f32 %v882_v7, %v883_v46  ;;  %v889_v25 = vrot.slane %v888_v15, 1  ;;  %v904_v26 = vmax.f32 %v857_v8, %v903_v16  ;;  %v909_v27 = vrot.slane %v858_v17, 4 }
 0x24b   :  { %v872_v22 = vmax.f32 %v870_v21, %v871_v18  ;;  %v877_v40 = vrot.slane %v876_v19, 1  ;;  %v892_v23 = vmax.f32 %v855_v13, %v891_v48  ;;  %v897_v30 = vrot.slane %v856_v62, 4  ;;  %v1245_v29 = vpop.f32.mrb[8].mxu1 }
 0x24c   :  { %v1138_v20 = vpack.c.bf16 %v884_v24, %v884_v24  ;;  %v890_v31 = vmax.f32 %v888_v15, %v889_v25  ;;  %v905_v32 = vrot.slane %v904_v26, 2  ;;  %v910_v33 = vmax.f32 %v858_v17, %v909_v27  ;;  %v820_v34 = vpop.f32.mrb[9].mxu1 }
 0x24d   :  { %v1136_v36 = vpack.c.bf16 %v872_v22, %v872_v22  ;;  %v878_v56 = vmax.f32 %v876_v19, %v877_v40  ;;  %v893_v37 = vrot.slane %v892_v23, 2  ;;  %v898_v38 = vmax.f32 %v856_v62, %v897_v30  ;;  %v1246_v39 = vpop.f32.mrb[10].mxu1 }
 0x24e   :  { %v1029_v59 = vunpack.c.l.b16 %v1138_v20  ;;  %v906_v11 = vmax.f32 %v904_v26, %v905_v32  ;;  %v911_v42 = vrot.slane %v910_v33, 2  ;;  %v823_v3 = vpop.f32.mrb[11].mxu1  ;;  %v1139_v2 = vpack.c.bf16 %v890_v31, %v890_v31 }
 0x24f   :  { %v1137_v28 = vpack.c.bf16 %v878_v56, %v878_v56  ;;  %v894_v43 = vmax.f32 %v892_v23, %v893_v37  ;;  %v899_v44 = vrot.slane %v898_v38, 2  ;;  %v1027_v45 = vunpack.c.l.b16 %v1136_v36 }
 0x250   :  { %v907_v47 = vrot.slane %v906_v11, 1  ;;  %v912_v10 = vmax.f32 %v910_v33, %v911_v42  ;;  %v829_v35 = vadd.f32 %v1245_v29, %v1912_v41  ;;  %v821_v50 = vadd.f32 %v1912_v41, %v820_v34 }
 0x251   :  { %v1028_v49 = vunpack.c.l.b16 %v1137_v28  ;;  %v895_v52 = vrot.slane %v894_v43, 1  ;;  %v900_v53 = vmax.f32 %v898_v38, %v899_v44  ;;  %v832_v57 = vadd.f32 %v1246_v39, %v1912_v41 }
 0x252   :  { %v908_v51 = vmax.f32 %v906_v11, %v907_v47  ;;  %v913_v54 = vrot.slane %v912_v10, 1  ;;  %v861_v55 = vmax.f32 %v829_v35, 0.0  ;;  %v859_v4 = vmax.f32 %v821_v50, 0.0 }
 0x253   :  { %v1044_v58 = vsel %vm1043_vm1, %v1028_v49, %v1027_v45  ;;  %v896_v60 = vmax.f32 %v894_v43, %v895_v52  ;;  %v901_v61 = vrot.slane %v900_v53, 1  ;;  %v1249_v5 = vpop.f32.mrb[12].mxu1  ;;  %v862_v21 = vmax.f32 %v832_v57, 0.0 }
 0x254   :  { %v1927_v0 = vsel %vm1045_vm2, %v1029_v59, %v1044_v58  ;;  %v1142_v6 = vpack.c.bf16 %v908_v51, %v908_v51  ;;  %v914_v7 = vmax.f32 %v912_v10, %v913_v54  ;;  %v927_v1 = vrot.slane %v861_v55, 4  ;;  %v836_v8 = vpop.f32.mrb[13].mxu1 }
 0x255   :  { %v902_v63 = vmax.f32 %v900_v53, %v901_v61  ;;  %v915_v9 = vrot.slane %v859_v4, 4  ;;  %v1250_v12 = vpop.f32.mrb[14].mxu1  ;;  %v1929_v13 = vunpack.c.l.b16 %v1139_v2  ;;  %v824_v46 = vadd.f32 %v1912_v41, %v823_v3 }
 0x256   :  { %v928_v14 = vmax.f32 %v861_v55, %v927_v1  ;;  %v839_v15 = vpop.f32.mrb[15].mxu1  ;;  %v1932_v16 = vunpack.c.l.b16 %v1142_v6  ;;  %v1140_v17 = vpack.c.bf16 %v896_v60, %v896_v60  ;;  %v933_v19 = vrot.slane %v862_v21, 4 }
 0x257   :  { %v916_v18 = vmax.f32 %v859_v4, %v915_v9  ;;  %v1143_v48 = vpack.c.bf16 %v914_v7, %v914_v7  ;;  %v860_v24 = vmax.f32 %v824_v46, 0.0  ;;  %v845_v25 = vadd.f32 %v1249_v5, %v1912_v41 }
 0x258   :  { %v929_v62 = vrot.slane %v928_v14, 2  ;;  %v1141_v26 = vpack.c.bf16 %v902_v63, %v902_v63  ;;  %v934_v22 = vmax.f32 %v862_v21, %v933_v19  ;;  %v837_v40 = vadd.f32 %v1912_v41, %v836_v8 }
 0x259   :  { %v917_v27 = vrot.slane %v916_v18, 2  ;;  %v921_v30 = vrot.slane %v860_v24, 4  ;;  %v865_v29 = vmax.f32 %v845_v25, 0.0  ;;  %v848_v20 = vadd.f32 %v1250_v12, %v1912_v41 }
 0x25a   :  { %v930_v23 = vmax.f32 %v928_v14, %v929_v62  ;;  %v935_v32 = vrot.slane %v934_v22, 2  ;;  %v863_v33 = vmax.f32 %v837_v40, 0.0  ;;  %v840_v34 = vadd.f32 %v1912_v41, %v839_v15 }
 0x25b   :  { %v918_v31 = vmax.f32 %v916_v18, %v917_v27  ;;  %v922_v56 = vmax.f32 %v860_v24, %v921_v30  ;;  %v951_v37 = vrot.slane %v865_v29, 4  ;;  %v866_v38 = vmax.f32 %v848_v20, 0.0 }
 0x25c   :  { %v931_v36 = vrot.slane %v930_v23, 1  ;;  %v936_v59 = vmax.f32 %v934_v22, %v935_v32  ;;  %v939_v11 = vrot.slane %v863_v33, 4  ;;  %v864_v42 = vmax.f32 %v840_v34, 0.0 }
 0x25d   :  { %v919_v39 = vrot.slane %v918_v31, 1  ;;  %v923_v2 = vrot.slane %v922_v56, 2  ;;  %v952_v28 = vmax.f32 %v865_v29, %v951_v37  ;;  %v957_v43 = vrot.slane %v866_v38, 4 }
 0x25e   :  { %v932_v3 = vmax.f32 %v930_v23, %v931_v36  ;;  %v937_v45 = vrot.slane %v936_v59, 1  ;;  %v940_v47 = vmax.f32 %v863_v33, %v939_v11  ;;  %v945_v10 = vrot.slane %v864_v42, 4 }
 0x25f   :  { %v920_v44 = vmax.f32 %v918_v31, %v919_v39  ;;  %v1031_v41 = vunpack.c.l.b16 %v1140_v17  ;;  %v924_v35 = vmax.f32 %v922_v56, %v923_v2  ;;  %v953_v49 = vrot.slane %v952_v28, 2 }
 0x260   :  { %v958_v52 = vmax.f32 %v866_v38, %v957_v43  ;;  %v1034_v53 = vunpack.c.l.b16 %v1143_v48  ;;  %v938_v50 = vmax.f32 %v936_v59, %v937_v45  ;;  %v941_v51 = vrot.slane %v940_v47, 2 }
 0x261   :  { %v946_v54 = vmax.f32 %v864_v42, %v945_v10  ;;  %v1032_v55 = vunpack.c.l.b16 %v1141_v26  ;;  %v925_v57 = vrot.slane %v924_v35, 1  ;;  %v954_v58 = vmax.f32 %v952_v28, %v953_v49 }
 0x262   :  { %v959_v60 = vrot.slane %v958_v52, 2  ;;  %v1146_v61 = vpack.c.bf16 %v932_v3, %v932_v3  ;;  %v1144_v4 = vpack.c.bf16 %v920_v44, %v920_v44  ;;  %v942_v5 = vmax.f32 %v940_v47, %v941_v51 }
 0x263   :  { %v947_v6 = vrot.slane %v946_v54, 2  ;;  %v926_v7 = vmax.f32 %v924_v35, %v925_v57  ;;  %v955_v1 = vrot.slane %v954_v58, 1  ;;  %v1048_v63 = vsel %vm1047_vm3, %v1929_v13, %v1927_v0 }
 0x264   :  { %v960_v8 = vmax.f32 %v958_v52, %v959_v60  ;;  %v1147_v9 = vpack.c.bf16 %v938_v50, %v938_v50  ;;  %v943_v21 = vrot.slane %v942_v5, 1  ;;  %v1050_v14 = vsel %vm1049_vm4, %v1031_v41, %v1048_v63 }
 0x265   :  { %v948_v12 = vmax.f32 %v946_v54, %v947_v6  ;;  %v1145_v46 = vpack.c.bf16 %v926_v7, %v926_v7  ;;  %v956_v15 = vmax.f32 %v954_v58, %v955_v1  ;;  %v1052_v18 = vsel %vm1051_vm5, %v1032_v55, %v1050_v14 }
 0x266   :  { %v961_v17 = vrot.slane %v960_v8, 1  ;;  %v944_v19 = vmax.f32 %v942_v5, %v943_v21  ;;  %v1054_v62 = vsel %vm1053_vm6, %v1932_v16, %v1052_v18  ;;  %v1035_v24 = vunpack.c.l.b16 %v1144_v4 }
 0x267   :  { %v949_v48 = vrot.slane %v948_v12, 1  ;;  %v1036_v25 = vunpack.c.l.b16 %v1145_v46  ;;  %v1056_v0 = vsel %vm1055_vm7, %v1034_v53, %v1054_v62  ;;  %v1037_v13 = vunpack.c.l.b16 %v1146_v61 }
 0x268   :  { %v962_v26 = vmax.f32 %v960_v8, %v961_v17  ;;  %v1148_v27 = vpack.c.bf16 %v944_v19, %v944_v19  ;;  %v1064_v40 = vpack.c.b16 %v1056_v0, %v1056_v0  ;;  %v1038_v23 = vunpack.c.l.b16 %v1147_v9 }
 0x269   :  { %v950_v22 = vmax.f32 %v948_v12, %v949_v48  ;;  %v1057_v30 = vsel %vm1043_vm1, %v1036_v25, %v1035_v24  ;;  %v1150_v29 = vpack.c.bf16 %v956_v15, %v956_v15 }
 0x26a   :  { %v1058_v20 = vsel %vm1045_vm2, %v1037_v13, %v1057_v30  ;;  %v1039_v31 = vunpack.c.l.b16 %v1148_v27  ;;  %v1151_v32 = vpack.c.bf16 %v962_v26, %v962_v26  ;;  %1068 = vst [vmem:[#allocation14] sm:$0xf] %v1064_v40 }
 0x26b   :  { %v1149_v33 = vpack.c.bf16 %v950_v22, %v950_v22  ;;  %v1059_v16 = vsel %vm1047_vm3, %v1038_v23, %v1058_v20  ;;  %v1041_v56 = vunpack.c.l.b16 %v1150_v29 }
 0x26c   :  { %v1060_v36 = vsel %vm1049_vm4, %v1039_v31, %v1059_v16  ;;  %v1042_v37 = vunpack.c.l.b16 %v1151_v32 }
 0x26d   :  { %v1040_v34 = vunpack.c.l.b16 %v1149_v33 }
 0x26f   :  { %v1061_v38 = vsel %vm1051_vm5, %v1040_v34, %v1060_v36 }
 0x270   :  { %v1062_v39 = vsel %vm1053_vm6, %v1041_v56, %v1061_v38 }
 0x271   :  { %v1063_v59 = vsel %vm1055_vm7, %v1042_v37, %v1062_v39 }
 0x272   :  { %v1065_v11 = vpack.c.b16 %v1063_v59, %v1063_v59 }
 0x274   :  { %1069 = vst [vmem:[#allocation14 + $0x4] sm:$0xf] %v1065_v11 }
 0x275   :  { %1579 = shalt.err (!%p1576_p4)
}
 0x276   :  { %s1580_s18 = scalar_lea.hbm %s1975_s7, 128 }
 0x277   :  { %p1581_p5 = scmp.ne.s32.totalorder %s1975_s7, %s1580_s18  ;;  %p1584_p6 = scmp.lt.u32.totalorder %s1580_s18, %s1975_s7 }
 0x279   :  { %p1586_p7 = pnand %p1584_p6, %p1581_p5 }
 0x27b   :  { %1589 = shalt.err (!%p1586_p7)
}
 0x27c   :  { %1081 = dma.vmem_to_hbm [thread:$0]  %s1076_s0, 128, %s1975_s7, [#allocation4], %s1602_s13, %s1602_s13, %s1603_s14  }
 0x27d   :  { %1598 = dma.done.wait [#allocation4], 128  }
 0x27e   :  { %1599 = vsyncadd [#allocation4], 4294967168 }
 0x27f   :  { %1085 = vsyncpa [#allocation3], 1 }
 0x280   :  { %1086 = vsyncpa [#allocation6], 1 }
 0x281   :  { %1087 = vsyncpa [#allocation9], 1 }
 0x282   :  { %1088 = vsyncpa [#allocation12], 1 }
 0x283   :  { %1089 = vsyncpa [#allocation4], 1 }

// kernel: a_call__.6
= control target key start
LH: loop header
LB: loop body
LE: loop exit
PB: predicated region body
PF: predicated region fallthrough
CT: control target
= control target key end

     0   :  { %s2532_s0 = inlined_call_operand.hbm [shape: f32[2,16,3], index: 0, kind: input, shape index: {}]   ;;  %s2533_s1 = inlined_call_operand.hbm [shape: f32[2,3,8], index: 1, kind: input, shape index: {}]   ;;  %s2534_s2 = inlined_call_operand.hbm [shape: bf16[2,8,64], index: 2, kind: input, shape index: {}]   ;;  %s2535_s3 = inlined_call_operand.hbm [shape: bf16[2,16,32], index: 3, kind: input, shape index: {}]   ;;  %s2536_s4 = inlined_call_operand.hbm [shape: bf16[64,64], index: 4, kind: input, shape index: {}]   ;;  %s2537_s5 = inlined_call_operand.hbm [shape: bf16[32,64], index: 5, kind: input, shape index: {}]   ;;  %s2538_s6 = inlined_call_operand.hbm [shape: f32[1,64], index: 6, kind: input, shape index: {}]   ;;  %s2539_s7 = inlined_call_operand.hbm [shape: bf16[64,128], index: 7, kind: input, shape index: {}]   ;;  %s2540_s8 = inlined_call_operand.hbm [shape: f32[1,128], index: 8, kind: input, shape index: {}]   ;;  %s2541_s9 = inlined_call_operand.hbm [shape: bf16[2,16,128], index: 9, kind: output, shape index: {}]  }
   0x1   :  { %2567 = sst [smem:[#allocation33_spill]] %s2533_s1 }
   0x2   :  { %2568 = sst [smem:[#allocation34_spill]] %s2536_s4 }
   0x3   :  { %2569 = sst [smem:[#allocation35_spill]] %s2537_s5 }
   0x4   :  { %2570 = sst [smem:[#allocation36_spill]] %s2539_s7 }
   0x5   :  { %2571 = sst [smem:[#allocation37_spill]] %s2541_s9 }
   0x6   :  { %14 = vsyncpa [#allocation3], 0 }
   0x7   :  { %16 = vsyncpa [#allocation3 + $0x1], 0 }
   0x8   :  { %17 = vsyncpa [#allocation6], 0 }
   0x9   :  { %19 = vsyncpa [#allocation6 + $0x1], 0 }
   0xa   :  { %20 = vsyncpa [#allocation9], 0 }
   0xb   :  { %22 = vsyncpa [#allocation9 + $0x1], 0 }
   0xc   :  { %23 = vsyncpa [#allocation12], 0 }
   0xd   :  { %24 = vsyncpa [#allocation15], 0 }
   0xe   :  { %25 = vsyncpa [#allocation4], 0 }
   0xf   :  { %27 = vsyncpa [#allocation4 + $0x1], 0  ;;  %s2024_s30 = smov 0   ;;  %s2026_s10 = smov 0  }
  0x10   :  { %s2028_s11 = smov 0   ;;  %s2030_s12 = smov 0  }
  0x11   :  { %s2032_s13 = smov 0   ;;  %s2034_s14 = smov 0  }
  0x12 LB: > { %2572 = sst [smem:[#allocation25_spill]] %s1931_s30  ;;  %s2055_s15 = sadd.s32 4294967295, %s1951_s14   ;;  %s1951_s14 = sphi %s2034_s14, %s33_s14   ;;  %s1947_s13 = sphi %s2032_s13, %s2626_s13   ;;  %s1943_s12 = sphi %s2030_s12, %s2625_s12   ;;  %s1939_s11 = sphi %s2028_s11, %s2621_s11   ;;  %s1935_s10 = sphi %s2026_s10, %s2624_s10   ;;  %s1931_s30 = sphi %s2024_s30, %s2623_s30  }
  0x13   : > { %2573 = sst [smem:[#allocation26_spill]] %s1939_s11  ;;  %p1304_p0 = scmp.ge.s32.totalorder %s1951_s14, 1 }
  0x14   : > { %2574 = sst [smem:[#allocation27_spill]] %s1943_s12  ;;  %p2544_p1 = scmp.eq.s32.totalorder %s2055_s15, 0 }
  0x15   : > { %p291_p2 = scmp.lt.s32.totalorder %s1951_s14, 3  ;;  %s1953_s17 = smov [#allocation10]  }
  0x16   : > { %s303_s18 = sshll.u32 %s1953_s17, 4  ;;  %s1954_s20 = smov [#allocation11]   ;;  %s2064_s18 = int_to_ptr.vmem [resolvable:$true] %s303_s18 }
  0x17   : > { %p2060_p3 = pnand %p1304_p0, %p291_p2  ;;  %s316_s21 = sshll.u32 %s1954_s20, 4  ;;  %s2075_s21 = int_to_ptr.vmem [resolvable:$true] %s316_s21 }
  0x18   : > { %s1955_s22 = smov [#allocation14]   ;;  %s2578_s4 = sld [smem:[#allocation34_spill]] }
  0x19   : > { %s2575_s16 = scalar_select %p2060_p3, 1, 0 }
  0x1a   : > { %p1449_p4 = pneg %p2060_p3  ;;  %s2077_s23 = sshll.u32 %s1955_s22, 4  ;;  %s341_s23 = int_to_ptr.vmem [resolvable:$true] %s2077_s23 }
  0x1b   : > { %2576 = sst [smem:[#allocation28_spill]] %s2575_s16 }
  0x1c   : > { %p2071_p6 = pnand %p1449_p4, %p2544_p1 }
  0x1e   : > { %s2577_s19 = scalar_select %p2071_p6, 1, 0 }
  0x1f   : > { %s1589_s26 = scalar_lea.hbm %s2578_s4, 512  ;;  %p2087_p8 = pneg %p2071_p6 }
  0x20   : > { %p1590_p7 = scmp.ne.s32.totalorder %s2578_s4, %s1589_s26  ;;  %p1596_p11 = scmp.lt.u32.totalorder %s1589_s26, %s2578_s4 }
  0x21   : > { %s2579_s29 = scalar_select %p2087_p8, 1, 0 }
  0x22   : > { %p1592_p9 = pnand %p2087_p8, %p1590_p7 }
  0x24   : > { %p1593_p10 = pneg %p1592_p9 }
  0x26   : > { %p1598_p12 = pnand %p1596_p11, %p1593_p10 }
  0x28   : > { %1601 = shalt.err (!%p1598_p12)
}
  0x29   : > { %s1602_s22 = scalar_lea.vmem %s2064_s18, 512  ;;  %p1610_p4 = scmp.lt.s32.totalorder %s2064_s18, %s2064_s18 }
  0x2a   : > { %p1603_p13 = scmp.ne.s32.totalorder %s2064_s18, %s1602_s22  ;;  %p1611_p5 = scmp.lt.s32.totalorder %s1602_s22, %s1602_s22 }
  0x2c   : > { %p1605_p0 = pnand %p1603_p13, %p2087_p8  ;;  %p1612_p7 = por %p1611_p5, %p1610_p4 }
  0x2e   : > { %p1606_p2 = pneg %p1605_p0 }
  0x30   : > { %p1613_p9 = pnand %p1612_p7, %p1606_p2 }
  0x32   : > { %1616 = shalt.err (!%p1613_p9)
}
  0x33   : > { %s2546_s24 = smov 64   ;;  %s2547_s25 = smov 4  }
  0x34   : > { %1452 = dma.hbm_to_vmem [thread:$0]  (!%p2071_p6), %s2578_s4, 512, %s2064_s18, [#allocation9], %s2546_s24, %s2546_s24, %s2547_s25  }
  0x35   : > { %s2580_s5 = sld [smem:[#allocation35_spill]] }
  0x3b   : > { %s1617_s20 = scalar_lea.hbm %s2580_s5, 256 }
  0x3c   : > { %p1618_p5 = scmp.ne.s32.totalorder %s2580_s5, %s1617_s20  ;;  %p1624_p12 = scmp.lt.u32.totalorder %s1617_s20, %s2580_s5 }
  0x3e   : > { %p1620_p10 = pnand %p1618_p5, %p2087_p8 }
  0x40   : > { %p1621_p11 = pneg %p1620_p10 }
  0x42   : > { %p1626_p13 = pnand %p1624_p12, %p1621_p11 }
  0x44   : > { %1629 = shalt.err (!%p1626_p13)
}
  0x45   : > { %s1630_s18 = scalar_lea.vmem %s2075_s21, 256  ;;  %p1638_p7 = scmp.lt.s32.totalorder %s2075_s21, %s2075_s21 }
  0x46   : > { %p1631_p0 = scmp.ne.s32.totalorder %s2075_s21, %s1630_s18  ;;  %p1639_p9 = scmp.lt.s32.totalorder %s1630_s18, %s1630_s18 }
  0x48   : > { %p1633_p2 = pnand %p1631_p0, %p2087_p8  ;;  %p1640_p5 = por %p1639_p9, %p1638_p7 }
  0x4a   : > { %p1634_p4 = pneg %p1633_p2 }
  0x4c   : > { %p1641_p10 = pnand %p1640_p5, %p1634_p4 }
  0x4e   : > { %1644 = shalt.err (!%p1641_p10)
}
  0x4f   : > { %1455 = dma.hbm_to_vmem [thread:$0]  (!%p2071_p6), %s2580_s5, 256, %s2075_s21, [#allocation12], %s2546_s24, %s2546_s24, %s2547_s25  }
  0x50   : > { %s2581_s7 = sld [smem:[#allocation36_spill]] }
  0x56   : > { %s1645_s27 = scalar_lea.hbm %s2581_s7, 512 }
  0x57   : > { %p1646_p11 = scmp.ne.s32.totalorder %s2581_s7, %s1645_s27  ;;  %p1652_p0 = scmp.lt.u32.totalorder %s1645_s27, %s2581_s7 }
  0x59   : > { %p1648_p12 = pnand %p1646_p11, %p2087_p8 }
  0x5b   : > { %p1649_p13 = pneg %p1648_p12 }
  0x5d   : > { %p1654_p2 = pnand %p1652_p0, %p1649_p13 }
  0x5f   : > { %1657 = shalt.err (!%p1654_p2)
}
  0x60   : > { %s1658_s18 = scalar_lea.vmem %s341_s23, 512  ;;  %p1666_p5 = scmp.lt.s32.totalorder %s341_s23, %s341_s23 }
  0x61   : > { %p1659_p4 = scmp.ne.s32.totalorder %s341_s23, %s1658_s18  ;;  %p1667_p10 = scmp.lt.s32.totalorder %s1658_s18, %s1658_s18 }
  0x63   : > { %p1661_p7 = pnand %p1659_p4, %p2087_p8  ;;  %p1668_p1 = por %p1667_p10, %p1666_p5 }
  0x65   : > { %p1662_p9 = pneg %p1661_p7 }
  0x67   : > { %p1669_p3 = pnand %p1668_p1, %p1662_p9 }
  0x69   : > { %1672 = shalt.err (!%p1669_p3)
}
  0x6a   : > { %1461 = dma.hbm_to_vmem [thread:$0]  (!%p2071_p6), %s2581_s7, 512, %s341_s23, [#allocation15], %s2546_s24, %s2546_s24, %s2547_s25  }
  0x6b   : > { %s1303_s12 = sadd.s32 4294967294, %s1951_s14   ;;  %s45_s16 = sadd.s32 1, %s1947_s13 }
  0x6c   : > { %s54_s26 = sadd.s32 1, %s1939_s11  ;;  %p47_p1 = scmp.ge.s32.totalorder %s45_s16, 2 }
  0x6d   : > { %p61_p3 = scmp.ne.s32.totalorder %s1939_s11, %s1935_s10  ;;  %p62_p11 = scmp.eq.s32.totalorder %s1951_s14, 0 }
  0x6e   : > { %p67_p12 = scmp.ne.s32.totalorder %s1935_s10, %s1931_s30  ;;  %s2628_s16 = smov (%p47_p1, %s45_s16), 0 }
  0x6f   : > { %2582 = sst [smem:[#allocation29_spill]] %s2628_s16  ;;  %p63_p13 = por %p62_p11, %p61_p3 }
  0x70   : > { %p2583_p0 = scmp.eq.s32.totalorder %s2055_s15, 0  ;;  %s49_s23 = ssub.s32 %s1947_s13, %s2628_s16 }
  0x71   : > { %p278_p4 = scmp.eq.s32.totalorder %s2055_s15, 1  ;;  %p52_p7 = scmp.eq.s32.totalorder %s49_s23, 0 }
  0x72   : > { %p2171_p2 = por %p2583_p0, %p67_p12  ;;  %p284_p9 = scmp.eq.s32.totalorder %s1303_s12, 1 }
  0x73   : > { %p2178_p5 = por %p278_p4, %p61_p3  ;;  %p1487_p10 = scmp.lt.s32.totalorder %s1951_s14, 2 }
  0x74   : > { %s2584_s27 = scalar_select %p2171_p2, 1, 0 }
  0x75   : > { %s2585_s28 = scalar_select %p2178_p5, 1, 0 }
  0x76   : > { %s2184_s17 = scalar_select %p52_p7, %s1939_s11, %s54_s26  }
  0x77   : > { %2586 = sst [smem:[#allocation30_spill]] %s2585_s28  ;;  %p2186_p1 = por %p284_p9, %p67_p12 }
  0x78   : > { %2587 = sst [smem:[#allocation31_spill]] %s2184_s17  ;;  %s2191_s22 = sand.u32 1, %s1939_s11  }
  0x79   : > { %s2588_s20 = scalar_select %p2186_p1, 1, 0 }
  0x7a   : > { %p2193_p11 = pnand %p1487_p10, %p63_p13  ;;  %s2552_s21 = sand.u32 1, %s1951_s14  }
  0x7b   : > { %2589 = sst [smem:[#allocation32_spill]] %s2588_s20  ;;  %s2548_s9 = sshll.u32 %s2191_s22, 2 }
  0x7c   : > { %s2590_s18 = scalar_select %p2193_p11, 1, 0 }
  0x7d   : > { %s2549_s12 = sshll.u32 %s1947_s13, 6  ;;  %s392_s23 = scalar_lea.vmem [#allocation5], %s2548_s9 }
  0x7e   : > { %s399_s26 = sshll.u32 %s392_s23, 4  ;;  %s2591_s1 = sld [smem:[#allocation33_spill]]  ;;  %s2209_s26 = int_to_ptr.vmem [resolvable:$true] %s399_s26 }
  0x7f   : > { %s2213_s5 = scalar_lea.sflag [#allocation6], %s2552_s21  ;;  %p2219_p12 = pneg %p2193_p11 }
  0x81   : > { %s2592_s23 = scalar_select %p2219_p12, 1, 0 }
  0x84   : > { %s2207_s4 = scalar_lea.hbm %s2591_s1, %s2549_s12  ;;  %s1678_s9 = scalar_lea.hbm %s2591_s1, 128 }
  0x85   : > { %s1673_s7 = scalar_lea.hbm %s2207_s4, 64  ;;  %p1679_p4 = scmp.lt.u32.totalorder %s2207_s4, %s2591_s1 }
  0x86   : > { %p1674_p3 = scmp.ne.s32.totalorder %s2207_s4, %s1673_s7  ;;  %p1680_p7 = scmp.lt.u32.totalorder %s1678_s9, %s1673_s7 }
  0x87   : > { %p1682_p10 = scmp.lt.u32.totalorder %s1673_s7, %s2207_s4 }
  0x88   : > { %p1676_p13 = pnand %p2219_p12, %p1674_p3  ;;  %p1681_p9 = por %p1680_p7, %p1679_p4 }
  0x8a   : > { %p1677_p0 = pneg %p1676_p13  ;;  %p1683_p1 = por %p1682_p10, %p1681_p9 }
  0x8c   : > { %p1684_p5 = pnand %p1683_p1, %p1677_p0 }
  0x8e   : > { %1687 = shalt.err (!%p1684_p5)
}
  0x8f   : > { %s1688_s21 = scalar_lea.vmem %s2209_s26, 64  ;;  %s1958_s24 = smov [#allocation5]  }
  0x90   : > { %p1689_p3 = scmp.ne.s32.totalorder %s2209_s26, %s1688_s21  ;;  %s1693_s25 = sshll.u32 %s1958_s24, 4  ;;  %s1694_s25 = int_to_ptr.vmem [resolvable:$false] %s1693_s25 }
  0x91   : > { %s1695_s16 = scalar_lea.vmem %s1694_s25, 128  ;;  %p1696_p6 = scmp.lt.s32.totalorder %s2209_s26, %s1694_s25 }
  0x92   : > { %p1691_p13 = pnand %p1689_p3, %p2219_p12  ;;  %p1697_p8 = scmp.lt.s32.totalorder %s1695_s16, %s1688_s21 }
  0x94   : > { %p1692_p2 = pneg %p1691_p13  ;;  %p1698_p4 = por %p1697_p8, %p1696_p6 }
  0x96   : > { %p1699_p7 = pnand %p1698_p4, %p1692_p2 }
  0x98   : > { %1702 = shalt.err (!%p1699_p7)
}
  0x99   : > { %1471 = dma.hbm_to_vmem [thread:$0]  (!%p2193_p11), %s2207_s4, 64, %s2209_s26, %s2213_s5  }
  0x9a   : > { %s2593_s7 = sshll.u32 %s1947_s13, 6  ;;  %s1959_s1 = smov [#allocation13]  }
  0x9b   : > { %s2248_s24 = scalar_lea.hbm %s2534_s2, %s2593_s7  ;;  %s330_s25 = sshll.u32 %s1959_s1, 4  ;;  %s331_s25 = int_to_ptr.vmem [resolvable:$true] %s330_s25 }
  0x9c   : > { %s1960_s21 = smov [#allocation16]   ;;  %s1703_s20 = scalar_lea.hbm %s2538_s6, 16 }
  0x9d   : > { %s354_s16 = sshll.u32 %s1960_s21, 4  ;;  %p1704_p6 = scmp.ne.s32.totalorder %s2538_s6, %s1703_s20  ;;  %s355_s16 = int_to_ptr.vmem [resolvable:$true] %s354_s16 }
  0x9e   : > { %p2594_p8 = scmp.ne.s32.totalorder %s2579_s29, 0  ;;  %p1710_p1 = scmp.lt.u32.totalorder %s1703_s20, %s2538_s6 }
  0xa0   : > { %p1706_p2 = pnand %p1704_p6, %p2594_p8 }
  0xa2   : > { %p1707_p5 = pneg %p1706_p2 }
  0xa4   : > { %p1712_p0 = pnand %p1710_p1, %p1707_p5 }
  0xa6   : > { %1715 = shalt.err (!%p1712_p0)
}
  0xa7   : > { %s1716_s1 = scalar_lea.vmem %s331_s25, 16  ;;  %s1723_s11 = scalar_lea.vmem %s331_s25, 32 }
  0xa8   : > { %p1717_p9 = scmp.ne.s32.totalorder %s331_s25, %s1716_s1  ;;  %p1724_p13 = scmp.lt.s32.totalorder %s331_s25, %s331_s25 }
  0xa9   : > { %p1725_p4 = scmp.lt.s32.totalorder %s1723_s11, %s1716_s1 }
  0xaa   : > { %p1719_p10 = pnand %p1717_p9, %p2594_p8 }
  0xab   : > { %p1726_p7 = por %p1725_p4, %p1724_p13 }
  0xac   : > { %p1720_p3 = pneg %p1719_p10 }
  0xae   : > { %p1727_p11 = pnand %p1726_p7, %p1720_p3 }
  0xb0   : > { %1730 = shalt.err (!%p1727_p11)
}
  0xb1   : > { %p2595_p6 = scmp.ne.s32.totalorder %s2577_s19, 0  ;;  %s1731_s7 = scalar_lea.hbm %s2540_s8, 16 }
  0xb2   : > { %p1732_p2 = scmp.ne.s32.totalorder %s2540_s8, %s1731_s7  ;;  %p1738_p11 = scmp.lt.u32.totalorder %s1731_s7, %s2540_s8 }
  0xb3   : > { %1458 = dma.hbm_to_vmem [thread:$0]  (!%p2595_p6), %s2538_s6, 16, %s331_s25, [#allocation12]  }
  0xb4   : > { %p1734_p5 = pnand %p1732_p2, %p2594_p8 }
  0xb6   : > { %p1735_p1 = pneg %p1734_p5 }
  0xb8   : > { %p1740_p0 = pnand %p1738_p11, %p1735_p1 }
  0xba   : > { %1743 = shalt.err (!%p1740_p0)
}
  0xbb   : > { %s1744_s26 = scalar_lea.vmem %s355_s16, 16  ;;  %s1751_s25 = scalar_lea.vmem %s355_s16, 32 }
  0xbc   : > { %p1745_p9 = scmp.ne.s32.totalorder %s355_s16, %s1744_s26  ;;  %p1752_p13 = scmp.lt.s32.totalorder %s355_s16, %s355_s16 }
  0xbd   : > { %p1753_p4 = scmp.lt.s32.totalorder %s1751_s25, %s1744_s26 }
  0xbe   : > { %p1747_p10 = pnand %p1745_p9, %p2594_p8 }
  0xbf   : > { %p1754_p7 = por %p1753_p4, %p1752_p13 }
  0xc0   : > { %p1748_p3 = pneg %p1747_p10 }
  0xc2   : > { %p1755_p12 = pnand %p1754_p7, %p1748_p3 }
  0xc4   : > { %1758 = shalt.err (!%p1755_p12)
}
  0xc5   : > { %1464 = dma.hbm_to_vmem [thread:$0]  (!%p2595_p6), %s2540_s8, 16, %s355_s16, [#allocation15]  }
  0xc6   : > { %s1311_s30 = sshll.u32 %s2191_s22, 4  ;;  %s1356_s29 = sshll.u32 %s1947_s13, 8 }
  0xc7   : > { %s2291_s20 = scalar_lea.hbm %s2532_s0, %s1356_s29  ;;  %s369_s19 = scalar_lea.vmem [#allocation2], %s1311_s30 }
  0xc8   : > { %s378_s7 = sshll.u32 %s369_s19, 4  ;;  %s366_s9 = scalar_lea.sflag [#allocation3], %s2191_s22  ;;  %s2293_s7 = int_to_ptr.vmem [resolvable:$true] %s378_s7 }
  0xc9   : > { %s1759_s12 = scalar_lea.hbm %s2291_s20, 256  ;;  %p2596_p8 = scmp.ne.s32.totalorder %s2592_s23, 0 }
  0xca   : > { %p1760_p12 = scmp.ne.s32.totalorder %s2291_s20, %s1759_s12  ;;  %s1764_s4 = scalar_lea.hbm %s2532_s0, 512 }
  0xcb   : > { %p1765_p5 = scmp.lt.u32.totalorder %s2291_s20, %s2532_s0  ;;  %p1766_p1 = scmp.lt.u32.totalorder %s1764_s4, %s1759_s12 }
  0xcc   : > { %p1762_p6 = pnand %p1760_p12, %p2596_p8  ;;  %p1768_p0 = scmp.lt.u32.totalorder %s1759_s12, %s2291_s20 }
  0xcd   : > { %p1767_p11 = por %p1766_p1, %p1765_p5 }
  0xce   : > { %p1763_p2 = pneg %p1762_p6 }
  0xcf   : > { %p1769_p9 = por %p1768_p0, %p1767_p11 }
  0xd1   : > { %p1770_p10 = pnand %p1769_p9, %p1763_p2 }
  0xd3   : > { %1773 = shalt.err (!%p1770_p10)
}
  0xd4   : > { %s1774_s1 = scalar_lea.vmem %s2293_s7, 256  ;;  %s1961_s11 = smov [#allocation2]  }
  0xd5   : > { %p1775_p3 = scmp.ne.s32.totalorder %s2293_s7, %s1774_s1  ;;  %s1779_s30 = sshll.u32 %s1961_s11, 4  ;;  %s1780_s30 = int_to_ptr.vmem [resolvable:$false] %s1779_s30 }
  0xd6   : > { %s1781_s29 = scalar_lea.vmem %s1780_s30, 512  ;;  %p1782_p7 = scmp.lt.s32.totalorder %s2293_s7, %s1780_s30 }
  0xd7   : > { %p1777_p13 = pnand %p1775_p3, %p2596_p8  ;;  %p1783_p12 = scmp.lt.s32.totalorder %s1781_s29, %s1774_s1 }
  0xd9   : > { %p1778_p4 = pneg %p1777_p13  ;;  %p1784_p6 = por %p1783_p12, %p1782_p7 }
  0xdb   : > { %p1785_p5 = pnand %p1784_p6, %p1778_p4 }
  0xdd   : > { %1788 = shalt.err (!%p1785_p5)
}
  0xde   : > { %s1962_s28 = smov 128   ;;  %s1963_s17 = smov 8  }
  0xdf   : > { %p2597_p2 = scmp.ne.s32.totalorder %s2590_s18, 0  ;;  %s2598_s19 = sshll.u32 %s2191_s22, 2 }
  0xe0   : > { %s410_s12 = scalar_lea.vmem [#allocation7], %s2598_s19  ;;  %s1318_s21 = sshll.u32 %s2191_s22, 3 }
  0xe1   : > { %1468 = dma.hbm_to_vmem [thread:$0]  (!%p2597_p2), %s2291_s20, 256, %s2293_s7, %s366_s9, %s1962_s28, %s1962_s28, %s1963_s17  }
  0xe2   : > { %s417_s16 = sshll.u32 %s410_s12, 4  ;;  %s1789_s4 = scalar_lea.hbm %s2248_s24, 64  ;;  %s418_s16 = int_to_ptr.vmem [resolvable:$true] %s417_s16 }
  0xe3   : > { %p1790_p1 = scmp.ne.s32.totalorder %s2248_s24, %s1789_s4  ;;  %s1794_s1 = scalar_lea.hbm %s2534_s2, 128 }
  0xe4   : > { %p1795_p9 = scmp.lt.u32.totalorder %s2248_s24, %s2534_s2  ;;  %p1796_p10 = scmp.lt.u32.totalorder %s1794_s1, %s1789_s4 }
  0xe5   : > { %p1792_p11 = pnand %p1790_p1, %p2596_p8  ;;  %p1798_p13 = scmp.lt.u32.totalorder %s1789_s4, %s2248_s24 }
  0xe6   : > { %p1797_p3 = por %p1796_p10, %p1795_p9 }
  0xe7   : > { %p1793_p0 = pneg %p1792_p11 }
  0xe8   : > { %p1799_p4 = por %p1798_p13, %p1797_p3 }
  0xea   : > { %p1800_p7 = pnand %p1799_p4, %p1793_p0 }
  0xec   : > { %1803 = shalt.err (!%p1800_p7)
}
  0xed   : > { %s1804_s20 = scalar_lea.vmem %s418_s16, 64  ;;  %s1964_s7 = smov [#allocation7]  }
  0xee   : > { %p1805_p12 = scmp.ne.s32.totalorder %s418_s16, %s1804_s20  ;;  %s1809_s9 = sshll.u32 %s1964_s7, 4  ;;  %s1810_s9 = int_to_ptr.vmem [resolvable:$false] %s1809_s9 }
  0xef   : > { %s1811_s29 = scalar_lea.vmem %s1810_s9, 128  ;;  %p1812_p1 = scmp.lt.s32.totalorder %s418_s16, %s1810_s9 }
  0xf0   : > { %p1807_p6 = pnand %p1805_p12, %p2596_p8  ;;  %p1813_p11 = scmp.lt.s32.totalorder %s1811_s29, %s1804_s20 }
  0xf2   : > { %p1808_p5 = pneg %p1807_p6  ;;  %p1814_p2 = por %p1813_p11, %p1812_p1 }
  0xf4   : > { %p1815_p9 = pnand %p1814_p2, %p1808_p5 }
  0xf6   : > { %1818 = shalt.err (!%p1815_p9)
}
  0xf7   : > { %p2599_p10 = scmp.ne.s32.totalorder %s2590_s18, 0  ;;  %s1357_s28 = sshll.u32 %s1947_s13, 7 }
  0xf8   : > { %s428_s17 = scalar_lea.vmem [#allocation8], %s1318_s21  ;;  %s2346_s26 = scalar_lea.hbm %s2535_s3, %s1357_s28 }
  0xf9   : > { %1474 = dma.hbm_to_vmem [thread:$0]  (!%p2599_p10), %s2248_s24, 64, %s418_s16, %s2213_s5  }
  0xfa   : > { %s437_s19 = sshll.u32 %s428_s17, 4  ;;  %s2600_s25 = sand.u32 1, %s1951_s14   ;;  %s2348_s19 = int_to_ptr.vmem [resolvable:$true] %s437_s19 }
  0xfb   : > { %s2352_s1 = scalar_lea.sflag [#allocation9], %s2600_s25  ;;  %s1819_s11 = scalar_lea.hbm %s2346_s26, 128 }
  0xfc   : > { %p1820_p2 = scmp.ne.s32.totalorder %s2346_s26, %s1819_s11  ;;  %s1824_s24 = scalar_lea.hbm %s2535_s3, 256 }
  0xfd   : > { %p1825_p13 = scmp.lt.u32.totalorder %s2346_s26, %s2535_s3  ;;  %p1826_p4 = scmp.lt.u32.totalorder %s1824_s24, %s1819_s11 }
  0xfe   : > { %p1822_p0 = pnand %p1820_p2, %p2596_p8  ;;  %p1828_p12 = scmp.lt.u32.totalorder %s1819_s11, %s2346_s26 }
  0xff   : > { %p1827_p7 = por %p1826_p4, %p1825_p13 }
 0x100   : > { %p1823_p3 = pneg %p1822_p0 }
 0x101   : > { %p1829_p6 = por %p1828_p12, %p1827_p7 }
 0x103   : > { %p1830_p5 = pnand %p1829_p6, %p1823_p3 }
 0x105   : > { %1833 = shalt.err (!%p1830_p5)
}
 0x106   : > { %s1834_s30 = scalar_lea.vmem %s2348_s19, 128  ;;  %s1965_s20 = smov [#allocation8]  }
 0x107   : > { %p1835_p1 = scmp.ne.s32.totalorder %s2348_s19, %s1834_s30  ;;  %s1839_s7 = sshll.u32 %s1965_s20, 4  ;;  %s1840_s7 = int_to_ptr.vmem [resolvable:$false] %s1839_s7 }
 0x108   : > { %s1841_s9 = scalar_lea.vmem %s1840_s7, 256  ;;  %p1842_p2 = scmp.lt.s32.totalorder %s2348_s19, %s1840_s7 }
 0x109   : > { %p1837_p11 = pnand %p1835_p1, %p2596_p8  ;;  %p1843_p0 = scmp.lt.s32.totalorder %s1841_s9, %s1834_s30 }
 0x10b   : > { %p1838_p9 = pneg %p1837_p11  ;;  %p1844_p13 = por %p1843_p0, %p1842_p2 }
 0x10d   : > { %p1845_p4 = pnand %p1844_p13, %p1838_p9 }
 0x10f   : > { %1848 = shalt.err (!%p1845_p4)
}
 0x110   : > { %s2601_s29 = smov 4   ;;  %s2602_s28 = smov 64  }
 0x111   : > { %1477 = dma.hbm_to_vmem [thread:$0]  (!%p2599_p10), %s2346_s26, 128, %s2348_s19, %s2352_s1, %s2602_s28, %s2602_s28, %s2601_s29  }
 0x112   : > { %s2603_s23 = sld [smem:[#allocation28_spill]] }
 0x118   : > { %p2604_p8 = scmp.ne.s32.totalorder %s2603_s23, 0 }
 0x119   : > { %s2382_s17 = sand.u32 (!%p2604_p8), 1, %s1935_s10   ;;  %p2605_p3 = scmp.ne.s32.totalorder (!%p2604_p8), %s2584_s27, 0 }
 0x11a   : > { %449 = sbr.rel (%p2604_p8) target bundleno = 2611 (0xa33), region = 56  ;;  %s1322_s12 = sshll.u32 (!%p2604_p8), %s2382_s17, 4 }
 0x11b   : > { %s452_s4 = scalar_lea.sflag (!%p2604_p8), [#allocation3], %s2382_s17  ;;  %s455_s25 = scalar_lea.vmem (!%p2604_p8), [#allocation2], %s1322_s12 }
 0x121   : > { %1902 = dma.done.wait (%p2605_p3), %s452_s4, 256  }
 0x122   : > { %1904 = vsyncadd (%p2605_p3), %s452_s4, 4294967040  ;;  %s460_s18 = sand.u32 1, %s2055_s15   ;;  %s1323_s19 = sshll.u32 %s2382_s17, 2 }
 0x123   : > { %s461_s26 = scalar_lea.sflag [#allocation6], %s460_s18  ;;  %s2392_s1 = scalar_lea.vmem [#allocation5], %s1323_s19 }
 0x124   : > { %1906 = dma.done.wait (%p2605_p3), %s461_s26, 128  }
 0x125   : > { %1908 = vsyncadd (%p2605_p3), %s461_s26, 4294967168  ;;  %s1325_s11 = sshll.u32 %s2382_s17, 3  ;;  %s2399_s5 = scalar_lea.vmem [#allocation7], %s1323_s19 }
 0x126   : > { %s479_s22 = scalar_lea.sflag [#allocation9], %s460_s18  ;;  %s2403_s24 = scalar_lea.vmem [#allocation8], %s1325_s11 }
 0x127   : > { %1910 = dma.done.wait (%p2605_p3), %s479_s22, 128  }
 0x128   : > { %1912 = vsyncadd (%p2605_p3), %s479_s22, 4294967168  ;;  %p2606_p10 = scmp.eq.s32.totalorder %s2055_s15, 0 }
 0x12a   : > { %1914 = dma.done.wait (%p2606_p10), [#allocation9], 512   ;;  %p2607_p7 = pmov %p2606_p10 }
 0x12c   : > { %1916 = vsyncadd (%p2607_p7), [#allocation9], 4294966784  ;;  %p2608_p12 = pmov %p2607_p7 }
 0x12d   : > { %p2609_p6 = pmov %p2607_p7 }
 0x12e   : > { %1918 = dma.done.wait (%p2608_p12), [#allocation12], 272  }
 0x12f   : > { %1920 = vsyncadd (%p2609_p6), [#allocation12], 4294967024  ;;  %p2610_p5 = pmov %p2609_p6 }
 0x131   : > { %1922 = dma.done.wait (%p2610_p5), [#allocation15], 528   ;;  %p2611_p1 = pmov %p2610_p5 }
 0x132   : > { %v1966_v0 = vmov 1   ;;  %v1967_v1 = vmov 0   ;;  %v556_v2 = vld [vmem:[%s455_s25] sm:$0xff]  ;;  %v557_v3 = vld [vmem:[%s455_s25 + $0x8] sm:$0xff]  ;;  %v1968_v4 = vmov 2   ;;  %v569_v5 = vlaneseq  ;;  %s2612_s15 = sld [smem:[#allocation27_spill]] }
 0x133   : > { %1924 = vsyncadd (%p2611_p1), [#allocation15], 4294966768  ;;  %1559 = vset.pattern.permute.xlu1 %v1966_v0  ;;  %1558 = vset.pattern.permute.xlu0 %v1967_v1  ;;  %v558_v9 = vld [vmem:[%s2392_s1] sm:$0x7]  ;;  %vm615_vm0 = vcmask 64512   ;;  %s2613_s27 = sld [smem:[#allocation30_spill]] }
 0x134   : > { %576 = vperm.xlu1 %1559, %v556_v2   ;;  %561 = vperm.xlu0 %1558, %v556_v2   ;;  %v570_v6 = vshrl.u32 %v569_v5, 7  ;;  %v2424_v38 = vand.u32 127, %v569_v5  ;;  %s551_s16 = scalar_lea.vmem [#allocation17], %s1325_s11  ;;  %s2614_s9 = sld [smem:[#allocation37_spill]] }
 0x135   : > { %s1099_s21 = sshll.u32 %s551_s16, 4  ;;  %s1084_s28 = scalar_lea.sflag [#allocation4], %s2382_s17  ;;  %s2478_s21 = int_to_ptr.vmem [resolvable:$true] %s1099_s21 }
 0x136   : > { %v585_v7 = vsub.s32 1, %v570_v6  ;;  %v571_v8 = vsub.s32 0, %v570_v6  ;;  %v599_v14 = vsub.s32 2, %v570_v6  ;;  %s1849_s23 = scalar_lea.vmem %s2478_s21, 128  ;;  %s1971_s12 = smov [#allocation17]  }
 0x137   : > { %p1850_p11 = scmp.ne.s32.totalorder %s2478_s21, %s1849_s23  ;;  %s1853_s4 = sshll.u32 %s1971_s12, 4  ;;  %s1854_s4 = int_to_ptr.vmem [resolvable:$false] %s1853_s4 }
 0x138   : > { %580 = vperm.xlu1 %1559, %v557_v3   ;;  %566 = vperm.xlu0 %1558, %v557_v3   ;;  %v586_v10 = vrot.slane %v558_v9, %v585_v7  ;;  %v572_v12 = vrot.slane %v558_v9, %v571_v8  ;;  %v600_v21 = vrot.slane %v558_v9, %v599_v14  ;;  %s1360_s30 = sshll.u32 %s2612_s15, 7  ;;  %s1855_s25 = scalar_lea.vmem %s1854_s4, 256 }
 0x139   : > { %p2615_p9 = scmp.ne.s32.totalorder %s2613_s27, 0  ;;  %p1856_p13 = scmp.lt.s32.totalorder %s2478_s21, %s1854_s4 }
 0x13a   : > { %s2483_s29 = scalar_lea.hbm %s2614_s9, %s1360_s30  ;;  %p1857_p4 = scmp.lt.s32.totalorder %s1855_s25, %s1849_s23 }
 0x13b   : > { %p1851_p2 = pnand %p1850_p11, %p2615_p9 }
 0x13c   : > { %1561 = vset.pattern.permute.xlu1 %v1968_v4  ;;  %1560 = vset.pattern.permute.xlu0 %v1968_v4  ;;  %p1858_p8 = por %p1857_p4, %p1856_p13 }
 0x13d   : > { %594 = vperm.xlu1 %1561, %v557_v3   ;;  %590 = vperm.xlu0 %1560, %v556_v2   ;;  %p1852_p0 = pneg %p1851_p2 }
 0x13f   : > { %p1859_p3 = pnand %p1858_p8, %p1852_p0 }
 0x1b3   : > { %v577_v11 = vpop.permute.xlu1 %576  ;;  %v562_v13 = vpop.permute.xlu0 %561 }
 0x1b4   : > { %v587_v15 = vsub.f32 %v577_v11, %v586_v10  ;;  %v573_v16 = vsub.f32 %v562_v13, %v572_v12 }
 0x1b6   : > { %v605_v22 = vmul.f32 %v587_v15, %v587_v15  ;;  %v603_v23 = vmul.f32 %v573_v16, %v573_v16 }
 0x1b7   : > { %v581_v17 = vpop.permute.xlu1 %580  ;;  %v567_v18 = vpop.permute.xlu0 %566 }
 0x1b8   : > { %v588_v19 = vsub.f32 %v581_v17, %v586_v10  ;;  %v574_v20 = vsub.f32 %v567_v18, %v572_v12  ;;  %v607_v30 = vadd.f32 %v605_v22, %v603_v23 }
 0x1ba   : > { %v606_v24 = vmul.f32 %v588_v19, %v588_v19  ;;  %v604_v25 = vmul.f32 %v574_v20, %v574_v20 }
 0x1bc   : > { %v595_v26 = vpop.permute.xlu1 %594  ;;  %v591_v27 = vpop.permute.xlu0 %590  ;;  %v608_v31 = vadd.f32 %v606_v24, %v604_v25 }
 0x1bd   : > { %v602_v28 = vsub.f32 %v595_v26, %v600_v21  ;;  %v601_v29 = vsub.f32 %v591_v27, %v600_v21 }
 0x1bf   : > { %v610_v32 = vmul.f32 %v602_v28, %v602_v28  ;;  %v609_v33 = vmul.f32 %v601_v29, %v601_v29 }
 0x1c1   : > { %v612_v34 = vadd.f32 %v610_v32, %v608_v31  ;;  %v611_v35 = vadd.f32 %v609_v33, %v607_v30 }
 0x1c3   : > { %v619_v36 = vsel %vm615_vm0, %v612_v34, inf  ;;  %v616_v37 = vsel %vm615_vm0, %v611_v35, inf }
 0x1c4   : > { %620 = vmin.xlane.f32.xlu0 %v619_v36  ;;  %617 = vmin.xlane.f32.xlu1 %v616_v37 }
 0x251   : > { %v2426_v39 = vpop.xlane.xlu1 %617  ;;  %v2428_v40 = vpop.xlane.xlu0 %620 }
 0x252   : > { %vm622_vm1 = vcmp.eq.f32.partialorder %v611_v35, %v2426_v39  ;;  %vm623_vm2 = vcmp.eq.f32.partialorder %v612_v34, %v2428_v40  ;;  %v658_v25 = vadd.f32 1e-08, %v2426_v39  ;;  %v659_v26 = vadd.f32 1e-08, %v2428_v40 }
 0x253   : > { %v624_v41 = vsel %vm622_vm1, %v2424_v38, 8  ;;  %v625_v42 = vsel %vm623_vm2, %v2424_v38, 8 }
 0x254   : > { %v626_v43 = vsel %vm615_vm0, %v624_v41, 2147483647  ;;  %v641_v44 = vsel %vm615_vm0, %v625_v42, 2147483647  ;;  %1573 = vrcp.f32 %v658_v25 }
 0x255   : > { %v628_v45 = vshra.s32 %v626_v43, 16  ;;  %v643_v46 = vshra.s32 %v641_v44, 16  ;;  %v642_v49 = vand.u32 65535, %v641_v44  ;;  %v627_v50 = vand.u32 65535, %v626_v43 }
 0x256   : > { %1575 = vrcp.f32 %v659_v26 }
 0x257   : > { %v630_v47 = vcvt.s32.f32 %v628_v45  ;;  %v645_v48 = vcvt.s32.f32 %v643_v46  ;;  %v644_v53 = vcvt.s32.f32 %v642_v49  ;;  %v629_v54 = vcvt.s32.f32 %v627_v50 }
 0x259   : > { %631 = vmin.xlane.f32.xlu0 %v630_v47  ;;  %646 = vmin.xlane.f32.xlu1 %v645_v48 }
 0x25e   : > { %v1574_v37 = vpop.eup %1573 }
 0x260   : > { %v1576_v41 = vpop.eup %1575 }
 0x2e6   : > { %v647_v51 = vpop.xlane.xlu1 %646  ;;  %v632_v52 = vpop.xlane.xlu0 %631 }
 0x2e7   : > { %vm648_vm3 = vcmp.eq.f32.partialorder %v645_v48, %v647_v51  ;;  %vm633_vm4 = vcmp.eq.f32.partialorder %v630_v47, %v632_v52  ;;  %v653_v57 = vcvt.f32.s32 %v647_v51  ;;  %v638_v58 = vcvt.f32.s32 %v632_v52 }
 0x2e8   : > { %v649_v55 = vsel %vm648_vm3, %v644_v53, inf  ;;  %v634_v56 = vsel %vm633_vm4, %v629_v54, inf  ;;  %vm785_vm4 = vcmask 1043456  }
 0x2e9   : > { %650 = vmin.xlane.f32.xlu1 %v649_v55  ;;  %635 = vmin.xlane.f32.xlu0 %v634_v56  ;;  %v654_v61 = vshll.u32 %v653_v57, 16  ;;  %v639_v62 = vshll.u32 %v638_v58, 16 }
 0x376   : > { %v651_v59 = vpop.xlane.xlu1 %650  ;;  %v636_v60 = vpop.xlane.xlu0 %635 }
 0x377   : > { %v652_v63 = vcvt.f32.s32 %v651_v59  ;;  %v637_v0 = vcvt.f32.s32 %v636_v60 }
 0x379   : > { %v655_v1 = vadd.s32 %v654_v61, %v652_v63  ;;  %v640_v2 = vadd.s32 %v639_v62, %v637_v0 }
 0x37b   : > { %vm657_vm5 = vcmp.eq.s32.totalorder %v2424_v38, %v655_v1  ;;  %vm656_vm6 = vcmp.eq.s32.totalorder %v2424_v38, %v640_v2 }
 0x37c   : > { %v667_v3 = vsel %vm657_vm5, inf, %v612_v34  ;;  %v666_v4 = vsel %vm656_vm6, inf, %v611_v35  ;;  %v663_v44 = vsel %vm657_vm5, %v1576_v41, 0.0  ;;  %v662_v45 = vsel %vm656_vm6, %v1574_v37, 0.0  ;;  %v1562_v41 = vld [vmem:[#allocation10] sm:$0xff]  }
 0x37d   : > { %v671_v5 = vsel %vm615_vm0, %v667_v3, inf  ;;  %v668_v6 = vsel %vm615_vm0, %v666_v4, inf  ;;  %vm1970_vm5 = vmmov 0   ;;  %vm862_vm6 = vcmask 261120  }
 0x37e   : > { %672 = vmin.xlane.f32.xlu1 %v671_v5  ;;  %669 = vmin.xlane.f32.xlu0 %v668_v6 }
 0x40b   : > { %v673_v7 = vpop.xlane.xlu1 %672  ;;  %v670_v8 = vpop.xlane.xlu0 %669 }
 0x40c   : > { %vm675_vm7 = vcmp.eq.f32.partialorder %v667_v3, %v673_v7  ;;  %vm674_vm8 = vcmp.eq.f32.partialorder %v666_v4, %v670_v8  ;;  %v711_v27 = vadd.f32 1e-08, %v673_v7  ;;  %v710_v28 = vadd.f32 1e-08, %v670_v8 }
 0x40d   : > { %v677_v9 = vsel %vm675_vm7, %v2424_v38, 8  ;;  %v676_v10 = vsel %vm674_vm8, %v2424_v38, 8 }
 0x40e   : > { %v693_v11 = vsel %vm615_vm0, %v677_v9, 2147483647  ;;  %v678_v12 = vsel %vm615_vm0, %v676_v10, 2147483647  ;;  %1577 = vrcp.f32 %v711_v27 }
 0x40f   : > { %v695_v13 = vshra.s32 %v693_v11, 16  ;;  %v680_v14 = vshra.s32 %v678_v12, 16  ;;  %v694_v17 = vand.u32 65535, %v693_v11  ;;  %v679_v18 = vand.u32 65535, %v678_v12 }
 0x410   : > { %1579 = vrcp.f32 %v710_v28  ;;  %v781_v28 = vld [vmem:[%s2399_s5] sm:$0xf] }
 0x411   : > { %v697_v15 = vcvt.s32.f32 %v695_v13  ;;  %v682_v16 = vcvt.s32.f32 %v680_v14  ;;  %v696_v21 = vcvt.s32.f32 %v694_v17  ;;  %v681_v22 = vcvt.s32.f32 %v679_v18 }
 0x413   : > { %698 = vmin.xlane.f32.xlu1 %v697_v15  ;;  %683 = vmin.xlane.f32.xlu0 %v682_v16 }
 0x418   : > { %v1578_v43 = vpop.eup %1577 }
 0x41a   : > { %v1580_v40 = vpop.eup %1579 }
 0x4a0   : > { %v699_v19 = vpop.xlane.xlu1 %698  ;;  %v684_v20 = vpop.xlane.xlu0 %683 }
 0x4a1   : > { %vm700_vm9 = vcmp.eq.f32.partialorder %v697_v15, %v699_v19  ;;  %vm685_vm10 = vcmp.eq.f32.partialorder %v682_v16, %v684_v20  ;;  %v705_v29 = vcvt.f32.s32 %v699_v19  ;;  %v690_v30 = vcvt.f32.s32 %v684_v20 }
 0x4a2   : > { %v701_v23 = vsel %vm700_vm9, %v696_v21, inf  ;;  %v686_v24 = vsel %vm685_vm10, %v681_v22, inf }
 0x4a3   : > { %702 = vmin.xlane.f32.xlu1 %v701_v23  ;;  %687 = vmin.xlane.f32.xlu0 %v686_v24  ;;  %v706_v33 = vshll.u32 %v705_v29, 16  ;;  %v691_v34 = vshll.u32 %v690_v30, 16  ;;  %v1969_v29 = vmov 0.0   ;;  %v787_v30 = vsel %vm785_vm4, %v781_v28, 0 }
 0x4a4   : > { %1381 = vmatprep.subr.bf16.mxu0 %v1969_v29  ;;  %1383 = vmatprep.mubr.msk.bf16.mxu0 %vm1970_vm5, %v1969_v29 }
 0x4a5   : > { %1382 = vmatpush3.bf16.msra.mxu0 %v787_v30  ;;  %1387 = vmatprep.subr.bf16.mxu1 %v1969_v29 }
 0x4a6   : > { %1395 = vmatprep.subr.bf16.mxu0 %v1969_v29  ;;  %1391 = vmatprep.mubr.msk.bf16.mxu1 %vm1970_vm5, %v1969_v29 }
 0x530   : > { %v703_v31 = vpop.xlane.xlu1 %702  ;;  %v688_v32 = vpop.xlane.xlu0 %687 }
 0x531   : > { %v704_v35 = vcvt.f32.s32 %v703_v31  ;;  %v689_v36 = vcvt.f32.s32 %v688_v32  ;;  %v1566_v31 = vld [vmem:[#allocation11 + $0x8] sm:$0xff]  }
 0x533   : > { %v707_v42 = vadd.s32 %v706_v33, %v704_v35  ;;  %v692_v39 = vadd.s32 %v691_v34, %v689_v36 }
 0x535   : > { %vm709_vm11 = vcmp.eq.s32.totalorder %v2424_v38, %v707_v42  ;;  %vm708_vm12 = vcmp.eq.s32.totalorder %v2424_v38, %v692_v39  ;;  %v1563_v39 = vld [vmem:[#allocation10 + $0x8] sm:$0xff]  }
 0x536   : > { %v719_v46 = vsel %vm709_vm11, inf, %v667_v3  ;;  %v715_v47 = vsel %vm709_vm11, %v1578_v43, 0.0  ;;  %v718_v48 = vsel %vm708_vm12, inf, %v666_v4  ;;  %v714_v49 = vsel %vm708_vm12, %v1580_v40, 0.0  ;;  %v1565_v43 = vld [vmem:[#allocation10 + $0x10] sm:$0xff]  }
 0x537   : > { %v723_v50 = vsel %vm615_vm0, %v719_v46, inf  ;;  %v720_v51 = vsel %vm615_vm0, %v718_v48, inf  ;;  %v717_v52 = vadd.f32 %v715_v47, %v663_v44  ;;  %v716_v53 = vadd.f32 %v714_v49, %v662_v45  ;;  %v1567_v40 = vld [vmem:[%s2403_s24] sm:$0xff]  }
 0x538   : > { %724 = vmin.xlane.f32.xlu1 %v723_v50  ;;  %721 = vmin.xlane.f32.xlu0 %v720_v51  ;;  %v1568_v44 = vld [vmem:[#allocation10 + $0x18] sm:$0xff]  }
 0x539   : > { %v1569_v45 = vld [vmem:[#allocation14] sm:$0xff]  }
 0x5c5   : > { %v725_v54 = vpop.xlane.xlu1 %724  ;;  %v722_v55 = vpop.xlane.xlu0 %721 }
 0x5c6   : > { %vm727_vm13 = vcmp.eq.f32.partialorder %v719_v46, %v725_v54  ;;  %vm726_vm14 = vcmp.eq.f32.partialorder %v718_v48, %v722_v55  ;;  %v763_v8 = vadd.f32 1e-08, %v725_v54  ;;  %v762_v9 = vadd.f32 1e-08, %v722_v55 }
 0x5c7   : > { %v729_v56 = vsel %vm727_vm13, %v2424_v38, 8  ;;  %v728_v57 = vsel %vm726_vm14, %v2424_v38, 8 }
 0x5c8   : > { %v745_v58 = vsel %vm615_vm0, %v729_v56, 2147483647  ;;  %v730_v59 = vsel %vm615_vm0, %v728_v57, 2147483647  ;;  %1581 = vrcp.f32 %v763_v8  ;;  %v1571_v56 = vld [vmem:[#allocation14 + $0x10] sm:$0xff]   ;;  %v1572_v57 = vld [vmem:[#allocation14 + $0x18] sm:$0xff]  }
 0x5c9   : > { %v747_v60 = vshra.s32 %v745_v58, 16  ;;  %v732_v61 = vshra.s32 %v730_v59, 16  ;;  %v746_v0 = vand.u32 65535, %v745_v58  ;;  %v731_v1 = vand.u32 65535, %v730_v59  ;;  %v1342_v59 = vld [vmem:[#allocation13] ss:$0 sm:$0xff] }
 0x5ca   : > { %1583 = vrcp.f32 %v762_v9 }
 0x5cb   : > { %v749_v62 = vcvt.s32.f32 %v747_v60  ;;  %v734_v63 = vcvt.s32.f32 %v732_v61  ;;  %v748_v4 = vcvt.s32.f32 %v746_v0  ;;  %v733_v5 = vcvt.s32.f32 %v731_v1 }
 0x5cd   : > { %750 = vmin.xlane.f32.xlu1 %v749_v62  ;;  %735 = vmin.xlane.f32.xlu0 %v734_v63 }
 0x5d2   : > { %v1582_v20 = vpop.eup %1581 }
 0x5d4   : > { %v1584_v21 = vpop.eup %1583 }
 0x65a   : > { %v751_v2 = vpop.xlane.xlu1 %750  ;;  %v736_v3 = vpop.xlane.xlu0 %735 }
 0x65b   : > { %vm752_vm15 = vcmp.eq.f32.partialorder %v749_v62, %v751_v2  ;;  %vm737_vm1 = vcmp.eq.f32.partialorder %v734_v63, %v736_v3  ;;  %v757_v10 = vcvt.f32.s32 %v751_v2  ;;  %v742_v11 = vcvt.f32.s32 %v736_v3 }
 0x65c   : > { %v753_v6 = vsel %vm752_vm15, %v748_v4, inf  ;;  %v738_v7 = vsel %vm737_vm1, %v733_v5, inf }
 0x65d   : > { %754 = vmin.xlane.f32.xlu1 %v753_v6  ;;  %739 = vmin.xlane.f32.xlu0 %v738_v7  ;;  %v758_v14 = vshll.u32 %v757_v10, 16  ;;  %v743_v15 = vshll.u32 %v742_v11, 16  ;;  %v1343_v6 = vld [vmem:[#allocation16] ss:$0 sm:$0xff] }
 0x6ea   : > { %v755_v12 = vpop.xlane.xlu1 %754  ;;  %v740_v13 = vpop.xlane.xlu0 %739 }
 0x6eb   : > { %v756_v16 = vcvt.f32.s32 %v755_v12  ;;  %v741_v17 = vcvt.f32.s32 %v740_v13 }
 0x6ed   : > { %v759_v18 = vadd.s32 %v758_v14, %v756_v16  ;;  %v744_v19 = vadd.s32 %v743_v15, %v741_v17 }
 0x6ef   : > { %vm761_vm2 = vcmp.eq.s32.totalorder %v2424_v38, %v759_v18  ;;  %vm760_vm3 = vcmp.eq.s32.totalorder %v2424_v38, %v744_v19  ;;  %v1564_v38 = vld [vmem:[#allocation11] sm:$0xff]  }
 0x6f0   : > { %v767_v22 = vsel %vm761_vm2, %v1582_v20, 0.0  ;;  %v766_v23 = vsel %vm760_vm3, %v1584_v21, 0.0  ;;  %1388 = vmatpush3.bf16.msra.mxu1 %v1564_v38 }
 0x6f1   : > { %v769_v24 = vadd.f32 %v767_v22, %v717_v52  ;;  %v768_v25 = vadd.f32 %v766_v23, %v716_v53  ;;  %1389 = vmatprep.subr.bf16.mxu1 %v1969_v29  ;;  %v1570_v53 = vld [vmem:[#allocation14 + $0x8] sm:$0xff]  }
 0x6f3   : > { %v773_v26 = vsel %vm615_vm0, %v769_v24, 0.0  ;;  %v770_v27 = vsel %vm615_vm0, %v768_v25, 0.0 }
 0x6f4   : > { %774 = vadd.xlane.f32.xlu1 %v773_v26  ;;  %771 = vadd.xlane.f32.xlu0 %v770_v27 }
 0x6f5   : > { %1390 = vmatpush3.bf16.msra.mxu1 %v1566_v31 }
 0x6f6   : > { %1407 = vmatprep.subr.bf16.mxu1 %v1969_v29 }
 0x6f8   : > { %1392 = vmatmul.mubr.msk.bf16.vlgmr.msra.gmra.mrb[0].mxu1 %vm862_vm6, %v1567_v40 }
 0x6f9   : > { %1415 = vmatprep.mubr.msk.bf16.mxu1 %vm1970_vm5, %v1969_v29  ;;  %1408 = vmatpush3.bf16.msra.mxu1 %v1569_v45 }
 0x6fa   : > { %1409 = vmatprep.subr.bf16.mxu1 %v1969_v29 }
 0x6fd   : > { %1410 = vmatpush3.bf16.msra.mxu1 %v1570_v53 }
 0x6fe   : > { %1411 = vmatprep.subr.bf16.mxu1 %v1969_v29 }
 0x701   : > { %1412 = vmatpush3.bf16.msra.mxu1 %v1571_v56 }
 0x702   : > { %1413 = vmatprep.subr.bf16.mxu1 %v1969_v29 }
 0x705   : > { %1414 = vmatpush3.bf16.msra.mxu1 %v1572_v57 }
 0x781   : > { %v775_v32 = vpop.xlane.xlu1 %774  ;;  %v772_v33 = vpop.xlane.xlu0 %771 }
 0x782   : > { %1585 = vrcp.f32 %v775_v32 }
 0x783   : > { %1587 = vrcp.f32 %v772_v33 }
 0x78c   : > { %v1586_v34 = vpop.eup %1585 }
 0x78d   : > { %v1588_v35 = vpop.eup %1587  ;;  %v779_v36 = vmul.f32 %v1586_v34, %v769_v24 }
 0x78e   : > { %v777_v37 = vmul.f32 %v1588_v35, %v768_v25 }
 0x790   : > { %v780_v42 = vpack.c.bf16 %v779_v36, %v777_v37 }
 0x792   : > { %1384 = vmatmul.mubr.msk.bf16.vlgmr.msra.gmra.mrb[0].mxu0 %vm615_vm0, %v780_v42  ;;  %vm931_vm0 = vcmask 523264  }
 0x793   : > { %1396 = vmatpush3.bf16.msra.mxu0 %v1562_v41  ;;  %1403 = vmatprep.mubr.msk.bf16.mxu0 %vm1970_vm5, %v1969_v29 }
 0x794   : > { %1397 = vmatprep.subr.bf16.mxu0 %v1969_v29 }
 0x797   : > { %1398 = vmatpush3.bf16.msra.mxu0 %v1563_v39 }
 0x798   : > { %1399 = vmatprep.subr.bf16.mxu0 %v1969_v29 }
 0x79b   : > { %1400 = vmatpush3.bf16.msra.mxu0 %v1565_v43 }
 0x79c   : > { %1401 = vmatprep.subr.bf16.mxu0 %v1969_v29 }
 0x79f   : > { %1402 = vmatpush3.bf16.msra.mxu0 %v1568_v44 }
 0x7cb   : > { %v900_v51 = vpop.f32.mrb[0].mxu1 }
 0x7cc   : > { %v1393_v52 = vpop.f32.mrb[1].mxu1 }
 0x7cd   : > { %v903_v54 = vpop.f32.mrb[2].mxu1 }
 0x7ce   : > { %v1394_v55 = vpop.f32.mrb[3].mxu1 }
 0x865   : > { %v823_v46 = vpop.f32.mrb[0].mxu0 }
 0x866   : > { %v1385_v47 = vpop.f32.mrb[1].mxu0 }
 0x867   : > { %v826_v48 = vpop.f32.mrb[2].mxu0 }
 0x868   : > { %v838_v49 = vpack.c.bf16 %v826_v48, %v823_v46  ;;  %v1386_v50 = vpop.f32.mrb[3].mxu0 }
 0x86a   : > { %1404 = vmatmul.mubr.msk.bf16.vlgmr.msra.gmra.mrb[4].mxu0 %vm931_vm0, %v838_v49 }
 0x93d   : > { %v969_v58 = vpop.f32.mrb[4].mxu0 }
 0x93e   : > { %v970_v60 = vadd.f32 %v969_v58, %v900_v51  ;;  %v1405_v61 = vpop.f32.mrb[5].mxu0 }
 0x93f   : > { %v972_v62 = vpop.f32.mrb[6].mxu0 }
 0x940   : > { %v983_v63 = vadd.f32 %v1342_v59, %v970_v60  ;;  %v973_v0 = vadd.f32 %v972_v62, %v903_v54  ;;  %v1406_v1 = vpop.f32.mrb[7].mxu0 }
 0x942   : > { %v984_v2 = vadd.f32 %v1342_v59, %v973_v0  ;;  %v985_v3 = vmax.f32 %v983_v63, 0.0 }
 0x944   : > { %v986_v4 = vmax.f32 %v984_v2, 0.0 }
 0x946   : > { %v987_v5 = vpack.c.bf16 %v986_v4, %v985_v3 }
 0x948   : > { %1416 = vmatmul.mubr.msk.bf16.vlgmr.msra.gmra.mrb[4].mxu1 %vm931_vm0, %v987_v5 }
 0xa1b   : > { %v1064_v7 = vpop.f32.mrb[4].mxu1 }
 0xa1c   : > { %v1065_v8 = vadd.f32 %v1343_v6, %v1064_v7  ;;  %v1417_v9 = vpop.f32.mrb[5].mxu1 }
 0xa1d   : > { %v1067_v10 = vpop.f32.mrb[6].mxu1 }
 0xa1e   : > { %v1068_v11 = vadd.f32 %v1343_v6, %v1067_v10  ;;  %v1418_v12 = vpop.f32.mrb[7].mxu1  ;;  %v1071_v13 = vmax.f32 %v1065_v8, 0.0 }
 0xa20   : > { %v1072_v14 = vmax.f32 %v1068_v11, 0.0 }
 0xa22   : > { %v1364_v15 = vpack.c.bf16 %v1072_v14, %v1071_v13 }
 0xa24   : > { %1365 = vst [vmem:[%s551_s16] sm:$0xff] %v1364_v15  }
 0xa25   : > { %1862 = shalt.err (!%p1859_p3)
}
 0xa26   : > { %s1863_s18 = scalar_lea.hbm %s2483_s29, 128  ;;  %s1867_s1 = scalar_lea.hbm %s2614_s9, 256 }
 0xa27   : > { %p1864_p10 = scmp.ne.s32.totalorder %s2483_s29, %s1863_s18  ;;  %p1868_p6 = scmp.lt.u32.totalorder %s2483_s29, %s2614_s9 }
 0xa28   : > { %p1869_p5 = scmp.lt.u32.totalorder %s1867_s1, %s1863_s18  ;;  %p1871_p11 = scmp.lt.u32.totalorder %s1863_s18, %s2483_s29 }
 0xa29   : > { %p1865_p7 = pnand %p1864_p10, %p2615_p9 }
 0xa2a   : > { %p1870_p1 = por %p1869_p5, %p1868_p6 }
 0xa2b   : > { %p1866_p12 = pneg %p1865_p7 }
 0xa2c   : > { %p1872_p2 = por %p1871_p11, %p1870_p1 }
 0xa2e   : > { %p1873_p0 = pnand %p1872_p2, %p1866_p12 }
 0xa30   : > { %1876 = shalt.err (!%p1873_p0)
}
 0xa31   : > { %s1972_s22 = smov 64   ;;  %s1973_s24 = smov 4  }
 0xa32   : > { %1447 = dma.vmem_to_hbm [thread:$0]  (%p2615_p9), %s2478_s21, 128, %s2483_s29, %s1084_s28, %s1972_s22, %s1972_s22, %s1973_s24  }
 0xa33 PF: > { %s2616_s15 = sld [smem:[#allocation25_spill]]  ;;  %s2617_s16 = sld [smem:[#allocation32_spill]] }
 0xa34   : > { %p2619_p4 = scmp.ge.s32.totalorder %s1951_s14, 2 }
 0xa39   : > { %s1114_s30 = sand.u32 1, %s2616_s15   ;;  %p2618_p13 = scmp.ne.s32.totalorder %s2617_s16, 0 }
 0xa3a   : > { %s1115_s20 = scalar_lea.sflag [#allocation4], %s1114_s30 }
 0xa3b   : > { %p1479_p8 = pnand %p2619_p4, %p2618_p13 }
 0xa3d   : > { %1926 = dma.done.wait (!%p1479_p8), %s1115_s20, 128  }
 0xa3e   : > { %1928 = vsyncadd (!%p1479_p8), %s1115_s20, 4294967168  ;;  %s33_s14 = sadd.s32 1, %s1951_s14   ;;  %s2620_s7 = sld [smem:[#allocation26_spill]] }
 0xa3f   : > { %p30_p3 = scmp.ge.s32.totalorder %s33_s14, 4   ;;  %s2621_s11 = sld [smem:[#allocation31_spill]] }
 0xa40   : > { %s2622_s17 = sld [smem:[#allocation29_spill]]  ;;  %s2623_s30 = smov %s1935_s10 }
 0xa41   : > { %s2625_s12 = smov %s1947_s13  ;;  %32 = sbr.rel (!%p30_p3) target bundleno = 18 (0x12), region = 158 }
 0xa44   : > { %s2624_s10 = smov %s2620_s7 }
 0xa46   : > { %s2626_s13 = smov %s2622_s17 }
 0xa48   :  { %1120 = vsyncpa [#allocation3], 1 }
 0xa49   :  { %1122 = vsyncpa [#allocation3 + $0x1], 1 }
 0xa4a   :  { %1123 = vsyncpa [#allocation6], 1 }
 0xa4b   :  { %1125 = vsyncpa [#allocation6 + $0x1], 1 }
 0xa4c   :  { %1126 = vsyncpa [#allocation9], 1 }
 0xa4d   :  { %1128 = vsyncpa [#allocation9 + $0x1], 1 }
 0xa4e   :  { %1129 = vsyncpa [#allocation12], 1 }
 0xa4f   :  { %1130 = vsyncpa [#allocation15], 1 }
 0xa50   :  { %1131 = vsyncpa [#allocation4], 1 }
 0xa51   :  { %1133 = vsyncpa [#allocation4 + $0x1], 1 }

// kernel: a_call__.7
= control target key start
LH: loop header
LB: loop body
LE: loop exit
PB: predicated region body
PF: predicated region fallthrough
CT: control target
= control target key end

     0   :  { %s4388_s0 = inlined_call_operand.hbm [shape: f32[2,64,3], index: 0, kind: input, shape index: {}]   ;;  %s4389_s1 = inlined_call_operand.hbm [shape: f32[2,3,16], index: 1, kind: input, shape index: {}]   ;;  %s4390_s2 = inlined_call_operand.hbm [shape: bf16[2,16,64], index: 2, kind: input, shape index: {}]   ;;  %s4391_s3 = inlined_call_operand.hbm [shape: bf16[2,64,6], index: 3, kind: input, shape index: {}]   ;;  %s4392_s4 = inlined_call_operand.hbm [shape: bf16[64,64], index: 4, kind: input, shape index: {}]   ;;  %s4393_s5 = inlined_call_operand.hbm [shape: f32[6,64], index: 5, kind: input, shape index: {}]   ;;  %s4394_s6 = inlined_call_operand.hbm [shape: f32[1,64], index: 6, kind: input, shape index: {}]   ;;  %s4395_s7 = inlined_call_operand.hbm [shape: bf16[64,128], index: 7, kind: input, shape index: {}]   ;;  %s4396_s8 = inlined_call_operand.hbm [shape: f32[1,128], index: 8, kind: input, shape index: {}]   ;;  %s4397_s9 = inlined_call_operand.hbm [shape: f32[2,64,128], index: 9, kind: output, shape index: {}]  }
   0x1   :  { %4421 = sst [smem:[#allocation31_spill]] %s4389_s1 }
   0x2   :  { %4422 = sst [smem:[#allocation32_spill]] %s4392_s4 }
   0x3   :  { %4423 = sst [smem:[#allocation33_spill]] %s4393_s5 }
   0x4   :  { %4424 = sst [smem:[#allocation34_spill]] %s4395_s7 }
   0x5   :  { %4425 = sst [smem:[#allocation35_spill]] %s4397_s9 }
   0x6   :  { %14 = vsyncpa [#allocation3], 0 }
   0x7   :  { %16 = vsyncpa [#allocation3 + $0x1], 0 }
   0x8   :  { %17 = vsyncpa [#allocation6], 0 }
   0x9   :  { %19 = vsyncpa [#allocation6 + $0x1], 0 }
   0xa   :  { %20 = vsyncpa [#allocation9], 0 }
   0xb   :  { %22 = vsyncpa [#allocation9 + $0x1], 0 }
   0xc   :  { %23 = vsyncpa [#allocation12], 0 }
   0xd   :  { %24 = vsyncpa [#allocation15], 0 }
   0xe   :  { %25 = vsyncpa [#allocation4], 0 }
   0xf   :  { %27 = vsyncpa [#allocation4 + $0x1], 0  ;;  %s3262_s30 = smov 0   ;;  %s3264_s10 = smov 0  }
  0x10   :  { %s3266_s11 = smov 0   ;;  %s3268_s12 = smov 0  }
  0x11   :  { %s3270_s13 = smov 0   ;;  %s3272_s14 = smov 0  }
  0x12 LB: > { %4426 = sst [smem:[#allocation25_spill]] %s3176_s11  ;;  %s3293_s15 = sadd.s32 4294967295, %s3188_s14   ;;  %s3188_s14 = sphi %s3272_s14, %s33_s14   ;;  %s3184_s13 = sphi %s3270_s13, %s4475_s13   ;;  %s3180_s12 = sphi %s3268_s12, %s4474_s12   ;;  %s3176_s11 = sphi %s3266_s11, %s4470_s11   ;;  %s3172_s10 = sphi %s3264_s10, %s4473_s10   ;;  %s3168_s30 = sphi %s3262_s30, %s4472_s30  }
  0x13   : > { %4427 = sst [smem:[#allocation26_spill]] %s3180_s12  ;;  %p2317_p0 = scmp.ge.s32.totalorder %s3188_s14, 1 }
  0x14   : > { %p4400_p1 = scmp.eq.s32.totalorder %s3293_s15, 0  ;;  %p291_p2 = scmp.lt.s32.totalorder %s3188_s14, 3 }
  0x15   : > { %s3190_s17 = smov [#allocation10]   ;;  %s3191_s20 = smov [#allocation11]  }
  0x16   : > { %p3298_p3 = pnand %p2317_p0, %p291_p2  ;;  %s303_s18 = sshll.u32 %s3190_s17, 4  ;;  %s3302_s18 = int_to_ptr.vmem [resolvable:$true] %s303_s18 }
  0x17   : > { %s317_s21 = sshll.u32 %s3191_s20, 4  ;;  %s3192_s22 = smov [#allocation14]   ;;  %s3313_s21 = int_to_ptr.vmem [resolvable:$true] %s317_s21 }
  0x18   : > { %s4428_s16 = scalar_select %p3298_p3, 1, 0 }
  0x19   : > { %p2490_p4 = pneg %p3298_p3  ;;  %s3315_s23 = sshll.u32 %s3192_s22, 4  ;;  %s339_s23 = int_to_ptr.vmem [resolvable:$true] %s3315_s23 }
  0x1a   : > { %4429 = sst [smem:[#allocation27_spill]] %s4428_s16 }
  0x1b   : > { %p3309_p6 = pnand %p2490_p4, %p4400_p1  ;;  %s4431_s4 = sld [smem:[#allocation32_spill]] }
  0x1d   : > { %s4430_s19 = scalar_select %p3309_p6, 1, 0 }
  0x1e   : > { %p3325_p8 = pneg %p3309_p6 }
  0x20   : > { %s4432_s29 = scalar_select %p3325_p8, 1, 0 }
  0x21   : > { %s2826_s26 = scalar_lea.hbm %s4431_s4, 512 }
  0x22   : > { %p2827_p7 = scmp.ne.s32.totalorder %s4431_s4, %s2826_s26  ;;  %p2833_p11 = scmp.lt.u32.totalorder %s2826_s26, %s4431_s4 }
  0x24   : > { %p2829_p9 = pnand %p3325_p8, %p2827_p7 }
  0x26   : > { %p2830_p10 = pneg %p2829_p9 }
  0x28   : > { %p2835_p12 = pnand %p2833_p11, %p2830_p10 }
  0x2a   : > { %2838 = shalt.err (!%p2835_p12)
}
  0x2b   : > { %s2839_s22 = scalar_lea.vmem %s3302_s18, 512  ;;  %p2847_p4 = scmp.lt.s32.totalorder %s3302_s18, %s3302_s18 }
  0x2c   : > { %p2840_p13 = scmp.ne.s32.totalorder %s3302_s18, %s2839_s22  ;;  %p2848_p5 = scmp.lt.s32.totalorder %s2839_s22, %s2839_s22 }
  0x2e   : > { %p2842_p0 = pnand %p2840_p13, %p3325_p8  ;;  %p2849_p7 = por %p2848_p5, %p2847_p4 }
  0x30   : > { %p2843_p2 = pneg %p2842_p0 }
  0x32   : > { %p2850_p9 = pnand %p2849_p7, %p2843_p2 }
  0x34   : > { %2853 = shalt.err (!%p2850_p9)
}
  0x35   : > { %s4402_s24 = smov 64   ;;  %s4404_s25 = smov 4  }
  0x36   : > { %2493 = dma.hbm_to_vmem [thread:$0]  (!%p3309_p6), %s4431_s4, 512, %s3302_s18, [#allocation9], %s4402_s24, %s4402_s24, %s4404_s25  }
  0x37   : > { %s4433_s5 = sld [smem:[#allocation33_spill]] }
  0x3d   : > { %s2854_s20 = scalar_lea.hbm %s4433_s5, 128 }
  0x3e   : > { %p2855_p5 = scmp.ne.s32.totalorder %s4433_s5, %s2854_s20  ;;  %p2861_p12 = scmp.lt.u32.totalorder %s2854_s20, %s4433_s5 }
  0x40   : > { %p2857_p10 = pnand %p2855_p5, %p3325_p8 }
  0x42   : > { %p2858_p11 = pneg %p2857_p10 }
  0x44   : > { %p2863_p13 = pnand %p2861_p12, %p2858_p11 }
  0x46   : > { %2866 = shalt.err (!%p2863_p13)
}
  0x47   : > { %s2867_s18 = scalar_lea.vmem %s3313_s21, 128  ;;  %p2875_p7 = scmp.lt.s32.totalorder %s3313_s21, %s3313_s21 }
  0x48   : > { %p2868_p0 = scmp.ne.s32.totalorder %s3313_s21, %s2867_s18  ;;  %p2876_p9 = scmp.lt.s32.totalorder %s2867_s18, %s2867_s18 }
  0x4a   : > { %p2870_p2 = pnand %p2868_p0, %p3325_p8  ;;  %p2877_p5 = por %p2876_p9, %p2875_p7 }
  0x4c   : > { %p2871_p4 = pneg %p2870_p2 }
  0x4e   : > { %p2878_p10 = pnand %p2877_p5, %p2871_p4 }
  0x50   : > { %2881 = shalt.err (!%p2878_p10)
}
  0x51   : > { %2496 = dma.hbm_to_vmem [thread:$0]  (!%p3309_p6), %s4433_s5, 128, %s3313_s21, [#allocation12]  }
  0x52   : > { %s4434_s7 = sld [smem:[#allocation34_spill]] }
  0x58   : > { %s2882_s27 = scalar_lea.hbm %s4434_s7, 512 }
  0x59   : > { %p2883_p11 = scmp.ne.s32.totalorder %s4434_s7, %s2882_s27  ;;  %p2889_p0 = scmp.lt.u32.totalorder %s2882_s27, %s4434_s7 }
  0x5b   : > { %p2885_p12 = pnand %p2883_p11, %p3325_p8 }
  0x5d   : > { %p2886_p13 = pneg %p2885_p12 }
  0x5f   : > { %p2891_p2 = pnand %p2889_p0, %p2886_p13 }
  0x61   : > { %2894 = shalt.err (!%p2891_p2)
}
  0x62   : > { %s2895_s18 = scalar_lea.vmem %s339_s23, 512  ;;  %p2903_p5 = scmp.lt.s32.totalorder %s339_s23, %s339_s23 }
  0x63   : > { %p2896_p4 = scmp.ne.s32.totalorder %s339_s23, %s2895_s18  ;;  %p2904_p10 = scmp.lt.s32.totalorder %s2895_s18, %s2895_s18 }
  0x65   : > { %p2898_p7 = pnand %p2896_p4, %p3325_p8  ;;  %p2905_p1 = por %p2904_p10, %p2903_p5 }
  0x67   : > { %p2899_p9 = pneg %p2898_p7 }
  0x69   : > { %p2906_p3 = pnand %p2905_p1, %p2899_p9 }
  0x6b   : > { %2909 = shalt.err (!%p2906_p3)
}
  0x6c   : > { %2502 = dma.hbm_to_vmem [thread:$0]  (!%p3309_p6), %s4434_s7, 512, %s339_s23, [#allocation15], %s4402_s24, %s4402_s24, %s4404_s25  }
  0x6d   : > { %s2316_s12 = sadd.s32 4294967294, %s3188_s14   ;;  %s45_s16 = sadd.s32 1, %s3184_s13 }
  0x6e   : > { %s54_s26 = sadd.s32 1, %s3176_s11  ;;  %p47_p1 = scmp.ge.s32.totalorder %s45_s16, 2 }
  0x6f   : > { %p61_p3 = scmp.ne.s32.totalorder %s3176_s11, %s3172_s10  ;;  %p62_p11 = scmp.eq.s32.totalorder %s3188_s14, 0 }
  0x70   : > { %p67_p12 = scmp.ne.s32.totalorder %s3172_s10, %s3168_s30  ;;  %s4477_s16 = smov (%p47_p1, %s45_s16), 0 }
  0x71   : > { %4435 = sst [smem:[#allocation28_spill]] %s4477_s16  ;;  %p63_p13 = por %p62_p11, %p61_p3 }
  0x72   : > { %p4436_p0 = scmp.eq.s32.totalorder %s3293_s15, 0  ;;  %s49_s23 = ssub.s32 %s3184_s13, %s4477_s16 }
  0x73   : > { %p278_p4 = scmp.eq.s32.totalorder %s3293_s15, 1  ;;  %p52_p7 = scmp.eq.s32.totalorder %s49_s23, 0 }
  0x74   : > { %p3406_p2 = por %p4436_p0, %p67_p12  ;;  %p284_p9 = scmp.eq.s32.totalorder %s2316_s12, 1 }
  0x75   : > { %p3413_p5 = por %p278_p4, %p61_p3  ;;  %p2528_p10 = scmp.lt.s32.totalorder %s3188_s14, 2 }
  0x76   : > { %s4437_s27 = scalar_select %p3406_p2, 1, 0 }
  0x77   : > { %s4438_s28 = scalar_select %p3413_p5, 1, 0 }
  0x78   : > { %s3419_s17 = scalar_select %p52_p7, %s3176_s11, %s54_s26  }
  0x79   : > { %p3421_p1 = por %p284_p9, %p67_p12  ;;  %s3426_s22 = sand.u32 1, %s3176_s11  }
  0x7a   : > { %4439 = sst [smem:[#allocation29_spill]] %s3419_s17  ;;  %p3428_p11 = pnand %p2528_p10, %p63_p13 }
  0x7b   : > { %s4440_s20 = scalar_select %p3421_p1, 1, 0 }
  0x7c   : > { %s4442_s18 = scalar_select %p3428_p11, 1, 0 }
  0x7d   : > { %4441 = sst [smem:[#allocation30_spill]] %s4440_s20  ;;  %s4408_s21 = sand.u32 1, %s3188_s14  }
  0x7e   : > { %s2327_s9 = sshll.u32 %s3426_s22, 2  ;;  %s2328_s12 = sshll.u32 %s3184_s13, 6 }
  0x7f   : > { %s390_s23 = scalar_lea.vmem [#allocation5], %s2327_s9  ;;  %s4443_s1 = sld [smem:[#allocation31_spill]] }
  0x80   : > { %s397_s24 = sshll.u32 %s390_s23, 4  ;;  %s3444_s5 = scalar_lea.sflag [#allocation6], %s4408_s21  ;;  %s3440_s24 = int_to_ptr.vmem [resolvable:$true] %s397_s24 }
  0x81   : > { %p3450_p12 = pneg %p3428_p11 }
  0x83   : > { %s4444_s9 = scalar_select %p3450_p12, 1, 0 }
  0x85   : > { %s3438_s4 = scalar_lea.hbm %s4443_s1, %s2328_s12  ;;  %s2915_s23 = scalar_lea.hbm %s4443_s1, 128 }
  0x86   : > { %s2910_s7 = scalar_lea.hbm %s3438_s4, 64  ;;  %p2916_p4 = scmp.lt.u32.totalorder %s3438_s4, %s4443_s1 }
  0x87   : > { %p2911_p3 = scmp.ne.s32.totalorder %s3438_s4, %s2910_s7  ;;  %p2917_p7 = scmp.lt.u32.totalorder %s2915_s23, %s2910_s7 }
  0x88   : > { %p2919_p10 = scmp.lt.u32.totalorder %s2910_s7, %s3438_s4 }
  0x89   : > { %p2913_p13 = pnand %p3450_p12, %p2911_p3  ;;  %p2918_p9 = por %p2917_p7, %p2916_p4 }
  0x8b   : > { %p2914_p0 = pneg %p2913_p13  ;;  %p2920_p1 = por %p2919_p10, %p2918_p9 }
  0x8d   : > { %p2921_p5 = pnand %p2920_p1, %p2914_p0 }
  0x8f   : > { %2924 = shalt.err (!%p2921_p5)
}
  0x90   : > { %s2925_s21 = scalar_lea.vmem %s3440_s24, 64  ;;  %s3195_s25 = smov [#allocation5]  }
  0x91   : > { %p2926_p3 = scmp.ne.s32.totalorder %s3440_s24, %s2925_s21  ;;  %s2930_s12 = sshll.u32 %s3195_s25, 4  ;;  %s2931_s12 = int_to_ptr.vmem [resolvable:$false] %s2930_s12 }
  0x92   : > { %s2932_s16 = scalar_lea.vmem %s2931_s12, 128  ;;  %p2933_p6 = scmp.lt.s32.totalorder %s3440_s24, %s2931_s12 }
  0x93   : > { %p2928_p13 = pnand %p2926_p3, %p3450_p12  ;;  %p2934_p8 = scmp.lt.s32.totalorder %s2932_s16, %s2925_s21 }
  0x95   : > { %p2929_p2 = pneg %p2928_p13  ;;  %p2935_p4 = por %p2934_p8, %p2933_p6 }
  0x97   : > { %p2936_p7 = pnand %p2935_p4, %p2929_p2 }
  0x99   : > { %2939 = shalt.err (!%p2936_p7)
}
  0x9a   : > { %2512 = dma.hbm_to_vmem [thread:$0]  (!%p3428_p11), %s3438_s4, 64, %s3440_s24, %s3444_s5  }
  0x9b   : > { %s3196_s7 = smov [#allocation13]   ;;  %s3197_s26 = smov [#allocation16]  }
  0x9c   : > { %s328_s23 = sshll.u32 %s3196_s7, 4  ;;  %s352_s1 = sshll.u32 %s3197_s26, 4  ;;  %s329_s23 = int_to_ptr.vmem [resolvable:$true] %s328_s23  ;;  %s353_s1 = int_to_ptr.vmem [resolvable:$true] %s352_s1 }
  0x9d   : > { %s2940_s12 = scalar_lea.hbm %s4394_s6, 16  ;;  %p4445_p8 = scmp.ne.s32.totalorder %s4432_s29, 0 }
  0x9e   : > { %p2941_p6 = scmp.ne.s32.totalorder %s4394_s6, %s2940_s12  ;;  %p2947_p1 = scmp.lt.u32.totalorder %s2940_s12, %s4394_s6 }
  0xa0   : > { %p2943_p2 = pnand %p2941_p6, %p4445_p8 }
  0xa2   : > { %p2944_p5 = pneg %p2943_p2 }
  0xa4   : > { %p2949_p0 = pnand %p2947_p1, %p2944_p5 }
  0xa6   : > { %2952 = shalt.err (!%p2949_p0)
}
  0xa7   : > { %s2953_s4 = scalar_lea.vmem %s329_s23, 16  ;;  %s2960_s24 = scalar_lea.vmem %s329_s23, 32 }
  0xa8   : > { %p2954_p9 = scmp.ne.s32.totalorder %s329_s23, %s2953_s4  ;;  %p2961_p13 = scmp.lt.s32.totalorder %s329_s23, %s329_s23 }
  0xa9   : > { %p2962_p4 = scmp.lt.s32.totalorder %s2960_s24, %s2953_s4 }
  0xaa   : > { %p2956_p10 = pnand %p2954_p9, %p4445_p8 }
  0xab   : > { %p2963_p7 = por %p2962_p4, %p2961_p13 }
  0xac   : > { %p2957_p3 = pneg %p2956_p10 }
  0xae   : > { %p2964_p11 = pnand %p2963_p7, %p2957_p3 }
  0xb0   : > { %2967 = shalt.err (!%p2964_p11)
}
  0xb1   : > { %p4446_p6 = scmp.ne.s32.totalorder %s4430_s19, 0  ;;  %s2968_s26 = scalar_lea.hbm %s4396_s8, 16 }
  0xb2   : > { %p2969_p2 = scmp.ne.s32.totalorder %s4396_s8, %s2968_s26  ;;  %p2975_p11 = scmp.lt.u32.totalorder %s2968_s26, %s4396_s8 }
  0xb3   : > { %2499 = dma.hbm_to_vmem [thread:$0]  (!%p4446_p6), %s4394_s6, 16, %s329_s23, [#allocation12]  }
  0xb4   : > { %p2971_p5 = pnand %p2969_p2, %p4445_p8 }
  0xb6   : > { %p2972_p1 = pneg %p2971_p5 }
  0xb8   : > { %p2977_p0 = pnand %p2975_p11, %p2972_p1 }
  0xba   : > { %2980 = shalt.err (!%p2977_p0)
}
  0xbb   : > { %s2981_s4 = scalar_lea.vmem %s353_s1, 16  ;;  %s2988_s23 = scalar_lea.vmem %s353_s1, 32 }
  0xbc   : > { %p2982_p9 = scmp.ne.s32.totalorder %s353_s1, %s2981_s4  ;;  %p2989_p13 = scmp.lt.s32.totalorder %s353_s1, %s353_s1 }
  0xbd   : > { %p2990_p4 = scmp.lt.s32.totalorder %s2988_s23, %s2981_s4 }
  0xbe   : > { %p2984_p10 = pnand %p2982_p9, %p4445_p8 }
  0xbf   : > { %p2991_p7 = por %p2990_p4, %p2989_p13 }
  0xc0   : > { %p2985_p3 = pneg %p2984_p10 }
  0xc2   : > { %p2992_p12 = pnand %p2991_p7, %p2985_p3 }
  0xc4   : > { %2995 = shalt.err (!%p2992_p12)
}
  0xc5   : > { %2505 = dma.hbm_to_vmem [thread:$0]  (!%p4446_p6), %s4396_s8, 16, %s353_s1, [#allocation15]  }
  0xc6   : > { %s2324_s7 = sshll.u32 %s3426_s22, 6  ;;  %s2374_s29 = sshll.u32 %s3184_s13, 10 }
  0xc7   : > { %s3515_s26 = scalar_lea.hbm %s4388_s0, %s2374_s29  ;;  %s367_s19 = scalar_lea.vmem [#allocation2], %s2324_s7 }
  0xc8   : > { %s376_s25 = sshll.u32 %s367_s19, 4  ;;  %s364_s12 = scalar_lea.sflag [#allocation3], %s3426_s22  ;;  %s3517_s25 = int_to_ptr.vmem [resolvable:$true] %s376_s25 }
  0xc9   : > { %s2996_s21 = scalar_lea.hbm %s3515_s26, 1024  ;;  %p4447_p8 = scmp.ne.s32.totalorder %s4444_s9, 0 }
  0xca   : > { %p2997_p12 = scmp.ne.s32.totalorder %s3515_s26, %s2996_s21  ;;  %s3001_s4 = scalar_lea.hbm %s4388_s0, 2048 }
  0xcb   : > { %p3002_p5 = scmp.lt.u32.totalorder %s3515_s26, %s4388_s0  ;;  %p3003_p1 = scmp.lt.u32.totalorder %s3001_s4, %s2996_s21 }
  0xcc   : > { %p2999_p6 = pnand %p2997_p12, %p4447_p8  ;;  %p3005_p0 = scmp.lt.u32.totalorder %s2996_s21, %s3515_s26 }
  0xcd   : > { %p3004_p11 = por %p3003_p1, %p3002_p5 }
  0xce   : > { %p3000_p2 = pneg %p2999_p6 }
  0xcf   : > { %p3006_p9 = por %p3005_p0, %p3004_p11 }
  0xd1   : > { %p3007_p10 = pnand %p3006_p9, %p3000_p2 }
  0xd3   : > { %3010 = shalt.err (!%p3007_p10)
}
  0xd4   : > { %s3011_s17 = scalar_lea.vmem %s3517_s25, 1024  ;;  %s3198_s7 = smov [#allocation2]  }
  0xd5   : > { %p3012_p3 = scmp.ne.s32.totalorder %s3517_s25, %s3011_s17  ;;  %s3016_s29 = sshll.u32 %s3198_s7, 4  ;;  %s3017_s29 = int_to_ptr.vmem [resolvable:$false] %s3016_s29 }
  0xd6   : > { %s3018_s11 = scalar_lea.vmem %s3017_s29, 2048  ;;  %p3019_p7 = scmp.lt.s32.totalorder %s3517_s25, %s3017_s29 }
  0xd7   : > { %p3014_p13 = pnand %p3012_p3, %p4447_p8  ;;  %p3020_p12 = scmp.lt.s32.totalorder %s3018_s11, %s3011_s17 }
  0xd9   : > { %p3015_p4 = pneg %p3014_p13  ;;  %p3021_p6 = por %p3020_p12, %p3019_p7 }
  0xdb   : > { %p3022_p5 = pnand %p3021_p6, %p3015_p4 }
  0xdd   : > { %3025 = shalt.err (!%p3022_p5)
}
  0xde   : > { %s3199_s20 = smov 128   ;;  %s3200_s19 = smov 8  }
  0xdf   : > { %p4448_p2 = scmp.ne.s32.totalorder %s4442_s18, 0  ;;  %s2329_s21 = sshll.u32 %s3426_s22, 3 }
  0xe0   : > { %s2375_s1 = sshll.u32 %s3184_s13, 7  ;;  %s408_s24 = scalar_lea.vmem [#allocation7], %s2329_s21 }
  0xe1   : > { %2509 = dma.hbm_to_vmem [thread:$0]  (!%p4448_p2), %s3515_s26, 1024, %s3517_s25, %s364_s12, %s3199_s20, %s3199_s20, %s3200_s19  }
  0xe2   : > { %s3548_s23 = scalar_lea.hbm %s4390_s2, %s2375_s1  ;;  %s415_s17 = sshll.u32 %s408_s24, 4  ;;  %s3551_s17 = int_to_ptr.vmem [resolvable:$true] %s415_s17 }
  0xe3   : > { %s2332_s7 = sshll.u32 %s3426_s22, 5  ;;  %s3026_s29 = scalar_lea.hbm %s3548_s23, 128 }
  0xe4   : > { %p3027_p1 = scmp.ne.s32.totalorder %s3548_s23, %s3026_s29  ;;  %s3031_s12 = scalar_lea.hbm %s4390_s2, 256 }
  0xe5   : > { %p3032_p9 = scmp.lt.u32.totalorder %s3548_s23, %s4390_s2  ;;  %p3033_p10 = scmp.lt.u32.totalorder %s3031_s12, %s3026_s29 }
  0xe6   : > { %p3029_p11 = pnand %p3027_p1, %p4447_p8  ;;  %p3035_p13 = scmp.lt.u32.totalorder %s3026_s29, %s3548_s23 }
  0xe7   : > { %p3034_p3 = por %p3033_p10, %p3032_p9 }
  0xe8   : > { %p3030_p0 = pneg %p3029_p11 }
  0xe9   : > { %p3036_p4 = por %p3035_p13, %p3034_p3 }
  0xeb   : > { %p3037_p7 = pnand %p3036_p4, %p3030_p0 }
  0xed   : > { %3040 = shalt.err (!%p3037_p7)
}
  0xee   : > { %s3041_s19 = scalar_lea.vmem %s3551_s17, 128  ;;  %s3201_s21 = smov [#allocation7]  }
  0xef   : > { %p3042_p12 = scmp.ne.s32.totalorder %s3551_s17, %s3041_s19  ;;  %s3046_s1 = sshll.u32 %s3201_s21, 4  ;;  %s3047_s1 = int_to_ptr.vmem [resolvable:$false] %s3046_s1 }
  0xf0   : > { %s3048_s16 = scalar_lea.vmem %s3047_s1, 256  ;;  %p3049_p1 = scmp.lt.s32.totalorder %s3551_s17, %s3047_s1 }
  0xf1   : > { %p3044_p6 = pnand %p3042_p12, %p4447_p8  ;;  %p3050_p11 = scmp.lt.s32.totalorder %s3048_s16, %s3041_s19 }
  0xf3   : > { %p3045_p5 = pneg %p3044_p6  ;;  %p3051_p9 = por %p3050_p11, %p3049_p1 }
  0xf5   : > { %p3052_p10 = pnand %p3051_p9, %p3045_p5 }
  0xf7   : > { %3055 = shalt.err (!%p3052_p10)
}
  0xf8   : > { %s4449_s4 = smov 4   ;;  %s4450_s24 = smov 64  }
  0xf9   : > { %2515 = dma.hbm_to_vmem [thread:$0]  (!%p4448_p2), %s3548_s23, 128, %s3551_s17, %s3444_s5, %s4450_s24, %s4450_s24, %s4449_s4  }
  0xfa   : > { %s2376_s29 = sshll.u32 %s3184_s13, 9  ;;  %s429_s26 = scalar_lea.vmem [#allocation8], %s2332_s7 }
  0xfb   : > { %s438_s25 = sshll.u32 %s429_s26, 4  ;;  %s3584_s20 = scalar_lea.hbm %s4391_s3, %s2376_s29  ;;  %s3586_s25 = int_to_ptr.vmem [resolvable:$true] %s438_s25 }
  0xfc   : > { %s4451_s19 = sand.u32 1, %s3188_s14   ;;  %s3056_s1 = scalar_lea.hbm %s3584_s20, 512 }
  0xfd   : > { %s3590_s21 = scalar_lea.sflag [#allocation9], %s4451_s19  ;;  %p3057_p0 = scmp.ne.s32.totalorder %s3584_s20, %s3056_s1 }
  0xfe   : > { %s3061_s23 = scalar_lea.hbm %s4391_s3, 1024  ;;  %p3062_p4 = scmp.lt.u32.totalorder %s3584_s20, %s4391_s3 }
  0xff   : > { %p3059_p3 = pnand %p3057_p0, %p4447_p8  ;;  %p3063_p7 = scmp.lt.u32.totalorder %s3061_s23, %s3056_s1 }
 0x100   : > { %p3065_p6 = scmp.lt.u32.totalorder %s3056_s1, %s3584_s20 }
 0x101   : > { %p3060_p13 = pneg %p3059_p3  ;;  %p3064_p12 = por %p3063_p7, %p3062_p4 }
 0x103   : > { %p3066_p5 = por %p3065_p6, %p3064_p12 }
 0x105   : > { %p3067_p1 = pnand %p3066_p5, %p3060_p13 }
 0x107   : > { %3070 = shalt.err (!%p3067_p1)
}
 0x108   : > { %s3071_s16 = scalar_lea.vmem %s3586_s25, 512  ;;  %s3202_s29 = smov [#allocation8]  }
 0x109   : > { %p3072_p11 = scmp.ne.s32.totalorder %s3586_s25, %s3071_s16  ;;  %s3076_s26 = sshll.u32 %s3202_s29, 4  ;;  %s3077_s26 = int_to_ptr.vmem [resolvable:$false] %s3076_s26 }
 0x10a   : > { %s3078_s12 = scalar_lea.vmem %s3077_s26, 1024  ;;  %p3079_p0 = scmp.lt.s32.totalorder %s3586_s25, %s3077_s26 }
 0x10b   : > { %p3074_p9 = pnand %p3072_p11, %p4447_p8  ;;  %p3080_p3 = scmp.lt.s32.totalorder %s3078_s12, %s3071_s16 }
 0x10d   : > { %p3075_p10 = pneg %p3074_p9  ;;  %p3081_p4 = por %p3080_p3, %p3079_p0 }
 0x10f   : > { %p3082_p7 = pnand %p3081_p4, %p3075_p10 }
 0x111   : > { %3085 = shalt.err (!%p3082_p7)
}
 0x112   : > { %2518 = dma.hbm_to_vmem [thread:$0]  (!%p4448_p2), %s3584_s20, 512, %s3586_s25, %s3590_s21, %s4450_s24, %s4450_s24, %s4449_s4  }
 0x113   : > { %s4452_s9 = sld [smem:[#allocation27_spill]] }
 0x119   : > { %p4453_p8 = scmp.ne.s32.totalorder %s4452_s9, 0 }
 0x11a   : > { %s3620_s11 = sand.u32 (!%p4453_p8), 1, %s3172_s10   ;;  %p4454_p13 = scmp.ne.s32.totalorder (!%p4453_p8), %s4437_s27, 0 }
 0x11b   : > { %450 = sbr.rel (%p4453_p8) target bundleno = 2666 (0xa6a), region = 56  ;;  %s2336_s19 = sshll.u32 (!%p4453_p8), %s3620_s11, 6 }
 0x11c   : > { %s453_s1 = scalar_lea.sflag (!%p4453_p8), [#allocation3], %s3620_s11  ;;  %s3626_s18 = scalar_lea.vmem (!%p4453_p8), [#allocation2], %s2336_s19 }
 0x122   : > { %3139 = dma.done.wait (%p4454_p13), %s453_s1, 1024  }
 0x123   : > { %3141 = vsyncadd (%p4454_p13), %s453_s1, 4294966272  ;;  %s461_s4 = sand.u32 1, %s3293_s15   ;;  %s2337_s24 = sshll.u32 %s3620_s11, 2 }
 0x124   : > { %s462_s25 = scalar_lea.sflag [#allocation6], %s461_s4  ;;  %s3634_s20 = scalar_lea.vmem [#allocation5], %s2337_s24 }
 0x125   : > { %3143 = dma.done.wait (%p4454_p13), %s462_s25, 192  }
 0x126   : > { %3145 = vsyncadd (%p4454_p13), %s462_s25, 4294967104  ;;  %s2338_s21 = sshll.u32 %s3620_s11, 3  ;;  %s2339_s5 = sshll.u32 %s3620_s11, 5 }
 0x127   : > { %s3642_s22 = scalar_lea.vmem [#allocation7], %s2338_s21  ;;  %s480_s23 = scalar_lea.sflag [#allocation9], %s461_s4 }
 0x128   : > { %s3644_s17 = scalar_lea.vmem [#allocation8], %s2339_s5 }
 0x129   : > { %3147 = dma.done.wait (%p4454_p13), %s480_s23, 512  }
 0x12a   : > { %3149 = vsyncadd (%p4454_p13), %s480_s23, 4294966784  ;;  %p4455_p2 = scmp.eq.s32.totalorder %s3293_s15, 0 }
 0x12c   : > { %3151 = dma.done.wait (%p4455_p2), [#allocation9], 512   ;;  %p4456_p12 = pmov %p4455_p2 }
 0x12d   : > { %p4457_p6 = pmov %p4455_p2 }
 0x12e   : > { %3153 = vsyncadd (%p4456_p12), [#allocation9], 4294966784 }
 0x12f   : > { %3155 = dma.done.wait (%p4457_p6), [#allocation12], 144   ;;  %p4458_p5 = pmov %p4455_p2 }
 0x130   : > { %p4459_p1 = pmov %p4455_p2 }
 0x131   : > { %3157 = vsyncadd (%p4458_p5), [#allocation12], 4294967152 }
 0x132   : > { %3159 = dma.done.wait (%p4459_p1), [#allocation15], 528   ;;  %p4460_p11 = pmov %p4459_p1 }
 0x133   : > { %v3203_v0 = vmov 1   ;;  %v3204_v1 = vmov 0   ;;  %v557_v2 = vld [vmem:[%s3626_s18] sm:$0xff]  ;;  %v558_v3 = vld [vmem:[%s3626_s18 + $0x8] sm:$0xff]  ;;  %v3205_v4 = vmov 2   ;;  %v560_v5 = vld [vmem:[%s3626_s18 + $0x18] sm:$0xff]  ;;  %v606_v11 = vlaneseq }
 0x134   : > { %3161 = vsyncadd (%p4460_p11), [#allocation15], 4294966768  ;;  %2601 = vset.pattern.permute.xlu1 %v3203_v0  ;;  %2600 = vset.pattern.permute.xlu0 %v3204_v1  ;;  %v559_v6 = vld [vmem:[%s3626_s18 + $0x10] sm:$0xff]  ;;  %v561_v7 = vld [vmem:[%s3626_s18 + $0x20] sm:$0xff]  ;;  %vm748_vm0 = vcmask 130048   ;;  %s4462_s15 = sld [smem:[#allocation26_spill]] }
 0x135   : > { %619 = vperm.xlu1 %2601, %v557_v2   ;;  %568 = vperm.xlu0 %2600, %v557_v2   ;;  %v562_v8 = vld [vmem:[%s3626_s18 + $0x28] sm:$0xff]  ;;  %v563_v9 = vld [vmem:[%s3626_s18 + $0x30] sm:$0xff]  ;;  %v564_v10 = vld [vmem:[%s3626_s18 + $0x38] sm:$0xff]  ;;  %v3687_v12 = vshrl.u32 %v606_v11, 7  ;;  %s552_s27 = scalar_lea.vmem [#allocation17], %s2336_s19  ;;  %s4463_s12 = sld [smem:[#allocation35_spill]] }
 0x136   : > { %v565_v17 = vld [vmem:[%s3634_s20] sm:$0x7]  ;;  %s2112_s7 = sshll.u32 %s552_s27, 4  ;;  %s2097_s1 = scalar_lea.sflag [#allocation4], %s3620_s11  ;;  %s4334_s7 = int_to_ptr.vmem [resolvable:$true] %s2112_s7 }
 0x137   : > { %v4420_v15 = vsub.s32 2, %v3687_v12  ;;  %v652_v16 = vsub.s32 1, %v3687_v12  ;;  %v608_v19 = vsub.s32 0, %v3687_v12  ;;  %s3086_s18 = scalar_lea.vmem %s4334_s7, 1024  ;;  %p4465_p10 = scmp.ne.s32.totalorder %s4438_s28, 0 }
 0x138   : > { %p3087_p9 = scmp.ne.s32.totalorder %s4334_s7, %s3086_s18  ;;  %s3209_s4 = smov [#allocation17]  }
 0x139   : > { %623 = vperm.xlu1 %2601, %v558_v3   ;;  %2605 = vset.pattern.permute.xlu0 %v3205_v4  ;;  %v3695_v20 = vrot.slane %v565_v17, %v4420_v15  ;;  %v3699_v22 = vrot.slane %v565_v17, %v652_v16  ;;  %v3703_v23 = vrot.slane %v565_v17, %v608_v19  ;;  %s3090_s24 = sshll.u32 %s3209_s4, 4  ;;  %s3091_s24 = int_to_ptr.vmem [resolvable:$false] %s3090_s24 }
 0x13a   : > { %667 = vperm.xlu0 %2605, %v558_v3   ;;  %s2377_s16 = sshll.u32 %s4462_s15, 10  ;;  %p3088_p0 = pnand %p3087_p9, %p4465_p10 }
 0x13b   : > { %s4464_s9 = smov %s4463_s12  ;;  %s4339_s19 = scalar_lea.hbm %s4463_s12, %s2377_s16 }
 0x13c   : > { %p3089_p3 = pneg %p3088_p0  ;;  %s3092_s25 = scalar_lea.vmem %s3091_s24, 2048 }
 0x13d   : > { %2602 = vset.pattern.permute.xlu1 %v3204_v1  ;;  %p3093_p4 = scmp.lt.s32.totalorder %s4334_s7, %s3091_s24  ;;  %p3094_p7 = scmp.lt.s32.totalorder %s3092_s25, %s3086_s18 }
 0x13e   : > { %583 = vperm.xlu1 %2602, %v560_v5   ;;  %2606 = vset.pattern.permute.xlu0 %v3204_v1 }
 0x13f   : > { %573 = vperm.xlu0 %2606, %v558_v3   ;;  %p3095_p8 = por %p3094_p7, %p3093_p4 }
 0x141   : > { %p3096_p13 = pnand %p3095_p8, %p3089_p3 }
 0x142   : > { %2603 = vset.pattern.permute.xlu1 %v3203_v0 }
 0x143   : > { %631 = vperm.xlu1 %2603, %v560_v5   ;;  %578 = vperm.xlu0 %2606, %v559_v6  }
 0x147   : > { %2604 = vset.pattern.permute.xlu1 %v3205_v4  ;;  %588 = vperm.xlu0 %2606, %v561_v7  }
 0x148   : > { %663 = vperm.xlu1 %2604, %v557_v2  }
 0x14b   : > { %2607 = vset.pattern.permute.xlu0 %v3203_v0 }
 0x14c   : > { %671 = vperm.xlu1 %2604, %v559_v6   ;;  %627 = vperm.xlu0 %2607, %v559_v6  }
 0x150   : > { %675 = vperm.xlu1 %2604, %v560_v5   ;;  %639 = vperm.xlu0 %2607, %v562_v8  }
 0x154   : > { %2608 = vset.pattern.permute.xlu1 %v3204_v1  ;;  %643 = vperm.xlu0 %2607, %v563_v9  }
 0x155   : > { %593 = vperm.xlu1 %2608, %v562_v8  }
 0x158   : > { %2612 = vset.pattern.permute.xlu0 %v3205_v4 }
 0x159   : > { %2609 = vset.pattern.permute.xlu1 %v3203_v0  ;;  %679 = vperm.xlu0 %2612, %v561_v7  }
 0x15a   : > { %635 = vperm.xlu1 %2609, %v561_v7  }
 0x15d   : > { %691 = vperm.xlu0 %2612, %v564_v10  }
 0x15e   : > { %2610 = vset.pattern.permute.xlu1 %v3204_v1 }
 0x15f   : > { %598 = vperm.xlu1 %2610, %v563_v9  }
 0x161   : > { %2614 = vset.pattern.permute.xlu0 %v3204_v1 }
 0x163   : > { %603 = vperm.xlu1 %2610, %v564_v10  }
 0x167   : > { %2611 = vset.pattern.permute.xlu1 %v3203_v0 }
 0x168   : > { %647 = vperm.xlu1 %2611, %v564_v10  }
 0x16c   : > { %2613 = vset.pattern.permute.xlu1 %v3205_v4 }
 0x16d   : > { %683 = vperm.xlu1 %2613, %v562_v8  }
 0x171   : > { %687 = vperm.xlu1 %2613, %v563_v9  }
 0x175   : > { %2620 = vset.pattern.permute.xlu1 %v3203_v0 }
 0x1b4   : > { %v620_v13 = vpop.permute.xlu1 %619  ;;  %v569_v14 = vpop.permute.xlu0 %568 }
 0x1b5   : > { %v654_v32 = vsub.f32 %v620_v13, %v3699_v22  ;;  %v610_v33 = vsub.f32 %v569_v14, %v3703_v23 }
 0x1b7   : > { %v714_v38 = vmul.f32 %v654_v32, %v654_v32  ;;  %v706_v39 = vmul.f32 %v610_v33, %v610_v33 }
 0x1b8   : > { %v624_v18 = vpop.permute.xlu1 %623 }
 0x1b9   : > { %v668_v21 = vpop.permute.xlu0 %667  ;;  %v655_v24 = vsub.f32 %v624_v18, %v3699_v22  ;;  %v722_v45 = vadd.f32 %v714_v38, %v706_v39 }
 0x1ba   : > { %v699_v25 = vsub.f32 %v668_v21, %v3695_v20 }
 0x1bb   : > { %v715_v29 = vmul.f32 %v655_v24, %v655_v24 }
 0x1bc   : > { %v731_v30 = vmul.f32 %v699_v25, %v699_v25 }
 0x1bd   : > { %v584_v26 = vpop.permute.xlu1 %583 }
 0x1be   : > { %v574_v27 = vpop.permute.xlu0 %573  ;;  %v613_v48 = vsub.f32 %v584_v26, %v3703_v23 }
 0x1bf   : > { %v611_v28 = vsub.f32 %v574_v27, %v3703_v23 }
 0x1c0   : > { %v709_v60 = vmul.f32 %v613_v48, %v613_v48 }
 0x1c1   : > { %v707_v31 = vmul.f32 %v611_v28, %v611_v28 }
 0x1c2   : > { %v632_v34 = vpop.permute.xlu1 %631  ;;  %v579_v35 = vpop.permute.xlu0 %578 }
 0x1c3   : > { %v723_v36 = vadd.f32 %v715_v29, %v707_v31  ;;  %v612_v43 = vsub.f32 %v579_v35, %v3703_v23  ;;  %v657_v46 = vsub.f32 %v632_v34, %v3699_v22 }
 0x1c5   : > { %v3710_v37 = vadd.f32 %v731_v30, %v723_v36  ;;  %v708_v51 = vmul.f32 %v612_v43, %v612_v43  ;;  %v717_v55 = vmul.f32 %v657_v46, %v657_v46 }
 0x1c6   : > { %v589_v40 = vpop.permute.xlu0 %588 }
 0x1c7   : > { %v664_v41 = vpop.permute.xlu1 %663  ;;  %v752_v42 = vsel %vm748_vm0, %v3710_v37, inf  ;;  %v725_v2 = vadd.f32 %v717_v55, %v709_v60  ;;  %v614_v13 = vsub.f32 %v589_v40, %v3703_v23 }
 0x1c8   : > { %v698_v44 = vsub.f32 %v664_v41, %v3695_v20  ;;  %753 = vmin.xlane.f32.xlu0 %v752_v42 }
 0x1c9   : > { %v710_v24 = vmul.f32 %v614_v13, %v614_v13 }
 0x1ca   : > { %v730_v47 = vmul.f32 %v698_v44, %v698_v44 }
 0x1cb   : > { %v672_v49 = vpop.permute.xlu1 %671  ;;  %v628_v50 = vpop.permute.xlu0 %627 }
 0x1cc   : > { %v3718_v52 = vadd.f32 %v730_v47, %v722_v45  ;;  %v700_v53 = vsub.f32 %v672_v49, %v3695_v20  ;;  %v656_v54 = vsub.f32 %v628_v50, %v3699_v22 }
 0x1ce   : > { %v716_v56 = vmul.f32 %v656_v54, %v656_v54  ;;  %v749_v57 = vsel %vm748_vm0, %v3718_v52, inf  ;;  %v732_v61 = vmul.f32 %v700_v53, %v700_v53 }
 0x1cf   : > { %v676_v58 = vpop.permute.xlu1 %675  ;;  %750 = vmin.xlane.f32.xlu1 %v749_v57  ;;  %v640_v59 = vpop.permute.xlu0 %639 }
 0x1d0   : > { %v724_v62 = vadd.f32 %v716_v56, %v708_v51  ;;  %v701_v63 = vsub.f32 %v676_v58, %v3695_v20  ;;  %v659_v32 = vsub.f32 %v640_v59, %v3699_v22 }
 0x1d2   : > { %v733_v3 = vmul.f32 %v701_v63, %v701_v63  ;;  %v3725_v5 = vadd.f32 %v732_v61, %v724_v62  ;;  %v719_v39 = vmul.f32 %v659_v32, %v659_v32 }
 0x1d3   : > { %v644_v6 = vpop.permute.xlu0 %643 }
 0x1d4   : > { %v3727_v7 = vadd.f32 %v733_v3, %v725_v2  ;;  %v594_v8 = vpop.permute.xlu1 %593  ;;  %v755_v9 = vsel %vm748_vm0, %v3725_v5, inf  ;;  %v660_v41 = vsub.f32 %v644_v6, %v3699_v22 }
 0x1d5   : > { %756 = vmin.xlane.f32.xlu0 %v755_v9  ;;  %v615_v33 = vsub.f32 %v594_v8, %v3703_v23 }
 0x1d6   : > { %v758_v10 = vsel %vm748_vm0, %v3727_v7, inf  ;;  %v720_v49 = vmul.f32 %v660_v41, %v660_v41 }
 0x1d7   : > { %759 = vmin.xlane.f32.xlu1 %v758_v10  ;;  %v711_v40 = vmul.f32 %v615_v33, %v615_v33 }
 0x1d8   : > { %v680_v14 = vpop.permute.xlu0 %679 }
 0x1d9   : > { %v636_v17 = vpop.permute.xlu1 %635  ;;  %v702_v18 = vsub.f32 %v680_v14, %v3695_v20  ;;  %v727_v48 = vadd.f32 %v719_v39, %v711_v40 }
 0x1da   : > { %v658_v21 = vsub.f32 %v636_v17, %v3699_v22 }
 0x1db   : > { %v734_v26 = vmul.f32 %v702_v18, %v702_v18 }
 0x1dc   : > { %v718_v25 = vmul.f32 %v658_v21, %v658_v21  ;;  %v692_v36 = vpop.permute.xlu0 %691 }
 0x1dd   : > { %v705_v44 = vsub.f32 %v692_v36, %v3695_v20 }
 0x1de   : > { %v726_v27 = vadd.f32 %v718_v25, %v710_v24  ;;  %v599_v28 = vpop.permute.xlu1 %598 }
 0x1df   : > { %v616_v42 = vsub.f32 %v599_v28, %v3703_v23  ;;  %v737_v53 = vmul.f32 %v705_v44, %v705_v44 }
 0x1e0   : > { %v3736_v29 = vadd.f32 %v734_v26, %v726_v27 }
 0x1e1   : > { %v712_v50 = vmul.f32 %v616_v42, %v616_v42 }
 0x1e2   : > { %v604_v30 = vpop.permute.xlu1 %603  ;;  %v761_v31 = vsel %vm748_vm0, %v3736_v29, inf }
 0x1e3   : > { %762 = vmin.xlane.f32.xlu0 %v761_v31  ;;  %v617_v38 = vsub.f32 %v604_v30, %v3703_v23  ;;  %v728_v57 = vadd.f32 %v720_v49, %v712_v50 }
 0x1e5   : > { %v713_v46 = vmul.f32 %v617_v38, %v617_v38 }
 0x1e7   : > { %v648_v34 = vpop.permute.xlu1 %647 }
 0x1e8   : > { %v661_v35 = vsub.f32 %v648_v34, %v3699_v22 }
 0x1ea   : > { %v721_v43 = vmul.f32 %v661_v35, %v661_v35 }
 0x1ec   : > { %v684_v45 = vpop.permute.xlu1 %683  ;;  %v729_v51 = vadd.f32 %v721_v43, %v713_v46 }
 0x1ed   : > { %v703_v47 = vsub.f32 %v684_v45, %v3695_v20 }
 0x1ee   : > { %v3751_v23 = vadd.f32 %v737_v53, %v729_v51 }
 0x1ef   : > { %v735_v54 = vmul.f32 %v703_v47, %v703_v47 }
 0x1f0   : > { %v688_v55 = vpop.permute.xlu1 %687  ;;  %v770_v62 = vsel %vm748_vm0, %v3751_v23, inf }
 0x1f1   : > { %v3748_v56 = vadd.f32 %v735_v54, %v727_v48  ;;  %v704_v22 = vsub.f32 %v688_v55, %v3695_v20  ;;  %v3762_v20 = vand.u32 127, %v606_v11 }
 0x1f3   : > { %v736_v58 = vmul.f32 %v704_v22, %v704_v22  ;;  %v764_v59 = vsel %vm748_vm0, %v3748_v56, inf }
 0x1f4   : > { %765 = vmin.xlane.f32.xlu1 %v764_v59 }
 0x1f5   : > { %v3755_v60 = vadd.f32 %v736_v58, %v728_v57 }
 0x1f7   : > { %v767_v61 = vsel %vm748_vm0, %v3755_v60, inf }
 0x1f8   : > { %768 = vmin.xlane.f32.xlu0 %v767_v61  ;;  %771 = vmin.xlane.f32.xlu1 %v770_v62 }
 0x255   : > { %v3764_v63 = vpop.xlane.xlu0 %753 }
 0x256   : > { %vm774_vm1 = vcmp.eq.f32.partialorder %v3710_v37, %v3764_v63 }
 0x257   : > { %v782_v2 = vsel %vm774_vm1, %v3762_v20, 16 }
 0x258   : > { %v804_v3 = vsel %vm748_vm0, %v782_v2, 2147483647 }
 0x259   : > { %v806_v6 = vshra.s32 %v804_v3, 16  ;;  %v805_v54 = vand.u32 65535, %v804_v3 }
 0x25b   : > { %v808_v8 = vcvt.s32.f32 %v806_v6  ;;  %v807_v22 = vcvt.s32.f32 %v805_v54 }
 0x25c   : > { %v3770_v9 = vpop.xlane.xlu1 %750 }
 0x25d   : > { %vm773_vm2 = vcmp.eq.f32.partialorder %v3718_v52, %v3770_v9  ;;  %809 = vmin.xlane.f32.xlu1 %v808_v8 }
 0x25e   : > { %v781_v11 = vsel %vm773_vm2, %v3762_v20, 16 }
 0x25f   : > { %v789_v10 = vsel %vm748_vm0, %v781_v11, 2147483647 }
 0x260   : > { %v791_v13 = vshra.s32 %v789_v10, 16  ;;  %v790_v58 = vand.u32 65535, %v789_v10 }
 0x262   : > { %v3776_v14 = vpop.xlane.xlu0 %756  ;;  %v793_v17 = vcvt.s32.f32 %v791_v13  ;;  %v792_v61 = vcvt.s32.f32 %v790_v58 }
 0x263   : > { %vm775_vm3 = vcmp.eq.f32.partialorder %v3725_v5, %v3776_v14  ;;  %v919_v54 = vadd.f32 1e-08, %v3776_v14 }
 0x264   : > { %v783_v18 = vsel %vm775_vm3, %v3762_v20, 16  ;;  %v3781_v21 = vpop.xlane.xlu1 %759  ;;  %794 = vmin.xlane.f32.xlu0 %v793_v17 }
 0x265   : > { %vm776_vm4 = vcmp.eq.f32.partialorder %v3727_v7, %v3781_v21  ;;  %v819_v24 = vsel %vm748_vm0, %v783_v18, 2147483647 }
 0x266   : > { %v821_v25 = vshra.s32 %v819_v24, 16  ;;  %v784_v26 = vsel %vm776_vm4, %v3762_v20, 16  ;;  %v820_v2 = vand.u32 65535, %v819_v24 }
 0x267   : > { %v834_v27 = vsel %vm748_vm0, %v784_v26, 2147483647 }
 0x268   : > { %v823_v28 = vcvt.s32.f32 %v821_v25  ;;  %v836_v30 = vshra.s32 %v834_v27, 16  ;;  %v835_v6 = vand.u32 65535, %v834_v27  ;;  %v822_v13 = vcvt.s32.f32 %v820_v2 }
 0x26a   : > { %824 = vmin.xlane.f32.xlu0 %v823_v28  ;;  %v838_v31 = vcvt.s32.f32 %v836_v30  ;;  %v837_v26 = vcvt.s32.f32 %v835_v6 }
 0x26c   : > { %839 = vmin.xlane.f32.xlu1 %v838_v31 }
 0x270   : > { %v3788_v32 = vpop.xlane.xlu0 %762 }
 0x271   : > { %vm777_vm5 = vcmp.eq.f32.partialorder %v3736_v29, %v3788_v32 }
 0x272   : > { %v785_v33 = vsel %vm777_vm5, %v3762_v20, 16 }
 0x273   : > { %v849_v34 = vsel %vm748_vm0, %v785_v33, 2147483647 }
 0x274   : > { %v851_v35 = vshra.s32 %v849_v34, 16 }
 0x276   : > { %v853_v36 = vcvt.s32.f32 %v851_v35 }
 0x278   : > { %854 = vmin.xlane.f32.xlu0 %v853_v36 }
 0x281   : > { %v3794_v38 = vpop.xlane.xlu1 %765 }
 0x282   : > { %vm778_vm6 = vcmp.eq.f32.partialorder %v3748_v56, %v3794_v38 }
 0x283   : > { %v786_v39 = vsel %vm778_vm6, %v3762_v20, 16 }
 0x284   : > { %v864_v40 = vsel %vm748_vm0, %v786_v39, 2147483647 }
 0x285   : > { %v3800_v41 = vpop.xlane.xlu1 %771  ;;  %v3802_v42 = vpop.xlane.xlu0 %768  ;;  %v866_v43 = vshra.s32 %v864_v40, 16  ;;  %v865_v24 = vand.u32 65535, %v864_v40 }
 0x286   : > { %vm780_vm7 = vcmp.eq.f32.partialorder %v3751_v23, %v3800_v41  ;;  %vm779_vm8 = vcmp.eq.f32.partialorder %v3755_v60, %v3802_v42 }
 0x287   : > { %v787_v44 = vsel %vm779_vm8, %v3762_v20, 16  ;;  %v868_v45 = vcvt.s32.f32 %v866_v43  ;;  %v788_v46 = vsel %vm780_vm7, %v3762_v20, 16  ;;  %v867_v33 = vcvt.s32.f32 %v865_v24 }
 0x288   : > { %v894_v47 = vsel %vm748_vm0, %v788_v46, 2147483647  ;;  %v879_v48 = vsel %vm748_vm0, %v787_v44, 2147483647  ;;  %v918_v46 = vadd.f32 1e-08, %v3764_v63 }
 0x289   : > { %869 = vmin.xlane.f32.xlu1 %v868_v45  ;;  %v896_v49 = vshra.s32 %v894_v47, 16  ;;  %v881_v50 = vshra.s32 %v879_v48, 16  ;;  %v880_v35 = vand.u32 65535, %v879_v48 }
 0x28a   : > { %2762 = vrcp.f32 %v918_v46 }
 0x28b   : > { %v898_v51 = vcvt.s32.f32 %v896_v49  ;;  %v883_v53 = vcvt.s32.f32 %v881_v50  ;;  %v882_v44 = vcvt.s32.f32 %v880_v35  ;;  %2764 = vrcp.f32 %v919_v54 }
 0x28d   : > { %899 = vmin.xlane.f32.xlu1 %v898_v51  ;;  %884 = vmin.xlane.f32.xlu0 %v883_v53 }
 0x2ea   : > { %v810_v55 = vpop.xlane.xlu1 %809 }
 0x2eb   : > { %vm811_vm9 = vcmp.eq.f32.partialorder %v808_v8, %v810_v55  ;;  %v850_v8 = vand.u32 65535, %v849_v34 }
 0x2ec   : > { %v812_v57 = vsel %vm811_vm9, %v807_v22, inf }
 0x2ed   : > { %813 = vmin.xlane.f32.xlu1 %v812_v57  ;;  %v852_v10 = vcvt.s32.f32 %v850_v8  ;;  %v2763_v57 = vpop.eup %2762 }
 0x2ee   : > { %v2765_v8 = vpop.eup %2764 }
 0x2f1   : > { %v795_v59 = vpop.xlane.xlu0 %794 }
 0x2f2   : > { %vm796_vm10 = vcmp.eq.f32.partialorder %v793_v17, %v795_v59  ;;  %v801_v22 = vcvt.f32.s32 %v795_v59 }
 0x2f3   : > { %v797_v62 = vsel %vm796_vm10, %v792_v61, inf }
 0x2f4   : > { %798 = vmin.xlane.f32.xlu0 %v797_v62 }
 0x2f7   : > { %v825_v11 = vpop.xlane.xlu0 %824 }
 0x2f8   : > { %vm826_vm11 = vcmp.eq.f32.partialorder %v823_v28, %v825_v11  ;;  %v895_v28 = vand.u32 65535, %v894_v47  ;;  %v831_v62 = vcvt.f32.s32 %v825_v11 }
 0x2f9   : > { %v840_v18 = vpop.xlane.xlu1 %839  ;;  %v827_v25 = vsel %vm826_vm11, %v822_v13, inf }
 0x2fa   : > { %828 = vmin.xlane.f32.xlu0 %v827_v25  ;;  %vm841_vm12 = vcmp.eq.f32.partialorder %v838_v31, %v840_v18  ;;  %v897_v43 = vcvt.s32.f32 %v895_v28  ;;  %v846_v14 = vcvt.f32.s32 %v840_v18  ;;  %v832_v6 = vshll.u32 %v831_v62, 16 }
 0x2fb   : > { %v842_v3 = vsel %vm841_vm12, %v837_v26, inf }
 0x2fc   : > { %843 = vmin.xlane.f32.xlu1 %v842_v3  ;;  %v847_v11 = vshll.u32 %v846_v14, 16 }
 0x305   : > { %v3812_v30 = vpop.xlane.xlu0 %854 }
 0x306   : > { %vm856_vm13 = vcmp.eq.f32.partialorder %v853_v36, %v3812_v30  ;;  %v861_v28 = vcvt.f32.s32 %v3812_v30 }
 0x307   : > { %v857_v17 = vsel %vm856_vm13, %v852_v10, inf  ;;  %v921_v10 = vadd.f32 1e-08, %v3788_v32 }
 0x308   : > { %858 = vmin.xlane.f32.xlu0 %v857_v17 }
 0x309   : > { %2766 = vrcp.f32 %v921_v10 }
 0x316   : > { %v3815_v27 = vpop.xlane.xlu1 %869 }
 0x317   : > { %vm871_vm14 = vcmp.eq.f32.partialorder %v868_v45, %v3815_v27  ;;  %v816_v45 = vcvt.f32.s32 %v810_v55  ;;  %v802_v55 = vshll.u32 %v801_v22, 16 }
 0x318   : > { %v872_v39 = vsel %vm871_vm14, %v867_v33, inf }
 0x319   : > { %873 = vmin.xlane.f32.xlu1 %v872_v39  ;;  %v817_v48 = vshll.u32 %v816_v45, 16  ;;  %v862_v39 = vshll.u32 %v861_v28, 16  ;;  %v876_v45 = vcvt.f32.s32 %v3815_v27 }
 0x31a   : > { %v3818_v31 = vpop.xlane.xlu1 %899  ;;  %v3820_v34 = vpop.xlane.xlu0 %884 }
 0x31b   : > { %vm901_vm15 = vcmp.eq.f32.partialorder %v898_v51, %v3818_v31  ;;  %vm886_vm1 = vcmp.eq.f32.partialorder %v883_v53, %v3820_v34  ;;  %v906_v30 = vcvt.f32.s32 %v3818_v31 }
 0x31c   : > { %v902_v36 = vsel %vm901_vm15, %v897_v43, inf  ;;  %v887_v40 = vsel %vm886_vm1, %v882_v44, inf }
 0x31d   : > { %903 = vmin.xlane.f32.xlu1 %v902_v36  ;;  %888 = vmin.xlane.f32.xlu0 %v887_v40  ;;  %v2767_v36 = vpop.eup %2766  ;;  %v907_v22 = vshll.u32 %v906_v30, 16 }
 0x37a   : > { %v814_v47 = vpop.xlane.xlu1 %813 }
 0x37b   : > { %v815_v49 = vcvt.f32.s32 %v814_v47 }
 0x37d   : > { %v818_v50 = vadd.s32 %v817_v48, %v815_v49  ;;  %v877_v48 = vshll.u32 %v876_v45, 16  ;;  %v891_v49 = vcvt.f32.s32 %v3820_v34 }
 0x37f   : > { %vm910_vm2 = vcmp.eq.s32.totalorder %v3762_v20, %v818_v50 }
 0x380   : > { %v3828_v51 = vsel %vm910_vm2, inf, %v3710_v37  ;;  %v3830_v53 = vsel %vm910_vm2, %v2763_v57, 0.0 }
 0x381   : > { %v799_v58 = vpop.xlane.xlu0 %798  ;;  %v960_v63 = vsel %vm748_vm0, %v3828_v51, inf }
 0x382   : > { %v800_v61 = vcvt.f32.s32 %v799_v58  ;;  %961 = vmin.xlane.f32.xlu1 %v960_v63  ;;  %v892_v58 = vshll.u32 %v891_v49, 16 }
 0x384   : > { %v3834_v2 = vadd.s32 %v802_v55, %v800_v61 }
 0x386   : > { %vm909_vm3 = vcmp.eq.s32.totalorder %v3762_v20, %v3834_v2 }
 0x387   : > { %v829_v59 = vpop.xlane.xlu0 %828  ;;  %v3842_v37 = vsel %vm909_vm3, inf, %v3718_v52 }
 0x388   : > { %v830_v13 = vcvt.f32.s32 %v829_v59  ;;  %v957_v25 = vsel %vm748_vm0, %v3842_v37, inf }
 0x389   : > { %v844_v26 = vpop.xlane.xlu1 %843  ;;  %958 = vmin.xlane.f32.xlu0 %v957_v25 }
 0x38a   : > { %v833_v3 = vadd.s32 %v832_v6, %v830_v13  ;;  %v845_v18 = vcvt.f32.s32 %v844_v26 }
 0x38c   : > { %v3847_v17 = vadd.s32 %v847_v11, %v845_v18  ;;  %vm911_vm4 = vcmp.eq.s32.totalorder %v3762_v20, %v833_v3 }
 0x38d   : > { %v3851_v52 = vsel %vm911_vm4, inf, %v3725_v5  ;;  %v3853_v24 = vsel %vm911_vm4, %v2765_v8, 0.0 }
 0x38e   : > { %v963_v33 = vsel %vm748_vm0, %v3851_v52, inf  ;;  %vm912_vm5 = vcmp.eq.s32.totalorder %v3762_v20, %v3847_v17 }
 0x38f   : > { %964 = vmin.xlane.f32.xlu0 %v963_v33  ;;  %v3863_v32 = vsel %vm912_vm5, inf, %v3727_v7 }
 0x390   : > { %v966_v5 = vsel %vm748_vm0, %v3863_v32, inf }
 0x391   : > { %967 = vmin.xlane.f32.xlu1 %v966_v5 }
 0x395   : > { %v859_v35 = vpop.xlane.xlu0 %858 }
 0x396   : > { %v860_v43 = vcvt.f32.s32 %v859_v35 }
 0x398   : > { %v863_v44 = vadd.s32 %v862_v39, %v860_v43 }
 0x39a   : > { %vm913_vm6 = vcmp.eq.s32.totalorder %v3762_v20, %v863_v44 }
 0x39b   : > { %v3870_v40 = vsel %vm913_vm6, inf, %v3736_v29  ;;  %v3872_v46 = vsel %vm913_vm6, %v2767_v36, 0.0 }
 0x39c   : > { %v969_v7 = vsel %vm748_vm0, %v3870_v40, inf }
 0x39d   : > { %970 = vmin.xlane.f32.xlu0 %v969_v7 }
 0x3a6   : > { %v874_v47 = vpop.xlane.xlu1 %873 }
 0x3a7   : > { %v875_v50 = vcvt.f32.s32 %v874_v47 }
 0x3a9   : > { %v3879_v54 = vadd.s32 %v877_v48, %v875_v50 }
 0x3aa   : > { %v904_v29 = vpop.xlane.xlu1 %903  ;;  %v889_v57 = vpop.xlane.xlu0 %888 }
 0x3ab   : > { %v905_v63 = vcvt.f32.s32 %v904_v29  ;;  %v890_v55 = vcvt.f32.s32 %v889_v57  ;;  %vm914_vm7 = vcmp.eq.s32.totalorder %v3762_v20, %v3879_v54 }
 0x3ac   : > { %v3887_v27 = vsel %vm914_vm7, inf, %v3748_v56 }
 0x3ad   : > { %v3889_v31 = vadd.s32 %v907_v22, %v905_v63  ;;  %v3891_v34 = vadd.s32 %v892_v58, %v890_v55  ;;  %v972_v61 = vsel %vm748_vm0, %v3887_v27, inf }
 0x3ae   : > { %973 = vmin.xlane.f32.xlu1 %v972_v61 }
 0x3af   : > { %vm916_vm8 = vcmp.eq.s32.totalorder %v3762_v20, %v3889_v31  ;;  %vm915_vm9 = vcmp.eq.s32.totalorder %v3762_v20, %v3891_v34 }
 0x3b0   : > { %v3903_v56 = vsel %vm916_vm8, inf, %v3751_v23  ;;  %v3909_v62 = vsel %vm915_vm9, inf, %v3755_v60 }
 0x3b1   : > { %v978_v14 = vsel %vm748_vm0, %v3903_v56, inf  ;;  %v975_v59 = vsel %vm748_vm0, %v3909_v62, inf }
 0x3b2   : > { %979 = vmin.xlane.f32.xlu1 %v978_v14  ;;  %976 = vmin.xlane.f32.xlu0 %v975_v59 }
 0x40f   : > { %v3915_v6 = vpop.xlane.xlu1 %961 }
 0x410   : > { %vm982_vm10 = vcmp.eq.f32.partialorder %v3828_v51, %v3915_v6 }
 0x411   : > { %v990_v23 = vsel %vm982_vm10, %v3762_v20, 16 }
 0x412   : > { %v1012_v13 = vsel %vm748_vm0, %v990_v23, 2147483647 }
 0x413   : > { %v1014_v25 = vshra.s32 %v1012_v13, 16 }
 0x415   : > { %v1016_v60 = vcvt.s32.f32 %v1014_v25 }
 0x416   : > { %v3921_v26 = vpop.xlane.xlu0 %958 }
 0x417   : > { %vm981_vm11 = vcmp.eq.f32.partialorder %v3842_v37, %v3921_v26  ;;  %1017 = vmin.xlane.f32.xlu1 %v1016_v60 }
 0x418   : > { %v989_v11 = vsel %vm981_vm11, %v3762_v20, 16 }
 0x419   : > { %v997_v3 = vsel %vm748_vm0, %v989_v11, 2147483647 }
 0x41a   : > { %v999_v18 = vshra.s32 %v997_v3, 16 }
 0x41c   : > { %v3927_v8 = vpop.xlane.xlu0 %964  ;;  %v1001_v10 = vcvt.s32.f32 %v999_v18 }
 0x41d   : > { %vm983_vm12 = vcmp.eq.f32.partialorder %v3851_v52, %v3927_v8 }
 0x41e   : > { %v991_v33 = vsel %vm983_vm12, %v3762_v20, 16  ;;  %v3932_v5 = vpop.xlane.xlu1 %967  ;;  %1002 = vmin.xlane.f32.xlu0 %v1001_v10 }
 0x41f   : > { %vm984_vm13 = vcmp.eq.f32.partialorder %v3863_v32, %v3932_v5  ;;  %v1027_v28 = vsel %vm748_vm0, %v991_v33, 2147483647 }
 0x420   : > { %v992_v35 = vsel %vm984_vm13, %v3762_v20, 16  ;;  %v1029_v39 = vshra.s32 %v1027_v28, 16 }
 0x421   : > { %v1042_v43 = vsel %vm748_vm0, %v992_v35, 2147483647  ;;  %v1013_v35 = vand.u32 65535, %v1012_v13 }
 0x422   : > { %v1031_v44 = vcvt.s32.f32 %v1029_v39  ;;  %v1044_v36 = vshra.s32 %v1042_v43, 16  ;;  %v1043_v15 = vand.u32 65535, %v1042_v43 }
 0x424   : > { %1032 = vmin.xlane.f32.xlu0 %v1031_v44  ;;  %v1046_v7 = vcvt.s32.f32 %v1044_v36  ;;  %v1015_v36 = vcvt.s32.f32 %v1013_v35  ;;  %v1045_v35 = vcvt.s32.f32 %v1043_v15 }
 0x426   : > { %1047 = vmin.xlane.f32.xlu1 %v1046_v7 }
 0x42a   : > { %v3939_v45 = vpop.xlane.xlu0 %970 }
 0x42b   : > { %vm985_vm14 = vcmp.eq.f32.partialorder %v3870_v40, %v3939_v45  ;;  %v1129_v2 = vadd.f32 1e-08, %v3939_v45 }
 0x42c   : > { %v993_v30 = vsel %vm985_vm14, %v3762_v20, 16 }
 0x42d   : > { %v1057_v47 = vsel %vm748_vm0, %v993_v30, 2147483647 }
 0x42e   : > { %v1059_v48 = vshra.s32 %v1057_v47, 16 }
 0x430   : > { %v1061_v49 = vcvt.s32.f32 %v1059_v48  ;;  %v998_v48 = vand.u32 65535, %v997_v3 }
 0x432   : > { %1062 = vmin.xlane.f32.xlu0 %v1061_v49 }
 0x43b   : > { %v3945_v50 = vpop.xlane.xlu1 %973 }
 0x43c   : > { %vm986_vm15 = vcmp.eq.f32.partialorder %v3887_v27, %v3945_v50 }
 0x43d   : > { %v994_v22 = vsel %vm986_vm15, %v3762_v20, 16 }
 0x43e   : > { %v1072_v29 = vsel %vm748_vm0, %v994_v22, 2147483647 }
 0x43f   : > { %v3951_v57 = vpop.xlane.xlu1 %979  ;;  %v3953_v58 = vpop.xlane.xlu0 %976  ;;  %v1074_v63 = vshra.s32 %v1072_v29, 16 }
 0x440   : > { %vm988_vm1 = vcmp.eq.f32.partialorder %v3903_v56, %v3951_v57  ;;  %vm987_vm2 = vcmp.eq.f32.partialorder %v3909_v62, %v3953_v58 }
 0x441   : > { %v996_v55 = vsel %vm988_vm1, %v3762_v20, 16  ;;  %v995_v61 = vsel %vm987_vm2, %v3762_v20, 16  ;;  %v1076_v14 = vcvt.s32.f32 %v1074_v63  ;;  %v1000_v63 = vcvt.s32.f32 %v998_v48 }
 0x442   : > { %v1102_v59 = vsel %vm748_vm0, %v996_v55, 2147483647  ;;  %v1087_v23 = vsel %vm748_vm0, %v995_v61, 2147483647  ;;  %v1028_v61 = vand.u32 65535, %v1027_v28 }
 0x443   : > { %1077 = vmin.xlane.f32.xlu1 %v1076_v14  ;;  %v1104_v25 = vshra.s32 %v1102_v59, 16  ;;  %v1089_v11 = vshra.s32 %v1087_v23, 16 }
 0x445   : > { %v1106_v18 = vcvt.s32.f32 %v1104_v25  ;;  %v1091_v33 = vcvt.s32.f32 %v1089_v11  ;;  %v1030_v11 = vcvt.s32.f32 %v1028_v61 }
 0x447   : > { %1107 = vmin.xlane.f32.xlu1 %v1106_v18  ;;  %1092 = vmin.xlane.f32.xlu0 %v1091_v33 }
 0x4a4   : > { %v1018_v39 = vpop.xlane.xlu1 %1017 }
 0x4a5   : > { %vm1019_vm4 = vcmp.eq.f32.partialorder %v1016_v60, %v1018_v39 }
 0x4a6   : > { %v1020_v30 = vsel %vm1019_vm4, %v1015_v36, inf  ;;  %v1058_v36 = vand.u32 65535, %v1057_v47 }
 0x4a7   : > { %1021 = vmin.xlane.f32.xlu1 %v1020_v30  ;;  %v1073_v30 = vand.u32 65535, %v1072_v29 }
 0x4a8   : > { %v1060_v28 = vcvt.s32.f32 %v1058_v36 }
 0x4ab   : > { %v3963_v22 = vpop.xlane.xlu0 %1002 }
 0x4ac   : > { %vm1004_vm6 = vcmp.eq.f32.partialorder %v1001_v10, %v3963_v22 }
 0x4ad   : > { %v1005_v55 = vsel %vm1004_vm6, %v1000_v63, inf  ;;  %v1103_v63 = vand.u32 65535, %v1102_v59  ;;  %v1126_v59 = vadd.f32 1e-08, %v3915_v6 }
 0x4ae   : > { %1006 = vmin.xlane.f32.xlu0 %v1005_v55  ;;  %v1088_v55 = vand.u32 65535, %v1087_v23  ;;  %v1024_v23 = vcvt.f32.s32 %v1018_v39 }
 0x4af   : > { %v1105_v61 = vcvt.s32.f32 %v1103_v63  ;;  %2768 = vrcp.f32 %v1126_v59 }
 0x4b1   : > { %v3966_v25 = vpop.xlane.xlu0 %1032 }
 0x4b2   : > { %vm1034_vm10 = vcmp.eq.f32.partialorder %v1031_v44, %v3966_v25  ;;  %v1075_v44 = vcvt.s32.f32 %v1073_v30  ;;  %v920_v30 = vadd.f32 1e-08, %v3781_v21  ;;  %v1039_v21 = vcvt.f32.s32 %v3966_v25 }
 0x4b3   : > { %v3969_v13 = vpop.xlane.xlu1 %1047  ;;  %v1035_v60 = vsel %vm1034_vm10, %v1030_v11, inf  ;;  %v1090_v11 = vcvt.s32.f32 %v1088_v55 }
 0x4b4   : > { %1036 = vmin.xlane.f32.xlu0 %v1035_v60  ;;  %vm1049_vm11 = vcmp.eq.f32.partialorder %v1046_v7, %v3969_v13  ;;  %v1125_v60 = vadd.f32 1e-08, %v3921_v26 }
 0x4b5   : > { %v1050_v3 = vsel %vm1049_vm11, %v1045_v35, inf }
 0x4b6   : > { %1051 = vmin.xlane.f32.xlu1 %v1050_v3  ;;  %v1025_v3 = vshll.u32 %v1024_v23, 16 }
 0x4bf   : > { %v3972_v10 = vpop.xlane.xlu0 %1062 }
 0x4c0   : > { %vm1064_vm12 = vcmp.eq.f32.partialorder %v1061_v49, %v3972_v10 }
 0x4c1   : > { %v1065_v43 = vsel %vm1064_vm12, %v1060_v28, inf  ;;  %v1009_v28 = vcvt.f32.s32 %v3963_v22 }
 0x4c2   : > { %1066 = vmin.xlane.f32.xlu0 %v1065_v43  ;;  %v2769_v43 = vpop.eup %2768 }
 0x4d0   : > { %v3975_v48 = vpop.xlane.xlu1 %1077 }
 0x4d1   : > { %vm1079_vm13 = vcmp.eq.f32.partialorder %v1076_v14, %v3975_v48  ;;  %v917_v14 = vadd.f32 1e-08, %v3770_v9  ;;  %v1128_v9 = vadd.f32 1e-08, %v3932_v5 }
 0x4d2   : > { %v1080_v15 = vsel %vm1079_vm13, %v1075_v44, inf }
 0x4d3   : > { %1081 = vmin.xlane.f32.xlu1 %v1080_v15  ;;  %2770 = vrcp.f32 %v917_v14  ;;  %v1054_v15 = vcvt.f32.s32 %v3969_v13 }
 0x4d4   : > { %v3978_v7 = vpop.xlane.xlu1 %1107  ;;  %v3980_v47 = vpop.xlane.xlu0 %1092  ;;  %2772 = vrcp.f32 %v1125_v60 }
 0x4d5   : > { %vm1109_vm14 = vcmp.eq.f32.partialorder %v1106_v18, %v3978_v7  ;;  %vm1094_vm15 = vcmp.eq.f32.partialorder %v1091_v33, %v3980_v47  ;;  %v1127_v33 = vadd.f32 1e-08, %v3927_v8  ;;  %v1010_v8 = vshll.u32 %v1009_v28, 16 }
 0x4d6   : > { %v1110_v49 = vsel %vm1109_vm14, %v1105_v61, inf  ;;  %v1095_v29 = vsel %vm1094_vm15, %v1090_v11, inf  ;;  %v1055_v13 = vshll.u32 %v1054_v15, 16 }
 0x4d7   : > { %1111 = vmin.xlane.f32.xlu1 %v1110_v49  ;;  %1096 = vmin.xlane.f32.xlu0 %v1095_v29  ;;  %2774 = vrcp.f32 %v1127_v33  ;;  %v1040_v29 = vshll.u32 %v1039_v21, 16 }
 0x4d8   : > { %2776 = vrcp.f32 %v920_v30 }
 0x4d9   : > { %2778 = vrcp.f32 %v1128_v9 }
 0x4da   : > { %2780 = vrcp.f32 %v1129_v2 }
 0x4dd   : > { %v2771_v55 = vpop.eup %2770 }
 0x534   : > { %v1022_v35 = vpop.xlane.xlu1 %1021 }
 0x535   : > { %v1023_v36 = vcvt.f32.s32 %v1022_v35 }
 0x537   : > { %v1026_v18 = vadd.s32 %v1025_v3, %v1023_v36 }
 0x539   : > { %vm1118_vm1 = vcmp.eq.s32.totalorder %v3762_v20, %v1026_v18 }
 0x53a   : > { %v3993_v6 = vsel %vm1118_vm1, inf, %v3828_v51  ;;  %v1142_v26 = vsel %vm1118_vm1, %v2769_v43, 0.0  ;;  %v2773_v51 = vpop.eup %2772 }
 0x53b   : > { %v1007_v39 = vpop.xlane.xlu0 %1006  ;;  %v1168_v44 = vsel %vm748_vm0, %v3993_v6, inf  ;;  %v3998_v63 = vadd.f32 %v1142_v26, %v3830_v53  ;;  %v933_v53 = vsel %vm909_vm3, %v2771_v55, 0.0  ;;  %v2775_v3 = vpop.eup %2774  ;;  %v922_v55 = vadd.f32 1e-08, %v3794_v38 }
 0x53c   : > { %v1008_v22 = vcvt.f32.s32 %v1007_v39  ;;  %1169 = vmin.xlane.f32.xlu1 %v1168_v44  ;;  %v1069_v44 = vcvt.f32.s32 %v3972_v10  ;;  %v1130_v10 = vadd.f32 1e-08, %v3945_v50  ;;  %v1084_v38 = vcvt.f32.s32 %v3975_v48 }
 0x53d   : > { %2782 = vrcp.f32 %v922_v55 }
 0x53e   : > { %v1011_v5 = vadd.s32 %v1010_v8, %v1008_v22  ;;  %v1070_v8 = vshll.u32 %v1069_v44, 16  ;;  %2784 = vrcp.f32 %v1130_v10 }
 0x540   : > { %vm1117_vm2 = vcmp.eq.s32.totalorder %v3762_v20, %v1011_v5 }
 0x541   : > { %v1037_v61 = vpop.xlane.xlu0 %1036  ;;  %v4007_v11 = vsel %vm1117_vm2, inf, %v3842_v37  ;;  %v1141_v49 = vsel %vm1117_vm2, %v2773_v51, 0.0  ;;  %v2777_v37 = vpop.eup %2776 }
 0x542   : > { %v1038_v59 = vcvt.f32.s32 %v1037_v61  ;;  %v1165_v25 = vsel %vm748_vm0, %v4007_v11, inf  ;;  %v4011_v14 = vadd.f32 %v1141_v49, %v933_v53  ;;  %v2779_v28 = vpop.eup %2778  ;;  %v936_v45 = vsel %vm912_vm5, %v2777_v37, 0.0 }
 0x543   : > { %v1052_v23 = vpop.xlane.xlu1 %1051  ;;  %1166 = vmin.xlane.f32.xlu0 %v1165_v25  ;;  %v2781_v17 = vpop.eup %2780  ;;  %v924_v53 = vadd.f32 1e-08, %v3800_v41  ;;  %v923_v61 = vadd.f32 1e-08, %v3802_v42  ;;  %v1131_v49 = vadd.f32 1e-08, %v3953_v58  ;;  %v1099_v41 = vcvt.f32.s32 %v3980_v47 }
 0x544   : > { %v1041_v60 = vadd.s32 %v1040_v29, %v1038_v59  ;;  %v1053_v35 = vcvt.f32.s32 %v1052_v23  ;;  %v1085_v29 = vshll.u32 %v1084_v38, 16 }
 0x545   : > { %2786 = vrcp.f32 %v924_v53  ;;  %v1100_v58 = vshll.u32 %v1099_v41, 16 }
 0x546   : > { %v1056_v36 = vadd.s32 %v1055_v13, %v1053_v35  ;;  %vm1119_vm3 = vcmp.eq.s32.totalorder %v3762_v20, %v1041_v60  ;;  %2788 = vrcp.f32 %v923_v61 }
 0x547   : > { %v4016_v18 = vsel %vm1119_vm3, inf, %v3851_v52  ;;  %v1143_v33 = vsel %vm1119_vm3, %v2775_v3, 0.0  ;;  %v2783_v25 = vpop.eup %2782 }
 0x548   : > { %v1171_v43 = vsel %vm748_vm0, %v4016_v18, inf  ;;  %vm1120_vm4 = vcmp.eq.s32.totalorder %v3762_v20, %v1056_v36  ;;  %v4022_v30 = vadd.f32 %v1143_v33, %v3853_v24  ;;  %v2785_v60 = vpop.eup %2784 }
 0x549   : > { %1172 = vmin.xlane.f32.xlu0 %v1171_v43  ;;  %v4028_v9 = vsel %vm1120_vm4, inf, %v3863_v32  ;;  %v1144_v52 = vsel %vm1120_vm4, %v2779_v28, 0.0 }
 0x54a   : > { %v1174_v26 = vsel %vm748_vm0, %v4028_v9, inf  ;;  %v4032_v39 = vadd.f32 %v1144_v52, %v936_v45 }
 0x54b   : > { %1175 = vmin.xlane.f32.xlu1 %v1174_v26 }
 0x54f   : > { %v1067_v24 = vpop.xlane.xlu0 %1066  ;;  %v2787_v48 = vpop.eup %2786 }
 0x550   : > { %v1068_v22 = vcvt.f32.s32 %v1067_v24  ;;  %v2789_v36 = vpop.eup %2788  ;;  %v940_v26 = vsel %vm916_vm8, %v2787_v48, 0.0 }
 0x551   : > { %v939_v54 = vsel %vm915_vm9, %v2789_v36, 0.0 }
 0x552   : > { %v1071_v21 = vadd.s32 %v1070_v8, %v1068_v22 }
 0x554   : > { %vm1121_vm5 = vcmp.eq.s32.totalorder %v3762_v20, %v1071_v21 }
 0x555   : > { %v4037_v32 = vsel %vm1121_vm5, inf, %v3870_v40  ;;  %v1145_v5 = vsel %vm1121_vm5, %v2781_v17, 0.0  ;;  %v1132_v40 = vadd.f32 1e-08, %v3951_v57 }
 0x556   : > { %v1177_v51 = vsel %vm748_vm0, %v4037_v32, inf  ;;  %v4043_v15 = vadd.f32 %v1145_v5, %v3872_v46  ;;  %v1114_v46 = vcvt.f32.s32 %v3978_v7  ;;  %v938_v7 = vsel %vm914_vm7, %v2783_v25, 0.0 }
 0x557   : > { %1178 = vmin.xlane.f32.xlu0 %v1177_v51  ;;  %2790 = vrcp.f32 %v1132_v40 }
 0x558   : > { %2792 = vrcp.f32 %v1131_v49  ;;  %v1115_v23 = vshll.u32 %v1114_v46, 16 }
 0x560   : > { %v1082_v50 = vpop.xlane.xlu1 %1081 }
 0x561   : > { %v1083_v59 = vcvt.f32.s32 %v1082_v50  ;;  %v2791_v45 = vpop.eup %2790 }
 0x562   : > { %v2793_v52 = vpop.eup %2792 }
 0x563   : > { %v1086_v42 = vadd.s32 %v1085_v29, %v1083_v59 }
 0x564   : > { %v1112_v57 = vpop.xlane.xlu1 %1111  ;;  %v1097_v13 = vpop.xlane.xlu0 %1096 }
 0x565   : > { %v1113_v35 = vcvt.f32.s32 %v1112_v57  ;;  %v1098_v3 = vcvt.f32.s32 %v1097_v13  ;;  %vm1122_vm6 = vcmp.eq.s32.totalorder %v3762_v20, %v1086_v42 }
 0x566   : > { %v1162_v2 = vsel %vm1122_vm6, inf, %v3887_v27  ;;  %v1146_v47 = vsel %vm1122_vm6, %v2785_v60, 0.0 }
 0x567   : > { %v1116_v37 = vadd.s32 %v1115_v23, %v1113_v35  ;;  %v1101_v33 = vadd.s32 %v1100_v58, %v1098_v3  ;;  %v1180_v28 = vsel %vm748_vm0, %v1162_v2, inf  ;;  %v4059_v43 = vadd.f32 %v1146_v47, %v938_v7 }
 0x568   : > { %1181 = vmin.xlane.f32.xlu1 %v1180_v28 }
 0x569   : > { %vm1124_vm7 = vcmp.eq.s32.totalorder %v3762_v20, %v1116_v37  ;;  %vm1123_vm10 = vcmp.eq.s32.totalorder %v3762_v20, %v1101_v33 }
 0x56a   : > { %v1164_v27 = vsel %vm1124_vm7, inf, %v3903_v56  ;;  %v1148_v44 = vsel %vm1124_vm7, %v2791_v45, 0.0  ;;  %v1163_v24 = vsel %vm1123_vm10, inf, %v3909_v62  ;;  %v1147_v8 = vsel %vm1123_vm10, %v2793_v52, 0.0 }
 0x56b   : > { %v1186_v22 = vsel %vm748_vm0, %v1164_v27, inf  ;;  %v4072_v21 = vadd.f32 %v1148_v44, %v940_v26  ;;  %v1183_v31 = vsel %vm748_vm0, %v1163_v24, inf  ;;  %v4075_v17 = vadd.f32 %v1147_v8, %v939_v54 }
 0x56c   : > { %1187 = vmin.xlane.f32.xlu1 %v1186_v22  ;;  %1184 = vmin.xlane.f32.xlu0 %v1183_v31 }
 0x5c9   : > { %v4077_v34 = vpop.xlane.xlu1 %1169 }
 0x5ca   : > { %vm1190_vm8 = vcmp.eq.f32.partialorder %v3993_v6, %v4077_v34 }
 0x5cb   : > { %v1198_v56 = vsel %vm1190_vm8, %v3762_v20, 16 }
 0x5cc   : > { %v1220_v62 = vsel %vm748_vm0, %v1198_v56, 2147483647 }
 0x5cd   : > { %v1222_v5 = vshra.s32 %v1220_v62, 16  ;;  %v1221_v52 = vand.u32 65535, %v1220_v62 }
 0x5cf   : > { %v1224_v55 = vcvt.s32.f32 %v1222_v5  ;;  %v1223_v54 = vcvt.s32.f32 %v1221_v52 }
 0x5d0   : > { %v4083_v51 = vpop.xlane.xlu0 %1166 }
 0x5d1   : > { %vm1189_vm9 = vcmp.eq.f32.partialorder %v4007_v11, %v4083_v51  ;;  %1225 = vmin.xlane.f32.xlu1 %v1224_v55 }
 0x5d2   : > { %v1197_v10 = vsel %vm1189_vm9, %v3762_v20, 16 }
 0x5d3   : > { %v1205_v53 = vsel %vm748_vm0, %v1197_v10, 2147483647 }
 0x5d4   : > { %v1207_v61 = vshra.s32 %v1205_v53, 16  ;;  %v1206_v44 = vand.u32 65535, %v1205_v53 }
 0x5d6   : > { %v4089_v40 = vpop.xlane.xlu0 %1172  ;;  %v1209_v6 = vcvt.s32.f32 %v1207_v61  ;;  %v1208_v8 = vcvt.s32.f32 %v1206_v44 }
 0x5d7   : > { %vm1191_vm11 = vcmp.eq.f32.partialorder %v4016_v18, %v4089_v40  ;;  %v1335_v52 = vadd.f32 1e-08, %v4089_v40 }
 0x5d8   : > { %v1199_v49 = vsel %vm1191_vm11, %v3762_v20, 16  ;;  %v4094_v38 = vpop.xlane.xlu1 %1175  ;;  %1210 = vmin.xlane.f32.xlu0 %v1209_v6 }
 0x5d9   : > { %vm1192_vm12 = vcmp.eq.f32.partialorder %v4028_v9, %v4094_v38  ;;  %v1235_v11 = vsel %vm748_vm0, %v1199_v49, 2147483647 }
 0x5da   : > { %v1200_v46 = vsel %vm1192_vm12, %v3762_v20, 16  ;;  %v1237_v50 = vshra.s32 %v1235_v11, 16  ;;  %v1236_v31 = vand.u32 65535, %v1235_v11 }
 0x5db   : > { %v1250_v29 = vsel %vm748_vm0, %v1200_v46, 2147483647 }
 0x5dc   : > { %v1239_v41 = vcvt.s32.f32 %v1237_v50  ;;  %v1252_v59 = vshra.s32 %v1250_v29, 16  ;;  %v1251_v56 = vand.u32 65535, %v1250_v29  ;;  %v1238_v10 = vcvt.s32.f32 %v1236_v31 }
 0x5de   : > { %1240 = vmin.xlane.f32.xlu0 %v1239_v41  ;;  %v1254_v42 = vcvt.s32.f32 %v1252_v59  ;;  %v1253_v49 = vcvt.s32.f32 %v1251_v56 }
 0x5e0   : > { %1255 = vmin.xlane.f32.xlu1 %v1254_v42 }
 0x5e4   : > { %v4101_v18 = vpop.xlane.xlu0 %1178 }
 0x5e5   : > { %vm1193_vm13 = vcmp.eq.f32.partialorder %v4037_v32, %v4101_v18 }
 0x5e6   : > { %v1201_v25 = vsel %vm1193_vm13, %v3762_v20, 16 }
 0x5e7   : > { %v1265_v9 = vsel %vm748_vm0, %v1201_v25, 2147483647 }
 0x5e8   : > { %v1267_v23 = vshra.s32 %v1265_v9, 16  ;;  %v1266_v53 = vand.u32 65535, %v1265_v9 }
 0x5ea   : > { %v1269_v57 = vcvt.s32.f32 %v1267_v23  ;;  %v1268_v11 = vcvt.s32.f32 %v1266_v53 }
 0x5ec   : > { %1270 = vmin.xlane.f32.xlu0 %v1269_v57 }
 0x5f5   : > { %v4107_v13 = vpop.xlane.xlu1 %1181 }
 0x5f6   : > { %vm1194_vm14 = vcmp.eq.f32.partialorder %v1162_v2, %v4107_v13 }
 0x5f7   : > { %v1202_v60 = vsel %vm1194_vm14, %v3762_v20, 16 }
 0x5f8   : > { %v1280_v58 = vsel %vm748_vm0, %v1202_v60, 2147483647 }
 0x5f9   : > { %v4112_v35 = vpop.xlane.xlu1 %1187  ;;  %v4114_v3 = vpop.xlane.xlu0 %1184  ;;  %v1282_v32 = vshra.s32 %v1280_v58, 16  ;;  %v1281_v50 = vand.u32 65535, %v1280_v58 }
 0x5fa   : > { %vm1196_vm15 = vcmp.eq.f32.partialorder %v1164_v27, %v4112_v35  ;;  %vm1195_vm1 = vcmp.eq.f32.partialorder %v1163_v24, %v4114_v3 }
 0x5fb   : > { %v1204_v48 = vsel %vm1196_vm15, %v3762_v20, 16  ;;  %v1203_v7 = vsel %vm1195_vm1, %v3762_v20, 16  ;;  %v1284_v47 = vcvt.s32.f32 %v1282_v32  ;;  %v1283_v59 = vcvt.s32.f32 %v1281_v50 }
 0x5fc   : > { %v1310_v2 = vsel %vm748_vm0, %v1204_v48, 2147483647  ;;  %v1295_v36 = vsel %vm748_vm0, %v1203_v7, 2147483647  ;;  %v1334_v48 = vadd.f32 1e-08, %v4077_v34 }
 0x5fd   : > { %1285 = vmin.xlane.f32.xlu1 %v1284_v47  ;;  %v1312_v37 = vshra.s32 %v1310_v2, 16  ;;  %v1297_v33 = vshra.s32 %v1295_v36, 16  ;;  %v1311_v29 = vand.u32 65535, %v1310_v2  ;;  %v1296_v25 = vand.u32 65535, %v1295_v36 }
 0x5fe   : > { %2794 = vrcp.f32 %v1334_v48 }
 0x5ff   : > { %v1314_v28 = vcvt.s32.f32 %v1312_v37  ;;  %v1299_v45 = vcvt.s32.f32 %v1297_v33  ;;  %v1313_v60 = vcvt.s32.f32 %v1311_v29  ;;  %v1298_v32 = vcvt.s32.f32 %v1296_v25 }
 0x601   : > { %1315 = vmin.xlane.f32.xlu1 %v1314_v28  ;;  %1300 = vmin.xlane.f32.xlu0 %v1299_v45 }
 0x65e   : > { %v1226_v26 = vpop.xlane.xlu1 %1225 }
 0x65f   : > { %vm1227_vm2 = vcmp.eq.f32.partialorder %v1224_v55, %v1226_v26  ;;  %v1232_v7 = vcvt.f32.s32 %v1226_v26 }
 0x660   : > { %v1228_v27 = vsel %vm1227_vm2, %v1223_v54, inf  ;;  %v2795_v54 = vpop.eup %2794 }
 0x661   : > { %1229 = vmin.xlane.f32.xlu1 %v1228_v27  ;;  %v1233_v36 = vshll.u32 %v1232_v7, 16 }
 0x665   : > { %v1211_v24 = vpop.xlane.xlu0 %1210 }
 0x666   : > { %vm1212_vm3 = vcmp.eq.f32.partialorder %v1209_v6, %v1211_v24 }
 0x667   : > { %v1213_v22 = vsel %vm1212_vm3, %v1208_v8, inf }
 0x668   : > { %1214 = vmin.xlane.f32.xlu0 %v1213_v22 }
 0x66b   : > { %v4122_v5 = vpop.xlane.xlu0 %1240 }
 0x66c   : > { %vm1242_vm4 = vcmp.eq.f32.partialorder %v1239_v41, %v4122_v5  ;;  %v1247_v40 = vcvt.f32.s32 %v4122_v5 }
 0x66d   : > { %v4125_v61 = vpop.xlane.xlu1 %1255  ;;  %v1243_v62 = vsel %vm1242_vm4, %v1238_v10, inf }
 0x66e   : > { %1244 = vmin.xlane.f32.xlu0 %v1243_v62  ;;  %vm1257_vm5 = vcmp.eq.f32.partialorder %v1254_v42, %v4125_v61  ;;  %v1262_v31 = vcvt.f32.s32 %v4125_v61  ;;  %v1337_v61 = vadd.f32 1e-08, %v4101_v18 }
 0x66f   : > { %v1258_v55 = vsel %vm1257_vm5, %v1253_v49, inf }
 0x670   : > { %1259 = vmin.xlane.f32.xlu1 %v1258_v55  ;;  %v1263_v55 = vshll.u32 %v1262_v31, 16 }
 0x679   : > { %v4128_v6 = vpop.xlane.xlu0 %1270 }
 0x67a   : > { %vm1272_vm6 = vcmp.eq.f32.partialorder %v1269_v57, %v4128_v6  ;;  %v1277_v18 = vcvt.f32.s32 %v4128_v6 }
 0x67b   : > { %v1273_v46 = vsel %vm1272_vm6, %v1268_v11, inf }
 0x67c   : > { %1274 = vmin.xlane.f32.xlu0 %v1273_v46 }
 0x68a   : > { %v4131_v41 = vpop.xlane.xlu1 %1285 }
 0x68b   : > { %vm1287_vm7 = vcmp.eq.f32.partialorder %v1284_v47, %v4131_v41  ;;  %v1333_v47 = vadd.f32 1e-08, %v4083_v51 }
 0x68c   : > { %v1288_v23 = vsel %vm1287_vm7, %v1283_v59, inf }
 0x68d   : > { %1289 = vmin.xlane.f32.xlu1 %v1288_v23  ;;  %2796 = vrcp.f32 %v1333_v47 }
 0x68e   : > { %v4134_v42 = vpop.xlane.xlu1 %1315  ;;  %v4136_v9 = vpop.xlane.xlu0 %1300  ;;  %2798 = vrcp.f32 %v1335_v52 }
 0x68f   : > { %vm1317_vm10 = vcmp.eq.f32.partialorder %v1314_v28, %v4134_v42  ;;  %vm1302_vm8 = vcmp.eq.f32.partialorder %v1299_v45, %v4136_v9  ;;  %v1217_v28 = vcvt.f32.s32 %v1211_v24  ;;  %v1336_v45 = vadd.f32 1e-08, %v4094_v38 }
 0x690   : > { %v1318_v57 = vsel %vm1317_vm10, %v1313_v60, inf  ;;  %v1303_v58 = vsel %vm1302_vm8, %v1298_v32, inf  ;;  %v1322_v52 = vcvt.f32.s32 %v4134_v42 }
 0x691   : > { %1319 = vmin.xlane.f32.xlu1 %v1318_v57  ;;  %1304 = vmin.xlane.f32.xlu0 %v1303_v58  ;;  %v1218_v51 = vshll.u32 %v1217_v28, 16  ;;  %2800 = vrcp.f32 %v1336_v45  ;;  %v1278_v58 = vshll.u32 %v1277_v18, 16  ;;  %v2753_v45 = vld [vmem:[%s3642_s22] sm:$0xff]  }
 0x692   : > { %2802 = vrcp.f32 %v1337_v61  ;;  %2418 = vmatprep.subr.bf16.mxu0 %v2753_v45 }
 0x693   : > { %2419 = vmatpush3.bf16.msra.mxu0 %v2753_v45 }
 0x697   : > { %v2797_v22 = vpop.eup %2796 }
 0x698   : > { %v2799_v46 = vpop.eup %2798 }
 0x69b   : > { %v2801_v59 = vpop.eup %2800 }
 0x69c   : > { %v2803_v7 = vpop.eup %2802 }
 0x6ee   : > { %v1230_v2 = vpop.xlane.xlu1 %1229 }
 0x6ef   : > { %v1231_v37 = vcvt.f32.s32 %v1230_v2 }
 0x6f1   : > { %v1234_v33 = vadd.s32 %v1233_v36, %v1231_v37  ;;  %v1340_v36 = vadd.f32 1e-08, %v4112_v35  ;;  %v1339_v37 = vadd.f32 1e-08, %v4114_v3 }
 0x6f3   : > { %vm1326_vm9 = vcmp.eq.s32.totalorder %v3762_v20, %v1234_v33  ;;  %v1292_v33 = vcvt.f32.s32 %v4131_v41 }
 0x6f4   : > { %v1350_v27 = vsel %vm1326_vm9, %v2795_v54, 0.0  ;;  %v1307_v54 = vcvt.f32.s32 %v4136_v9 }
 0x6f5   : > { %v1215_v44 = vpop.xlane.xlu0 %1214  ;;  %v4146_v34 = vadd.f32 %v1350_v27, %v3998_v63  ;;  %v1248_v63 = vshll.u32 %v1247_v40, 16 }
 0x6f6   : > { %v1216_v26 = vcvt.f32.s32 %v1215_v44  ;;  %v1323_v44 = vshll.u32 %v1322_v52, 16 }
 0x6f7   : > { %v1368_v8 = vsel %vm748_vm0, %v4146_v34, 0.0 }
 0x6f8   : > { %v1219_v24 = vadd.s32 %v1218_v51, %v1216_v26  ;;  %1369 = vadd.xlane.f32.xlu1 %v1368_v8  ;;  %v1308_v8 = vshll.u32 %v1307_v54, 16  ;;  %v2394_v54 = vld [vmem:[%s3644_s17 + $0x8] sm:$0xff]  }
 0x6fa   : > { %vm1325_vm11 = vcmp.eq.s32.totalorder %v3762_v20, %v1219_v24 }
 0x6fb   : > { %v1245_v38 = vpop.xlane.xlu0 %1244  ;;  %v1349_v56 = vsel %vm1325_vm11, %v2797_v22, 0.0 }
 0x6fc   : > { %v1246_v10 = vcvt.f32.s32 %v1245_v38  ;;  %v4154_v62 = vadd.f32 %v1349_v56, %v4011_v14 }
 0x6fd   : > { %v1260_v49 = vpop.xlane.xlu1 %1259 }
 0x6fe   : > { %v1249_v53 = vadd.s32 %v1248_v63, %v1246_v10  ;;  %v1261_v11 = vcvt.f32.s32 %v1260_v49  ;;  %v1365_v5 = vsel %vm748_vm0, %v4154_v62, 0.0 }
 0x6ff   : > { %1366 = vadd.xlane.f32.xlu0 %v1365_v5 }
 0x700   : > { %v1264_v50 = vadd.s32 %v1263_v55, %v1261_v11  ;;  %vm1327_vm12 = vcmp.eq.s32.totalorder %v3762_v20, %v1249_v53  ;;  %v2755_v11 = vld [vmem:[#allocation10 + $0x8] sm:$0xff]  }
 0x701   : > { %v1351_v29 = vsel %vm1327_vm12, %v2799_v46, 0.0 }
 0x702   : > { %vm1328_vm13 = vcmp.eq.s32.totalorder %v3762_v20, %v1264_v50  ;;  %v4162_v14 = vadd.f32 %v1351_v29, %v4022_v30 }
 0x703   : > { %v1352_v25 = vsel %vm1328_vm13, %v2801_v59, 0.0 }
 0x704   : > { %v1371_v23 = vsel %vm748_vm0, %v4162_v14, 0.0  ;;  %v4167_v60 = vadd.f32 %v1352_v25, %v4032_v39  ;;  %v1338_v39 = vadd.f32 1e-08, %v4107_v13 }
 0x705   : > { %1372 = vadd.xlane.f32.xlu0 %v1371_v23 }
 0x706   : > { %v1374_v32 = vsel %vm748_vm0, %v4167_v60, 0.0  ;;  %2804 = vrcp.f32 %v1338_v39 }
 0x707   : > { %1375 = vadd.xlane.f32.xlu1 %v1374_v32  ;;  %2806 = vrcp.f32 %v1340_v36 }
 0x708   : > { %2808 = vrcp.f32 %v1339_v37 }
 0x709   : > { %v1275_v57 = vpop.xlane.xlu0 %1274 }
 0x70a   : > { %v1276_v48 = vcvt.f32.s32 %v1275_v57 }
 0x70c   : > { %v1279_v30 = vadd.s32 %v1278_v58, %v1276_v48 }
 0x70e   : > { %vm1329_vm14 = vcmp.eq.s32.totalorder %v3762_v20, %v1279_v30 }
 0x70f   : > { %v1353_v47 = vsel %vm1329_vm14, %v2803_v7, 0.0 }
 0x710   : > { %v4174_v2 = vadd.f32 %v1353_v47, %v4043_v15  ;;  %v1293_v15 = vshll.u32 %v1292_v33, 16  ;;  %v2805_v35 = vpop.eup %2804 }
 0x711   : > { %v2807_v9 = vpop.eup %2806 }
 0x712   : > { %v1377_v6 = vsel %vm748_vm0, %v4174_v2, 0.0  ;;  %v2809_v31 = vpop.eup %2808 }
 0x713   : > { %1378 = vadd.xlane.f32.xlu0 %v1377_v6 }
 0x71a   : > { %v1290_v28 = vpop.xlane.xlu1 %1289 }
 0x71b   : > { %v1291_v13 = vcvt.f32.s32 %v1290_v28  ;;  %v2757_v28 = vld [vmem:[#allocation10 + $0x18] sm:$0xff]  }
 0x71d   : > { %v1294_v27 = vadd.s32 %v1293_v15, %v1291_v13  ;;  %v2379_v15 = vld [vmem:[%s3644_s17] sm:$0xff]  }
 0x71e   : > { %v1320_v51 = vpop.xlane.xlu1 %1319  ;;  %v1305_v26 = vpop.xlane.xlu0 %1304  ;;  %v2380_v13 = vunpack.c.l.bf16 %v2379_v15  ;;  %v2381_v45 = vunpack.c.h.bf16 %v2379_v15 }
 0x71f   : > { %vm1330_vm15 = vcmp.eq.s32.totalorder %v3762_v20, %v1294_v27  ;;  %v1321_v3 = vcvt.f32.s32 %v1320_v51  ;;  %v1306_v41 = vcvt.f32.s32 %v1305_v26  ;;  %v2384_v27 = vunpack.c.l.bf16 %v2394_v54 }
 0x720   : > { %v1354_v40 = vsel %vm1330_vm15, %v2805_v35, 0.0  ;;  %v3206_v26 = vmov 3   ;;  %v3207_v35 = vmov 5  }
 0x721   : > { %v1324_v42 = vadd.s32 %v1323_v44, %v1321_v3  ;;  %v1309_v24 = vadd.s32 %v1308_v8, %v1306_v41  ;;  %v1362_v22 = vadd.f32 %v1354_v40, %v4059_v43  ;;  %v2754_v43 = vld [vmem:[#allocation10] sm:$0xff]   ;;  %v2621_v44 = vpack.i.bf16 %v2381_v45, %v2380_v13  ;;  %v2396_v8 = vld [vmem:[%s3644_s17 + $0x18] sm:$0xff]   ;;  %v2395_v3 = vld [vmem:[%s3644_s17 + $0x10] sm:$0xff]  }
 0x722   : > { %2428 = vmatprep.subr.bf16.mxu1 %v2754_v43  ;;  %v2392_v41 = vunpack.c.l.bf16 %v2396_v8  ;;  %v2393_v40 = vunpack.c.h.bf16 %v2396_v8  ;;  %v4461_v13 = vsub.s32 2, %v3687_v12 }
 0x723   : > { %vm1332_vm1 = vcmp.eq.s32.totalorder %v3762_v20, %v1324_v42  ;;  %vm1331_vm2 = vcmp.eq.s32.totalorder %v3762_v20, %v1309_v24  ;;  %v1380_v38 = vsel %vm748_vm0, %v1362_v22, 0.0  ;;  %2429 = vmatpush3.bf16.msra.mxu1 %v2754_v43  ;;  %v2756_v20 = vld [vmem:[#allocation10 + $0x10] sm:$0xff]   ;;  %v2388_v42 = vunpack.c.l.bf16 %v2395_v3 }
 0x724   : > { %1381 = vadd.xlane.f32.xlu1 %v1380_v38  ;;  %v1356_v56 = vsel %vm1332_vm1, %v2807_v9, 0.0  ;;  %v1355_v63 = vsel %vm1331_vm2, %v2809_v31, 0.0  ;;  %2430 = vmatprep.subr.bf16.mxu1 %v2755_v11  ;;  %v2389_v24 = vunpack.c.h.bf16 %v2395_v3  ;;  %v2708_v9 = vpack.i.bf16 %v2393_v40, %v2392_v41  ;;  %v2758_v38 = vld [vmem:[#allocation14] sm:$0xff]  }
 0x725   : > { %v1364_v10 = vadd.f32 %v1356_v56, %v4072_v21  ;;  %v1363_v49 = vadd.f32 %v1355_v63, %v4075_v17  ;;  %2444 = vmatprep.subr.bf16.mxu0 %v2758_v38 }
 0x726   : > { %v2667_v31 = vpack.i.bf16 %v2389_v24, %v2388_v42 }
 0x727   : > { %v1386_v55 = vsel %vm748_vm0, %v1364_v10, 0.0  ;;  %v1383_v53 = vsel %vm748_vm0, %v1363_v49, 0.0  ;;  %2431 = vmatpush3.bf16.msra.mxu1 %v2755_v11 }
 0x728   : > { %1387 = vadd.xlane.f32.xlu1 %v1386_v55  ;;  %1384 = vadd.xlane.f32.xlu0 %v1383_v53 }
 0x729   : > { %2432 = vmatprep.subr.bf16.mxu1 %v2756_v20 }
 0x72b   : > { %2433 = vmatpush3.bf16.msra.mxu1 %v2756_v20 }
 0x72c   : > { %2434 = vmatprep.subr.bf16.mxu1 %v2757_v28 }
 0x72f   : > { %2435 = vmatpush3.bf16.msra.mxu1 %v2757_v28 }
 0x739   : > { %2622 = vperm.xlu1 %2620, %v2621_v44  }
 0x73d   : > { %2626 = vset.pattern.permute.xlu1 %v3204_v1 }
 0x73e   : > { %2616 = vperm.xlu0 %2614, %v2621_v44  }
 0x742   : > { %2678 = vset.pattern.permute.xlu0 %v3207_v35 }
 0x743   : > { %2680 = vperm.xlu0 %2678, %v2621_v44  }
 0x785   : > { %v1370_v5 = vpop.xlane.xlu1 %1369 }
 0x786   : > { %2810 = vrcp.f32 %v1370_v5  ;;  %v2759_v5 = vld [vmem:[#allocation14 + $0x8] sm:$0xff]  }
 0x78c   : > { %v1367_v21 = vpop.xlane.xlu0 %1366 }
 0x78d   : > { %2812 = vrcp.f32 %v1367_v21  ;;  %v2760_v21 = vld [vmem:[#allocation14 + $0x10] sm:$0xff]  }
 0x790   : > { %v2811_v61 = vpop.eup %2810 }
 0x791   : > { %v1392_v59 = vmul.f32 %v2811_v61, %v4146_v34 }
 0x792   : > { %v1373_v17 = vpop.xlane.xlu0 %1372 }
 0x793   : > { %2814 = vrcp.f32 %v1373_v17  ;;  %v2761_v17 = vld [vmem:[#allocation14 + $0x18] sm:$0xff]  }
 0x794   : > { %v1376_v46 = vpop.xlane.xlu1 %1375 }
 0x795   : > { %2816 = vrcp.f32 %v1376_v46 }
 0x797   : > { %v2813_v50 = vpop.eup %2812 }
 0x798   : > { %v1390_v29 = vmul.f32 %v2813_v50, %v4154_v62 }
 0x79a   : > { %v1405_v25 = vpack.c.bf16 %v1392_v59, %v1390_v29 }
 0x79c   : > { %2420 = vmatprep.mubr.msk.bf16.mxu0 %vm748_vm0, %v1405_v25 }
 0x79d   : > { %v2815_v23 = vpop.eup %2814 }
 0x79e   : > { %v1394_v32 = vmul.f32 %v2815_v23, %v4162_v14 }
 0x79f   : > { %v2817_v18 = vpop.eup %2816 }
 0x7a0   : > { %v1396_v57 = vmul.f32 %v2817_v18, %v4167_v60  ;;  %v1379_v48 = vpop.xlane.xlu0 %1378 }
 0x7a1   : > { %2818 = vrcp.f32 %v1379_v48  ;;  %v1514_v48 = vld [vmem:[#allocation11] sm:$0x3f] }
 0x7a2   : > { %v1406_v58 = vpack.c.bf16 %v1396_v57, %v1394_v32 }
 0x7a4   : > { %2421 = vmatmul.mubr.msk.bf16.vlgmr.msra.gmra.mrb[0].mxu0 %vm748_vm0, %v1406_v58 }
 0x7a5   : > { %2445 = vmatpush3.bf16.msra.mxu0 %v2758_v38  ;;  %v1765_v38 = vsub.s32 4, %v3687_v12 }
 0x7a6   : > { %2446 = vmatprep.subr.bf16.mxu0 %v2759_v5 }
 0x7a9   : > { %2447 = vmatpush3.bf16.msra.mxu0 %v2759_v5 }
 0x7aa   : > { %2448 = vmatprep.subr.bf16.mxu0 %v2760_v21 }
 0x7ab   : > { %v2819_v34 = vpop.eup %2818 }
 0x7ac   : > { %v1398_v39 = vmul.f32 %v2819_v34, %v4174_v2  ;;  %v2385_v2 = vunpack.c.h.bf16 %v2394_v54  ;;  %v4230_v34 = vrot.slane %v1514_v48, %v652_v16  ;;  %v1713_v16 = vsub.s32 3, %v3687_v12 }
 0x7ad   : > { %2449 = vmatpush3.bf16.msra.mxu0 %v2760_v21 }
 0x7ae   : > { %v2627_v51 = vpack.i.bf16 %v2385_v2, %v2384_v27  ;;  %2450 = vmatprep.subr.bf16.mxu0 %v2761_v17  ;;  %v4254_v42 = vrot.slane %v1514_v48, %v1713_v16 }
 0x7b0   : > { %2628 = vperm.xlu1 %2626, %v2627_v51   ;;  %2697 = vperm.xlu0 %2678, %v2627_v51  }
 0x7b1   : > { %v1382_v30 = vpop.xlane.xlu1 %1381  ;;  %2451 = vmatpush3.bf16.msra.mxu0 %v2761_v17  ;;  %v4265_v17 = vrot.slane %v1514_v48, %v1765_v38 }
 0x7b2   : > { %2820 = vrcp.f32 %v1382_v30 }
 0x7b4   : > { %2632 = vset.pattern.permute.xlu1 %v3203_v0  ;;  %2707 = vset.pattern.permute.xlu0 %v3205_v4 }
 0x7b5   : > { %v1388_v7 = vpop.xlane.xlu1 %1387  ;;  %v1385_v62 = vpop.xlane.xlu0 %1384  ;;  %2634 = vperm.xlu1 %2632, %v2627_v51   ;;  %2709 = vperm.xlu0 %2707, %v2708_v9  }
 0x7b6   : > { %2822 = vrcp.f32 %v1388_v7 }
 0x7b7   : > { %2824 = vrcp.f32 %v1385_v62 }
 0x7b9   : > { %2638 = vset.pattern.permute.xlu1 %v3205_v4  ;;  %v2623_v46 = vpop.permute.xlu1 %2622 }
 0x7ba   : > { %2640 = vperm.xlu1 %2638, %v2621_v44  }
 0x7bc   : > { %v2821_v47 = vpop.eup %2820 }
 0x7bd   : > { %v1400_v14 = vmul.f32 %v2821_v47, %v1362_v22  ;;  %v3208_v22 = vmov 4   ;;  %v2617_v23 = vpop.permute.xlu0 %2616  ;;  %v2624_v47 = vunpack.i.l.bf16 %v2623_v46 }
 0x7be   : > { %2645 = vperm.xlu1 %2638, %v2627_v51   ;;  %2713 = vset.pattern.permute.xlu0 %v3208_v22 }
 0x7bf   : > { %v1407_v6 = vpack.c.bf16 %v1400_v14, %v1398_v39  ;;  %2715 = vperm.xlu0 %2713, %v2627_v51   ;;  %v4234_v39 = vrot.slane %v1514_v48, %v608_v19  ;;  %v2618_v14 = vunpack.i.l.bf16 %v2617_v23  ;;  %v1611_v54 = vmul.f32 %v2624_v47, %v4230_v34 }
 0x7c0   : > { %v2823_v60 = vpop.eup %2822  ;;  %v4244_v19 = vrot.slane %v1514_v48, %v4461_v13 }
 0x7c1   : > { %v2825_v36 = vpop.eup %2824  ;;  %2424 = vmatprep.mubr.msk.bf16.mxu0 %vm748_vm0, %v1407_v6  ;;  %v1404_v37 = vmul.f32 %v2823_v60, %v1364_v10  ;;  %v1567_v27 = vmul.f32 %v2618_v14, %v4234_v39 }
 0x7c2   : > { %v1402_v33 = vmul.f32 %v2825_v36, %v1363_v49  ;;  %2649 = vset.pattern.permute.xlu1 %v3206_v26  ;;  %v4220_v32 = vpop.permute.xlu0 %2680  ;;  %v2625_v36 = vunpack.i.h.bf16 %v2623_v46 }
 0x7c3   : > { %2651 = vperm.xlu1 %2649, %v2621_v44   ;;  %2731 = vperm.xlu0 %2713, %v2667_v31   ;;  %v2682_v14 = vunpack.i.l.bf16 %v4220_v32 }
 0x7c4   : > { %v1408_v52 = vpack.c.bf16 %v1404_v37, %v1402_v33  ;;  %v2619_v37 = vunpack.i.h.bf16 %v2617_v23 }
 0x7c6   : > { %2425 = vmatmul.mubr.msk.bf16.gmra.mrb[4].mxu0 %vm748_vm0, %v1408_v52  ;;  %vm1859_vm0 = vcmask 523264   ;;  %v1568_v3 = vmul.f32 %v2619_v37, %v4234_v39 }
 0x7c7   : > { %2656 = vperm.xlu1 %2649, %v2627_v51   ;;  %2747 = vset.pattern.permute.xlu0 %v3207_v35 }
 0x7c8   : > { %2749 = vperm.xlu0 %2747, %v2708_v9  }
 0x7cb   : > { %2660 = vset.pattern.permute.xlu1 %v3208_v22 }
 0x7cc   : > { %2662 = vperm.xlu1 %2660, %v2621_v44  }
 0x7d0   : > { %2666 = vset.pattern.permute.xlu1 %v3204_v1 }
 0x7d1   : > { %2668 = vperm.xlu1 %2666, %v2667_v31  }
 0x7d5   : > { %2672 = vset.pattern.permute.xlu1 %v3203_v0 }
 0x7d6   : > { %2674 = vperm.xlu1 %2672, %v2667_v31  }
 0x7da   : > { %2684 = vset.pattern.permute.xlu1 %v3204_v1 }
 0x7db   : > { %2686 = vperm.xlu1 %2684, %v2708_v9  }
 0x7df   : > { %2690 = vset.pattern.permute.xlu1 %v3203_v0 }
 0x7e0   : > { %2692 = vperm.xlu1 %2690, %v2708_v9  }
 0x7e4   : > { %2701 = vset.pattern.permute.xlu1 %v3205_v4 }
 0x7e5   : > { %2703 = vperm.xlu1 %2701, %v2667_v31  }
 0x7e9   : > { %2719 = vset.pattern.permute.xlu1 %v3206_v26 }
 0x7ea   : > { %2721 = vperm.xlu1 %2719, %v2667_v31  }
 0x7ee   : > { %2726 = vperm.xlu1 %2719, %v2708_v9  }
 0x7f2   : > { %2735 = vset.pattern.permute.xlu1 %v3208_v22 }
 0x7f3   : > { %2737 = vperm.xlu1 %2735, %v2708_v9   ;;  %v1619_v9 = vadd.f32 %v1611_v54, %v1567_v27 }
 0x7f7   : > { %2741 = vset.pattern.permute.xlu1 %v3207_v35  ;;  %v1612_v35 = vmul.f32 %v2625_v36, %v4230_v34 }
 0x7f8   : > { %2743 = vperm.xlu1 %2741, %v2667_v31  }
 0x82f   : > { %v2629_v61 = vpop.permute.xlu1 %2628  ;;  %v4224_v58 = vpop.permute.xlu0 %2697 }
 0x830   : > { %v2630_v30 = vunpack.i.l.bf16 %v2629_v61  ;;  %v2631_v6 = vunpack.i.h.bf16 %v2629_v61  ;;  %v2700_v36 = vunpack.i.h.bf16 %v4224_v58 }
 0x832   : > { %v1569_v52 = vmul.f32 %v2630_v30, %v4234_v39  ;;  %v1570_v2 = vmul.f32 %v2631_v6, %v4234_v39 }
 0x834   : > { %v2635_v50 = vpop.permute.xlu1 %2634  ;;  %v4236_v33 = vpop.permute.xlu0 %2709 }
 0x835   : > { %v2636_v7 = vunpack.i.l.bf16 %v2635_v50  ;;  %v2637_v60 = vunpack.i.h.bf16 %v2635_v50 }
 0x837   : > { %v1613_v28 = vmul.f32 %v2636_v7, %v4230_v34  ;;  %v1614_v44 = vmul.f32 %v2637_v60, %v4230_v34 }
 0x839   : > { %v2641_v29 = vpop.permute.xlu1 %2640  ;;  %v1621_v41 = vadd.f32 %v1613_v28, %v1569_v52 }
 0x83a   : > { %v2642_v45 = vunpack.i.l.bf16 %v2641_v29  ;;  %v2643_v8 = vunpack.i.h.bf16 %v2641_v29 }
 0x83c   : > { %v1663_v22 = vmul.f32 %v2642_v45, %v4244_v19 }
 0x83d   : > { %v2646_v59 = vpop.permute.xlu1 %2645 }
 0x83e   : > { %v2647_v15 = vunpack.i.l.bf16 %v2646_v59  ;;  %v2648_v51 = vunpack.i.h.bf16 %v2646_v59  ;;  %v1671_v5 = vadd.f32 %v1663_v22, %v1619_v9 }
 0x840   : > { %v1665_v40 = vmul.f32 %v2647_v15, %v4244_v19 }
 0x842   : > { %v2652_v25 = vpop.permute.xlu1 %2651 }
 0x843   : > { %v2653_v31 = vunpack.i.l.bf16 %v2652_v25 }
 0x845   : > { %v1715_v21 = vmul.f32 %v2653_v31, %v4254_v42 }
 0x846   : > { %v2657_v18 = vpop.permute.xlu1 %2656 }
 0x847   : > { %v2658_v24 = vunpack.i.l.bf16 %v2657_v18  ;;  %v1723_v7 = vadd.f32 %v1715_v21, %v1671_v5 }
 0x84b   : > { %v4222_v57 = vpop.permute.xlu1 %2662 }
 0x84c   : > { %v2664_v46 = vunpack.i.l.bf16 %v4222_v57 }
 0x84e   : > { %v1767_v6 = vmul.f32 %v2664_v46, %v4265_v17 }
 0x850   : > { %v4226_v62 = vpop.permute.xlu1 %2668  ;;  %v1775_v13 = vadd.f32 %v1767_v6, %v1723_v7 }
 0x851   : > { %v2670_v46 = vunpack.i.l.bf16 %v4226_v62 }
 0x855   : > { %v4249_v26 = vpop.permute.xlu1 %2674 }
 0x877   : > { %v2422_v1 = vpop.f32.mrb[0].mxu0 }
 0x878   : > { %v1463_v56 = vpop.f32.mrb[1].mxu0 }
 0x879   : > { %v2423_v63 = vpop.f32.mrb[2].mxu0 }
 0x87a   : > { %v1503_v10 = vpack.c.bf16 %v2423_v63, %v2422_v1  ;;  %v1466_v49 = vpop.f32.mrb[3].mxu0  ;;  %v2716_v1 = vpop.permute.xlu0 %2715  ;;  %v1666_v63 = vmul.f32 %v2648_v51, %v4244_v19 }
 0x87b   : > { %v1502_v0 = vpack.c.bf16 %v1466_v49, %v1463_v56  ;;  %v1622_v56 = vadd.f32 %v1614_v44, %v1570_v2  ;;  %v1664_v49 = vmul.f32 %v2643_v8, %v4244_v19  ;;  %v2718_v29 = vunpack.i.h.bf16 %v2716_v1  ;;  %v4285_v8 = vld [vmem:[#allocation13] ss:$0 sm:$0xff] }
 0x87d   : > { %2436 = vmatprep.mubr.msk.bf16.mxu1 %vm1859_vm0, %v1502_v0  ;;  %v1620_v0 = vadd.f32 %v1612_v35, %v1568_v3  ;;  %v1674_v61 = vadd.f32 %v1666_v63, %v1622_v56  ;;  %v1770_v37 = vmul.f32 %v2718_v29, %v4265_v17 }
 0x87e   : > { %2437 = vmatmul.mubr.msk.bf16.vlgmr.msra.gmra.mrb[0].mxu1 %vm1859_vm0, %v1503_v10  ;;  %v2659_v10 = vunpack.i.h.bf16 %v2657_v18  ;;  %v2699_v18 = vunpack.i.l.bf16 %v4224_v58 }
 0x880   : > { %v1718_v50 = vmul.f32 %v2659_v10, %v4254_v42 }
 0x882   : > { %v1726_v60 = vadd.f32 %v1718_v50, %v1674_v61  ;;  %v2676_v61 = vunpack.i.l.bf16 %v4249_v26 }
 0x884   : > { %v1778_v27 = vadd.f32 %v1770_v37, %v1726_v60  ;;  %v2712_v60 = vunpack.i.h.bf16 %v4236_v33 }
 0x899   : > { %v2426_v4 = vpop.f32.mrb[4].mxu0 }
 0x89a   : > { %v1479_v55 = vpop.f32.mrb[5].mxu0 }
 0x89b   : > { %v2427_v53 = vpop.f32.mrb[6].mxu0 }
 0x89c   : > { %v1505_v43 = vpack.c.bf16 %v2427_v53, %v2426_v4  ;;  %v1482_v11 = vpop.f32.mrb[7].mxu0  ;;  %v2654_v4 = vunpack.i.h.bf16 %v2652_v25  ;;  %v1817_v53 = vsub.s32 5, %v3687_v12  ;;  %v1672_v25 = vadd.f32 %v1664_v49, %v1620_v0 }
 0x89d   : > { %v1504_v20 = vpack.c.bf16 %v1482_v11, %v1479_v55  ;;  %v1673_v55 = vadd.f32 %v1665_v40, %v1621_v41  ;;  %v2717_v11 = vunpack.i.l.bf16 %v2716_v1  ;;  %v2665_v12 = vunpack.i.h.bf16 %v4222_v57 }
 0x89e   : > { %v1716_v59 = vmul.f32 %v2654_v4, %v4254_v42  ;;  %v4273_v47 = vrot.slane %v1514_v48, %v1817_v53  ;;  %v2683_v57 = vunpack.i.h.bf16 %v4220_v32 }
 0x89f   : > { %2440 = vmatprep.mubr.msk.bf16.mxu1 %vm1859_vm0, %v1504_v20  ;;  %v4262_v20 = vpop.permute.xlu1 %2686  ;;  %v1769_v30 = vmul.f32 %v2717_v11, %v4265_v17  ;;  %v1768_v15 = vmul.f32 %v2665_v12, %v4265_v17  ;;  %v2671_v12 = vunpack.i.h.bf16 %v4226_v62 }
 0x8a0   : > { %2441 = vmatmul.mubr.msk.bf16.gmra.mrb[4].mxu1 %vm1859_vm0, %v1505_v43  ;;  %v1717_v43 = vmul.f32 %v2658_v24, %v4254_v42  ;;  %v1724_v28 = vadd.f32 %v1716_v59, %v1672_v25  ;;  %v1821_v16 = vmul.f32 %v2699_v18, %v4273_v47  ;;  %v1819_v48 = vmul.f32 %v2682_v14, %v4273_v47 }
 0x8a1   : > { %v1822_v45 = vmul.f32 %v2700_v36, %v4273_v47  ;;  %v1820_v2 = vmul.f32 %v2683_v57, %v4273_v47  ;;  %v2688_v11 = vunpack.i.l.bf16 %v4262_v20  ;;  %v2689_v29 = vunpack.i.h.bf16 %v4262_v20 }
 0x8a2   : > { %v1725_v23 = vadd.f32 %v1717_v43, %v1673_v55  ;;  %v1776_v58 = vadd.f32 %v1768_v15, %v1724_v28  ;;  %v1827_v32 = vadd.f32 %v1819_v48, %v1775_v13  ;;  %v2711_v18 = vunpack.i.l.bf16 %v4236_v33 }
 0x8a3   : > { %v2693_v52 = vpop.permute.xlu1 %2692  ;;  %v1830_v40 = vadd.f32 %v1822_v45, %v1778_v27  ;;  %v1571_v14 = vmul.f32 %v2670_v46, %v4234_v39  ;;  %v1615_v20 = vmul.f32 %v2676_v61, %v4230_v34  ;;  %v1574_v62 = vmul.f32 %v2689_v29, %v4234_v39  ;;  %v2732_v45 = vpop.permute.xlu0 %2731 }
 0x8a4   : > { %v1777_v54 = vadd.f32 %v1769_v30, %v1725_v23  ;;  %v1828_v9 = vadd.f32 %v1820_v2, %v1776_v58  ;;  %v2694_v5 = vunpack.i.l.bf16 %v2693_v52  ;;  %v2695_v59 = vunpack.i.h.bf16 %v2693_v52 }
 0x8a5   : > { %v2677_v23 = vunpack.i.h.bf16 %v4249_v26  ;;  %v1573_v30 = vmul.f32 %v2688_v11, %v4234_v39  ;;  %v1572_v36 = vmul.f32 %v2671_v12, %v4234_v39  ;;  %v1669_v28 = vmul.f32 %v2711_v18, %v4244_v19 }
 0x8a6   : > { %v1829_v51 = vadd.f32 %v1821_v16, %v1777_v54  ;;  %v1617_v7 = vmul.f32 %v2694_v5, %v4230_v34  ;;  %v1618_v26 = vmul.f32 %v2695_v59, %v4230_v34  ;;  %v1623_v54 = vadd.f32 %v1615_v20, %v1571_v14 }
 0x8a7   : > { %v2704_v44 = vpop.permute.xlu1 %2703  ;;  %v1616_v37 = vmul.f32 %v2677_v23, %v4230_v34  ;;  %v1670_v33 = vmul.f32 %v2712_v60, %v4244_v19 }
 0x8a8   : > { %v2705_v6 = vunpack.i.l.bf16 %v2704_v44  ;;  %v2706_v52 = vunpack.i.h.bf16 %v2704_v44  ;;  %v1625_v57 = vadd.f32 %v1617_v7, %v1573_v30  ;;  %v1626_v27 = vadd.f32 %v1618_v26, %v1574_v62 }
 0x8a9   : > { %v1624_v58 = vadd.f32 %v1616_v37, %v1572_v36 }
 0x8aa   : > { %v1667_v48 = vmul.f32 %v2705_v6, %v4244_v19  ;;  %v1668_v39 = vmul.f32 %v2706_v52, %v4244_v19  ;;  %v1677_v34 = vadd.f32 %v1669_v28, %v1625_v57 }
 0x8ab   : > { %v2722_v10 = vpop.permute.xlu1 %2721 }
 0x8ac   : > { %v2723_v13 = vunpack.i.l.bf16 %v2722_v10 }
 0x8af   : > { %v2727_v25 = vpop.permute.xlu1 %2726 }
 0x8b0   : > { %v2728_v15 = vunpack.i.l.bf16 %v2727_v25  ;;  %v2729_v2 = vunpack.i.h.bf16 %v2727_v25 }
 0x8b2   : > { %v1721_v44 = vmul.f32 %v2728_v15, %v4254_v42 }
 0x8b3   : > { %v2738_v16 = vpop.permute.xlu1 %2737 }
 0x8b4   : > { %v1729_v19 = vadd.f32 %v1721_v44, %v1677_v34 }
 0x951   : > { %v2438_v35 = vpop.f32.mrb[0].mxu1 }
 0x952   : > { %v1915_v3 = vadd.f32 %v2438_v35, %v1829_v51  ;;  %v1906_v41 = vpop.f32.mrb[1].mxu1  ;;  %v2724_v51 = vunpack.i.h.bf16 %v2722_v10  ;;  %v2739_v35 = vunpack.i.l.bf16 %v2738_v16 }
 0x953   : > { %v1907_v24 = vadd.f32 %v1906_v41, %v1827_v32  ;;  %v2439_v22 = vpop.f32.mrb[2].mxu1  ;;  %v1675_v32 = vadd.f32 %v1667_v48, %v1623_v54  ;;  %v2733_v41 = vunpack.i.l.bf16 %v2732_v45 }
 0x954   : > { %v1946_v31 = vadd.f32 %v4285_v8, %v1915_v3  ;;  %v1918_v38 = vadd.f32 %v2439_v22, %v1830_v40  ;;  %v1909_v1 = vpop.f32.mrb[3].mxu1  ;;  %v1719_v3 = vmul.f32 %v2723_v13, %v4254_v42  ;;  %v2750_v40 = vpop.permute.xlu0 %2749  ;;  %v1678_v22 = vadd.f32 %v1670_v33, %v1626_v27 }
 0x955   : > { %v1944_v56 = vadd.f32 %v4285_v8, %v1907_v24  ;;  %v1910_v63 = vadd.f32 %v1909_v1, %v1828_v9  ;;  %v1722_v24 = vmul.f32 %v2729_v2, %v4254_v42  ;;  %v2740_v9 = vunpack.i.h.bf16 %v2738_v16 }
 0x956   : > { %v1947_v49 = vadd.f32 %v4285_v8, %v1918_v38  ;;  %v1954_v4 = vmax.f32 %v1946_v31, 0.0  ;;  %v2744_v31 = vpop.permute.xlu1 %2743  ;;  %v1676_v38 = vadd.f32 %v1668_v39, %v1624_v58  ;;  %v1720_v1 = vmul.f32 %v2724_v51, %v4254_v42 }
 0x957   : > { %v1945_v0 = vadd.f32 %v4285_v8, %v1910_v63  ;;  %v1952_v53 = vmax.f32 %v1944_v56, 0.0  ;;  %v2734_v56 = vunpack.i.h.bf16 %v2732_v45  ;;  %v1773_v63 = vmul.f32 %v2739_v35, %v4265_v17  ;;  %v2360_v45 = vld [vmem:[#allocation16] ss:$0 sm:$0xff] }
 0x958   : > { %v1955_v55 = vmax.f32 %v1947_v49, 0.0  ;;  %v2751_v10 = vunpack.i.l.bf16 %v2750_v40  ;;  %v1727_v49 = vadd.f32 %v1719_v3, %v1675_v32  ;;  %v1728_v11 = vadd.f32 %v1720_v1, %v1676_v38 }
 0x959   : > { %v1953_v43 = vmax.f32 %v1945_v0, 0.0  ;;  %v1771_v0 = vmul.f32 %v2733_v41, %v4265_v17  ;;  %v1772_v5 = vmul.f32 %v2734_v56, %v4265_v17  ;;  %v1781_v42 = vadd.f32 %v1773_v63, %v1729_v19 }
 0x95a   : > { %v1961_v21 = vpack.c.bf16 %v1955_v55, %v1954_v4  ;;  %v2745_v4 = vunpack.i.l.bf16 %v2744_v31  ;;  %v1730_v55 = vadd.f32 %v1722_v24, %v1678_v22  ;;  %v1825_v46 = vmul.f32 %v2751_v10, %v4273_v47 }
 0x95b   : > { %v1960_v50 = vpack.c.bf16 %v1953_v43, %v1952_v53  ;;  %v1774_v53 = vmul.f32 %v2740_v9, %v4265_v17  ;;  %v2752_v43 = vunpack.i.h.bf16 %v2750_v40  ;;  %v1780_v12 = vadd.f32 %v1772_v5, %v1728_v11 }
 0x95c   : > { %v1823_v61 = vmul.f32 %v2745_v4, %v4273_v47  ;;  %v1833_v23 = vadd.f32 %v1825_v46, %v1781_v42 }
 0x95d   : > { %2452 = vmatprep.mubr.msk.bf16.mxu0 %vm1859_vm0, %v1960_v50  ;;  %v1779_v50 = vadd.f32 %v1771_v0, %v1727_v49  ;;  %v1826_v29 = vmul.f32 %v2752_v43, %v4273_v47  ;;  %v1782_v59 = vadd.f32 %v1774_v53, %v1730_v55 }
 0x95e   : > { %2453 = vmatmul.mubr.msk.bf16.vlgmr.msra.gmra.mrb[8].mxu0 %vm1859_vm0, %v1961_v21  ;;  %v2746_v21 = vunpack.i.h.bf16 %v2744_v31 }
 0x95f   : > { %v1831_v30 = vadd.f32 %v1823_v61, %v1779_v50  ;;  %v1834_v20 = vadd.f32 %v1826_v29, %v1782_v59 }
 0x960   : > { %v1824_v25 = vmul.f32 %v2746_v21, %v4273_v47 }
 0x962   : > { %v1832_v60 = vadd.f32 %v1824_v25, %v1780_v12 }
 0x973   : > { %v2442_v18 = vpop.f32.mrb[4].mxu1 }
 0x974   : > { %v1931_v7 = vadd.f32 %v2442_v18, %v1833_v23  ;;  %v1922_v14 = vpop.f32.mrb[5].mxu1 }
 0x975   : > { %v1923_v17 = vadd.f32 %v1922_v14, %v1831_v30  ;;  %v2443_v6 = vpop.f32.mrb[6].mxu1 }
 0x976   : > { %v1950_v62 = vadd.f32 %v4285_v8, %v1931_v7  ;;  %v1934_v26 = vadd.f32 %v2443_v6, %v1834_v20  ;;  %v1925_v36 = vpop.f32.mrb[7].mxu1 }
 0x977   : > { %v1948_v37 = vadd.f32 %v4285_v8, %v1923_v17  ;;  %v1926_v52 = vadd.f32 %v1925_v36, %v1832_v60 }
 0x978   : > { %v1951_v28 = vadd.f32 %v4285_v8, %v1934_v26  ;;  %v1958_v57 = vmax.f32 %v1950_v62, 0.0 }
 0x979   : > { %v1949_v47 = vadd.f32 %v4285_v8, %v1926_v52  ;;  %v1956_v16 = vmax.f32 %v1948_v37, 0.0 }
 0x97a   : > { %v1959_v15 = vmax.f32 %v1951_v28, 0.0 }
 0x97b   : > { %v1957_v54 = vmax.f32 %v1949_v47, 0.0 }
 0x97c   : > { %v1963_v48 = vpack.c.bf16 %v1959_v15, %v1958_v57 }
 0x97d   : > { %v1962_v13 = vpack.c.bf16 %v1957_v54, %v1956_v16 }
 0x97f   : > { %2456 = vmatprep.mubr.msk.bf16.mxu0 %vm1859_vm0, %v1962_v13 }
 0x980   : > { %2457 = vmatmul.mubr.msk.bf16.gmra.mrb[12].mxu0 %vm1859_vm0, %v1963_v48 }
 0xa31   : > { %v2454_v33 = vpop.f32.mrb[8].mxu0 }
 0xa32   : > { %v2058_v27 = vadd.f32 %v2454_v33, %v2360_v45  ;;  %v2049_v2 = vpop.f32.mrb[9].mxu0 }
 0xa33   : > { %v2050_v58 = vadd.f32 %v2360_v45, %v2049_v2  ;;  %v2455_v39 = vpop.f32.mrb[10].mxu0 }
 0xa34   : > { %v2082_v51 = vmax.f32 %v2058_v27, 0.0  ;;  %v2061_v34 = vadd.f32 %v2455_v39, %v2360_v45  ;;  %v2052_v8 = vpop.f32.mrb[11].mxu0 }
 0xa35   : > { %v2080_v44 = vmax.f32 %v2050_v58, 0.0  ;;  %v2053_v35 = vadd.f32 %v2360_v45, %v2052_v8 }
 0xa36   : > { %2090 = vst [vmem:[%s552_s27 + $0x10] sm:$0xff] %v2082_v51  ;;  %v2083_v32 = vmax.f32 %v2061_v34, 0.0 }
 0xa37   : > { %2088 = vst [vmem:[%s552_s27] sm:$0xff] %v2080_v44  ;;  %v2081_v3 = vmax.f32 %v2053_v35, 0.0 }
 0xa38   : > { %2091 = vst [vmem:[%s552_s27 + $0x18] sm:$0xff] %v2083_v32 }
 0xa39   : > { %2089 = vst [vmem:[%s552_s27 + $0x8] sm:$0xff] %v2081_v3 }
 0xa53   : > { %v2458_v41 = vpop.f32.mrb[12].mxu0 }
 0xa54   : > { %v2074_v40 = vadd.f32 %v2458_v41, %v2360_v45  ;;  %v2065_v24 = vpop.f32.mrb[13].mxu0 }
 0xa55   : > { %v2066_v22 = vadd.f32 %v2360_v45, %v2065_v24  ;;  %v2459_v9 = vpop.f32.mrb[14].mxu0 }
 0xa56   : > { %v2086_v31 = vmax.f32 %v2074_v40, 0.0  ;;  %v2077_v38 = vadd.f32 %v2459_v9, %v2360_v45  ;;  %v2068_v1 = vpop.f32.mrb[15].mxu0 }
 0xa57   : > { %v2084_v56 = vmax.f32 %v2066_v22, 0.0  ;;  %v2069_v19 = vadd.f32 %v2360_v45, %v2068_v1 }
 0xa58   : > { %2094 = vst [vmem:[%s552_s27 + $0x30] sm:$0xff] %v2086_v31  ;;  %v2087_v63 = vmax.f32 %v2077_v38, 0.0 }
 0xa59   : > { %2092 = vst [vmem:[%s552_s27 + $0x20] sm:$0xff] %v2084_v56  ;;  %v2085_v10 = vmax.f32 %v2069_v19, 0.0 }
 0xa5a   : > { %2095 = vst [vmem:[%s552_s27 + $0x38] sm:$0xff] %v2087_v63 }
 0xa5b   : > { %2093 = vst [vmem:[%s552_s27 + $0x28] sm:$0xff] %v2085_v10 }
 0xa5c   : > { %3099 = shalt.err (!%p3096_p13)
}
 0xa5d   : > { %s3100_s20 = scalar_lea.hbm %s4339_s19, 1024  ;;  %s3104_s22 = scalar_lea.hbm %s4464_s9, 2048 }
 0xa5e   : > { %p3101_p2 = scmp.ne.s32.totalorder %s4339_s19, %s3100_s20  ;;  %p3105_p5 = scmp.lt.u32.totalorder %s4339_s19, %s4464_s9 }
 0xa5f   : > { %p3106_p1 = scmp.lt.u32.totalorder %s3104_s22, %s3100_s20  ;;  %p3108_p9 = scmp.lt.u32.totalorder %s3100_s20, %s4339_s19 }
 0xa60   : > { %p3102_p12 = pnand %p3101_p2, %p4465_p10 }
 0xa61   : > { %p3107_p11 = por %p3106_p1, %p3105_p5 }
 0xa62   : > { %p3103_p6 = pneg %p3102_p12 }
 0xa63   : > { %p3109_p0 = por %p3108_p9, %p3107_p11 }
 0xa65   : > { %p3110_p3 = pnand %p3109_p0, %p3103_p6 }
 0xa67   : > { %3113 = shalt.err (!%p3110_p3)
}
 0xa68   : > { %s3210_s15 = smov 128   ;;  %s3211_s27 = smov 8  }
 0xa69   : > { %2488 = dma.vmem_to_hbm [thread:$0]  (%p4465_p10), %s4334_s7, 1024, %s4339_s19, %s2097_s1, %s3210_s15, %s3210_s15, %s3211_s27  }
 0xa6a PF: > { %s4466_s16 = sld [smem:[#allocation30_spill]]  ;;  %s2127_s29 = sand.u32 1, %s3168_s30  }
 0xa6b   : > { %p4468_p7 = scmp.ge.s32.totalorder %s3188_s14, 2  ;;  %s2128_s26 = scalar_lea.sflag [#allocation4], %s2127_s29 }
 0xa70   : > { %p4467_p4 = scmp.ne.s32.totalorder %s4466_s16, 0 }
 0xa72   : > { %p2520_p8 = pnand %p4468_p7, %p4467_p4 }
 0xa74   : > { %3163 = dma.done.wait (!%p2520_p8), %s2128_s26, 1024  }
 0xa75   : > { %3165 = vsyncadd (!%p2520_p8), %s2128_s26, 4294966272  ;;  %s33_s14 = sadd.s32 1, %s3188_s14   ;;  %s4469_s12 = sld [smem:[#allocation25_spill]] }
 0xa76   : > { %p30_p13 = scmp.ge.s32.totalorder %s33_s14, 4   ;;  %s4470_s11 = sld [smem:[#allocation29_spill]] }
 0xa77   : > { %s4471_s28 = sld [smem:[#allocation28_spill]]  ;;  %s4472_s30 = smov %s3172_s10 }
 0xa78   :  { %32 = sbr.rel (!%p30_p13) target bundleno = 18 (0x12), region = 158 }
 0xa7b   : > { %s4473_s10 = smov %s4469_s12  ;;  %s4474_s12 = smov %s3184_s13 }
 0xa7d   : > { %s4475_s13 = smov %s4471_s28 }
 0xa7f   :  { %2133 = vsyncpa [#allocation3], 1 }
 0xa80   :  { %2135 = vsyncpa [#allocation3 + $0x1], 1 }
 0xa81   :  { %2136 = vsyncpa [#allocation6], 1 }
 0xa82   :  { %2138 = vsyncpa [#allocation6 + $0x1], 1 }
 0xa83   :  { %2139 = vsyncpa [#allocation9], 1 }
 0xa84   :  { %2141 = vsyncpa [#allocation9 + $0x1], 1 }
 0xa85   :  { %2142 = vsyncpa [#allocation12], 1 }
 0xa86   :  { %2143 = vsyncpa [#allocation15], 1 }
 0xa87   :  { %2144 = vsyncpa [#allocation4], 1 }
 0xa88   :  { %2146 = vsyncpa [#allocation4 + $0x1], 1 }

</bundles_post_ra>
